<compile_context>
chip_gen: v6e
topology: v6e:2x2x1
jax: 0.10.0
libtpu: 0.0.40
codegen_flags: <defaults>
</compile_context>

<pallas_src>
import functools

import jax
import jax.numpy as jnp
from jax import lax
from jax.experimental import pallas as pl
from jax.experimental.pallas import tpu as pltpu


# ---------------------------------------------------------------------------
# small helpers (tile pickers, upsample glue)
# ---------------------------------------------------------------------------
def _pick_row_tile(h2, w2, target_rows):
    """Pick th | h2 so one grid step handles th*w2 matmul rows (~target_rows)."""
    th_max = max(1, min(h2, target_rows // max(w2, 1)))
    for th in range(th_max, 0, -1):
        if h2 % th == 0 and (th * w2) % 8 == 0:
            return th
    return h2


def _pick_tile(n, target):
    """Largest divisor of n that is <= target and a multiple of 8 (or n itself)."""
    for d in range(min(n, target), 0, -1):
        if n % d == 0 and (d % 8 == 0 or d == n):
            return d
    return n


def _upsample2_axis(x, axis):
    """F.interpolate(scale_factor=2, mode='bilinear', align_corners=False) along
    one axis, using static slices only (weights 0.75/0.25, edge clamp).  No gather."""
    s = x.shape[axis]

    def sl(a, b):
        idx = [slice(None)] * x.ndim
        idx[axis] = slice(a, b)
        return x[tuple(idx)]

    x_prev = jnp.concatenate([sl(0, 1), sl(0, s - 1)], axis=axis)   # x[max(i-1,0)]
    x_next = jnp.concatenate([sl(1, s), sl(s - 1, s)], axis=axis)   # x[min(i+1,s-1)]
    even = 0.25 * x_prev + 0.75 * x          # output 2i
    odd = 0.75 * x + 0.25 * x_next           # output 2i+1
    y = jnp.stack([even, odd], axis=axis + 1)
    shape = list(x.shape)
    shape[axis] = 2 * s
    return y.reshape(shape)


# ---------------------------------------------------------------------------
# Pallas kernel 1: fused im2col + conv-as-matmul + per-tile BN partial stats.
# ---------------------------------------------------------------------------
def _conv_stats_kernel(slab_ref, w_ref, conv_ref, psum_ref, psq_ref,
                       *, th, w2, cin, cout):
    # slab_ref: (1, th+2, w2+2, cin) bf16  -- upsampled + reflect-padded NHWC rows
    # w_ref:    (9, cin, cout)       bf16  -- 3x3 taps, index = kh*3 + kw
    # f32 view of the slab: cheap, and keeps the static sublane-offset slicing on
    # an unpacked dtype (robust layout); the MXU operands stay bf16.
    slab = slab_ref[0].astype(jnp.float32)
    acc = jnp.zeros((th * w2, cout), jnp.float32)
    for kh in range(3):
        for kw in range(3):
            v = slab[kh:kh + th, kw:kw + w2, :].reshape(th * w2, cin)
            acc += jnp.dot(v.astype(jnp.bfloat16), w_ref[kh * 3 + kw],
                           preferred_element_type=jnp.float32)
    conv_ref[...] = acc
    # Per-tile partial statistics (reduced in JAX) -> grid axis stays "parallel",
    # no cross-iteration accumulator (megacore / v7x friendly, no raciness).
    psum_ref[...] = jnp.sum(acc, axis=0).reshape(1, 1, cout)
    psq_ref[...] = jnp.sum(acc * acc, axis=0).reshape(1, 1, cout)


# ---------------------------------------------------------------------------
# Pallas kernel 2: fused BatchNorm affine + ReLU, lane-dense (last dim = 128).
# ---------------------------------------------------------------------------
def _bn_relu_kernel(c_ref, scale_ref, bias_ref, o_ref):
    y = c_ref[...] * scale_ref[...] + bias_ref[...]
    o_ref[...] = jnp.maximum(y, 0.0).astype(o_ref.dtype)


# ---------------------------------------------------------------------------
# Wrapper
# ---------------------------------------------------------------------------
@jax.jit
def upblock_forward(x_nchw, w_hwio, gamma, beta):
    eps = 1e-5
    n, cin, h, w = x_nchw.shape
    kh_, kw_, cin_w, cout = w_hwio.shape
    assert (kh_, kw_) == (3, 3) and cin_w == cin

    h2, w2 = 2 * h, 2 * w
    w2p = w2 + 2

    # --- glue (pure data movement): upsample x2 + reflection pad, NHWC ---
    x = jnp.transpose(x_nchw, (0, 2, 3, 1)).astype(jnp.float32)
    x = _upsample2_axis(x, axis=1)
    x = _upsample2_axis(x, axis=2)
    # Cast to bf16 BEFORE pad/stack: the padded intermediate and the row slabs
    # are materialized once in bf16 (pad/stack don't change values, so numerics
    # are identical to casting after the pad).
    x = x.astype(jnp.bfloat16)
    xp = jnp.pad(x, ((0, 0), (1, 1), (1, 1), (0, 0)), mode="reflect")  # (N,H2+2,W2+2,C)

    # --- row slabs with a 1-row halo; im2col happens INSIDE the kernel ---
    th = _pick_row_tile(h2, w2, target_rows=4096)
    n_th = h2 // th
    if n_th == 1:
        slabs = xp                                                  # (N, H2+2, W2p, C)
    else:
        slabs = jnp.stack([xp[:, i * th:i * th + th + 2] for i in range(n_th)], axis=1)
        slabs = slabs.reshape(n * n_th, th + 2, w2p, cin)
    n_tiles = n * n_th
    rows_per_tile = th * w2
    m = n_tiles * rows_per_tile            # == N*H2*W2, no padded rows

    w_taps = w_hwio.reshape(9, cin, cout).astype(jnp.bfloat16)

    kernel1 = functools.partial(_conv_stats_kernel, th=th, w2=w2, cin=cin, cout=cout)
    conv_cost = pl.CostEstimate(
        flops=2 * m * 9 * cin * cout,
        transcendentals=0,
        bytes_accessed=int(n_tiles * (th + 2) * w2p * cin * 2   # bf16 slabs
                           + 9 * cin * cout * 2                 # bf16 weights
                           + m * cout * 4                       # f32 conv out
                           + 2 * n_tiles * cout * 4),           # partial stats
    )
    conv, psum, psq = pl.pallas_call(
        kernel1,
        out_shape=(
            jax.ShapeDtypeStruct((m, cout), jnp.float32),
            jax.ShapeDtypeStruct((n_tiles, 1, cout), jnp.float32),
            jax.ShapeDtypeStruct((n_tiles, 1, cout), jnp.float32),
        ),
        grid=(n_tiles,),
        in_specs=[
            pl.BlockSpec((1, th + 2, w2p, cin), lambda i: (i, 0, 0, 0)),
            pl.BlockSpec((9, cin, cout), lambda i: (0, 0, 0)),
        ],
        out_specs=(
            pl.BlockSpec((rows_per_tile, cout), lambda i: (i, 0)),
            pl.BlockSpec((1, 1, cout), lambda i: (i, 0, 0)),
            pl.BlockSpec((1, 1, cout), lambda i: (i, 0, 0)),
        ),
        cost_estimate=conv_cost,
        compiler_params=pltpu.CompilerParams(
            dimension_semantics=("parallel",),
            vmem_limit_bytes=32 * 1024 * 1024,
        ),
    )(slabs, w_taps)

    # --- BatchNorm batch statistics (training mode, biased variance) ---
    ssum = jnp.sum(psum.reshape(n_tiles, cout), axis=0)
    ssq = jnp.sum(psq.reshape(n_tiles, cout), axis=0)
    mean = ssum / m
    # TODO(synk): E[x^2]-mean^2 can lose precision for large-mean activations;
    # a two-pass / Welford reduction would be numerically safer.
    var = jnp.maximum(ssq / m - mean * mean, 0.0)
    inv_std = gamma.astype(jnp.float32) / jnp.sqrt(var + eps)
    scale = inv_std                                        # (cout,)
    bias = beta.astype(jnp.float32) - mean * inv_std       # (cout,)

    # --- lane-dense view for the elementwise BN+ReLU kernel ---
    if cout <= 128 and 128 % cout == 0 and (m * cout) % 128 == 0:
        gfac = 128 // cout       # pack gfac rows into one 128-lane row
    else:
        gfac = 1                 # fallback: channel-sparse lanes
    cols2 = cout * gfac
    rows2 = (m * cout) // cols2
    conv2 = conv.reshape(rows2, cols2)                     # row-major bitcast
    scale_t = jnp.tile(scale, gfac).reshape(1, cols2)
    bias_t = jnp.tile(bias, gfac).reshape(1, cols2)

    tr2 = _pick_tile(rows2, 2048)
    y2 = pl.pallas_call(
        _bn_relu_kernel,
        out_shape=jax.ShapeDtypeStruct((rows2, cols2), jnp.float32),
        grid=(rows2 // tr2,),
        in_specs=[
            pl.BlockSpec((tr2, cols2), lambda i: (i, 0)),
            pl.BlockSpec((1, cols2), lambda i: (0, 0)),
            pl.BlockSpec((1, cols2), lambda i: (0, 0)),
        ],
        out_specs=pl.BlockSpec((tr2, cols2), lambda i: (i, 0)),
        input_output_aliases={0: 0},          # reuse the conv buffer for the output
        compiler_params=pltpu.CompilerParams(
            dimension_semantics=("parallel",),
            vmem_limit_bytes=32 * 1024 * 1024,
        ),
    )(conv2, scale_t, bias_t)

    y = y2.reshape(n, h2, w2, cout)
    return jnp.transpose(y, (0, 3, 1, 2))                 # NCHW


# ---------------------------------------------------------------------------
# Pure-JAX reference (same math, same bf16 conv inputs / f32 accumulation).
# ---------------------------------------------------------------------------
def upblock_reference(x_nchw, w_hwio, gamma, beta, eps=1e-5):
    x = jnp.transpose(x_nchw, (0, 2, 3, 1)).astype(jnp.float32)
    x = _upsample2_axis(x, axis=1)
    x = _upsample2_axis(x, axis=2)
    xp = jnp.pad(x, ((0, 0), (1, 1), (1, 1), (0, 0)), mode="reflect")
    y = lax.conv_general_dilated(
        xp.astype(jnp.bfloat16), w_hwio.astype(jnp.bfloat16), (1, 1), "VALID",
        dimension_numbers=("NHWC", "HWIO", "NHWC"),
        preferred_element_type=jnp.float32,
        precision=lax.Precision.HIGHEST)
    mean = y.mean(axis=(0, 1, 2))
    var = ((y - mean) ** 2).mean(axis=(0, 1, 2))
    yn = (y - mean) / jnp.sqrt(var + eps) * gamma + beta
    yn = jnp.maximum(yn, 0.0)
    return jnp.transpose(yn, (0, 3, 1, 2))


if __name__ == "__main__":
    in_nc, out_nc = 4, 8
    N, H, W = 2, 16, 16

    key = jax.random.PRNGKey(0)
    kx, kw_, kg, kb = jax.random.split(key, 4)
    x = jax.random.normal(kx, (N, in_nc, H, W), dtype=jnp.float32)
    # Conv2d weight (no bias), stored HWIO.
    w_hwio = 0.1 * jax.random.normal(kw_, (3, 3, in_nc, out_nc), dtype=jnp.float32)
    # BatchNorm2d affine parameters.
    gamma = 1.0 + 0.1 * jax.random.normal(kg, (out_nc,), dtype=jnp.float32)
    beta = 0.1 * jax.random.normal(kb, (out_nc,), dtype=jnp.float32)

    out = upblock_forward(x, w_hwio, gamma, beta)
    out = jax.block_until_ready(out)
    assert out.shape == (N, out_nc, 2 * H, 2 * W), out.shape

    ref = upblock_reference(x, w_hwio, gamma, beta)
    if not jnp.allclose(out, ref, atol=2e-3, rtol=2e-3):
        err = float(jnp.max(jnp.abs(out - ref)))
        raise AssertionError(f"Pallas UpBlock mismatch vs JAX reference, max|err|={err}")

    print("KERNEL_OK")
</pallas_src>

<mosaic_0001>
module attributes {stable_mosaic.version = 11 : i64} {
  func.func @_conv_stats_kernel(%arg0: i32, %arg1: memref<1x34x34x4xbf16, #tpu.memory_space<vmem>>, %arg2: memref<9x4x8xbf16, #tpu.memory_space<vmem>>, %arg3: memref<1024x8xf32, #tpu.memory_space<vmem>>, %arg4: memref<1x1x8xf32, #tpu.memory_space<vmem>>, %arg5: memref<1x1x8xf32, #tpu.memory_space<vmem>>) attributes {dimension_semantics = [#tpu.dimension_semantics<parallel>], iteration_bounds = array<i64: 2>, scalar_prefetch = 0 : i64, scratch_operands = 0 : i64, tpu.core_type = #tpu.core_type<tc>, window_params = [{transform_indices = @transform_0, window_bounds = array<i64: 1, 34, 34, 4>}, {pipeline_mode = #tpu.pipeline_mode<synchronous>, transform_indices = @transform_1, window_bounds = array<i64: 9, 4, 8>}, {transform_indices = @transform_2, window_bounds = array<i64: 1024, 8>}, {transform_indices = @transform_3, window_bounds = array<i64: 1, 1, 8>}, {transform_indices = @transform_4, window_bounds = array<i64: 1, 1, 8>}]} {
    %c0 = arith.constant 0 : index
    %c0_0 = arith.constant 0 : index
    %c0_1 = arith.constant 0 : index
    %c0_2 = arith.constant 0 : index
    %0 = vector.load %arg1[%c0, %c0_0, %c0_1, %c0_2] : memref<1x34x34x4xbf16, #tpu.memory_space<vmem>>, vector<1x34x34x4xbf16>
    %1 = vector.shape_cast %0 : vector<1x34x34x4xbf16> to vector<34x34x4xbf16>
    %2 = arith.extf %1 : vector<34x34x4xbf16> to vector<34x34x4xf32>
    %cst = arith.constant 0.000000e+00 : f32
    %3 = vector.broadcast %cst : f32 to vector<1024x8xf32>
    %4 = vector.extract_strided_slice %2 {offsets = [0, 0, 0], sizes = [32, 32, 4], strides = [1, 1, 1]} : vector<34x34x4xf32> to vector<32x32x4xf32>
    %5 = vector.shape_cast %4 : vector<32x32x4xf32> to vector<1024x4xf32>
    %6 = arith.truncf %5 : vector<1024x4xf32> to vector<1024x4xbf16>
    %c0_3 = arith.constant 0 : index
    %c0_4 = arith.constant 0 : index
    %c0_5 = arith.constant 0 : index
    %7 = vector.load %arg2[%c0_3, %c0_4, %c0_5] : memref<9x4x8xbf16, #tpu.memory_space<vmem>>, vector<1x4x8xbf16>
    %8 = vector.shape_cast %7 : vector<1x4x8xbf16> to vector<4x8xbf16>
    %cst_6 = arith.constant dense<0.000000e+00> : vector<1024x8xf32>
    %9 = tpu.matmul %6, %8, %cst_6 {dimension_numbers = #tpu.dot_dimension_numbers<[1], [0], [0], [1], [0, 0, 1, 1], [], []>} : vector<1024x4xbf16>, vector<4x8xbf16>, vector<1024x8xf32> -> vector<1024x8xf32>
    %10 = arith.addf %3, %9 : vector<1024x8xf32>
    %11 = vector.extract_strided_slice %2 {offsets = [0, 1, 0], sizes = [32, 32, 4], strides = [1, 1, 1]} : vector<34x34x4xf32> to vector<32x32x4xf32>
    %12 = vector.shape_cast %11 : vector<32x32x4xf32> to vector<1024x4xf32>
    %13 = arith.truncf %12 : vector<1024x4xf32> to vector<1024x4xbf16>
    %c1 = arith.constant 1 : index
    %c0_7 = arith.constant 0 : index
    %c0_8 = arith.constant 0 : index
    %14 = vector.load %arg2[%c1, %c0_7, %c0_8] : memref<9x4x8xbf16, #tpu.memory_space<vmem>>, vector<1x4x8xbf16>
    %15 = vector.shape_cast %14 : vector<1x4x8xbf16> to vector<4x8xbf16>
    %cst_9 = arith.constant dense<0.000000e+00> : vector<1024x8xf32>
    %16 = tpu.matmul %13, %15, %cst_9 {dimension_numbers = #tpu.dot_dimension_numbers<[1], [0], [0], [1], [0, 0, 1, 1], [], []>} : vector<1024x4xbf16>, vector<4x8xbf16>, vector<1024x8xf32> -> vector<1024x8xf32>
    %17 = arith.addf %10, %16 : vector<1024x8xf32>
    %18 = vector.extract_strided_slice %2 {offsets = [0, 2, 0], sizes = [32, 32, 4], strides = [1, 1, 1]} : vector<34x34x4xf32> to vector<32x32x4xf32>
    %19 = vector.shape_cast %18 : vector<32x32x4xf32> to vector<1024x4xf32>
    %20 = arith.truncf %19 : vector<1024x4xf32> to vector<1024x4xbf16>
    %c2 = arith.constant 2 : index
    %c0_10 = arith.constant 0 : index
    %c0_11 = arith.constant 0 : index
    %21 = vector.load %arg2[%c2, %c0_10, %c0_11] : memref<9x4x8xbf16, #tpu.memory_space<vmem>>, vector<1x4x8xbf16>
    %22 = vector.shape_cast %21 : vector<1x4x8xbf16> to vector<4x8xbf16>
    %cst_12 = arith.constant dense<0.000000e+00> : vector<1024x8xf32>
    %23 = tpu.matmul %20, %22, %cst_12 {dimension_numbers = #tpu.dot_dimension_numbers<[1], [0], [0], [1], [0, 0, 1, 1], [], []>} : vector<1024x4xbf16>, vector<4x8xbf16>, vector<1024x8xf32> -> vector<1024x8xf32>
    %24 = arith.addf %17, %23 : vector<1024x8xf32>
    %25 = vector.extract_strided_slice %2 {offsets = [1, 0, 0], sizes = [32, 32, 4], strides = [1, 1, 1]} : vector<34x34x4xf32> to vector<32x32x4xf32>
    %26 = vector.shape_cast %25 : vector<32x32x4xf32> to vector<1024x4xf32>
    %27 = arith.truncf %26 : vector<1024x4xf32> to vector<1024x4xbf16>
    %c3 = arith.constant 3 : index
    %c0_13 = arith.constant 0 : index
    %c0_14 = arith.constant 0 : index
    %28 = vector.load %arg2[%c3, %c0_13, %c0_14] : memref<9x4x8xbf16, #tpu.memory_space<vmem>>, vector<1x4x8xbf16>
    %29 = vector.shape_cast %28 : vector<1x4x8xbf16> to vector<4x8xbf16>
    %cst_15 = arith.constant dense<0.000000e+00> : vector<1024x8xf32>
    %30 = tpu.matmul %27, %29, %cst_15 {dimension_numbers = #tpu.dot_dimension_numbers<[1], [0], [0], [1], [0, 0, 1, 1], [], []>} : vector<1024x4xbf16>, vector<4x8xbf16>, vector<1024x8xf32> -> vector<1024x8xf32>
    %31 = arith.addf %24, %30 : vector<1024x8xf32>
    %32 = vector.extract_strided_slice %2 {offsets = [1, 1, 0], sizes = [32, 32, 4], strides = [1, 1, 1]} : vector<34x34x4xf32> to vector<32x32x4xf32>
    %33 = vector.shape_cast %32 : vector<32x32x4xf32> to vector<1024x4xf32>
    %34 = arith.truncf %33 : vector<1024x4xf32> to vector<1024x4xbf16>
    %c4 = arith.constant 4 : index
    %c0_16 = arith.constant 0 : index
    %c0_17 = arith.constant 0 : index
    %35 = vector.load %arg2[%c4, %c0_16, %c0_17] : memref<9x4x8xbf16, #tpu.memory_space<vmem>>, vector<1x4x8xbf16>
    %36 = vector.shape_cast %35 : vector<1x4x8xbf16> to vector<4x8xbf16>
    %cst_18 = arith.constant dense<0.000000e+00> : vector<1024x8xf32>
    %37 = tpu.matmul %34, %36, %cst_18 {dimension_numbers = #tpu.dot_dimension_numbers<[1], [0], [0], [1], [0, 0, 1, 1], [], []>} : vector<1024x4xbf16>, vector<4x8xbf16>, vector<1024x8xf32> -> vector<1024x8xf32>
    %38 = arith.addf %31, %37 : vector<1024x8xf32>
    %39 = vector.extract_strided_slice %2 {offsets = [1, 2, 0], sizes = [32, 32, 4], strides = [1, 1, 1]} : vector<34x34x4xf32> to vector<32x32x4xf32>
    %40 = vector.shape_cast %39 : vector<32x32x4xf32> to vector<1024x4xf32>
    %41 = arith.truncf %40 : vector<1024x4xf32> to vector<1024x4xbf16>
    %c5 = arith.constant 5 : index
    %c0_19 = arith.constant 0 : index
    %c0_20 = arith.constant 0 : index
    %42 = vector.load %arg2[%c5, %c0_19, %c0_20] : memref<9x4x8xbf16, #tpu.memory_space<vmem>>, vector<1x4x8xbf16>
    %43 = vector.shape_cast %42 : vector<1x4x8xbf16> to vector<4x8xbf16>
    %cst_21 = arith.constant dense<0.000000e+00> : vector<1024x8xf32>
    %44 = tpu.matmul %41, %43, %cst_21 {dimension_numbers = #tpu.dot_dimension_numbers<[1], [0], [0], [1], [0, 0, 1, 1], [], []>} : vector<1024x4xbf16>, vector<4x8xbf16>, vector<1024x8xf32> -> vector<1024x8xf32>
    %45 = arith.addf %38, %44 : vector<1024x8xf32>
    %46 = vector.extract_strided_slice %2 {offsets = [2, 0, 0], sizes = [32, 32, 4], strides = [1, 1, 1]} : vector<34x34x4xf32> to vector<32x32x4xf32>
    %47 = vector.shape_cast %46 : vector<32x32x4xf32> to vector<1024x4xf32>
    %48 = arith.truncf %47 : vector<1024x4xf32> to vector<1024x4xbf16>
    %c6 = arith.constant 6 : index
    %c0_22 = arith.constant 0 : index
    %c0_23 = arith.constant 0 : index
    %49 = vector.load %arg2[%c6, %c0_22, %c0_23] : memref<9x4x8xbf16, #tpu.memory_space<vmem>>, vector<1x4x8xbf16>
    %50 = vector.shape_cast %49 : vector<1x4x8xbf16> to vector<4x8xbf16>
    %cst_24 = arith.constant dense<0.000000e+00> : vector<1024x8xf32>
    %51 = tpu.matmul %48, %50, %cst_24 {dimension_numbers = #tpu.dot_dimension_numbers<[1], [0], [0], [1], [0, 0, 1, 1], [], []>} : vector<1024x4xbf16>, vector<4x8xbf16>, vector<1024x8xf32> -> vector<1024x8xf32>
    %52 = arith.addf %45, %51 : vector<1024x8xf32>
    %53 = vector.extract_strided_slice %2 {offsets = [2, 1, 0], sizes = [32, 32, 4], strides = [1, 1, 1]} : vector<34x34x4xf32> to vector<32x32x4xf32>
    %54 = vector.shape_cast %53 : vector<32x32x4xf32> to vector<1024x4xf32>
    %55 = arith.truncf %54 : vector<1024x4xf32> to vector<1024x4xbf16>
    %c7 = arith.constant 7 : index
    %c0_25 = arith.constant 0 : index
    %c0_26 = arith.constant 0 : index
    %56 = vector.load %arg2[%c7, %c0_25, %c0_26] : memref<9x4x8xbf16, #tpu.memory_space<vmem>>, vector<1x4x8xbf16>
    %57 = vector.shape_cast %56 : vector<1x4x8xbf16> to vector<4x8xbf16>
    %cst_27 = arith.constant dense<0.000000e+00> : vector<1024x8xf32>
    %58 = tpu.matmul %55, %57, %cst_27 {dimension_numbers = #tpu.dot_dimension_numbers<[1], [0], [0], [1], [0, 0, 1, 1], [], []>} : vector<1024x4xbf16>, vector<4x8xbf16>, vector<1024x8xf32> -> vector<1024x8xf32>
    %59 = arith.addf %52, %58 : vector<1024x8xf32>
    %60 = vector.extract_strided_slice %2 {offsets = [2, 2, 0], sizes = [32, 32, 4], strides = [1, 1, 1]} : vector<34x34x4xf32> to vector<32x32x4xf32>
    %61 = vector.shape_cast %60 : vector<32x32x4xf32> to vector<1024x4xf32>
    %62 = arith.truncf %61 : vector<1024x4xf32> to vector<1024x4xbf16>
    %c8 = arith.constant 8 : index
    %c0_28 = arith.constant 0 : index
    %c0_29 = arith.constant 0 : index
    %63 = vector.load %arg2[%c8, %c0_28, %c0_29] : memref<9x4x8xbf16, #tpu.memory_space<vmem>>, vector<1x4x8xbf16>
    %64 = vector.shape_cast %63 : vector<1x4x8xbf16> to vector<4x8xbf16>
    %cst_30 = arith.constant dense<0.000000e+00> : vector<1024x8xf32>
    %65 = tpu.matmul %62, %64, %cst_30 {dimension_numbers = #tpu.dot_dimension_numbers<[1], [0], [0], [1], [0, 0, 1, 1], [], []>} : vector<1024x4xbf16>, vector<4x8xbf16>, vector<1024x8xf32> -> vector<1024x8xf32>
    %66 = arith.addf %59, %65 : vector<1024x8xf32>
    %c0_31 = arith.constant 0 : index
    %c0_32 = arith.constant 0 : index
    %67 = vector.load %arg3[%c0_31, %c0_32] : memref<1024x8xf32, #tpu.memory_space<vmem>>, vector<1024x8xf32>
    tpu.vector_store %arg3[%c0_31, %c0_32], %66 {strides = array<i32>} : memref<1024x8xf32, #tpu.memory_space<vmem>>, vector<1024x8xf32>,
    %cst_33 = arith.constant dense<0.000000e+00> : vector<8xf32>
    %68 = vector.multi_reduction <add>, %66, %cst_33 [0] : vector<1024x8xf32> to vector<8xf32>
    %69 = vector.shape_cast %68 : vector<8xf32> to vector<1x1x8xf32>
    %c0_34 = arith.constant 0 : index
    %c0_35 = arith.constant 0 : index
    %c0_36 = arith.constant 0 : index
    %70 = vector.load %arg4[%c0_34, %c0_35, %c0_36] : memref<1x1x8xf32, #tpu.memory_space<vmem>>, vector<1x1x8xf32>
    tpu.vector_store %arg4[%c0_34, %c0_35, %c0_36], %69 {strides = array<i32>} : memref<1x1x8xf32, #tpu.memory_space<vmem>>, vector<1x1x8xf32>,
    %71 = arith.mulf %66, %66 : vector<1024x8xf32>
    %cst_37 = arith.constant dense<0.000000e+00> : vector<8xf32>
    %72 = vector.multi_reduction <add>, %71, %cst_37 [0] : vector<1024x8xf32> to vector<8xf32>
    %73 = vector.shape_cast %72 : vector<8xf32> to vector<1x1x8xf32>
    %c0_38 = arith.constant 0 : index
    %c0_39 = arith.constant 0 : index
    %c0_40 = arith.constant 0 : index
    %74 = vector.load %arg5[%c0_38, %c0_39, %c0_40] : memref<1x1x8xf32, #tpu.memory_space<vmem>>, vector<1x1x8xf32>
    tpu.vector_store %arg5[%c0_38, %c0_39, %c0_40], %73 {strides = array<i32>} : memref<1x1x8xf32, #tpu.memory_space<vmem>>, vector<1x1x8xf32>,
    return
  }
  func.func @transform_0(%arg0: i32) -> (i32, i32, i32, i32) {
    %c0_i32 = arith.constant 0 : i32
    %c0_i32_0 = arith.constant 0 : i32
    %c0_i32_1 = arith.constant 0 : i32
    %c0_i32_2 = arith.constant 0 : i32
    return %arg0, %c0_i32, %c0_i32_0, %c0_i32_1 : i32, i32, i32, i32
  }
  func.func @transform_1(%arg0: i32) -> (i32, i32, i32) {
    %c0_i32 = arith.constant 0 : i32
    %c0_i32_0 = arith.constant 0 : i32
    %c0_i32_1 = arith.constant 0 : i32
    %c0_i32_2 = arith.constant 0 : i32
    return %c0_i32, %c0_i32_0, %c0_i32_1 : i32, i32, i32
  }
  func.func @transform_2(%arg0: i32) -> (i32, i32) {
    %c0_i32 = arith.constant 0 : i32
    %c0_i32_0 = arith.constant 0 : i32
    return %arg0, %c0_i32 : i32, i32
  }
  func.func @transform_3(%arg0: i32) -> (i32, i32, i32) {
    %c0_i32 = arith.constant 0 : i32
    %c0_i32_0 = arith.constant 0 : i32
    %c0_i32_1 = arith.constant 0 : i32
    return %arg0, %c0_i32, %c0_i32_0 : i32, i32, i32
  }
  func.func @transform_4(%arg0: i32) -> (i32, i32, i32) {
    %c0_i32 = arith.constant 0 : i32
    %c0_i32_0 = arith.constant 0 : i32
    %c0_i32_1 = arith.constant 0 : i32
    return %arg0, %c0_i32, %c0_i32_0 : i32, i32, i32
  }
}

module attributes {stable_mosaic.version = 11 : i64} {
  func.func @_bn_relu_kernel(%arg0: i32, %arg1: memref<128x128xf32, #tpu.memory_space<vmem>>, %arg2: memref<1x128xf32, #tpu.memory_space<vmem>>, %arg3: memref<1x128xf32, #tpu.memory_space<vmem>>, %arg4: memref<128x128xf32, #tpu.memory_space<vmem>>) attributes {dimension_semantics = [#tpu.dimension_semantics<parallel>], iteration_bounds = array<i64: 1>, scalar_prefetch = 0 : i64, scratch_operands = 0 : i64, tpu.core_type = #tpu.core_type<tc>, window_params = [{transform_indices = @transform_0, window_bounds = array<i64: 128, 128>}, {pipeline_mode = #tpu.pipeline_mode<synchronous>, transform_indices = @transform_1, window_bounds = array<i64: 1, 128>}, {pipeline_mode = #tpu.pipeline_mode<synchronous>, transform_indices = @transform_2, window_bounds = array<i64: 1, 128>}, {transform_indices = @transform_3, window_bounds = array<i64: 128, 128>}]} {
    %c0 = arith.constant 0 : index
    %c0_0 = arith.constant 0 : index
    %0 = vector.load %arg1[%c0, %c0_0] : memref<128x128xf32, #tpu.memory_space<vmem>>, vector<128x128xf32>
    %c0_1 = arith.constant 0 : index
    %c0_2 = arith.constant 0 : index
    %1 = vector.load %arg2[%c0_1, %c0_2] : memref<1x128xf32, #tpu.memory_space<vmem>>, vector<1x128xf32>
    %2 = vector.broadcast %1 : vector<1x128xf32> to vector<128x128xf32>
    %3 = arith.mulf %0, %2 : vector<128x128xf32>
    %c0_3 = arith.constant 0 : index
    %c0_4 = arith.constant 0 : index
    %4 = vector.load %arg3[%c0_3, %c0_4] : memref<1x128xf32, #tpu.memory_space<vmem>>, vector<1x128xf32>
    %5 = vector.broadcast %4 : vector<1x128xf32> to vector<128x128xf32>
    %6 = arith.addf %3, %5 : vector<128x128xf32>
    %cst = arith.constant 0.000000e+00 : f32
    %7 = vector.broadcast %cst : f32 to vector<128x128xf32>
    %8 = arith.maximumf %6, %7 : vector<128x128xf32>
    %c0_5 = arith.constant 0 : index
    %c0_6 = arith.constant 0 : index
    %9 = vector.load %arg4[%c0_5, %c0_6] : memref<128x128xf32, #tpu.memory_space<vmem>>, vector<128x128xf32>
    tpu.vector_store %arg4[%c0_5, %c0_6], %8 {strides = array<i32>} : memref<128x128xf32, #tpu.memory_space<vmem>>, vector<128x128xf32>,
    return
  }
  func.func @transform_0(%arg0: i32) -> (i32, i32) {
    %c0_i32 = arith.constant 0 : i32
    %c0_i32_0 = arith.constant 0 : i32
    return %arg0, %c0_i32 : i32, i32
  }
  func.func @transform_1(%arg0: i32) -> (i32, i32) {
    %c0_i32 = arith.constant 0 : i32
    %c0_i32_0 = arith.constant 0 : i32
    %c0_i32_1 = arith.constant 0 : i32
    return %c0_i32, %c0_i32_0 : i32, i32
  }
  func.func @transform_2(%arg0: i32) -> (i32, i32) {
    %c0_i32 = arith.constant 0 : i32
    %c0_i32_0 = arith.constant 0 : i32
    %c0_i32_1 = arith.constant 0 : i32
    return %c0_i32, %c0_i32_0 : i32, i32
  }
  func.func @transform_3(%arg0: i32) -> (i32, i32) {
    %c0_i32 = arith.constant 0 : i32
    %c0_i32_0 = arith.constant 0 : i32
    return %arg0, %c0_i32 : i32, i32
  }
}

</mosaic_0001>

<bundles_post_ra>
// kernel: tile.18
= control target key start
LH: loop header
LB: loop body
LE: loop exit
PB: predicated region body
PF: predicated region fallthrough
CT: control target
= control target key end

     0   :  { %s28_s0 = inlined_call_operand.vmem [shape: f32[8], index: 0, kind: input, shape index: {}]   ;;  %s29_s1 = inlined_call_operand.vmem [shape: f32[16,8], index: 1, kind: output, shape index: {}]  }
   0x1   :  { %v4_v0 = vld [vmem:[%s28_s0] ss:$0 sm:$0xff] }
   0x2   :  { %5 = vst [vmem:[%s29_s1] sm:$0xff] %v4_v0  ;;  %8 = vst [vmem:[%s29_s1 + $0x8] sm:$0xff] %v4_v0 }

// kernel: tile.19
= control target key start
LH: loop header
LB: loop body
LE: loop exit
PB: predicated region body
PF: predicated region fallthrough
CT: control target
= control target key end

     0   :  { %s133_s10 = smov 120   ;;  %s134_s11 = smov 104   ;;  %vm3_vm0 = vcmask 64512   ;;  %vm9_vm1 = vcmask 1048512   ;;  %vm15_vm2 = vcmask 982912   ;;  %vm21_vm3 = vcmask 917312   ;;  %s209_s0 = inlined_call_operand.vmem [shape: f32[16,8], index: 0, kind: input, shape index: {}]   ;;  %s210_s1 = inlined_call_operand.vmem [shape: f32[1,128], index: 1, kind: output, shape index: {}]  }
   0x1   :  { %v103_v0 = vld [vmem:[%s209_s0 + $0xf] sm:$0x1]   ;;  %v105_v1 = vld [vmem:[%s209_s0 + $0xd] sm:$0x1]   ;;  %v104_v2 = vld [vmem:[%s209_s0 + $0xe] sm:$0x1]  }
   0x2   :  { %7 = vrot.lane.b32.xlu0 %v103_v0, %s133_s10  ;;  %19 = vrot.lane.b32.xlu1 %v105_v1, %s134_s11  ;;  %v106_v3 = vld [vmem:[%s209_s0 + $0xc] sm:$0x1]   ;;  %s135_s16 = smov 112   ;;  %s136_s17 = smov 96   ;;  %v107_v4 = vld [vmem:[%s209_s0 + $0xb] sm:$0x1]  }
   0x3   :  { %v108_v5 = vld [vmem:[%s209_s0 + $0xa] sm:$0x1]   ;;  %v2_v6 = vld [vmem:[%s209_s0] sm:$0x1]   ;;  %s137_s24 = smov 88   ;;  %s138_s25 = smov 80  }
   0x4   :  { %4 = vst.msk [vmem:[#allocation0] sm:$0x1] %vm3_vm0, %v2_v6   ;;  %v109_v7 = vld [vmem:[%s209_s0 + $0x9] sm:$0x1]   ;;  %v110_v8 = vld [vmem:[%s209_s0 + $0x8] sm:$0x1]  }
   0x5   :  { %s139_s30 = smov 72   ;;  %s140_s2 = smov 64   ;;  %v111_v9 = vld [vmem:[%s209_s0 + $0x7] sm:$0x1]   ;;  %v112_v10 = vld [vmem:[%s209_s0 + $0x6] sm:$0x1]  }
   0x6   :  { %13 = vrot.lane.b32.xlu0 %v104_v2, %s135_s16  ;;  %25 = vrot.lane.b32.xlu1 %v106_v3, %s136_s17  ;;  %s141_s7 = smov 56   ;;  %s142_s8 = smov 48   ;;  %v113_v11 = vld [vmem:[%s209_s0 + $0x5] sm:$0x1]   ;;  %v114_v12 = vld [vmem:[%s209_s0 + $0x4] sm:$0x1]  }
   0x7   :  { %s143_s13 = smov 40   ;;  %s144_s14 = smov 32   ;;  %v115_v13 = vld [vmem:[%s209_s0 + $0x3] sm:$0x1]   ;;  %v116_v14 = vld [vmem:[%s209_s0 + $0x2] sm:$0x1]  }
   0x8   :  { %s145_s19 = smov 24   ;;  %s146_s20 = smov 16   ;;  %v117_v15 = vld [vmem:[%s209_s0 + $0x1] sm:$0x1]   ;;  %vm27_vm4 = vcmask 851712   ;;  %vm33_vm5 = vcmask 786112  }
   0x9   :  { %s147_s0 = smov 8   ;;  %vm39_vm6 = vcmask 720512   ;;  %vm45_vm7 = vcmask 654912   ;;  %vm51_vm8 = vcmask 589312   ;;  %vm57_vm9 = vcmask 523712  }
   0xa   :  { %31 = vrot.lane.b32.xlu0 %v107_v4, %s137_s24  ;;  %37 = vrot.lane.b32.xlu1 %v108_v5, %s138_s25  ;;  %vm63_vm10 = vcmask 458112   ;;  %vm69_vm11 = vcmask 392512   ;;  %vm75_vm12 = vcmask 326912   ;;  %vm81_vm13 = vcmask 261312  }
   0xb   :  { %vm87_vm14 = vcmask 195712   ;;  %vm93_vm15 = vcmask 130112  }
   0xe   :  { %43 = vrot.lane.b32.xlu0 %v109_v7, %s139_s30  ;;  %49 = vrot.lane.b32.xlu1 %v110_v8, %s140_s2 }
  0x12   :  { %55 = vrot.lane.b32.xlu0 %v111_v9, %s141_s7  ;;  %61 = vrot.lane.b32.xlu1 %v112_v10, %s142_s8 }
  0x16   :  { %67 = vrot.lane.b32.xlu0 %v113_v11, %s143_s13  ;;  %73 = vrot.lane.b32.xlu1 %v114_v12, %s144_s14 }
  0x1a   :  { %79 = vrot.lane.b32.xlu0 %v115_v13, %s145_s19  ;;  %85 = vrot.lane.b32.xlu1 %v116_v14, %s146_s20 }
  0x1e   :  { %91 = vrot.lane.b32.xlu0 %v117_v15, %s147_s0 }
  0x74   :  { %v8_v16 = vpop.permute.xlu0 %7   ;;  %v20_v17 = vpop.permute.xlu1 %19  }
  0x75   :  { %10 = vst.msk [vmem:[#allocation0] sm:$0x1] %vm9_vm1, %v8_v16  }
  0x78   :  { %v14_v18 = vpop.permute.xlu0 %13   ;;  %v26_v19 = vpop.permute.xlu1 %25  }
  0x79   :  { %16 = vst.msk [vmem:[#allocation0] sm:$0x1] %vm15_vm2, %v14_v18  }
  0x7a   :  { %22 = vst.msk [vmem:[#allocation0] sm:$0x1] %vm21_vm3, %v20_v17  }
  0x7b   :  { %28 = vst.msk [vmem:[#allocation0] sm:$0x1] %vm27_vm4, %v26_v19  }
  0x7c   :  { %v32_v20 = vpop.permute.xlu0 %31   ;;  %v38_v21 = vpop.permute.xlu1 %37  }
  0x7d   :  { %34 = vst.msk [vmem:[#allocation0] sm:$0x1] %vm33_vm5, %v32_v20  }
  0x7e   :  { %40 = vst.msk [vmem:[#allocation0] sm:$0x1] %vm39_vm6, %v38_v21  }
  0x80   :  { %v44_v22 = vpop.permute.xlu0 %43   ;;  %v50_v23 = vpop.permute.xlu1 %49  }
  0x81   :  { %46 = vst.msk [vmem:[#allocation0] sm:$0x1] %vm45_vm7, %v44_v22  }
  0x82   :  { %52 = vst.msk [vmem:[#allocation0] sm:$0x1] %vm51_vm8, %v50_v23  }
  0x84   :  { %v56_v24 = vpop.permute.xlu0 %55   ;;  %v62_v25 = vpop.permute.xlu1 %61  }
  0x85   :  { %58 = vst.msk [vmem:[#allocation0] sm:$0x1] %vm57_vm9, %v56_v24  }
  0x86   :  { %64 = vst.msk [vmem:[#allocation0] sm:$0x1] %vm63_vm10, %v62_v25  }
  0x88   :  { %v68_v26 = vpop.permute.xlu0 %67   ;;  %v74_v27 = vpop.permute.xlu1 %73  }
  0x89   :  { %70 = vst.msk [vmem:[#allocation0] sm:$0x1] %vm69_vm11, %v68_v26  }
  0x8a   :  { %76 = vst.msk [vmem:[#allocation0] sm:$0x1] %vm75_vm12, %v74_v27  }
  0x8c   :  { %v80_v28 = vpop.permute.xlu0 %79   ;;  %v86_v29 = vpop.permute.xlu1 %85  }
  0x8d   :  { %82 = vst.msk [vmem:[#allocation0] sm:$0x1] %vm81_vm13, %v80_v28  }
  0x8e   :  { %88 = vst.msk [vmem:[#allocation0] sm:$0x1] %vm87_vm14, %v86_v29  }
  0x90   :  { %v92_v30 = vpop.permute.xlu0 %91  }
  0x91   :  { %94 = vst.msk [vmem:[#allocation0] sm:$0x1] %vm93_vm15, %v92_v30  }
  0x98   :  { %v99_v31 = vld [vmem:[#allocation0] sm:$0x1] }
  0x99   :  { %102 = vst [vmem:[%s210_s1] sm:$0x1] %v99_v31 }

// kernel: upblock_forward.3
= control target key start
LH: loop header
LB: loop body
LE: loop exit
PB: predicated region body
PF: predicated region fallthrough
CT: control target
= control target key end

     0   :  { %s254_s0 = inlined_call_operand.vmem [shape: f32[128,128], index: 0, kind: input, shape index: {}, may-alias: {0,3}]   ;;  %s255_s1 = inlined_call_operand.vmem [shape: f32[1,128], index: 1, kind: input, shape index: {}]   ;;  %s256_s2 = inlined_call_operand.vmem [shape: f32[1,128], index: 2, kind: input, shape index: {}]   ;;  %s257_s3 = inlined_call_operand.vmem [shape: f32[128,128], index: 3, kind: output, shape index: {}, may-alias: {0,3}]  }
   0x1   :  { %v14_v0 = vld [vmem:[%s254_s0] sm:$0xff]  ;;  %v15_v4 = vld [vmem:[%s254_s0 + $0x8] sm:$0xff]  ;;  %v16_v5 = vld [vmem:[%s254_s0 + $0x10] sm:$0xff] }
   0x2   :  { %v112_v1 = vld [vmem:[%s255_s1] ss:$0 sm:$0xff]  ;;  %v17_v6 = vld [vmem:[%s254_s0 + $0x18] sm:$0xff]  ;;  %v19_v11 = vld [vmem:[%s254_s0 + $0x28] sm:$0xff] }
   0x3   :  { %v143_v2 = vld [vmem:[%s256_s2] ss:$0 sm:$0xff]  ;;  %v37_v3 = vmul.f32 %v112_v1, %v14_v0  ;;  %v38_v7 = vmul.f32 %v112_v1, %v15_v4  ;;  %v39_v8 = vmul.f32 %v112_v1, %v16_v5  ;;  %v40_v9 = vmul.f32 %v112_v1, %v17_v6  ;;  %v20_v12 = vld [vmem:[%s254_s0 + $0x30] sm:$0xff]  ;;  %v21_v17 = vld [vmem:[%s254_s0 + $0x38] sm:$0xff] }
   0x4   :  { %v18_v10 = vld [vmem:[%s254_s0 + $0x20] sm:$0xff]  ;;  %v42_v15 = vmul.f32 %v112_v1, %v19_v11  ;;  %v43_v16 = vmul.f32 %v112_v1, %v20_v12  ;;  %v44_v21 = vmul.f32 %v112_v1, %v21_v17  ;;  %v23_v27 = vld [vmem:[%s254_s0 + $0x48] sm:$0xff]  ;;  %v24_v28 = vld [vmem:[%s254_s0 + $0x50] sm:$0xff] }
   0x5   :  { %v60_v13 = vadd.f32 %v143_v2, %v37_v3  ;;  %v41_v14 = vmul.f32 %v112_v1, %v18_v10  ;;  %v61_v18 = vadd.f32 %v143_v2, %v38_v7  ;;  %v62_v19 = vadd.f32 %v143_v2, %v39_v8  ;;  %v22_v22 = vld [vmem:[%s254_s0 + $0x40] sm:$0xff]  ;;  %v25_v29 = vld [vmem:[%s254_s0 + $0x58] sm:$0xff]  ;;  %v27_v35 = vld [vmem:[%s254_s0 + $0x68] sm:$0xff] }
   0x6   :  { %v63_v20 = vadd.f32 %v143_v2, %v40_v9  ;;  %v65_v25 = vadd.f32 %v143_v2, %v42_v15  ;;  %v66_v26 = vadd.f32 %v143_v2, %v43_v16  ;;  %v67_v33 = vadd.f32 %v143_v2, %v44_v21  ;;  %v26_v34 = vld [vmem:[%s254_s0 + $0x60] sm:$0xff]  ;;  %v28_v36 = vld [vmem:[%s254_s0 + $0x70] sm:$0xff] }
   0x7   :  { %v76_v23 = vmax.f32 %v60_v13, 0.0  ;;  %v64_v24 = vadd.f32 %v143_v2, %v41_v14  ;;  %v77_v30 = vmax.f32 %v61_v18, 0.0  ;;  %v78_v31 = vmax.f32 %v62_v19, 0.0 }
   0x8   :  { %v79_v32 = vmax.f32 %v63_v20, 0.0  ;;  %v81_v38 = vmax.f32 %v65_v25, 0.0  ;;  %v82_v39 = vmax.f32 %v66_v26, 0.0  ;;  %v45_v40 = vmul.f32 %v112_v1, %v22_v22 }
   0x9   :  { %92 = vst [vmem:[%s257_s3] sm:$0xff] %v76_v23  ;;  %v80_v37 = vmax.f32 %v64_v24, 0.0  ;;  %v83_v42 = vmax.f32 %v67_v33, 0.0  ;;  %v46_v43 = vmul.f32 %v112_v1, %v23_v27  ;;  %v47_v44 = vmul.f32 %v112_v1, %v24_v28 }
   0xa   :  { %v48_v45 = vmul.f32 %v112_v1, %v25_v29  ;;  %v68_v46 = vadd.f32 %v143_v2, %v45_v40  ;;  %v49_v47 = vmul.f32 %v112_v1, %v26_v34  ;;  %v50_v48 = vmul.f32 %v112_v1, %v27_v35 }
   0xb   :  { %v51_v49 = vmul.f32 %v112_v1, %v28_v36  ;;  %v69_v50 = vadd.f32 %v143_v2, %v46_v43  ;;  %v70_v51 = vadd.f32 %v143_v2, %v47_v44 }
   0xc   :  { %v71_v52 = vadd.f32 %v143_v2, %v48_v45  ;;  %v84_v54 = vmax.f32 %v68_v46, 0.0  ;;  %v72_v55 = vadd.f32 %v143_v2, %v49_v47  ;;  %v73_v56 = vadd.f32 %v143_v2, %v50_v48 }
   0xd   :  { %v74_v57 = vadd.f32 %v143_v2, %v51_v49  ;;  %v85_v58 = vmax.f32 %v69_v50, 0.0  ;;  %v86_v59 = vmax.f32 %v70_v51, 0.0 }
   0xe   :  { %v87_v60 = vmax.f32 %v71_v52, 0.0  ;;  %v88_v62 = vmax.f32 %v72_v55, 0.0  ;;  %v89_v63 = vmax.f32 %v73_v56, 0.0 }
   0xf   :  { %v90_v0 = vmax.f32 %v74_v57, 0.0 }
  0x10   :  { %v29_v41 = vld [vmem:[%s254_s0 + $0x78] sm:$0xff] }
  0x11   :  { %93 = vst [vmem:[%s257_s3 + $0x8] sm:$0xff] %v77_v30  ;;  %94 = vst [vmem:[%s257_s3 + $0x10] sm:$0xff] %v78_v31  ;;  %v52_v53 = vmul.f32 %v112_v1, %v29_v41 }
  0x12   :  { %95 = vst [vmem:[%s257_s3 + $0x18] sm:$0xff] %v79_v32  ;;  %96 = vst [vmem:[%s257_s3 + $0x20] sm:$0xff] %v80_v37 }
  0x13   :  { %97 = vst [vmem:[%s257_s3 + $0x28] sm:$0xff] %v81_v38  ;;  %98 = vst [vmem:[%s257_s3 + $0x30] sm:$0xff] %v82_v39  ;;  %v75_v61 = vadd.f32 %v143_v2, %v52_v53 }
  0x14   :  { %99 = vst [vmem:[%s257_s3 + $0x38] sm:$0xff] %v83_v42  ;;  %100 = vst [vmem:[%s257_s3 + $0x40] sm:$0xff] %v84_v54 }
  0x15   :  { %101 = vst [vmem:[%s257_s3 + $0x48] sm:$0xff] %v85_v58  ;;  %102 = vst [vmem:[%s257_s3 + $0x50] sm:$0xff] %v86_v59  ;;  %v91_v1 = vmax.f32 %v75_v61, 0.0 }
  0x16   :  { %103 = vst [vmem:[%s257_s3 + $0x58] sm:$0xff] %v87_v60  ;;  %104 = vst [vmem:[%s257_s3 + $0x60] sm:$0xff] %v88_v62 }
  0x17   :  { %105 = vst [vmem:[%s257_s3 + $0x68] sm:$0xff] %v89_v63  ;;  %106 = vst [vmem:[%s257_s3 + $0x70] sm:$0xff] %v90_v0 }
  0x18   :  { %107 = vst [vmem:[%s257_s3 + $0x78] sm:$0xff] %v91_v1 }

// kernel: upblock_forward.2
= control target key start
LH: loop header
LB: loop body
LE: loop exit
PB: predicated region body
PF: predicated region fallthrough
CT: control target
= control target key end

     0   :  { %s11834_s15 = smov 0   ;;  %s17111_s0 = inlined_call_operand.vmem [shape: bf16[2,34,34,4], index: 0, kind: input, shape index: {}]   ;;  %s17112_s1 = inlined_call_operand.vmem [shape: bf16[9,4,8], index: 1, kind: input, shape index: {}]   ;;  %s17113_s2 = inlined_call_operand.vmem [shape: f32[2048,8], index: 2, kind: output, shape index: {0}]   ;;  %s17114_s3 = inlined_call_operand.vmem [shape: f32[2,1,8], index: 3, kind: output, shape index: {1}]   ;;  %s17115_s4 = inlined_call_operand.vmem [shape: f32[2,1,8], index: 4, kind: output, shape index: {2}]  }
   0x1 LB: > { %s11840_s16 = sadd.s32 4294967295, %s11807_s15   ;;  %p9168_p0 = scmp.ge.s32.totalorder %s11807_s15, 1  ;;  %s11807_s15 = sphi %s11834_s15, %s15_s15  }
   0x2   : > { %p167_p1 = scmp.lt.s32.totalorder %s11807_s15, 3 }
   0x4   : > { %p168_p2 = pnand %p9168_p0, %p167_p1 }
   0x6   : > { %171 = sbr.rel (%p168_p2) target bundleno = 1408 (0x580), region = 28 }
   0xb   : > { %v9236_v0 = vld [vmem:[%s17112_s1 + $0x2] sm:$0x3]  ;;  %vm1458_vm0 = vcmask 1041408   ;;  %p199_p3 = scmp.lt.s32.totalorder %s11840_s16, 1  ;;  %v621_v2 = vld [vmem:[%s17112_s1] sm:$0x3] }
   0xc   : > { %11584 = vmatprep.subr.msk.bf16.mxu1 %vm1458_vm0, %v9236_v0  ;;  %11583 = vmatprep.subr.msk.bf16.mxu0 %vm1458_vm0, %v9236_v0  ;;  %v1460_v1 = vsel %vm1458_vm0, %v9236_v0, 0  ;;  %v9365_v3 = vld [vmem:[%s17112_s1 + $0x4] sm:$0x3]  ;;  %vm782_vm1 = vcmask 1046528   ;;  %vm2747_vm2 = vcmask 1045504   ;;  %vm1265_vm3 = vcmask 31744  }
   0xd   : > { %11582 = vmatpush3.bf16.msra.mxu1 %v1460_v1  ;;  %10412 = vmatpush3.bf16.msra.mxu0 %v1460_v1  ;;  %s11858_s23 = scalar_select %p199_p3, %s11840_s16, 1  ;;  %v2200_v43 = vsel %vm1458_vm0, %v621_v2, 0  ;;  %v3423_v44 = vsel %vm1458_vm0, %v9365_v3, 0  ;;  %vm8276_vm4 = vcmask 64512   ;;  %vm8666_vm5 = vcmask 57344  }
   0xe   : > { %11585 = vmatprep.subr.msk.bf16.mxu1 %vm1458_vm0, %v621_v2  ;;  %11586 = vmatprep.subr.msk.bf16.mxu0 %vm1458_vm0, %v9365_v3  ;;  %s9170_s20 = sshll.u32 %s11840_s16, 7 }
   0xf   : > { %s11593_s24 = smul.u32 680, %s11858_s23  ;;  %p205_p4 = scmp.lt.s32.totalorder %s9170_s20, 255 }
  0x10   : > { %s215_s30 = scalar_lea.vmem %s17115_s4, %s11858_s23 }
  0x11   : > { %s11866_s27 = scalar_lea.vmem %s17111_s0, %s11593_s24  ;;  %s19295_s20 = smov (!%p205_p4, %s9170_s20), 255 }
  0x12   : > { %v11869_v4 = vld [vmem:[%s11866_s27] sm:$0xff]   ;;  %v219_v5 = vld [vmem:[%s11866_s27 + $0x8] sm:$0xff]   ;;  %v11888_v18 = vld [vmem:[%s11866_s27 + $0x10] sm:$0x1]  ;;  %s9171_s16 = sshll.u32 %s19295_s20, 3 }
  0x13   : > { %v11873_v6 = vld [vmem:[%s11866_s27 + $0x140] sm:$0xff]   ;;  %v17159_v7 = vunpack.c.l.bf16 %v11869_v4  ;;  %v17155_v8 = vunpack.c.h.bf16 %v11869_v4  ;;  %v389_v9 = vunpack.c.l.bf16 %v219_v5  ;;  %v11878_v10 = vld [vmem:[%s11866_s27 + $0x148] sm:$0xff]   ;;  %v390_v11 = vunpack.c.h.bf16 %v219_v5  ;;  %v11897_v22 = vld [vmem:[%s11866_s27 + $0x150] sm:$0x1]  ;;  %s16371_s24 = scalar_lea.vmem %s17113_s2, %s9171_s16 }
  0x14   : > { %17678 = vst [vmem:[#allocation2_spill] sm:$0xff] %v11873_v6  ;;  %v17121_v12 = vunpack.c.l.bf16 %v11873_v6  ;;  %v17120_v13 = vunpack.c.h.bf16 %v11873_v6  ;;  %v17124_v14 = vunpack.c.l.bf16 %v11878_v10  ;;  %v17154_v29 = vunpack.c.l.bf16 %v11888_v18  ;;  %v11916_v35 = vld [vmem:[%s11866_s27 + $0x14] sm:$0xff]   ;;  %v11919_v36 = vld [vmem:[%s11866_s27 + $0x1c] sm:$0xff]   ;;  %v11949_v54 = vld [vmem:[%s11866_s27 + $0x24] sm:$0x1] }
  0x15   : > { %v783_v15 = vrot.slane %v17159_v7, 1  ;;  %v784_v16 = vrot.slane %v17155_v8, 1  ;;  %v786_v17 = vrot.slane %v389_v9, 1  ;;  %v11890_v19 = vrot.slane %v389_v9, 2  ;;  %v11928_v40 = vld [vmem:[%s11866_s27 + $0x154] sm:$0xff]   ;;  %v11943_v49 = vld [vmem:[%s11866_s27 + $0x15c] sm:$0xff]  }
  0x16   : > { %v11892_v20 = vrot.slane %v390_v11, 2  ;;  %v927_v21 = vrot.slane %v17121_v12, 1  ;;  %v928_v25 = vrot.slane %v17120_v13, 1  ;;  %v930_v26 = vrot.slane %v17124_v14, 1  ;;  %17680 = vst [vmem:[#allocation4_spill] sm:$0xff] %v11928_v40  ;;  %v11975_v5 = vld [vmem:[%s11866_s27 + $0x28] sm:$0xff]  }
  0x17   : > { %v785_v23 = vsel %vm782_vm1, %v783_v15, %v784_v16  ;;  %v787_v24 = vsel %vm782_vm1, %v784_v16, %v786_v17  ;;  %v788_v30 = vrot.slane %v390_v11, 1  ;;  %v17130_v33 = vunpack.c.h.bf16 %v11878_v10  ;;  %v11966_v63 = vld [vmem:[%s11866_s27 + $0x164] sm:$0x1]  ;;  %v12217_v7 = vld [vmem:[%s11866_s27 + $0x6c] sm:$0xff]  }
  0x18   : > { %v1199_v27 = vpack.c.bf16 %v787_v24, %v785_v23  ;;  %v11908_v28 = vsel %vm2747_vm2, %v11890_v19, %v11892_v20  ;;  %v929_v31 = vsel %vm782_vm1, %v927_v21, %v928_v25  ;;  %v931_v32 = vsel %vm782_vm1, %v928_v25, %v930_v26  ;;  %v11991_v24 = vld [vmem:[%s11866_s27 + $0x30] sm:$0xff]   ;;  %v12078_v12 = vld [vmem:[%s11866_s27 + $0x184] sm:$0xff]  }
  0x19   : > { %v17129_v34 = vunpack.c.l.bf16 %v11897_v22  ;;  %v11922_v37 = vpack.c.bf16 %v931_v32, %v929_v31  ;;  %v789_v38 = vsel %vm782_vm1, %v786_v17, %v788_v30  ;;  %v790_v39 = vrot.slane %v17154_v29, 1  ;;  %v12000_v31 = vld [vmem:[%s11866_s27 + $0x168] sm:$0xff]  }
  0x1a   : > { %10413 = vmatprep.mubr.msk.bf16.mxu0 %vm1265_vm3, %v1199_v27  ;;  %v932_v41 = vrot.slane %v17130_v33, 1  ;;  %v17153_v46 = vunpack.c.l.bf16 %v11916_v35  ;;  %v17152_v47 = vunpack.c.h.bf16 %v11916_v35  ;;  %v17148_v48 = vunpack.c.l.bf16 %v11919_v36  ;;  %17683 = vst [vmem:[#allocation7_spill] sm:$0xff] %v12000_v31  ;;  %v12210_v8 = vld [vmem:[%s11866_s27 + $0x64] sm:$0xff]  }
  0x1b   : > { %17679 = vst [vmem:[#allocation3_spill] sm:$0xff] %v11922_v37  ;;  %v934_v42 = vrot.slane %v17129_v34, 1  ;;  %10477 = vmatprep.mubr.msk.bf16.mxu1 %vm1265_vm3, %v11922_v37  ;;  %v791_v45 = vsel %vm782_vm1, %v788_v30, %v790_v39  ;;  %v17119_v53 = vunpack.c.l.bf16 %v11928_v40  ;;  %v17118_v59 = vunpack.c.h.bf16 %v11928_v40 }
  0x1c   : > { %v1200_v50 = vpack.c.bf16 %v791_v45, %v789_v38  ;;  %v933_v51 = vsel %vm782_vm1, %v930_v26, %v932_v41  ;;  %v792_v56 = vrot.slane %v17153_v46, 1  ;;  %v793_v57 = vrot.slane %v17152_v47, 1 }
  0x1d   : > { %v935_v52 = vsel %vm782_vm1, %v932_v41, %v934_v42  ;;  %v795_v58 = vrot.slane %v17148_v48, 1  ;;  %v17123_v60 = vunpack.c.l.bf16 %v11943_v49  ;;  %v936_v61 = vrot.slane %v17119_v53, 1  ;;  %v12009_v42 = vld [vmem:[%s11866_s27 + $0x170] sm:$0xff]   ;;  %v12065_v53 = vld [vmem:[%s11866_s27 + $0x44] sm:$0xff]  }
  0x1e   : > { %v11951_v55 = vpack.c.bf16 %v935_v52, %v933_v51  ;;  %10414 = vmatmul.mubr.msk.bf16.vlgmr.msra.gmra.mxu0 %vm1265_vm3, %v1200_v50  ;;  %v17147_v62 = vunpack.c.h.bf16 %v11919_v36  ;;  %v794_v0 = vsel %vm782_vm1, %v792_v56, %v793_v57  ;;  %v17146_v2 = vunpack.c.l.bf16 %v11949_v54  ;;  %v12016_v50 = vld [vmem:[%s11866_s27 + $0x38] sm:$0x1] }
  0x1f   : > { %10672 = vmatpush3.bf16.msra.mxu0 %v3423_v44  ;;  %v796_v1 = vsel %vm782_vm1, %v793_v57, %v795_v58  ;;  %v17128_v3 = vunpack.c.h.bf16 %v11943_v49  ;;  %v937_v11 = vrot.slane %v17118_v59, 1  ;;  %v939_v15 = vrot.slane %v17123_v60, 1 }
  0x20   : > { %17681 = vst [vmem:[#allocation5_spill] sm:$0xff] %v11951_v55  ;;  %10478 = vmatmul.mubr.msk.bf16.vlgmr.msra.gmra.mxu1 %vm1265_vm3, %v11951_v55  ;;  %v11977_v9 = vpack.c.bf16 %v796_v1, %v794_v0  ;;  %v797_v16 = vrot.slane %v17147_v62, 1  ;;  %v799_v17 = vrot.slane %v17146_v2, 1  ;;  %v17127_v21 = vunpack.c.l.bf16 %v11966_v63  ;;  %v9497_v2 = vld [vmem:[%s17112_s1 + $0x8] sm:$0x3] }
  0x21   : > { %10542 = vmatpush3.bf16.msra.mxu1 %v2200_v43  ;;  %v941_v23 = vrot.slane %v17128_v3, 1  ;;  %v938_v25 = vsel %vm782_vm1, %v936_v61, %v937_v11  ;;  %v940_v26 = vsel %vm782_vm1, %v937_v11, %v939_v15  ;;  %v17145_v30 = vunpack.c.l.bf16 %v11975_v5  ;;  %11588 = vmatprep.subr.msk.bf16.mxu0 %vm1458_vm0, %v9497_v2 }
  0x22   : > { %17682 = vst [vmem:[#allocation6_spill] sm:$0xff] %v11977_v9  ;;  %10417 = vmatprep.mubr.msk.bf16.mxu0 %vm1265_vm3, %v11977_v9  ;;  %v798_v27 = vsel %vm782_vm1, %v795_v58, %v797_v16  ;;  %v12002_v32 = vpack.c.bf16 %v940_v26, %v938_v25  ;;  %v800_v38 = vsel %vm782_vm1, %v797_v16, %v799_v17  ;;  %v943_v41 = vrot.slane %v17127_v21, 1 }
  0x23   : > { %v942_v39 = vsel %vm782_vm1, %v939_v15, %v941_v23  ;;  %v12011_v43 = vpack.c.bf16 %v800_v38, %v798_v27  ;;  %v17141_v44 = vunpack.c.h.bf16 %v11975_v5  ;;  %v17140_v45 = vunpack.c.l.bf16 %v11991_v24 }
  0x24   : > { %17684 = vst [vmem:[#allocation8_spill] sm:$0xff] %v12002_v32  ;;  %10481 = vmatprep.mubr.msk.bf16.mxu1 %vm1265_vm3, %v12002_v32  ;;  %v944_v51 = vsel %vm782_vm1, %v941_v23, %v943_v41  ;;  %v801_v52 = vrot.slane %v17145_v30, 1  ;;  %v17117_v56 = vunpack.c.l.bf16 %v12000_v31  ;;  %v17116_v57 = vunpack.c.h.bf16 %v12000_v31  ;;  %v12041_v23 = vld [vmem:[%s11866_s27 + $0x178] sm:$0x1]  ;;  %v12164_v30 = vld [vmem:[%s11866_s27 + $0x60] sm:$0x1] }
  0x25   : > { %17685 = vst [vmem:[#allocation9_spill] sm:$0xff] %v12011_v43  ;;  %v12027_v58 = vpack.c.bf16 %v944_v51, %v942_v39  ;;  %v802_v61 = vrot.slane %v17141_v44, 1  ;;  %v804_v0 = vrot.slane %v17140_v45, 1  ;;  %v17122_v1 = vunpack.c.l.bf16 %v12009_v42  ;;  %v12051_v39 = vld [vmem:[%s11866_s27 + $0x3c] sm:$0xff]  }
  0x26   : > { %10418 = vmatmul.mubr.msk.bf16.gmra.mxu0 %vm1265_vm3, %v12011_v43  ;;  %v945_v11 = vrot.slane %v17117_v56, 1  ;;  %v946_v15 = vrot.slane %v17116_v57, 1  ;;  %v17139_v16 = vunpack.c.h.bf16 %v11991_v24  ;;  %v17137_v17 = vunpack.c.l.bf16 %v12016_v50  ;;  %v12134_v45 = vld [vmem:[%s11866_s27 + $0x58] sm:$0xff]   ;;  %v12365_v43 = vld [vmem:[%s11866_s27 + $0x1cc] sm:$0xff]  }
  0x27   : > { %17686 = vst [vmem:[#allocation10_spill] sm:$0xff] %v12027_v58  ;;  %v803_v25 = vsel %vm782_vm1, %v801_v52, %v802_v61  ;;  %v805_v26 = vsel %vm782_vm1, %v802_v61, %v804_v0  ;;  %v948_v27 = vrot.slane %v17122_v1, 1  ;;  %v17126_v38 = vunpack.c.h.bf16 %v12009_v42  ;;  %17718 = vst [vmem:[#allocation38_spill] sm:$0xff] %v12365_v43 }
  0x28   : > { %10482 = vmatmul.mubr.msk.bf16.gmra.mxu1 %vm1265_vm3, %v12027_v58  ;;  %v12053_v41 = vpack.c.bf16 %v805_v26, %v803_v25  ;;  %v947_v51 = vsel %vm782_vm1, %v945_v11, %v946_v15  ;;  %v806_v57 = vrot.slane %v17139_v16, 1  ;;  %v808_v52 = vrot.slane %v17137_v17, 1  ;;  %v12068_v25 = vld [vmem:[%s11866_s27 + $0x17c] sm:$0xff]  }
  0x29   : > { %v949_v61 = vsel %vm782_vm1, %v946_v15, %v948_v27  ;;  %v17125_v56 = vunpack.c.l.bf16 %v12041_v23  ;;  %v950_v59 = vrot.slane %v17126_v38, 1  ;;  %17688 = vst [vmem:[#allocation12_spill] sm:$0xff] %v12068_v25  ;;  %v17131_v15 = vunpack.c.l.bf16 %v12051_v39  ;;  %v12102_v38 = vld [vmem:[%s11866_s27 + $0x18c] sm:$0x1] }
  0x2a   : > { %17687 = vst [vmem:[#allocation11_spill] sm:$0xff] %v12053_v41  ;;  %10421 = vmatprep.mubr.msk.bf16.mxu0 %vm1265_vm3, %v12053_v41  ;;  %v12072_v11 = vpack.c.bf16 %v949_v61, %v947_v51  ;;  %v807_v26 = vsel %vm782_vm1, %v804_v0, %v806_v57  ;;  %v809_v13 = vsel %vm782_vm1, %v806_v57, %v808_v52  ;;  %v17135_v51 = vunpack.c.h.bf16 %v12051_v39  ;;  %v12093_v61 = vld [vmem:[%s11866_s27 + $0x4c] sm:$0x1] }
  0x2b   : > { %v12080_v1 = vpack.c.bf16 %v809_v13, %v807_v26  ;;  %v951_v60 = vsel %vm782_vm1, %v948_v27, %v950_v59  ;;  %v952_v14 = vrot.slane %v17125_v56, 1  ;;  %v17132_v0 = vunpack.c.l.bf16 %v12065_v53 }
  0x2c   : > { %17689 = vst [vmem:[#allocation13_spill] sm:$0xff] %v12072_v11  ;;  %10485 = vmatprep.mubr.msk.bf16.mxu1 %vm1265_vm3, %v12072_v11  ;;  %v810_v57 = vrot.slane %v17131_v15, 1  ;;  %v17133_v52 = vunpack.c.l.bf16 %v12068_v25  ;;  %v17134_v27 = vunpack.c.h.bf16 %v12068_v25  ;;  %v17136_v26 = vunpack.c.l.bf16 %v12078_v12 }
  0x2d   : > { %17690 = vst [vmem:[#allocation14_spill] sm:$0xff] %v12080_v1  ;;  %v953_v13 = vsel %vm782_vm1, %v950_v59, %v952_v14  ;;  %v17138_v56 = vunpack.c.h.bf16 %v12065_v53  ;;  %v811_v3 = vrot.slane %v17135_v51, 1  ;;  %v813_v34 = vrot.slane %v17132_v0, 1  ;;  %v12126_v51 = vld [vmem:[%s11866_s27 + $0x50] sm:$0xff]  }
  0x2e   : > { %10422 = vmatmul.mubr.msk.bf16.gmra.mxu0 %vm1265_vm3, %v12080_v1  ;;  %v12104_v21 = vpack.c.bf16 %v953_v13, %v951_v60  ;;  %v954_v14 = vrot.slane %v17133_v52, 1  ;;  %v955_v59 = vrot.slane %v17134_v27, 1  ;;  %v957_v33 = vrot.slane %v17136_v26, 1  ;;  %v12354_v1 = vld [vmem:[%s11866_s27 + $0x8c] sm:$0xff]  }
  0x2f   : > { %v17144_v15 = vunpack.c.l.bf16 %v12093_v61  ;;  %v815_v60 = vrot.slane %v17138_v56, 1  ;;  %v812_v13 = vsel %vm782_vm1, %v810_v57, %v811_v3  ;;  %v814_v0 = vsel %vm782_vm1, %v811_v3, %v813_v34 }
  0x30   : > { %17691 = vst [vmem:[#allocation15_spill] sm:$0xff] %v12104_v21  ;;  %10486 = vmatmul.mubr.msk.bf16.gmra.mxu1 %vm1265_vm3, %v12104_v21  ;;  %v17143_v52 = vunpack.c.h.bf16 %v12078_v12  ;;  %v17142_v27 = vunpack.c.l.bf16 %v12102_v38  ;;  %v12128_v26 = vpack.c.bf16 %v814_v0, %v812_v13  ;;  %v956_v17 = vsel %vm782_vm1, %v954_v14, %v955_v59 }
  0x31   : > { %v958_v56 = vsel %vm782_vm1, %v955_v59, %v957_v33  ;;  %v816_v16 = vsel %vm782_vm1, %v813_v34, %v815_v60  ;;  %v817_v57 = vrot.slane %v17144_v15, 1  ;;  %v17151_v14 = vunpack.c.l.bf16 %v12126_v51  ;;  %v12149_v59 = vld [vmem:[%s11866_s27 + $0x190] sm:$0xff]  }
  0x32   : > { %17692 = vst [vmem:[#allocation16_spill] sm:$0xff] %v12128_v26  ;;  %v12136_v3 = vpack.c.bf16 %v958_v56, %v956_v17  ;;  %v959_v44 = vrot.slane %v17143_v52, 1  ;;  %v961_v0 = vrot.slane %v17142_v27, 1  ;;  %10425 = vmatprep.mubr.msk.bf16.mxu0 %vm1265_vm3, %v12128_v26  ;;  %v17150_v34 = vunpack.c.h.bf16 %v12126_v51  ;;  %17694 = vst [vmem:[#allocation18_spill] sm:$0xff] %v12149_v59  ;;  %v12152_v56 = vld [vmem:[%s11866_s27 + $0x198] sm:$0xff]  }
  0x33   : > { %17695 = vst [vmem:[#allocation19_spill] sm:$0xff] %v12152_v56  ;;  %v9432_v17 = vld [vmem:[%s17112_s1 + $0x6] sm:$0x3]  ;;  %v818_v13 = vsel %vm782_vm1, %v815_v60, %v817_v57  ;;  %v17149_v15 = vunpack.c.l.bf16 %v12134_v45  ;;  %v819_v60 = vrot.slane %v17151_v14, 1  ;;  %v17156_v57 = vunpack.c.l.bf16 %v12149_v59 }
  0x34   : > { %17693 = vst [vmem:[#allocation17_spill] sm:$0xff] %v12136_v3  ;;  %10489 = vmatprep.mubr.msk.bf16.mxu1 %vm1265_vm3, %v12136_v3  ;;  %v960_v27 = vsel %vm782_vm1, %v957_v33, %v959_v44  ;;  %v962_v52 = vsel %vm782_vm1, %v959_v44, %v961_v0  ;;  %11587 = vmatprep.subr.msk.bf16.mxu1 %vm1458_vm0, %v9432_v17  ;;  %v820_v33 = vrot.slane %v17150_v34, 1  ;;  %v17157_v0 = vunpack.c.h.bf16 %v12149_v59 }
  0x35   : > { %v12170_v62 = vpack.c.bf16 %v818_v13, %v816_v16  ;;  %v12172_v48 = vpack.c.bf16 %v962_v52, %v960_v27  ;;  %v822_v44 = vrot.slane %v17149_v15, 1  ;;  %v17158_v16 = vunpack.c.l.bf16 %v12152_v56  ;;  %v12185_v52 = vld [vmem:[%s11866_s27 + $0x1a0] sm:$0x1] }
  0x36   : > { %17698 = vst [vmem:[#allocation22_spill] sm:$0xff] %v12185_v52  ;;  %v821_v27 = vsel %vm782_vm1, %v819_v60, %v820_v33  ;;  %v17161_v17 = vunpack.c.h.bf16 %v12134_v45  ;;  %v17160_v2 = vunpack.c.l.bf16 %v12164_v30  ;;  %v17162_v13 = vunpack.c.h.bf16 %v12152_v56  ;;  %v12956_v56 = vld [vmem:[%s11866_s27 + $0x274] sm:$0xff]  }
  0x37   : > { %17696 = vst [vmem:[#allocation20_spill] sm:$0xff] %v12170_v62  ;;  %17697 = vst [vmem:[#allocation21_spill] sm:$0xff] %v12172_v48  ;;  %10426 = vmatmul.mubr.msk.bf16.gmra.mxu0 %vm1265_vm3, %v12170_v62  ;;  %v823_v15 = vsel %vm782_vm1, %v820_v33, %v822_v44  ;;  %v963_v34 = vrot.slane %v17156_v57, 1  ;;  %v964_v14 = vrot.slane %v17157_v0, 1  ;;  %v966_v60 = vrot.slane %v17158_v16, 1 }
  0x38   : > { %10490 = vmatmul.mubr.msk.bf16.gmra.mxu1 %vm1265_vm3, %v12172_v48  ;;  %v12202_v47 = vpack.c.bf16 %v823_v15, %v821_v27  ;;  %v824_v46 = vrot.slane %v17161_v17, 1  ;;  %v826_v29 = vrot.slane %v17160_v2, 1  ;;  %v17167_v33 = vunpack.c.l.bf16 %v12185_v52  ;;  %v12220_v15 = vld [vmem:[%s11866_s27 + $0x1a4] sm:$0xff]   ;;  %v12944_v52 = vld [vmem:[%s11866_s27 + $0x134] sm:$0xff]  }
  0x39   : > { %v965_v57 = vsel %vm782_vm1, %v963_v34, %v964_v14  ;;  %v967_v0 = vsel %vm782_vm1, %v964_v14, %v966_v60  ;;  %v968_v16 = vrot.slane %v17162_v13, 1  ;;  %17700 = vst [vmem:[#allocation24_spill] sm:$0xff] %v12220_v15  ;;  %v12231_v34 = vld [vmem:[%s11866_s27 + $0x1ac] sm:$0xff]   ;;  %v17170_v3 = vunpack.c.l.bf16 %v12210_v8  ;;  %17816 = vst [vmem:[#allocation113_spill] sm:$0xff] %v12944_v52 }
  0x3a   : > { %17699 = vst [vmem:[#allocation23_spill] sm:$0xff] %v12202_v47  ;;  %10429 = vmatprep.mubr.msk.bf16.mxu0 %vm1265_vm3, %v12202_v47  ;;  %v12224_v27 = vpack.c.bf16 %v967_v0, %v965_v57  ;;  %v825_v2 = vsel %vm782_vm1, %v822_v44, %v824_v46  ;;  %v827_v17 = vsel %vm782_vm1, %v824_v46, %v826_v29  ;;  %v970_v14 = vrot.slane %v17167_v33, 1  ;;  %v12244_v0 = vld [vmem:[%s11866_s27 + $0x74] sm:$0x1] }
  0x3b   : > { %17702 = vst [vmem:[#allocation26_spill] sm:$0xff] %v12231_v34  ;;  %v12233_v13 = vpack.c.bf16 %v827_v17, %v825_v2  ;;  %v969_v48 = vsel %vm782_vm1, %v966_v60, %v968_v16  ;;  %v17173_v44 = vunpack.c.h.bf16 %v12210_v8  ;;  %v17174_v29 = vunpack.c.l.bf16 %v12217_v7 }
  0x3c   : > { %17701 = vst [vmem:[#allocation25_spill] sm:$0xff] %v12224_v27  ;;  %10493 = vmatprep.mubr.msk.bf16.mxu1 %vm1265_vm3, %v12224_v27  ;;  %v971_v57 = vsel %vm782_vm1, %v968_v16, %v970_v14  ;;  %v17177_v46 = vunpack.c.l.bf16 %v12220_v15  ;;  %v828_v17 = vrot.slane %v17170_v3, 1  ;;  %v17182_v2 = vunpack.c.h.bf16 %v12220_v15  ;;  %v12253_v27 = vld [vmem:[%s11866_s27 + $0x1b4] sm:$0x1] }
  0x3d   : > { %17703 = vst [vmem:[#allocation27_spill] sm:$0xff] %v12233_v13  ;;  %v12246_v33 = vpack.c.bf16 %v971_v57, %v969_v48  ;;  %v17185_v60 = vunpack.c.l.bf16 %v12231_v34  ;;  %17705 = vst [vmem:[#allocation29_spill] sm:$0xff] %v12253_v27  ;;  %v829_v16 = vrot.slane %v17173_v44, 1  ;;  %v831_v48 = vrot.slane %v17174_v29, 1 }
  0x3e   : > { %v972_v14 = vrot.slane %v17177_v46, 1  ;;  %v17188_v57 = vunpack.c.h.bf16 %v12217_v7  ;;  %v973_v3 = vrot.slane %v17182_v2, 1  ;;  %v12278_v2 = vld [vmem:[%s11866_s27 + $0x78] sm:$0xff]   ;;  %v17707_v29 = vunpack.c.l.bf16 %v12244_v0 }
  0x3f   : > { %17704 = vst [vmem:[#allocation28_spill] sm:$0xff] %v12246_v33  ;;  %10430 = vmatmul.mubr.msk.bf16.gmra.mxu0 %vm1265_vm3, %v12233_v13  ;;  %v975_v21 = vrot.slane %v17185_v60, 1  ;;  %v830_v11 = vsel %vm782_vm1, %v828_v17, %v829_v16  ;;  %v832_v46 = vsel %vm782_vm1, %v829_v16, %v831_v48 }
  0x40   : > { %10494 = vmatmul.mubr.msk.bf16.gmra.mxu1 %vm1265_vm3, %v12246_v33  ;;  %v833_v58 = vrot.slane %v17188_v57, 1  ;;  %v17193_v33 = vunpack.c.l.bf16 %v12253_v27  ;;  %v12280_v32 = vpack.c.bf16 %v832_v46, %v830_v11  ;;  %v974_v60 = vsel %vm782_vm1, %v972_v14, %v973_v3  ;;  %v12294_v11 = vld [vmem:[%s11866_s27 + $0x80] sm:$0xff]   ;;  %v12297_v46 = vld [vmem:[%s11866_s27 + $0x1b8] sm:$0xff]  }
  0x41   : > { %v976_v44 = vsel %vm782_vm1, %v973_v3, %v975_v21  ;;  %v835_v55 = vrot.slane %v17707_v29, 1  ;;  %v17709_v57 = vunpack.c.h.bf16 %v12231_v34  ;;  %17710 = vst [vmem:[#allocation32_spill] sm:$0xff] %v12297_v46  ;;  %v12304_v29 = vld [vmem:[%s11866_s27 + $0x1c0] sm:$0xff]   ;;  %v17207_v47 = vunpack.c.l.bf16 %v12297_v46  ;;  %v12897_v34 = vld [vmem:[%s11866_s27 + $0x128] sm:$0x1] }
  0x42   : > { %17706 = vst [vmem:[#allocation30_spill] sm:$0xff] %v12280_v32  ;;  %v12286_v17 = vpack.c.bf16 %v976_v44, %v974_v60  ;;  %v834_v16 = vsel %vm782_vm1, %v831_v48, %v833_v58  ;;  %v979_v13 = vrot.slane %v17193_v33, 1  ;;  %10433 = vmatprep.mubr.msk.bf16.mxu0 %vm1265_vm3, %v12280_v32  ;;  %v17199_v44 = vunpack.c.l.bf16 %v12278_v2  ;;  %17711 = vst [vmem:[#allocation33_spill] sm:$0xff] %v12304_v29  ;;  %v12314_v33 = vld [vmem:[%s11866_s27 + $0x88] sm:$0x1] }
  0x43   : > { %v977_v37 = vrot.slane %v17709_v57, 1  ;;  %v836_v3 = vsel %vm782_vm1, %v833_v58, %v835_v55  ;;  %v17198_v57 = vunpack.c.h.bf16 %v12278_v2  ;;  %v17206_v55 = vunpack.c.l.bf16 %v12294_v11 }
  0x44   : > { %17708 = vst [vmem:[#allocation31_spill] sm:$0xff] %v12286_v17  ;;  %10497 = vmatprep.mubr.msk.bf16.mxu1 %vm1265_vm3, %v12286_v17  ;;  %v12308_v60 = vpack.c.bf16 %v836_v3, %v834_v16  ;;  %v837_v58 = vrot.slane %v17199_v44, 1  ;;  %v12330_v3 = vld [vmem:[%s11866_s27 + $0x1c8] sm:$0x1]  ;;  %v17219_v44 = vunpack.c.h.bf16 %v12304_v29  ;;  %v17715_v17 = vunpack.c.l.bf16 %v12304_v29 }
  0x45   : > { %v978_v48 = vsel %vm782_vm1, %v975_v21, %v977_v37  ;;  %v980_v14 = vsel %vm782_vm1, %v977_v37, %v979_v13  ;;  %v838_v21 = vrot.slane %v17198_v57, 1  ;;  %v17214_v37 = vunpack.c.h.bf16 %v12297_v46  ;;  %17714 = vst [vmem:[#allocation36_spill] sm:$0xff] %v12330_v3 }
  0x46   : > { %17712 = vst [vmem:[#allocation34_spill] sm:$0xff] %v12308_v60  ;;  %v12316_v32 = vpack.c.bf16 %v980_v14, %v978_v48  ;;  %v840_v48 = vrot.slane %v17206_v55, 1  ;;  %v981_v14 = vrot.slane %v17207_v47, 1  ;;  %v17218_v57 = vunpack.c.l.bf16 %v12314_v33 }
  0x47   : > { %10434 = vmatmul.mubr.msk.bf16.gmra.mxu0 %vm1265_vm3, %v12308_v60  ;;  %v839_v13 = vsel %vm782_vm1, %v837_v58, %v838_v21  ;;  %v982_v16 = vrot.slane %v17214_v37, 1  ;;  %v17716_v60 = vunpack.c.h.bf16 %v12294_v11  ;;  %v986_v58 = vrot.slane %v17219_v44, 1 }
  0x48   : > { %17713 = vst [vmem:[#allocation35_spill] sm:$0xff] %v12316_v32  ;;  %10498 = vmatmul.mubr.msk.bf16.gmra.mxu1 %vm1265_vm3, %v12316_v32  ;;  %v984_v32 = vrot.slane %v17715_v17, 1  ;;  %v841_v47 = vsel %vm782_vm1, %v838_v21, %v840_v48  ;;  %v844_v62 = vrot.slane %v17218_v57, 1  ;;  %v12362_v21 = vld [vmem:[%s11866_s27 + $0x94] sm:$0xff]  }
  0x49   : > { %v842_v55 = vrot.slane %v17716_v60, 1  ;;  %v12356_v37 = vpack.c.bf16 %v841_v47, %v839_v13  ;;  %v983_v17 = vsel %vm782_vm1, %v981_v14, %v982_v16  ;;  %v17720_v47 = vunpack.c.l.bf16 %v12330_v3  ;;  %v12374_v14 = vld [vmem:[%s11866_s27 + $0x1d4] sm:$0xff]  }
  0x4a   : > { %v985_v41 = vsel %vm782_vm1, %v982_v16, %v984_v32  ;;  %v987_v44 = vsel %vm782_vm1, %v984_v32, %v986_v58  ;;  %17721 = vst [vmem:[#allocation40_spill] sm:$0xff] %v12374_v14  ;;  %v17227_v32 = vunpack.c.h.bf16 %v12354_v1 }
  0x4b   : > { %17717 = vst [vmem:[#allocation37_spill] sm:$0xff] %v12356_v37  ;;  %v843_v60 = vsel %vm782_vm1, %v840_v48, %v842_v55  ;;  %v12367_v57 = vpack.c.bf16 %v985_v41, %v983_v17  ;;  %v845_v26 = vsel %vm782_vm1, %v842_v55, %v844_v62  ;;  %v988_v13 = vrot.slane %v17720_v47, 1  ;;  %10437 = vmatprep.mubr.msk.bf16.mxu0 %vm1265_vm3, %v12356_v37  ;;  %v12388_v17 = vld [vmem:[%s11866_s27 + $0x9c] sm:$0x1] }
  0x4c   : > { %v12378_v16 = vpack.c.bf16 %v845_v26, %v843_v60  ;;  %v17224_v48 = vunpack.c.l.bf16 %v12354_v1  ;;  %v17228_v41 = vunpack.c.l.bf16 %v12362_v21  ;;  %17723 = vst [vmem:[#allocation42_spill] sm:$0xff] %v12388_v17  ;;  %v17234_v47 = vunpack.c.h.bf16 %v12365_v43 }
  0x4d   : > { %17719 = vst [vmem:[#allocation39_spill] sm:$0xff] %v12367_v57  ;;  %10501 = vmatprep.mubr.msk.bf16.mxu1 %vm1265_vm3, %v12367_v57  ;;  %v989_v62 = vsel %vm782_vm1, %v986_v58, %v988_v13  ;;  %v17237_v58 = vunpack.c.l.bf16 %v12374_v14  ;;  %v12399_v13 = vld [vmem:[%s11866_s27 + $0x1dc] sm:$0x1]  ;;  %v847_v55 = vrot.slane %v17227_v32, 1 }
  0x4e   : > { %17722 = vst [vmem:[#allocation41_spill] sm:$0xff] %v12378_v16  ;;  %v12392_v26 = vpack.c.bf16 %v989_v62, %v987_v44  ;;  %v846_v60 = vrot.slane %v17224_v48, 1  ;;  %17725 = vst [vmem:[#allocation44_spill] sm:$0xff] %v12399_v13  ;;  %v849_v57 = vrot.slane %v17228_v41, 1  ;;  %v17240_v62 = vunpack.c.h.bf16 %v12362_v21 }
  0x4f   : > { %10438 = vmatmul.mubr.msk.bf16.gmra.mxu0 %vm1265_vm3, %v12378_v16  ;;  %v17726_v16 = vunpack.c.l.bf16 %v12365_v43  ;;  %v991_v48 = vrot.slane %v17234_v47, 1  ;;  %v993_v37 = vrot.slane %v17237_v58, 1  ;;  %v12422_v47 = vld [vmem:[%s11866_s27 + $0xa0] sm:$0xff]   ;;  %v17729_v41 = vunpack.c.l.bf16 %v12388_v17 }
  0x50   : > { %17724 = vst [vmem:[#allocation43_spill] sm:$0xff] %v12392_v26  ;;  %10502 = vmatmul.mubr.msk.bf16.gmra.mxu1 %vm1265_vm3, %v12392_v26  ;;  %v848_v9 = vsel %vm782_vm1, %v846_v60, %v847_v55  ;;  %v851_v46 = vrot.slane %v17240_v62, 1  ;;  %v17245_v26 = vunpack.c.l.bf16 %v12399_v13  ;;  %17727 = vst [vmem:[#allocation45_spill] sm:$0xff] %v12422_v47  ;;  %v17731_v62 = vunpack.c.h.bf16 %v12374_v14  ;;  %v12498_v13 = vld [vmem:[%s11866_s27 + $0xb4] sm:$0xff]  }
  0x51   : > { %v990_v44 = vrot.slane %v17726_v16, 1  ;;  %v850_v16 = vsel %vm782_vm1, %v847_v55, %v849_v57  ;;  %v994_v32 = vsel %vm782_vm1, %v991_v48, %v993_v37  ;;  %v853_v15 = vrot.slane %v17729_v41, 1  ;;  %v12448_v41 = vld [vmem:[%s11866_s27 + $0x1e8] sm:$0xff]   ;;  %17741 = vst [vmem:[#allocation55_spill] sm:$0xff] %v12498_v13  ;;  %v12509_v14 = vld [vmem:[%s11866_s27 + $0x1f4] sm:$0xff]  }
  0x52   : > { %v12424_v43 = vpack.c.bf16 %v850_v16, %v848_v9  ;;  %v852_v55 = vsel %vm782_vm1, %v849_v57, %v851_v46  ;;  %v995_v59 = vrot.slane %v17731_v62, 1  ;;  %v997_v25 = vrot.slane %v17245_v26, 1  ;;  %v12438_v9 = vld [vmem:[%s11866_s27 + $0xa8] sm:$0xff]   ;;  %v12441_v16 = vld [vmem:[%s11866_s27 + $0x1e0] sm:$0xff]   ;;  %17734 = vst [vmem:[#allocation50_spill] sm:$0xff] %v12448_v41  ;;  %17744 = vst [vmem:[#allocation58_spill] sm:$0xff] %v12509_v14 }
  0x53   : > { %v992_v58 = vsel %vm782_vm1, %v990_v44, %v991_v48  ;;  %17732 = vst [vmem:[#allocation48_spill] sm:$0xff] %v12438_v9  ;;  %17733 = vst [vmem:[#allocation49_spill] sm:$0xff] %v12441_v16  ;;  %v854_v48 = vsel %vm782_vm1, %v851_v46, %v853_v15  ;;  %v17250_v62 = vunpack.c.h.bf16 %v12422_v47  ;;  %v12458_v26 = vld [vmem:[%s11866_s27 + $0xb0] sm:$0x1]  ;;  %v17258_v15 = vunpack.c.l.bf16 %v12438_v9 }
  0x54   : > { %17728 = vst [vmem:[#allocation46_spill] sm:$0xff] %v12424_v43  ;;  %v12430_v60 = vpack.c.bf16 %v994_v32, %v992_v58  ;;  %10441 = vmatprep.mubr.msk.bf16.mxu0 %vm1265_vm3, %v12424_v43  ;;  %v17251_v32 = vunpack.c.l.bf16 %v12422_v47  ;;  %v12452_v57 = vpack.c.bf16 %v854_v48, %v852_v55  ;;  %v996_v58 = vsel %vm782_vm1, %v993_v37, %v995_v59  ;;  %v12474_v48 = vld [vmem:[%s11866_s27 + $0x1f0] sm:$0x1] }
  0x55   : > { %v998_v44 = vsel %vm782_vm1, %v995_v59, %v997_v25  ;;  %17736 = vst [vmem:[#allocation52_spill] sm:$0xff] %v12458_v26  ;;  %v17259_v31 = vunpack.c.l.bf16 %v12441_v16  ;;  %v856_v37 = vrot.slane %v17250_v62, 1  ;;  %v17265_v25 = vunpack.c.h.bf16 %v12441_v16  ;;  %17738 = vst [vmem:[#allocation54_spill] sm:$0xff] %v12474_v48 }
  0x56   : > { %17730 = vst [vmem:[#allocation47_spill] sm:$0xff] %v12430_v60  ;;  %10505 = vmatprep.mubr.msk.bf16.mxu1 %vm1265_vm3, %v12430_v60  ;;  %17735 = vst [vmem:[#allocation51_spill] sm:$0xff] %v12452_v57  ;;  %v12460_v43 = vpack.c.bf16 %v998_v44, %v996_v58  ;;  %v855_v46 = vrot.slane %v17251_v32, 1  ;;  %v858_v58 = vrot.slane %v17258_v15, 1  ;;  %v17270_v62 = vunpack.c.l.bf16 %v12458_v26 }
  0x57   : > { %10442 = vmatmul.mubr.msk.bf16.gmra.mxu0 %vm1265_vm3, %v12452_v57  ;;  %v999_v44 = vrot.slane %v17259_v31, 1  ;;  %v17271_v32 = vunpack.c.h.bf16 %v12448_v41  ;;  %v1000_v55 = vrot.slane %v17265_v25, 1  ;;  %v17739_v60 = vunpack.c.l.bf16 %v12448_v41 }
  0x58   : > { %17737 = vst [vmem:[#allocation53_spill] sm:$0xff] %v12460_v43  ;;  %10506 = vmatmul.mubr.msk.bf16.gmra.mxu1 %vm1265_vm3, %v12460_v43  ;;  %v857_v59 = vsel %vm782_vm1, %v855_v46, %v856_v37  ;;  %v17740_v57 = vunpack.c.h.bf16 %v12438_v9  ;;  %v859_v31 = vsel %vm782_vm1, %v856_v37, %v858_v58  ;;  %v862_v40 = vrot.slane %v17270_v62, 1  ;;  %v12506_v37 = vld [vmem:[%s11866_s27 + $0xbc] sm:$0xff]  }
  0x59   : > { %v1002_v43 = vrot.slane %v17739_v60, 1  ;;  %v1004_v46 = vrot.slane %v17271_v32, 1  ;;  %v12500_v25 = vpack.c.bf16 %v859_v31, %v857_v59  ;;  %v1001_v60 = vsel %vm782_vm1, %v999_v44, %v1000_v55  ;;  %17743 = vst [vmem:[#allocation57_spill] sm:$0xff] %v12506_v37  ;;  %v12518_v44 = vld [vmem:[%s11866_s27 + $0x1fc] sm:$0xff]  }
  0x5a   : > { %v860_v15 = vrot.slane %v17740_v57, 1  ;;  %v17746_v31 = vunpack.c.l.bf16 %v12474_v48  ;;  %17747 = vst [vmem:[#allocation60_spill] sm:$0xff] %v12518_v44  ;;  %v12997_v9 = vld [vmem:[%s11866_s27 + $0x27c] sm:$0x1] }
  0x5b   : > { %17742 = vst [vmem:[#allocation56_spill] sm:$0xff] %v12500_v25  ;;  %v1003_v16 = vsel %vm782_vm1, %v1000_v55, %v1002_v43  ;;  %v1005_v32 = vsel %vm782_vm1, %v1002_v43, %v1004_v46  ;;  %10445 = vmatprep.mubr.msk.bf16.mxu0 %vm1265_vm3, %v12500_v25  ;;  %v17279_v43 = vunpack.c.h.bf16 %v12498_v13 }
  0x5c   : > { %v861_v57 = vsel %vm782_vm1, %v858_v58, %v860_v15  ;;  %v12511_v62 = vpack.c.bf16 %v1003_v16, %v1001_v60  ;;  %v863_v6 = vsel %vm782_vm1, %v860_v15, %v862_v40  ;;  %v1006_v59 = vrot.slane %v17746_v31, 1  ;;  %v12532_v60 = vld [vmem:[%s11866_s27 + $0xc4] sm:$0x1] }
  0x5d   : > { %v12522_v55 = vpack.c.bf16 %v863_v6, %v861_v57  ;;  %v17276_v58 = vunpack.c.l.bf16 %v12498_v13  ;;  %v17280_v16 = vunpack.c.l.bf16 %v12506_v37  ;;  %17749 = vst [vmem:[#allocation62_spill] sm:$0xff] %v12532_v60  ;;  %v17286_v31 = vunpack.c.h.bf16 %v12509_v14 }
  0x5e   : > { %17745 = vst [vmem:[#allocation59_spill] sm:$0xff] %v12511_v62  ;;  %10509 = vmatprep.mubr.msk.bf16.mxu1 %vm1265_vm3, %v12511_v62  ;;  %v1007_v40 = vsel %vm782_vm1, %v1004_v46, %v1006_v59  ;;  %v17289_v46 = vunpack.c.l.bf16 %v12518_v44  ;;  %v12543_v59 = vld [vmem:[%s11866_s27 + $0x204] sm:$0x1]  ;;  %v865_v15 = vrot.slane %v17279_v43, 1 }
  0x5f   : > { %17748 = vst [vmem:[#allocation61_spill] sm:$0xff] %v12522_v55  ;;  %10446 = vmatmul.mubr.msk.bf16.gmra.mxu0 %vm1265_vm3, %v12522_v55  ;;  %v12536_v6 = vpack.c.bf16 %v1007_v40, %v1005_v32  ;;  %v864_v57 = vrot.slane %v17276_v58, 1  ;;  %17751 = vst [vmem:[#allocation64_spill] sm:$0xff] %v12543_v59  ;;  %v867_v62 = vrot.slane %v17280_v16, 1  ;;  %v17752_v55 = vunpack.c.l.bf16 %v12509_v14 }
  0x60   : > { %v17292_v40 = vunpack.c.h.bf16 %v12506_v37  ;;  %v1009_v58 = vrot.slane %v17286_v31, 1  ;;  %v1011_v25 = vrot.slane %v17289_v46, 1  ;;  %v12566_v31 = vld [vmem:[%s11866_s27 + $0xc8] sm:$0xff]   ;;  %v17755_v16 = vunpack.c.l.bf16 %v12532_v60  ;;  %v12642_v60 = vld [vmem:[%s11866_s27 + $0xdc] sm:$0xff]  }
  0x61   : > { %17750 = vst [vmem:[#allocation63_spill] sm:$0xff] %v12536_v6  ;;  %v1008_v32 = vrot.slane %v17752_v55, 1  ;;  %10510 = vmatmul.mubr.msk.bf16.gmra.mxu1 %vm1265_vm3, %v12536_v6  ;;  %v866_v48 = vsel %vm782_vm1, %v864_v57, %v865_v15  ;;  %v868_v55 = vsel %vm782_vm1, %v865_v15, %v867_v62  ;;  %v17296_v6 = vunpack.c.l.bf16 %v12543_v59  ;;  %17753 = vst [vmem:[#allocation65_spill] sm:$0xff] %v12566_v31 }
  0x62   : > { %v869_v41 = vrot.slane %v17292_v40, 1  ;;  %v12568_v14 = vpack.c.bf16 %v868_v55, %v866_v48  ;;  %v1012_v43 = vsel %vm782_vm1, %v1009_v58, %v1011_v25  ;;  %v871_v13 = vrot.slane %v17755_v16, 1  ;;  %v12582_v48 = vld [vmem:[%s11866_s27 + $0xd0] sm:$0xff]   ;;  %v12585_v55 = vld [vmem:[%s11866_s27 + $0x208] sm:$0xff]   ;;  %17767 = vst [vmem:[#allocation75_spill] sm:$0xff] %v12642_v60 }
  0x63   : > { %v1010_v46 = vsel %vm782_vm1, %v1008_v32, %v1009_v58  ;;  %v17757_v40 = vunpack.c.h.bf16 %v12518_v44  ;;  %v1015_v26 = vrot.slane %v17296_v6, 1  ;;  %17758 = vst [vmem:[#allocation68_spill] sm:$0xff] %v12582_v48  ;;  %17759 = vst [vmem:[#allocation69_spill] sm:$0xff] %v12585_v55  ;;  %v12592_v16 = vld [vmem:[%s11866_s27 + $0x210] sm:$0xff]   ;;  %v12602_v6 = vld [vmem:[%s11866_s27 + $0xd8] sm:$0x1]  ;;  %v17309_v59 = vunpack.c.l.bf16 %v12585_v55 }
  0x64   : > { %17754 = vst [vmem:[#allocation66_spill] sm:$0xff] %v12568_v14  ;;  %v12574_v57 = vpack.c.bf16 %v1012_v43, %v1010_v46  ;;  %v870_v15 = vsel %vm782_vm1, %v867_v62, %v869_v41  ;;  %10449 = vmatprep.mubr.msk.bf16.mxu0 %vm1265_vm3, %v12568_v14  ;;  %v872_v58 = vsel %vm782_vm1, %v869_v41, %v871_v13  ;;  %v17301_v43 = vunpack.c.l.bf16 %v12566_v31 }
  0x65   : > { %v1013_v37 = vrot.slane %v17757_v40, 1  ;;  %17760 = vst [vmem:[#allocation70_spill] sm:$0xff] %v12592_v16  ;;  %v12596_v62 = vpack.c.bf16 %v872_v58, %v870_v15  ;;  %v17300_v40 = vunpack.c.h.bf16 %v12566_v31  ;;  %17762 = vst [vmem:[#allocation72_spill] sm:$0xff] %v12602_v6  ;;  %v17308_v13 = vunpack.c.l.bf16 %v12582_v48  ;;  %v12618_v58 = vld [vmem:[%s11866_s27 + $0x218] sm:$0x1] }
  0x66   : > { %17756 = vst [vmem:[#allocation67_spill] sm:$0xff] %v12574_v57  ;;  %10513 = vmatprep.mubr.msk.bf16.mxu1 %vm1265_vm3, %v12574_v57  ;;  %v873_v41 = vrot.slane %v17301_v43, 1  ;;  %17764 = vst [vmem:[#allocation74_spill] sm:$0xff] %v12618_v58  ;;  %v17320_v43 = vunpack.c.h.bf16 %v12592_v16  ;;  %v17765_v57 = vunpack.c.l.bf16 %v12592_v16 }
  0x67   : > { %17761 = vst [vmem:[#allocation71_spill] sm:$0xff] %v12596_v62  ;;  %v1014_v46 = vsel %vm782_vm1, %v1011_v25, %v1013_v37  ;;  %v1016_v32 = vsel %vm782_vm1, %v1013_v37, %v1015_v26  ;;  %10450 = vmatmul.mubr.msk.bf16.gmra.mxu0 %vm1265_vm3, %v12596_v62  ;;  %v874_v25 = vrot.slane %v17300_v40, 1  ;;  %v17315_v26 = vunpack.c.h.bf16 %v12585_v55 }
  0x68   : > { %v12604_v14 = vpack.c.bf16 %v1016_v32, %v1014_v46  ;;  %v876_v46 = vrot.slane %v17308_v13, 1  ;;  %v1017_v32 = vrot.slane %v17309_v59, 1  ;;  %v17319_v40 = vunpack.c.l.bf16 %v12602_v6  ;;  %v12653_v6 = vld [vmem:[%s11866_s27 + $0x21c] sm:$0xff]  }
  0x69   : > { %v875_v37 = vsel %vm782_vm1, %v873_v41, %v874_v25  ;;  %v1018_v15 = vrot.slane %v17315_v26, 1  ;;  %v17766_v62 = vunpack.c.h.bf16 %v12582_v48  ;;  %v1022_v41 = vrot.slane %v17320_v43, 1  ;;  %17770 = vst [vmem:[#allocation78_spill] sm:$0xff] %v12653_v6 }
  0x6a   : > { %17763 = vst [vmem:[#allocation73_spill] sm:$0xff] %v12604_v14  ;;  %10514 = vmatmul.mubr.msk.bf16.gmra.mxu1 %vm1265_vm3, %v12604_v14  ;;  %v1020_v14 = vrot.slane %v17765_v57, 1  ;;  %v877_v59 = vsel %vm782_vm1, %v874_v25, %v876_v46  ;;  %v880_v44 = vrot.slane %v17319_v40, 1  ;;  %v12650_v25 = vld [vmem:[%s11866_s27 + $0xe4] sm:$0xff]  }
  0x6b   : > { %v878_v13 = vrot.slane %v17766_v62, 1  ;;  %v12644_v26 = vpack.c.bf16 %v877_v59, %v875_v37  ;;  %v1019_v57 = vsel %vm782_vm1, %v1017_v32, %v1018_v15  ;;  %17769 = vst [vmem:[#allocation77_spill] sm:$0xff] %v12650_v25  ;;  %v17772_v59 = vunpack.c.l.bf16 %v12618_v58  ;;  %v12662_v32 = vld [vmem:[%s11866_s27 + $0x224] sm:$0xff]  }
  0x6c   : > { %v1021_v55 = vsel %vm782_vm1, %v1018_v15, %v1020_v14  ;;  %v1023_v43 = vsel %vm782_vm1, %v1020_v14, %v1022_v41  ;;  %17773 = vst [vmem:[#allocation80_spill] sm:$0xff] %v12662_v32  ;;  %v17328_v14 = vunpack.c.h.bf16 %v12642_v60 }
  0x6d   : > { %17768 = vst [vmem:[#allocation76_spill] sm:$0xff] %v12644_v26  ;;  %v879_v62 = vsel %vm782_vm1, %v876_v46, %v878_v13  ;;  %v12655_v40 = vpack.c.bf16 %v1021_v55, %v1019_v57  ;;  %v881_v31 = vsel %vm782_vm1, %v878_v13, %v880_v44  ;;  %v1024_v37 = vrot.slane %v17772_v59, 1  ;;  %10453 = vmatprep.mubr.msk.bf16.mxu0 %vm1265_vm3, %v12644_v26  ;;  %v12676_v57 = vld [vmem:[%s11866_s27 + $0xec] sm:$0x1] }
  0x6e   : > { %v12666_v15 = vpack.c.bf16 %v881_v31, %v879_v62  ;;  %v17325_v46 = vunpack.c.l.bf16 %v12642_v60  ;;  %v17329_v55 = vunpack.c.l.bf16 %v12650_v25  ;;  %17775 = vst [vmem:[#allocation82_spill] sm:$0xff] %v12676_v57  ;;  %v17335_v59 = vunpack.c.h.bf16 %v12653_v6 }
  0x6f   : > { %17771 = vst [vmem:[#allocation79_spill] sm:$0xff] %v12655_v40  ;;  %10517 = vmatprep.mubr.msk.bf16.mxu1 %vm1265_vm3, %v12655_v40  ;;  %v1025_v44 = vsel %vm782_vm1, %v1022_v41, %v1024_v37  ;;  %v17338_v41 = vunpack.c.l.bf16 %v12662_v32  ;;  %v12687_v37 = vld [vmem:[%s11866_s27 + $0x22c] sm:$0x1]  ;;  %v883_v13 = vrot.slane %v17328_v14, 1 }
  0x70   : > { %17774 = vst [vmem:[#allocation81_spill] sm:$0xff] %v12666_v15  ;;  %10454 = vmatmul.mubr.msk.bf16.gmra.mxu0 %vm1265_vm3, %v12666_v15  ;;  %v12680_v31 = vpack.c.bf16 %v1025_v44, %v1023_v43  ;;  %v882_v62 = vrot.slane %v17325_v46, 1  ;;  %17777 = vst [vmem:[#allocation84_spill] sm:$0xff] %v12687_v37  ;;  %v885_v40 = vrot.slane %v17329_v55, 1  ;;  %v17778_v15 = vunpack.c.l.bf16 %v12653_v6 }
  0x71   : > { %v17341_v44 = vunpack.c.h.bf16 %v12650_v25  ;;  %v1027_v46 = vrot.slane %v17335_v59, 1  ;;  %v1029_v26 = vrot.slane %v17338_v41, 1  ;;  %v12710_v59 = vld [vmem:[%s11866_s27 + $0xf0] sm:$0xff]   ;;  %v17781_v55 = vunpack.c.l.bf16 %v12676_v57 }
  0x72   : > { %17776 = vst [vmem:[#allocation83_spill] sm:$0xff] %v12680_v31  ;;  %v1026_v43 = vrot.slane %v17778_v15, 1  ;;  %10518 = vmatmul.mubr.msk.bf16.gmra.mxu1 %vm1265_vm3, %v12680_v31  ;;  %v884_v58 = vsel %vm782_vm1, %v882_v62, %v883_v13  ;;  %v886_v15 = vsel %vm782_vm1, %v883_v13, %v885_v40  ;;  %v17346_v31 = vunpack.c.l.bf16 %v12687_v37  ;;  %17779 = vst [vmem:[#allocation85_spill] sm:$0xff] %v12710_v59  ;;  %v12777_v37 = vld [vmem:[%s11866_s27 + $0x240] sm:$0x1] }
  0x73   : > { %v887_v16 = vrot.slane %v17341_v44, 1  ;;  %v12712_v6 = vpack.c.bf16 %v886_v15, %v884_v58  ;;  %v1030_v14 = vsel %vm782_vm1, %v1027_v46, %v1029_v26  ;;  %v889_v60 = vrot.slane %v17781_v55, 1  ;;  %v12726_v58 = vld [vmem:[%s11866_s27 + $0xf8] sm:$0xff]   ;;  %v12729_v15 = vld [vmem:[%s11866_s27 + $0x230] sm:$0xff]   ;;  %17790 = vst [vmem:[#allocation92_spill] sm:$0xff] %v12777_v37 }
  0x74   : > { %v1028_v41 = vsel %vm782_vm1, %v1026_v43, %v1027_v46  ;;  %v17783_v44 = vunpack.c.h.bf16 %v12662_v32  ;;  %v1033_v48 = vrot.slane %v17346_v31, 1  ;;  %17784 = vst [vmem:[#allocation88_spill] sm:$0xff] %v12729_v15  ;;  %v12736_v55 = vld [vmem:[%s11866_s27 + $0x238] sm:$0xff]   ;;  %v12746_v31 = vld [vmem:[%s11866_s27 + $0x100] sm:$0x1]  ;;  %v17370_v57 = vunpack.c.l.bf16 %v12777_v37 }
  0x75   : > { %17780 = vst [vmem:[#allocation86_spill] sm:$0xff] %v12712_v6  ;;  %v12718_v62 = vpack.c.bf16 %v1030_v14, %v1028_v41  ;;  %v888_v13 = vsel %vm782_vm1, %v885_v40, %v887_v16  ;;  %10457 = vmatprep.mubr.msk.bf16.mxu0 %vm1265_vm3, %v12712_v6  ;;  %v890_v46 = vsel %vm782_vm1, %v887_v16, %v889_v60  ;;  %v17352_v14 = vunpack.c.l.bf16 %v12710_v59 }
  0x76   : > { %v1031_v25 = vrot.slane %v17783_v44, 1  ;;  %17785 = vst [vmem:[#allocation89_spill] sm:$0xff] %v12736_v55  ;;  %v12740_v40 = vpack.c.bf16 %v890_v46, %v888_v13  ;;  %v17351_v44 = vunpack.c.h.bf16 %v12710_v59  ;;  %v17357_v60 = vunpack.c.l.bf16 %v12726_v58  ;;  %v12791_v59 = vld [vmem:[%s11866_s27 + $0x10c] sm:$0xff]  }
  0x77   : > { %17782 = vst [vmem:[#allocation87_spill] sm:$0xff] %v12718_v62  ;;  %10521 = vmatprep.mubr.msk.bf16.mxu1 %vm1265_vm3, %v12718_v62  ;;  %v891_v16 = vrot.slane %v17352_v14, 1  ;;  %v17359_v62 = vunpack.c.l.bf16 %v12729_v15  ;;  %v17788_v13 = vunpack.c.l.bf16 %v12736_v55 }
  0x78   : > { %17786 = vst [vmem:[#allocation90_spill] sm:$0xff] %v12740_v40  ;;  %v1032_v41 = vsel %vm782_vm1, %v1029_v26, %v1031_v25  ;;  %v1034_v43 = vsel %vm782_vm1, %v1031_v25, %v1033_v48  ;;  %10458 = vmatmul.mubr.msk.bf16.gmra.mxu0 %vm1265_vm3, %v12740_v40  ;;  %v892_v48 = vrot.slane %v17351_v44, 1  ;;  %v17362_v26 = vunpack.c.h.bf16 %v12729_v15  ;;  %v12783_v44 = vld [vmem:[%s11866_s27 + $0x104] sm:$0xff]  }
  0x79   : > { %v12748_v6 = vpack.c.bf16 %v1034_v43, %v1032_v41  ;;  %v894_v46 = vrot.slane %v17357_v60, 1  ;;  %v1035_v41 = vrot.slane %v17359_v62, 1  ;;  %v17368_v43 = vunpack.c.l.bf16 %v12746_v31  ;;  %17791 = vst [vmem:[#allocation93_spill] sm:$0xff] %v12783_v44 }
  0x7a   : > { %v893_v14 = vsel %vm782_vm1, %v891_v16, %v892_v48  ;;  %v1036_v25 = vrot.slane %v17362_v26, 1  ;;  %v17789_v40 = vunpack.c.h.bf16 %v12726_v58 }
  0x7b   : > { %17787 = vst [vmem:[#allocation91_spill] sm:$0xff] %v12748_v6  ;;  %10522 = vmatmul.mubr.msk.bf16.gmra.mxu1 %vm1265_vm3, %v12748_v6  ;;  %v1038_v6 = vrot.slane %v17788_v13, 1  ;;  %v895_v62 = vsel %vm782_vm1, %v892_v48, %v894_v46  ;;  %v898_v32 = vrot.slane %v17368_v43, 1  ;;  %v17794_v43 = vunpack.c.h.bf16 %v12736_v55 }
  0x7c   : > { %v896_v60 = vrot.slane %v17789_v40, 1  ;;  %v12785_v16 = vpack.c.bf16 %v895_v62, %v893_v14  ;;  %v1037_v26 = vsel %vm782_vm1, %v1035_v41, %v1036_v25  ;;  %v12800_v62 = vld [vmem:[%s11866_s27 + $0x244] sm:$0xff]  }
  0x7d   : > { %v1039_v15 = vsel %vm782_vm1, %v1036_v25, %v1038_v6  ;;  %v1040_v3 = vrot.slane %v17794_v43, 1  ;;  %17795 = vst [vmem:[#allocation96_spill] sm:$0xff] %v12800_v62  ;;  %v17375_v25 = vunpack.c.l.bf16 %v12783_v44  ;;  %v17799_v37 = vunpack.c.h.bf16 %v12800_v62 }
  0x7e   : > { %17792 = vst [vmem:[#allocation94_spill] sm:$0xff] %v12785_v16  ;;  %v897_v13 = vsel %vm782_vm1, %v894_v46, %v896_v60  ;;  %v12793_v40 = vpack.c.bf16 %v1039_v15, %v1037_v26  ;;  %v899_v48 = vsel %vm782_vm1, %v896_v60, %v898_v32  ;;  %10461 = vmatprep.mubr.msk.bf16.mxu0 %vm1265_vm3, %v12785_v16  ;;  %v17378_v15 = vunpack.c.h.bf16 %v12783_v44  ;;  %v12809_v26 = vld [vmem:[%s11866_s27 + $0x24c] sm:$0xff]  }
  0x7f   : > { %v12804_v14 = vpack.c.bf16 %v899_v48, %v897_v13  ;;  %17797 = vst [vmem:[#allocation98_spill] sm:$0xff] %v12809_v26  ;;  %v1041_v32 = vsel %vm782_vm1, %v1038_v6, %v1040_v3  ;;  %v1042_v60 = vrot.slane %v17370_v57, 1  ;;  %v17382_v46 = vunpack.c.l.bf16 %v12791_v59  ;;  %v12826_v6 = vld [vmem:[%s11866_s27 + $0x114] sm:$0x1] }
  0x80   : > { %17793 = vst [vmem:[#allocation95_spill] sm:$0xff] %v12793_v40  ;;  %10525 = vmatprep.mubr.msk.bf16.mxu1 %vm1265_vm3, %v12793_v40  ;;  %v900_v41 = vrot.slane %v17375_v25, 1  ;;  %v901_v43 = vrot.slane %v17378_v15, 1  ;;  %v17383_v13 = vunpack.c.l.bf16 %v12800_v62  ;;  %v17385_v25 = vunpack.c.h.bf16 %v12791_v59 }
  0x81   : > { %17796 = vst [vmem:[#allocation97_spill] sm:$0xff] %v12804_v14  ;;  %10462 = vmatmul.mubr.msk.bf16.gmra.mxu0 %vm1265_vm3, %v12804_v14  ;;  %v1043_v57 = vsel %vm782_vm1, %v1040_v3, %v1042_v60  ;;  %v903_v40 = vrot.slane %v17382_v46, 1  ;;  %v17384_v14 = vunpack.c.l.bf16 %v12809_v26  ;;  %v1045_v55 = vrot.slane %v17799_v37, 1 }
  0x82   : > { %v12833_v16 = vpack.c.bf16 %v1043_v57, %v1041_v32  ;;  %v902_v15 = vsel %vm782_vm1, %v900_v41, %v901_v43  ;;  %v1044_v48 = vrot.slane %v17383_v13, 1  ;;  %v905_v57 = vrot.slane %v17385_v25, 1  ;;  %v12847_v32 = vld [vmem:[%s11866_s27 + $0x254] sm:$0x1]  ;;  %v12856_v13 = vld [vmem:[%s11866_s27 + $0x118] sm:$0xff]  }
  0x83   : > { %v904_v3 = vsel %vm782_vm1, %v901_v43, %v903_v40  ;;  %v1047_v60 = vrot.slane %v17384_v14, 1  ;;  %17800 = vst [vmem:[#allocation100_spill] sm:$0xff] %v12847_v32  ;;  %v17396_v43 = vunpack.c.h.bf16 %v12809_v26  ;;  %17802 = vst [vmem:[#allocation102_spill] sm:$0xff] %v12856_v13  ;;  %v12859_v14 = vld [vmem:[%s11866_s27 + $0x120] sm:$0xff]   ;;  %v17804_v62 = vunpack.c.l.bf16 %v12826_v6 }
  0x84   : > { %17798 = vst [vmem:[#allocation99_spill] sm:$0xff] %v12833_v16  ;;  %10526 = vmatmul.mubr.msk.bf16.gmra.mxu1 %vm1265_vm3, %v12833_v16  ;;  %v12851_v41 = vpack.c.bf16 %v904_v3, %v902_v15  ;;  %v1046_v37 = vsel %vm782_vm1, %v1044_v48, %v1045_v55  ;;  %17803 = vst [vmem:[#allocation103_spill] sm:$0xff] %v12859_v14  ;;  %v906_v25 = vsel %vm782_vm1, %v903_v40, %v905_v57  ;;  %v12873_v16 = vld [vmem:[%s11866_s27 + $0x258] sm:$0xff]  }
  0x85   : > { %v1048_v46 = vsel %vm782_vm1, %v1045_v55, %v1047_v60  ;;  %v907_v44 = vrot.slane %v17804_v62, 1  ;;  %v17402_v48 = vunpack.c.l.bf16 %v12847_v32  ;;  %v1049_v3 = vrot.slane %v17396_v43, 1  ;;  %17806 = vst [vmem:[#allocation105_spill] sm:$0xff] %v12873_v16 }
  0x86   : > { %17801 = vst [vmem:[#allocation101_spill] sm:$0xff] %v12851_v41  ;;  %10465 = vmatprep.mubr.msk.bf16.mxu0 %vm1265_vm3, %v12851_v41  ;;  %v12867_v15 = vpack.c.bf16 %v1048_v46, %v1046_v37  ;;  %v17404_v40 = vunpack.c.l.bf16 %v12856_v13  ;;  %v17403_v29 = vunpack.c.h.bf16 %v12856_v13  ;;  %v17405_v62 = vunpack.c.l.bf16 %v12859_v14  ;;  %v12880_v41 = vld [vmem:[%s11866_s27 + $0x260] sm:$0xff]  }
  0x87   : > { %v908_v55 = vsel %vm782_vm1, %v905_v57, %v907_v44  ;;  %17807 = vst [vmem:[#allocation106_spill] sm:$0xff] %v12880_v41  ;;  %v1050_v37 = vsel %vm782_vm1, %v1047_v60, %v1049_v3  ;;  %v1051_v43 = vrot.slane %v17402_v48, 1  ;;  %v17411_v60 = vunpack.c.h.bf16 %v12873_v16 }
  0x88   : > { %17805 = vst [vmem:[#allocation104_spill] sm:$0xff] %v12867_v15  ;;  %10529 = vmatprep.mubr.msk.bf16.mxu1 %vm1265_vm3, %v12867_v15  ;;  %v12884_v46 = vpack.c.bf16 %v908_v55, %v906_v25  ;;  %v909_v44 = vrot.slane %v17404_v40, 1  ;;  %v910_v57 = vrot.slane %v17403_v29, 1  ;;  %v912_v26 = vrot.slane %v17405_v62, 1  ;;  %v12906_v29 = vld [vmem:[%s11866_s27 + $0x268] sm:$0x1] }
  0x89   : > { %v1052_v25 = vsel %vm782_vm1, %v1049_v3, %v1051_v43  ;;  %v17412_v55 = vunpack.c.l.bf16 %v12880_v41  ;;  %v17413_v48 = vunpack.c.h.bf16 %v12859_v14  ;;  %17809 = vst [vmem:[#allocation108_spill] sm:$0xff] %v12906_v29  ;;  %v17811_v15 = vunpack.c.l.bf16 %v12873_v16 }
  0x8a   : > { %17808 = vst [vmem:[#allocation107_spill] sm:$0xff] %v12884_v46  ;;  %10466 = vmatmul.mubr.msk.bf16.gmra.mxu0 %vm1265_vm3, %v12884_v46  ;;  %v12908_v40 = vpack.c.bf16 %v1052_v25, %v1050_v37  ;;  %v911_v62 = vsel %vm782_vm1, %v909_v44, %v910_v57  ;;  %v913_v27 = vsel %vm782_vm1, %v910_v57, %v912_v26  ;;  %v1054_v43 = vrot.slane %v17411_v60, 1 }
  0x8b   : > { %v1053_v46 = vrot.slane %v17811_v15, 1  ;;  %v12914_v32 = vpack.c.bf16 %v913_v27, %v911_v62  ;;  %v1056_v3 = vrot.slane %v17412_v55, 1  ;;  %v17421_v37 = vunpack.c.l.bf16 %v12897_v34  ;;  %v12928_v62 = vld [vmem:[%s11866_s27 + $0x12c] sm:$0xff]  }
  0x8c   : > { %17810 = vst [vmem:[#allocation109_spill] sm:$0xff] %v12908_v40  ;;  %10530 = vmatmul.mubr.msk.bf16.gmra.mxu1 %vm1265_vm3, %v12908_v40  ;;  %v914_v44 = vrot.slane %v17413_v48, 1  ;;  %v17424_v15 = vunpack.c.h.bf16 %v12880_v41  ;;  %17813 = vst [vmem:[#allocation111_spill] sm:$0xff] %v12928_v62  ;;  %v17815_v40 = vunpack.c.l.bf16 %v12906_v29  ;;  %v12966_v41 = vld [vmem:[%s11866_s27 + $0x13c] sm:$0x1] }
  0x8d   : > { %17812 = vst [vmem:[#allocation110_spill] sm:$0xff] %v12914_v32  ;;  %10469 = vmatprep.mubr.msk.bf16.mxu0 %vm1265_vm3, %v12914_v32  ;;  %v1055_v57 = vsel %vm782_vm1, %v1053_v46, %v1054_v43  ;;  %v1057_v25 = vsel %vm782_vm1, %v1054_v43, %v1056_v3  ;;  %v916_v60 = vrot.slane %v17421_v37, 1  ;;  %v12947_v32 = vld [vmem:[%s11866_s27 + $0x26c] sm:$0xff]   ;;  %v17818_v46 = vunpack.c.l.bf16 %v11869_v4 }
  0x8e   : > { %v12936_v55 = vpack.c.bf16 %v1057_v25, %v1055_v57  ;;  %v915_v48 = vsel %vm782_vm1, %v912_v26, %v914_v44  ;;  %v1058_v27 = vrot.slane %v17424_v15, 1  ;;  %v1060_v16 = vrot.slane %v17815_v40, 1  ;;  %17817 = vst [vmem:[#allocation114_spill] sm:$0xff] %v12947_v32 }
  0x8f   : > { %v2748_v43 = vrot.slane %v17818_v46, 2  ;;  %v17819_v37 = vunpack.c.h.bf16 %v11869_v4  ;;  %v917_v25 = vsel %vm782_vm1, %v914_v44, %v916_v60  ;;  %v17428_v26 = vunpack.c.l.bf16 %v12928_v62 }
  0x90   : > { %17814 = vst [vmem:[#allocation112_spill] sm:$0xff] %v12936_v55  ;;  %10533 = vmatprep.mubr.msk.bf16.mxu1 %vm1265_vm3, %v12936_v55  ;;  %v12960_v40 = vpack.c.bf16 %v917_v25, %v915_v48  ;;  %v1059_v15 = vsel %vm782_vm1, %v1056_v3, %v1058_v27  ;;  %v1061_v29 = vsel %vm782_vm1, %v1058_v27, %v1060_v16  ;;  %v17429_v46 = vunpack.c.h.bf16 %v12928_v62 }
  0x91   : > { %v2749_v57 = vrot.slane %v17819_v37, 2  ;;  %v12968_v4 = vpack.c.bf16 %v1061_v29, %v1059_v15  ;;  %v17432_v60 = vunpack.c.l.bf16 %v12944_v52  ;;  %v918_v37 = vrot.slane %v17428_v26, 1 }
  0x92   : > { %17820 = vst [vmem:[#allocation115_spill] sm:$0xff] %v12960_v40  ;;  %v17437_v44 = vunpack.c.l.bf16 %v12947_v32  ;;  %10470 = vmatmul.mubr.msk.bf16.gmra.mxu0 %vm1265_vm3, %v12960_v40  ;;  %v919_v16 = vrot.slane %v17429_v46, 1  ;;  %v17442_v48 = vunpack.c.h.bf16 %v12947_v32  ;;  %v17822_v29 = vunpack.c.l.bf16 %v12956_v56 }
  0x93   : > { %17821 = vst [vmem:[#allocation116_spill] sm:$0xff] %v12968_v4  ;;  %v921_v15 = vrot.slane %v17432_v60, 1  ;;  %v17823_v60 = vunpack.c.h.bf16 %v12944_v52 }
  0x94   : > { %v1062_v27 = vrot.slane %v17437_v44, 1  ;;  %10534 = vmatmul.mubr.msk.bf16.gmra.mxu1 %vm1265_vm3, %v12968_v4  ;;  %v920_v46 = vsel %vm782_vm1, %v918_v37, %v919_v16  ;;  %v1063_v3 = vrot.slane %v17442_v48, 1  ;;  %v1065_v55 = vrot.slane %v17822_v29, 1 }
  0x95   : > { %v923_v40 = vrot.slane %v17823_v60, 1  ;;  %v17824_v44 = vunpack.c.l.bf16 %v11888_v18  ;;  %v922_v26 = vsel %vm782_vm1, %v919_v16, %v921_v15  ;;  %v17825_v4 = vunpack.c.l.bf16 %v12966_v41 }
  0x96   : > { %v13004_v37 = vpack.c.bf16 %v922_v26, %v920_v46  ;;  %v1064_v48 = vsel %vm782_vm1, %v1062_v27, %v1063_v3  ;;  %v1066_v32 = vsel %vm782_vm1, %v1063_v3, %v1065_v55  ;;  %v17446_v18 = vunpack.c.l.bf16 %v12997_v9 }
  0x97   : > { %v2755_v25 = vrot.slane %v17824_v44, 2  ;;  %v925_v47 = vrot.slane %v17825_v4, 1  ;;  %v924_v29 = vsel %vm782_vm1, %v921_v15, %v923_v40  ;;  %v13009_v60 = vpack.c.bf16 %v1066_v32, %v1064_v48  ;;  %v11738_v48 = vld [vmem:[%s11866_s27] sm:$0xff]  }
  0x98   : > { %17826 = vst [vmem:[#allocation117_spill] sm:$0xff] %v13004_v37  ;;  %v17828_v44 = vunpack.c.h.bf16 %v12956_v56  ;;  %10473 = vmatprep.mubr.msk.bf16.mxu0 %vm1265_vm3, %v13004_v37  ;;  %v2750_v46 = vsel %vm2747_vm2, %v2748_v43, %v2749_v57 }
  0x99   : > { %17827 = vst [vmem:[#allocation118_spill] sm:$0xff] %v13009_v60  ;;  %v926_v17 = vsel %vm782_vm1, %v923_v40, %v925_v47  ;;  %10537 = vmatprep.mubr.msk.bf16.mxu1 %vm1265_vm3, %v13009_v60  ;;  %v1069_v47 = vrot.slane %v17446_v18, 1  ;;  %v2752_v40 = vsel %vm2747_vm2, %v2749_v57, %v11890_v19  ;;  %v17832_v19 = vunpack.c.h.bf16 %v11916_v35 }
  0x9a   : > { %v1067_v16 = vrot.slane %v17828_v44, 1  ;;  %v13017_v26 = vpack.c.bf16 %v926_v17, %v924_v29  ;;  %v3164_v4 = vpack.c.bf16 %v2752_v40, %v2750_v46  ;;  %v2756_v17 = vsel %vm2747_vm2, %v11892_v20, %v2755_v25 }
  0x9b   : > { %v3165_v3 = vpack.c.bf16 %v2756_v17, %v11908_v28  ;;  %v2758_v57 = vrot.slane %v17832_v19, 2  ;;  %v17833_v29 = vunpack.c.l.bf16 %v11919_v36 }
  0x9c   : > { %17829 = vst [vmem:[#allocation119_spill] sm:$0xff] %v13017_v26  ;;  %v1068_v32 = vsel %vm782_vm1, %v1065_v55, %v1067_v16  ;;  %10474 = vmatmul.mubr.msk.bf16.gmra.mxu0 %vm1265_vm3, %v13017_v26  ;;  %v1070_v43 = vsel %vm782_vm1, %v1067_v16, %v1069_v47  ;;  %v17830_v55 = vunpack.c.l.bf16 %v11916_v35  ;;  %v17835_v16 = vunpack.c.h.bf16 %v11919_v36  ;;  %v11739_v47 = vld [vmem:[%s17112_s1 + $0x8] sm:$0x3] }
  0x9d   : > { %v13036_v27 = vpack.c.bf16 %v1070_v43, %v1068_v32  ;;  %10673 = vmatprep.mubr.msk.bf16.mxu0 %vm1265_vm3, %v3164_v4  ;;  %v2760_v44 = vrot.slane %v17833_v29, 2  ;;  %v17836_v35 = vunpack.c.l.bf16 %v11949_v54  ;;  %v4813_v40 = vsel %vm1458_vm0, %v11739_v47, 0  ;;  %v11740_v36 = vld [vmem:[%s11866_s27 + $0x8] sm:$0xff]   ;;  %v13067_v54 = vld [vmem:[%s11866_s27 + $0x14] sm:$0xff]  }
  0x9e   : > { %v2757_v15 = vrot.slane %v17830_v55, 2  ;;  %v2762_v46 = vrot.slane %v17835_v16, 2  ;;  %v17837_v4 = vunpack.c.l.bf16 %v11975_v5  ;;  %v17838_v43 = vunpack.c.h.bf16 %v11975_v5  ;;  %17840 = vst [vmem:[#allocation122_spill] sm:$0xff] %v13067_v54  ;;  %v11742_v5 = vld [vmem:[%s17112_s1 + $0x6] sm:$0x3] }
  0x9f   : > { %17831 = vst [vmem:[#allocation120_spill] sm:$0xff] %v13036_v27  ;;  %10538 = vmatmul.mubr.msk.bf16.gmra.mxu1 %vm1265_vm3, %v13036_v27  ;;  %v2761_v28 = vsel %vm2747_vm2, %v2758_v57, %v2760_v44  ;;  %v2764_v32 = vrot.slane %v17836_v35, 2  ;;  %v17839_v55 = vunpack.c.l.bf16 %v11991_v24  ;;  %v4109_v29 = vsel %vm1458_vm0, %v11742_v5, 0  ;;  %v17943_v27 = vld [vmem:[#allocation33_spill] sm:$0xff] }
  0xa0   : > { %v2759_v20 = vsel %vm2747_vm2, %v2757_v15, %v2758_v57  ;;  %10543 = vmatprep.mubr.msk.bf16.mxu1 %vm1265_vm3, %v11738_v48  ;;  %v2766_v17 = vrot.slane %v17837_v4, 2  ;;  %v2767_v48 = vrot.slane %v17838_v43, 2  ;;  %v2763_v19 = vsel %vm2747_vm2, %v2760_v44, %v2762_v46 }
  0xa1   : > { %v13048_v25 = vpack.c.bf16 %v2761_v28, %v2759_v20  ;;  %v2769_v15 = vrot.slane %v17839_v55, 2  ;;  %v2765_v57 = vsel %vm2747_vm2, %v2762_v46, %v2764_v32  ;;  %v17843_v16 = vunpack.c.h.bf16 %v11991_v24  ;;  %v13097_v55 = vld [vmem:[%s11866_s27 + $0x1c] sm:$0xff]   ;;  %v13102_v24 = vld [vmem:[%s11866_s27 + $0x28] sm:$0xff]  }
  0xa2   : > { %v13080_v28 = vpack.c.bf16 %v2765_v57, %v2763_v19  ;;  %v17844_v35 = vunpack.c.l.bf16 %v12016_v50  ;;  %v17845_v47 = vunpack.c.l.bf16 %v12051_v39  ;;  %v17846_v4 = vunpack.c.h.bf16 %v12051_v39  ;;  %17848 = vst [vmem:[#allocation125_spill] sm:$0xff] %v13097_v55  ;;  %17849 = vst [vmem:[#allocation126_spill] sm:$0xff] %v13102_v24 }
  0xa3   : > { %17834 = vst [vmem:[#allocation121_spill] sm:$0xff] %v13048_v25  ;;  %v2770_v20 = vsel %vm2747_vm2, %v2767_v48, %v2769_v15  ;;  %v2771_v46 = vrot.slane %v17843_v16, 2  ;;  %v17847_v43 = vunpack.c.l.bf16 %v12065_v53  ;;  %v17854_v16 = vunpack.c.l.bf16 %v12126_v51 }
  0xa4   : > { %10674 = vmatmul.mubr.msk.bf16.vlgmr.msra.gmra.mxu0 %vm1265_vm3, %v3165_v3  ;;  %v2768_v3 = vsel %vm2747_vm2, %v2766_v17, %v2767_v48  ;;  %17841 = vst [vmem:[#allocation123_spill] sm:$0xff] %v13080_v28  ;;  %v2773_v32 = vrot.slane %v17844_v35, 2  ;;  %v2776_v17 = vrot.slane %v17846_v4, 2  ;;  %v17855_v35 = vunpack.c.h.bf16 %v12126_v51  ;;  %v13129_v4 = vld [vmem:[%s11866_s27 + $0x30] sm:$0xff]  }
  0xa5   : > { %10932 = vmatpush3.bf16.msra.mxu0 %v4813_v40  ;;  %10677 = vmatprep.mubr.msk.bf16.mxu0 %vm1265_vm3, %v13048_v25  ;;  %v13084_v44 = vpack.c.bf16 %v2770_v20, %v2768_v3  ;;  %v2775_v40 = vrot.slane %v17845_v47, 2  ;;  %v2778_v48 = vrot.slane %v17847_v43, 2  ;;  %v2772_v50 = vsel %vm2747_vm2, %v2769_v15, %v2771_v46  ;;  %17857 = vst [vmem:[#allocation129_spill] sm:$0xff] %v13129_v4 }
  0xa6   : > { %v2774_v39 = vsel %vm2747_vm2, %v2771_v46, %v2773_v32  ;;  %v17853_v15 = vunpack.c.l.bf16 %v12093_v61  ;;  %v2784_v46 = vrot.slane %v17854_v16, 2  ;;  %v2785_v32 = vrot.slane %v17855_v35, 2 }
  0xa7   : > { %10544 = vmatmul.mubr.msk.bf16.vlgmr.msra.gmra.mxu1 %vm1265_vm3, %v11740_v36  ;;  %17842 = vst [vmem:[#allocation124_spill] sm:$0xff] %v13084_v44  ;;  %v2777_v36 = vsel %vm2747_vm2, %v2775_v40, %v2776_v17  ;;  %v2779_v19 = vsel %vm2747_vm2, %v2776_v17, %v2778_v48  ;;  %v13112_v57 = vpack.c.bf16 %v2774_v39, %v2772_v50  ;;  %v17856_v47 = vunpack.c.l.bf16 %v12134_v45 }
  0xa8   : > { %10802 = vmatpush3.bf16.msra.mxu1 %v4109_v29  ;;  %10547 = vmatprep.mubr.msk.bf16.mxu1 %vm1265_vm3, %v13067_v54  ;;  %v13116_v5 = vpack.c.bf16 %v2779_v19, %v2777_v36  ;;  %v17852_v29 = vunpack.c.h.bf16 %v12065_v53  ;;  %v2782_v20 = vrot.slane %v17853_v15, 2  ;;  %v13134_v53 = vld [vmem:[%s11866_s27 + $0x3c] sm:$0xff]   ;;  %v2786_v17 = vsel %vm2747_vm2, %v2784_v46, %v2785_v32 }
  0xa9   : > { %17850 = vst [vmem:[#allocation127_spill] sm:$0xff] %v13112_v57  ;;  %v2787_v40 = vrot.slane %v17856_v47, 2  ;;  %17858 = vst [vmem:[#allocation130_spill] sm:$0xff] %v13134_v53  ;;  %v17860_v39 = vunpack.c.h.bf16 %v12134_v45  ;;  %v17861_v19 = vunpack.c.l.bf16 %v12164_v30  ;;  %v17865_v46 = vunpack.c.l.bf16 %v12217_v7  ;;  %v13166_v30 = vld [vmem:[%s11866_s27 + $0x50] sm:$0xff]  }
  0xaa   : > { %17851 = vst [vmem:[#allocation128_spill] sm:$0xff] %v13116_v5  ;;  %v2780_v3 = vrot.slane %v17852_v29, 2  ;;  %17867 = vst [vmem:[#allocation134_spill] sm:$0xff] %v13166_v30  ;;  %v17868_v47 = vunpack.c.h.bf16 %v12217_v7 }
  0xab   : > { %v2788_v43 = vsel %vm2747_vm2, %v2785_v32, %v2787_v40  ;;  %v2789_v36 = vrot.slane %v17860_v39, 2  ;;  %v2791_v29 = vrot.slane %v17861_v19, 2  ;;  %v2796_v35 = vrot.slane %v17865_v46, 2  ;;  %v13161_v32 = vld [vmem:[%s11866_s27 + $0x44] sm:$0xff]  }
  0xac   : > { %10678 = vmatmul.mubr.msk.bf16.gmra.mxu0 %vm1265_vm3, %v13080_v28  ;;  %v2781_v61 = vsel %vm2747_vm2, %v2778_v48, %v2780_v3  ;;  %v2783_v51 = vsel %vm2747_vm2, %v2780_v3, %v2782_v20  ;;  %v13152_v48 = vpack.c.bf16 %v2788_v43, %v2786_v17  ;;  %v17863_v3 = vunpack.c.l.bf16 %v12210_v8  ;;  %17866 = vst [vmem:[#allocation133_spill] sm:$0xff] %v13161_v32 }
  0xad   : > { %10681 = vmatprep.mubr.msk.bf16.mxu0 %vm1265_vm3, %v13084_v44  ;;  %v13144_v50 = vpack.c.bf16 %v2783_v51, %v2781_v61  ;;  %v17864_v20 = vunpack.c.h.bf16 %v12210_v8  ;;  %v2790_v45 = vsel %vm2747_vm2, %v2787_v40, %v2789_v36  ;;  %v2798_v61 = vrot.slane %v17868_v47, 2  ;;  %v13299_v44 = vld [vmem:[%s11866_s27 + $0x6c] sm:$0xff]  }
  0xae   : > { %17862 = vst [vmem:[#allocation132_spill] sm:$0xff] %v13152_v48  ;;  %v2793_v15 = vrot.slane %v17863_v3, 2  ;;  %v2792_v8 = vsel %vm2747_vm2, %v2789_v36, %v2791_v29  ;;  %v17869_v43 = vunpack.c.l.bf16 %v12244_v0  ;;  %v17870_v19 = vunpack.c.h.bf16 %v11878_v10  ;;  %17909 = vst [vmem:[#allocation145_spill] sm:$0xff] %v13299_v44 }
  0xaf   : > { %10548 = vmatmul.mubr.msk.bf16.gmra.mxu1 %vm1265_vm3, %v13097_v55  ;;  %17859 = vst [vmem:[#allocation131_spill] sm:$0xff] %v13144_v50  ;;  %v2794_v16 = vrot.slane %v17864_v20, 2  ;;  %v17871_v40 = vunpack.c.h.bf16 %v12726_v58  ;;  %v17872_v20 = vunpack.c.l.bf16 %v12746_v31  ;;  %v17873_v47 = vunpack.c.l.bf16 %v11897_v22 }
  0xb0   : > { %10551 = vmatprep.mubr.msk.bf16.mxu1 %vm1265_vm3, %v13102_v24  ;;  %v2800_v39 = vrot.slane %v17869_v43, 2  ;;  %v13180_v3 = vrot.slane %v17870_v19, 2  ;;  %v17874_v29 = vunpack.c.h.bf16 %v11943_v49  ;;  %v17875_v0 = vunpack.c.l.bf16 %v11966_v63  ;;  %v18010_v24 = vld [vmem:[#allocation77_spill] sm:$0xff] }
  0xb1   : > { %v2795_v51 = vsel %vm2747_vm2, %v2793_v15, %v2794_v16  ;;  %v2797_v17 = vsel %vm2747_vm2, %v2794_v16, %v2796_v35  ;;  %v2861_v7 = vrot.slane %v17871_v40, 2  ;;  %v2863_v46 = vrot.slane %v17872_v20, 2 }
  0xb2   : > { %v13188_v36 = vrot.slane %v17873_v47, 2  ;;  %v13192_v15 = vrot.slane %v17874_v29, 2  ;;  %v13196_v16 = vrot.slane %v17875_v0, 2  ;;  %v17876_v43 = vunpack.c.h.bf16 %v12791_v59 }
  0xb3   : > { %v17877_v40 = vunpack.c.l.bf16 %v12826_v6  ;;  %v13204_v22 = vpack.c.bf16 %v2792_v8, %v2790_v45  ;;  %v13206_v31 = vpack.c.bf16 %v2797_v17, %v2795_v51  ;;  %v2799_v20 = vsel %vm2747_vm2, %v2796_v35, %v2798_v61 }
  0xb4   : > { %10682 = vmatmul.mubr.msk.bf16.gmra.mxu0 %vm1265_vm3, %v13112_v57  ;;  %v2870_v19 = vrot.slane %v17876_v43, 2  ;;  %v2801_v63 = vsel %vm2747_vm2, %v2798_v61, %v2800_v39  ;;  %v17880_v47 = vunpack.c.l.bf16 %v12278_v2  ;;  %v17881_v29 = vunpack.c.h.bf16 %v12278_v2 }
  0xb5   : > { %10685 = vmatprep.mubr.msk.bf16.mxu0 %vm1265_vm3, %v13116_v5  ;;  %v2872_v18 = vrot.slane %v17877_v40, 2  ;;  %17878 = vst [vmem:[#allocation135_spill] sm:$0xff] %v13204_v22  ;;  %17879 = vst [vmem:[#allocation136_spill] sm:$0xff] %v13206_v31  ;;  %v17882_v43 = vunpack.c.l.bf16 %v12294_v11  ;;  %v17883_v8 = vunpack.c.h.bf16 %v12009_v42  ;;  %v17884_v35 = vunpack.c.h.bf16 %v12859_v14 }
  0xb6   : > { %v2802_v6 = vrot.slane %v17880_v47, 2  ;;  %v2803_v0 = vrot.slane %v17881_v29, 2  ;;  %v17885_v40 = vunpack.c.l.bf16 %v12726_v58  ;;  %v2864_v61 = vsel %vm2747_vm2, %v2861_v7, %v2863_v46 }
  0xb7   : > { %10552 = vmatmul.mubr.msk.bf16.gmra.mxu1 %vm1265_vm3, %v13129_v4  ;;  %v2805_v45 = vrot.slane %v17882_v43, 2  ;;  %v13220_v51 = vrot.slane %v17883_v8, 2  ;;  %v2879_v17 = vrot.slane %v17884_v35, 2  ;;  %v17886_v39 = vunpack.c.l.bf16 %v12897_v34  ;;  %v13236_v8 = vld [vmem:[%s11866_s27 + $0x58] sm:$0xff]   ;;  %v13241_v35 = vld [vmem:[%s11866_s27 + $0x64] sm:$0xff]  }
  0xb8   : > { %10555 = vmatprep.mubr.msk.bf16.mxu1 %vm1265_vm3, %v13134_v53  ;;  %v17887_v47 = vunpack.c.h.bf16 %v12944_v52  ;;  %v17888_v43 = vunpack.c.l.bf16 %v12966_v41  ;;  %17889 = vst [vmem:[#allocation137_spill] sm:$0xff] %v13236_v8  ;;  %17890 = vst [vmem:[#allocation138_spill] sm:$0xff] %v13241_v35  ;;  %v13243_v58 = vpack.c.bf16 %v2801_v63, %v2799_v20  ;;  %v17892_v34 = vunpack.c.l.bf16 %v12791_v59 }
  0xb9   : > { %v2881_v2 = vrot.slane %v17886_v39, 2  ;;  %v2804_v41 = vsel %vm2747_vm2, %v2802_v6, %v2803_v0  ;;  %v2806_v39 = vsel %vm2747_vm2, %v2803_v0, %v2805_v45  ;;  %v17894_v20 = vunpack.c.h.bf16 %v12294_v11 }
  0xba   : > { %v2888_v29 = vrot.slane %v17887_v47, 2  ;;  %17891 = vst [vmem:[#allocation139_spill] sm:$0xff] %v13243_v58  ;;  %v17897_v6 = vunpack.c.l.bf16 %v12354_v1  ;;  %v17900_v11 = vunpack.c.l.bf16 %v12859_v14 }
  0xbb   : > { %v2807_v63 = vrot.slane %v17894_v20, 2 }
  0xbc   : > { %10686 = vmatmul.mubr.msk.bf16.gmra.mxu0 %vm1265_vm3, %v13144_v50  ;;  %v2890_v50 = vrot.slane %v17888_v43, 2  ;;  %v2873_v43 = vsel %vm2747_vm2, %v2870_v19, %v2872_v18  ;;  %v2811_v5 = vrot.slane %v17897_v6, 2 }
  0xbd   : > { %10689 = vmatprep.mubr.msk.bf16.mxu0 %vm1265_vm3, %v13152_v48  ;;  %v13226_v48 = vrot.slane %v17885_v40, 2  ;;  %v13249_v40 = vrot.slane %v17892_v34, 2  ;;  %v17896_v34 = vunpack.c.l.bf16 %v12856_v13 }
  0xbf   : > { %10556 = vmatmul.mubr.msk.bf16.gmra.mxu1 %vm1265_vm3, %v13161_v32  ;;  %v2862_v46 = vsel %vm2747_vm2, %v13226_v48, %v2861_v7  ;;  %v17895_v7 = vunpack.c.l.bf16 %v12314_v33  ;;  %v2871_v59 = vsel %vm2747_vm2, %v13249_v40, %v2870_v19  ;;  %v13276_v33 = vpack.c.bf16 %v2806_v39, %v2804_v41 }
  0xc0   : > { %10559 = vmatprep.mubr.msk.bf16.mxu1 %vm1265_vm3, %v13166_v30  ;;  %v13255_v47 = vpack.c.bf16 %v2864_v61, %v2862_v46  ;;  %v13268_v0 = vpack.c.bf16 %v2873_v43, %v2871_v59  ;;  %v17899_v61 = vunpack.c.h.bf16 %v12856_v13  ;;  %v2877_v46 = vrot.slane %v17900_v11, 2 }
  0xc1   : > { %17901 = vst [vmem:[#allocation142_spill] sm:$0xff] %v13276_v33  ;;  %v17902_v19 = vunpack.c.h.bf16 %v12354_v1  ;;  %v17903_v43 = vunpack.c.l.bf16 %v12928_v62  ;;  %v17904_v41 = vunpack.c.h.bf16 %v12928_v62  ;;  %v17905_v1 = vunpack.c.l.bf16 %v12362_v21 }
  0xc2   : > { %17893 = vst [vmem:[#allocation140_spill] sm:$0xff] %v13255_v47  ;;  %17898 = vst [vmem:[#allocation141_spill] sm:$0xff] %v13268_v0  ;;  %v2875_v18 = vrot.slane %v17899_v61, 2  ;;  %v2880_v61 = vsel %vm2747_vm2, %v2877_v46, %v2879_v17 }
  0xc3   : > { %v2812_v20 = vrot.slane %v17902_v19, 2  ;;  %v2883_v59 = vrot.slane %v17903_v43, 2  ;;  %v2884_v39 = vrot.slane %v17904_v41, 2  ;;  %v2814_v11 = vrot.slane %v17905_v1, 2 }
  0xc4   : > { %10690 = vmatmul.mubr.msk.bf16.gmra.mxu0 %vm1265_vm3, %v13204_v22  ;;  %v2809_v22 = vrot.slane %v17895_v7, 2  ;;  %v2882_v7 = vsel %vm2747_vm2, %v2879_v17, %v2881_v2  ;;  %v2878_v6 = vsel %vm2747_vm2, %v2875_v18, %v2877_v46  ;;  %v17908_v43 = vunpack.c.l.bf16 %v12944_v52 }
  0xc5   : > { %10693 = vmatprep.mubr.msk.bf16.mxu0 %vm1265_vm3, %v13206_v31  ;;  %v2874_v31 = vrot.slane %v17896_v34, 2  ;;  %v13294_v2 = vpack.c.bf16 %v2882_v7, %v2880_v61  ;;  %v2891_v17 = vsel %vm2747_vm2, %v2888_v29, %v2890_v50  ;;  %v2808_v46 = vsel %vm2747_vm2, %v2805_v45, %v2807_v63 }
  0xc6   : > { %v2886_v57 = vrot.slane %v17908_v43, 2  ;;  %v2900_v45 = vsel %vm2747_vm2, %v13180_v3, %v13188_v36  ;;  %v17916_v43 = vunpack.c.l.bf16 %v12102_v38  ;;  %v2909_v38 = vsel %vm2747_vm2, %v13192_v15, %v13196_v16 }
  0xc7   : > { %10560 = vmatmul.mubr.msk.bf16.gmra.mxu1 %vm1265_vm3, %v13236_v8  ;;  %v2876_v34 = vsel %vm2747_vm2, %v2874_v31, %v2875_v18  ;;  %17907 = vst [vmem:[#allocation144_spill] sm:$0xff] %v13294_v2  ;;  %v13302_v31 = vld [vmem:[%s11866_s27 + $0x78] sm:$0xff]   ;;  %v2885_v18 = vsel %vm2747_vm2, %v2883_v59, %v2884_v39  ;;  %v2810_v59 = vsel %vm2747_vm2, %v2807_v63, %v2809_v22  ;;  %v17915_v22 = vunpack.c.h.bf16 %v12078_v12 }
  0xc8   : > { %10563 = vmatprep.mubr.msk.bf16.mxu1 %vm1265_vm3, %v13241_v35  ;;  %v13292_v19 = vpack.c.bf16 %v2878_v6, %v2876_v34  ;;  %17910 = vst [vmem:[#allocation146_spill] sm:$0xff] %v13302_v31  ;;  %v2887_v34 = vsel %vm2747_vm2, %v2884_v39, %v2886_v57  ;;  %v2889_v7 = vsel %vm2747_vm2, %v2886_v57, %v2888_v29  ;;  %v17911_v6 = vunpack.c.l.bf16 %v11878_v10 }
  0xc9   : > { %v13318_v41 = vpack.c.bf16 %v2887_v34, %v2885_v18  ;;  %v13320_v50 = vpack.c.bf16 %v2891_v17, %v2889_v7  ;;  %v17914_v39 = vunpack.c.l.bf16 %v12041_v23  ;;  %v2813_v10 = vsel %vm2747_vm2, %v2811_v5, %v2812_v20 }
  0xca   : > { %17906 = vst [vmem:[#allocation143_spill] sm:$0xff] %v13292_v19  ;;  %v13313_v61 = vrot.slane %v17911_v6, 2  ;;  %v2815_v29 = vsel %vm2747_vm2, %v2812_v20, %v2814_v11  ;;  %v2924_v63 = vrot.slane %v17915_v22, 2  ;;  %v2926_v18 = vrot.slane %v17916_v43, 2  ;;  %v17928_v43 = vld [vmem:[#allocation48_spill] sm:$0xff] }
  0xcb   : > { %17912 = vst [vmem:[#allocation147_spill] sm:$0xff] %v13318_v41  ;;  %17913 = vst [vmem:[#allocation148_spill] sm:$0xff] %v13320_v50  ;;  %v2917_v57 = vrot.slane %v17914_v39, 2  ;;  %v13340_v23 = vpack.c.bf16 %v2810_v59, %v2808_v46  ;;  %v17919_v5 = vunpack.c.h.bf16 %v12362_v21  ;;  %v17920_v20 = vunpack.c.l.bf16 %v11943_v49  ;;  %v17922_v46 = vld [vmem:[#allocation42_spill] sm:$0xff]  ;;  %v17924_v21 = vld [vmem:[#allocation45_spill] sm:$0xff] }
  0xcc   : > { %10694 = vmatmul.mubr.msk.bf16.gmra.mxu0 %vm1265_vm3, %v13243_v58  ;;  %v2898_v1 = vsel %vm2747_vm2, %v13313_v61, %v13180_v3  ;;  %v13353_v34 = vpack.c.bf16 %v2815_v29, %v2813_v10  ;;  %v17923_v7 = vunpack.c.l.bf16 %v17922_v46  ;;  %v17925_v59 = vunpack.c.l.bf16 %v17924_v21 }
  0xcd   : > { %10697 = vmatprep.mubr.msk.bf16.mxu0 %vm1265_vm3, %v13276_v33  ;;  %v13336_v17 = vpack.c.bf16 %v2900_v45, %v2898_v1  ;;  %17918 = vst [vmem:[#allocation150_spill] sm:$0xff] %v13340_v23  ;;  %v2816_v36 = vrot.slane %v17919_v5, 2  ;;  %v13346_v3 = vrot.slane %v17920_v20, 2  ;;  %v17926_v49 = vunpack.c.l.bf16 %v12009_v42  ;;  %v17930_v20 = vld [vmem:[#allocation19_spill] sm:$0xff]  ;;  %v17933_v42 = vld [vmem:[#allocation22_spill] sm:$0xff] }
  0xce   : > { %17921 = vst [vmem:[#allocation151_spill] sm:$0xff] %v13353_v34  ;;  %v2818_v6 = vrot.slane %v17923_v7, 2  ;;  %v2820_v45 = vrot.slane %v17925_v59, 2  ;;  %v17927_v1 = vunpack.c.h.bf16 %v17924_v21  ;;  %v17929_v16 = vunpack.c.l.bf16 %v17928_v43  ;;  %v13379_v21 = vld [vmem:[%s11866_s27 + $0x80] sm:$0xff]  }
  0xcf   : > { %17917 = vst [vmem:[#allocation149_spill] sm:$0xff] %v13336_v17  ;;  %10564 = vmatmul.mubr.msk.bf16.gmra.mxu1 %vm1265_vm3, %v13299_v44  ;;  %v13361_v39 = vrot.slane %v17926_v49, 2  ;;  %v2907_v10 = vsel %vm2747_vm2, %v13346_v3, %v13192_v15  ;;  %v2918_v29 = vsel %vm2747_vm2, %v13220_v51, %v2917_v57  ;;  %v17931_v46 = vunpack.c.h.bf16 %v17930_v20  ;;  %17935 = vst [vmem:[#allocation45_spill] sm:$0xff] %v13379_v21 }
  0xd0   : > { %10567 = vmatprep.mubr.msk.bf16.mxu1 %vm1265_vm3, %v13302_v31  ;;  %v2821_v22 = vrot.slane %v17927_v1, 2  ;;  %v2823_v5 = vrot.slane %v17929_v16, 2  ;;  %v13374_v59 = vpack.c.bf16 %v2909_v38, %v2907_v10  ;;  %v17934_v49 = vunpack.c.l.bf16 %v17933_v42  ;;  %v13384_v1 = vld [vmem:[%s11866_s27 + $0x8c] sm:$0xff]   ;;  %v17939_v42 = vld [vmem:[#allocation26_spill] sm:$0xff]  ;;  %v13451_v31 = vld [vmem:[%s11866_s27 + $0x94] sm:$0xff]  }
  0xd1   : > { %v2933_v7 = vrot.slane %v17931_v46, 2  ;;  %17936 = vst [vmem:[#allocation48_spill] sm:$0xff] %v13384_v1  ;;  %v2916_v15 = vsel %vm2747_vm2, %v13361_v39, %v13220_v51  ;;  %v2817_v57 = vsel %vm2747_vm2, %v2814_v11, %v2816_v36  ;;  %v2819_v38 = vsel %vm2747_vm2, %v2816_v36, %v2818_v6 }
  0xd2   : > { %17932 = vst [vmem:[#allocation42_spill] sm:$0xff] %v13374_v59  ;;  %v2935_v33 = vrot.slane %v17934_v49, 2  ;;  %v13393_v16 = vpack.c.bf16 %v2918_v29, %v2916_v15  ;;  %v17938_v10 = vunpack.c.l.bf16 %v12078_v12  ;;  %v17940_v49 = vunpack.c.h.bf16 %v17939_v42 }
  0xd3   : > { %v2822_v58 = vsel %vm2747_vm2, %v2820_v45, %v2821_v22  ;;  %v2824_v51 = vsel %vm2747_vm2, %v2821_v22, %v2823_v5  ;;  %v2927_v28 = vsel %vm2747_vm2, %v2924_v63, %v2926_v18  ;;  %v17944_v36 = vunpack.c.h.bf16 %v17943_v27 }
  0xd4   : > { %10698 = vmatmul.mubr.msk.bf16.gmra.mxu0 %vm1265_vm3, %v13340_v23  ;;  %17937 = vst [vmem:[#allocation19_spill] sm:$0xff] %v13393_v16  ;;  %v13397_v46 = vrot.slane %v17938_v10, 2  ;;  %v2942_v23 = vrot.slane %v17940_v49, 2  ;;  %v17945_v29 = vunpack.c.l.bf16 %v17930_v20  ;;  %v17946_v10 = vld [vmem:[#allocation36_spill] sm:$0xff]  ;;  %v13418_v18 = vpack.c.bf16 %v2819_v38, %v2817_v57  ;;  %v17954_v38 = vld [vmem:[#allocation55_spill] sm:$0xff] }
  0xd5   : > { %10701 = vmatprep.mubr.msk.bf16.mxu0 %vm1265_vm3, %v13353_v34  ;;  %v17941_v34 = vld [vmem:[#allocation29_spill] sm:$0xff]  ;;  %v2951_v6 = vrot.slane %v17944_v36, 2  ;;  %v17947_v49 = vunpack.c.l.bf16 %v17946_v10  ;;  %v17952_v20 = vld [vmem:[#allocation52_spill] sm:$0xff]  ;;  %v2936_v57 = vsel %vm2747_vm2, %v2933_v7, %v2935_v33  ;;  %17965 = vst [vmem:[#allocation36_spill] sm:$0xff] %v13451_v31 }
  0xd6   : > { %v17942_v25 = vunpack.c.l.bf16 %v17941_v34  ;;  %v2925_v12 = vsel %vm2747_vm2, %v13397_v46, %v2924_v63  ;;  %v13412_v15 = vrot.slane %v17945_v29, 2  ;;  %17948 = vst [vmem:[#allocation22_spill] sm:$0xff] %v13418_v18  ;;  %v13426_v63 = vpack.c.bf16 %v2824_v51, %v2822_v58  ;;  %v17960_v58 = vld [vmem:[#allocation40_spill] sm:$0xff] }
  0xd7   : > { %v2953_v45 = vrot.slane %v17947_v49, 2  ;;  %10568 = vmatmul.mubr.msk.bf16.gmra.mxu1 %vm1265_vm3, %v13379_v21  ;;  %v13422_v22 = vpack.c.bf16 %v2927_v28, %v2925_v12  ;;  %v17953_v36 = vunpack.c.l.bf16 %v17952_v20  ;;  %v17956_v28 = vunpack.c.h.bf16 %v17954_v38 }
  0xd8   : > { %v2944_v11 = vrot.slane %v17942_v25, 2  ;;  %v17949_v25 = vunpack.c.h.bf16 %v17928_v43  ;;  %10571 = vmatprep.mubr.msk.bf16.mxu1 %vm1265_vm3, %v13384_v1  ;;  %17951 = vst [vmem:[#allocation29_spill] sm:$0xff] %v13426_v63  ;;  %v2934_v10 = vsel %vm2747_vm2, %v13412_v15, %v2933_v7  ;;  %v17955_v43 = vunpack.c.l.bf16 %v17954_v38  ;;  %v17963_v7 = vld [vmem:[#allocation44_spill] sm:$0xff] }
  0xd9   : > { %17950 = vst [vmem:[#allocation26_spill] sm:$0xff] %v13422_v22  ;;  %v2827_v29 = vrot.slane %v17953_v36, 2  ;;  %v2830_v12 = vrot.slane %v17956_v28, 2  ;;  %v13439_v37 = vpack.c.bf16 %v2936_v57, %v2934_v10  ;;  %v17961_v51 = vunpack.c.h.bf16 %v17960_v58 }
  0xda   : > { %v2825_v34 = vrot.slane %v17949_v25, 2  ;;  %v2829_v49 = vrot.slane %v17955_v43, 2  ;;  %v17957_v25 = vld [vmem:[#allocation57_spill] sm:$0xff]  ;;  %v17962_v36 = vunpack.c.l.bf16 %v17939_v42  ;;  %v2945_v33 = vsel %vm2747_vm2, %v2942_v23, %v2944_v11 }
  0xdb   : > { %v17958_v60 = vunpack.c.l.bf16 %v17957_v25  ;;  %17959 = vst [vmem:[#allocation33_spill] sm:$0xff] %v13439_v37  ;;  %v2960_v20 = vrot.slane %v17961_v51, 2  ;;  %v17964_v21 = vunpack.c.l.bf16 %v17963_v7  ;;  %v17967_v57 = vunpack.c.l.bf16 %v17943_v27 }
  0xdc   : > { %v13445_v1 = vrot.slane %v17962_v36, 2  ;;  %10702 = vmatmul.mubr.msk.bf16.gmra.mxu0 %vm1265_vm3, %v13418_v18  ;;  %v2828_v11 = vsel %vm2747_vm2, %v2825_v34, %v2827_v29  ;;  %v2954_v51 = vsel %vm2747_vm2, %v2951_v6, %v2953_v45  ;;  %v2831_v27 = vsel %vm2747_vm2, %v2829_v49, %v2830_v12 }
  0xdd   : > { %v2832_v26 = vrot.slane %v17958_v60, 2  ;;  %v2962_v43 = vrot.slane %v17964_v21, 2  ;;  %v13456_v60 = vld [vmem:[%s11866_s27 + $0xa0] sm:$0xff]   ;;  %v13462_v38 = vrot.slane %v17967_v57, 2  ;;  %10705 = vmatprep.mubr.msk.bf16.mxu0 %vm1265_vm3, %v13426_v63  ;;  %v2826_v21 = vsel %vm2747_vm2, %v2823_v5, %v2825_v34 }
  0xde   : > { %17966 = vst [vmem:[#allocation52_spill] sm:$0xff] %v13456_v60  ;;  %v13458_v10 = vpop.f32.mrf.mxu0  ;;  %v2943_v28 = vsel %vm2747_vm2, %v13445_v1, %v2942_v23  ;;  %v17970_v63 = vld [vmem:[#allocation50_spill] sm:$0xff]  ;;  %v13489_v45 = vpack.c.bf16 %v2828_v11, %v2826_v21  ;;  %v17980_v21 = vunpack.c.h.bf16 %v17957_v25 }
  0xdf   : > { %v2833_v7 = vsel %vm2747_vm2, %v2830_v12, %v2832_v26  ;;  %v13477_v57 = vpack.c.bf16 %v2945_v33, %v2943_v28  ;;  %v17971_v18 = vunpack.c.h.bf16 %v17970_v63  ;;  %v2952_v5 = vsel %vm2747_vm2, %v13462_v38, %v2951_v6  ;;  %v17973_v34 = vld [vmem:[#allocation54_spill] sm:$0xff]  ;;  %10572 = vmatmul.mubr.msk.bf16.gmra.mxu1 %vm1265_vm3, %v13451_v31 }
  0xe0   : > { %v13466_v42 = vpop.f32.mrf.mxu1  ;;  %v13473_v36 = vpop.f32.mrf.mxu0  ;;  %v17974_v23 = vunpack.c.l.bf16 %v17973_v34  ;;  %17975 = vst [vmem:[#allocation44_spill] sm:$0xff] %v13489_v45  ;;  %v13493_v12 = vpack.c.bf16 %v2954_v51, %v2952_v5  ;;  %v17977_v33 = vunpack.c.l.bf16 %v17960_v58  ;;  %10575 = vmatprep.mubr.msk.bf16.mxu1 %vm1265_vm3, %v13456_v60  ;;  %v13503_v28 = vpack.c.bf16 %v2833_v7, %v2831_v27  ;;  %v17981_v34 = vld [vmem:[#allocation62_spill] sm:$0xff] }
  0xe1   : > { %17968 = vst [vmem:[#allocation55_spill] sm:$0xff] %v13466_v42  ;;  %17969 = vst [vmem:[#allocation57_spill] sm:$0xff] %v13477_v57  ;;  %v2969_v42 = vrot.slane %v17971_v18, 2  ;;  %v2834_v11 = vrot.slane %v17980_v21, 2  ;;  %v2963_v5 = vsel %vm2747_vm2, %v2960_v20, %v2962_v43  ;;  %v17990_v43 = vunpack.c.l.bf16 %v17970_v63 }
  0xe2   : > { %v13481_v44 = vpop.f32.mrf.mxu1  ;;  %v2971_v29 = vrot.slane %v17974_v23, 2  ;;  %v13491_v49 = vpop.f32.mrf.mxu0  ;;  %17976 = vst [vmem:[#allocation50_spill] sm:$0xff] %v13493_v12  ;;  %v13497_v18 = vrot.slane %v17977_v33, 2  ;;  %17979 = vst [vmem:[#allocation152_spill] sm:$0xff] %v13503_v28  ;;  %v17982_v23 = vunpack.c.l.bf16 %v17981_v34  ;;  %v17983_v33 = vld [vmem:[#allocation65_spill] sm:$0xff] }
  0xe3   : > { %17972 = vst [vmem:[#allocation40_spill] sm:$0xff] %v13481_v44  ;;  %v17984_v44 = vunpack.c.l.bf16 %v17983_v33  ;;  %v17985_v60 = vunpack.c.h.bf16 %v17983_v33  ;;  %v13526_v34 = vrot.slane %v17990_v43, 2 }
  0xe4   : > { %v13501_v6 = vpop.f32.mrf.mxu1  ;;  %v2836_v51 = vrot.slane %v17982_v23, 2  ;;  %v13510_v58 = vpop.f32.mrf.mxu0  ;;  %v2961_v25 = vsel %vm2747_vm2, %v13497_v18, %v2960_v20  ;;  %v13529_v23 = vld [vmem:[%s11866_s27 + $0xa8] sm:$0xff]   ;;  %10706 = vmatmul.mubr.msk.bf16.gmra.mxu0 %vm1265_vm3, %v13489_v45  ;;  %v2972_v45 = vsel %vm2747_vm2, %v2969_v42, %v2971_v29 }
  0xe5   : > { %17978 = vst [vmem:[#allocation54_spill] sm:$0xff] %v13501_v6  ;;  %v2838_v31 = vrot.slane %v17984_v44, 2  ;;  %v2839_v35 = vrot.slane %v17985_v60, 2  ;;  %v17986_v6 = vld [vmem:[#allocation68_spill] sm:$0xff]  ;;  %v13522_v21 = vpack.c.bf16 %v2963_v5, %v2961_v25  ;;  %10709 = vmatprep.mubr.msk.bf16.mxu0 %vm1265_vm3, %v13503_v28  ;;  %v2970_v63 = vsel %vm2747_vm2, %v13526_v34, %v2969_v42 }
  0xe6   : > { %v17987_v8 = vunpack.c.l.bf16 %v17986_v6  ;;  %v13520_v7 = vpop.f32.mrf.mxu1  ;;  %17991 = vst [vmem:[#allocation68_spill] sm:$0xff] %v13529_v23  ;;  %v13533_v44 = vpop.f32.mrf.mxu0  ;;  %v13536_v60 = vld [vmem:[%s11866_s27 + $0xb4] sm:$0xff]   ;;  %v2837_v20 = vsel %vm2747_vm2, %v2834_v11, %v2836_v51 }
  0xe7   : > { %17988 = vst [vmem:[#allocation62_spill] sm:$0xff] %v13520_v7  ;;  %17989 = vst [vmem:[#allocation65_spill] sm:$0xff] %v13522_v21  ;;  %v2840_v25 = vsel %vm2747_vm2, %v2838_v31, %v2839_v35  ;;  %v13551_v7 = vpack.c.bf16 %v2972_v45, %v2970_v63  ;;  %v17995_v28 = vld [vmem:[#allocation60_spill] sm:$0xff]  ;;  %10576 = vmatmul.mubr.msk.bf16.gmra.mxu1 %vm1265_vm3, %v13529_v23  ;;  %v18007_v23 = vld [vmem:[#allocation75_spill] sm:$0xff] }
  0xe8   : > { %v2841_v27 = vrot.slane %v17987_v8, 2  ;;  %17992 = vst [vmem:[#allocation153_spill] sm:$0xff] %v13536_v60  ;;  %v2835_v8 = vsel %vm2747_vm2, %v2832_v26, %v2834_v11  ;;  %v13544_v5 = vpop.f32.mrf.mxu1  ;;  %v13546_v33 = vpop.f32.mrf.mxu0  ;;  %v17996_v30 = vunpack.c.h.bf16 %v17995_v28  ;;  %v17999_v31 = vld [vmem:[#allocation64_spill] sm:$0xff]  ;;  %10579 = vmatprep.mubr.msk.bf16.mxu1 %vm1265_vm3, %v13536_v60  ;;  %v18008_v53 = vunpack.c.l.bf16 %v18007_v23 }
  0xe9   : > { %17993 = vst [vmem:[#allocation154_spill] sm:$0xff] %v13544_v5  ;;  %17994 = vst [vmem:[#allocation155_spill] sm:$0xff] %v13551_v7  ;;  %v13557_v11 = vpack.c.bf16 %v2837_v20, %v2835_v8  ;;  %v18003_v45 = vld [vmem:[#allocation72_spill] sm:$0xff]  ;;  %v18011_v60 = vunpack.c.l.bf16 %v18010_v24 }
  0xea   : > { %v2842_v43 = vsel %vm2747_vm2, %v2839_v35, %v2841_v27  ;;  %v2978_v26 = vrot.slane %v17996_v30, 2  ;;  %v13559_v51 = vpop.f32.mrf.mxu1  ;;  %v13561_v5 = vpop.f32.mrf.mxu0  ;;  %v18000_v35 = vunpack.c.l.bf16 %v17999_v31  ;;  %v18002_v30 = vunpack.c.h.bf16 %v17986_v6 }
  0xeb   : > { %17997 = vst [vmem:[#allocation60_spill] sm:$0xff] %v13557_v11  ;;  %17998 = vst [vmem:[#allocation156_spill] sm:$0xff] %v13559_v51  ;;  %v13567_v42 = vpack.c.bf16 %v2842_v43, %v2840_v25  ;;  %v18004_v63 = vunpack.c.l.bf16 %v18003_v45  ;;  %v2847_v4 = vrot.slane %v18008_v53, 2  ;;  %v18009_v31 = vunpack.c.h.bf16 %v18007_v23 }
  0xec   : > { %v2980_v32 = vrot.slane %v18000_v35, 2  ;;  %v2843_v29 = vrot.slane %v18002_v30, 2  ;;  %v13573_v20 = vpop.f32.mrf.mxu1  ;;  %v13575_v51 = vpop.f32.mrf.mxu0  ;;  %v2850_v25 = vrot.slane %v18011_v60, 2  ;;  %v18012_v43 = vunpack.c.l.bf16 %v17995_v28  ;;  %v13588_v30 = vld [vmem:[%s11866_s27 + $0xbc] sm:$0xff]   ;;  %10710 = vmatmul.mubr.msk.bf16.gmra.mxu0 %vm1265_vm3, %v13557_v11 }
  0xed   : > { %18001 = vst [vmem:[#allocation64_spill] sm:$0xff] %v13567_v42  ;;  %v2845_v8 = vrot.slane %v18004_v63, 2  ;;  %18005 = vst [vmem:[#allocation72_spill] sm:$0xff] %v13573_v20  ;;  %v2848_v35 = vrot.slane %v18009_v31, 2  ;;  %v13595_v63 = vld [vmem:[%s11866_s27 + $0xc8] sm:$0xff]   ;;  %10713 = vmatprep.mubr.msk.bf16.mxu0 %vm1265_vm3, %v13567_v42  ;;  %v18020_v42 = vld [vmem:[#allocation70_spill] sm:$0xff] }
  0xee   : > { %18006 = vst [vmem:[#allocation157_spill] sm:$0xff] %v13575_v51  ;;  %v13585_v6 = vrot.slane %v18012_v43, 2  ;;  %18013 = vst [vmem:[#allocation75_spill] sm:$0xff] %v13588_v30  ;;  %v13592_v45 = vpop.f32.mrf.mxu1  ;;  %v13597_v53 = vpop.f32.mrf.mxu0  ;;  %v2844_v23 = vsel %vm2747_vm2, %v2841_v27, %v2843_v29  ;;  %v2981_v31 = vsel %vm2747_vm2, %v2978_v26, %v2980_v32  ;;  %v18021_v54 = vunpack.c.h.bf16 %v18020_v42 }
  0xef   : > { %18014 = vst [vmem:[#allocation77_spill] sm:$0xff] %v13592_v45  ;;  %18015 = vst [vmem:[#allocation158_spill] sm:$0xff] %v13595_v63  ;;  %v2846_v28 = vsel %vm2747_vm2, %v2843_v29, %v2845_v8  ;;  %v2849_v11 = vsel %vm2747_vm2, %v2847_v4, %v2848_v35  ;;  %v2851_v45 = vsel %vm2747_vm2, %v2848_v35, %v2850_v25  ;;  %10580 = vmatmul.mubr.msk.bf16.gmra.mxu1 %vm1265_vm3, %v13588_v30 }
  0xf0   : > { %18016 = vst [vmem:[#allocation159_spill] sm:$0xff] %v13597_v53  ;;  %v2979_v60 = vsel %vm2747_vm2, %v13585_v6, %v2978_v26  ;;  %v13606_v43 = vpop.f32.mrf.mxu0  ;;  %v13612_v55 = vpop.f32.mrf.mxu1  ;;  %v2987_v27 = vrot.slane %v18021_v54, 2  ;;  %v13618_v29 = vpack.c.bf16 %v2846_v28, %v2844_v23  ;;  %v18024_v26 = vld [vmem:[#allocation74_spill] sm:$0xff]  ;;  %10583 = vmatprep.mubr.msk.bf16.mxu1 %vm1265_vm3, %v13595_v63  ;;  %v18028_v54 = vunpack.c.h.bf16 %v18010_v24  ;;  %v18031_v28 = vld [vmem:[#allocation85_spill] sm:$0xff] }
  0xf1   : > { %18017 = vst [vmem:[#allocation160_spill] sm:$0xff] %v13606_v43  ;;  %v13610_v20 = vpack.c.bf16 %v2981_v31, %v2979_v60  ;;  %18019 = vst [vmem:[#allocation162_spill] sm:$0xff] %v13612_v55  ;;  %v18025_v4 = vunpack.c.l.bf16 %v18024_v26  ;;  %v13628_v60 = vpack.c.bf16 %v2851_v45, %v2849_v11  ;;  %v18029_v55 = vld [vmem:[#allocation82_spill] sm:$0xff]  ;;  %v18033_v26 = vunpack.c.h.bf16 %v18031_v28  ;;  %v13647_v45 = vld [vmem:[%s11866_s27 + $0xd0] sm:$0xff]  }
  0xf2   : > { %18022 = vst [vmem:[#allocation70_spill] sm:$0xff] %v13618_v29  ;;  %v13620_v32 = vpop.f32.mrf.mxu0  ;;  %v13626_v35 = vpop.f32.mrf.mxu1  ;;  %v2852_v31 = vrot.slane %v18028_v54, 2  ;;  %v18030_v30 = vunpack.c.l.bf16 %v18029_v55  ;;  %v18034_v63 = vunpack.c.l.bf16 %v18020_v42  ;;  %18036 = vst [vmem:[#allocation85_spill] sm:$0xff] %v13647_v45  ;;  %v13652_v55 = vld [vmem:[%s11866_s27 + $0xdc] sm:$0xff]  }
  0xf3   : > { %18018 = vst [vmem:[#allocation161_spill] sm:$0xff] %v13610_v20  ;;  %18023 = vst [vmem:[#allocation163_spill] sm:$0xff] %v13620_v32  ;;  %v2989_v8 = vrot.slane %v18025_v4, 2  ;;  %v18032_v32 = vunpack.c.l.bf16 %v18031_v28  ;;  %v2857_v4 = vrot.slane %v18033_v26, 2 }
  0xf4   : > { %18026 = vst [vmem:[#allocation74_spill] sm:$0xff] %v13626_v35  ;;  %18027 = vst [vmem:[#allocation164_spill] sm:$0xff] %v13628_v60  ;;  %v2854_v43 = vrot.slane %v18030_v30, 2  ;;  %v13634_v23 = vpop.f32.mrf.mxu0  ;;  %v13642_v51 = vrot.slane %v18034_v63, 2  ;;  %v13644_v11 = vpop.f32.mrf.mxu1  ;;  %10714 = vmatmul.mubr.msk.bf16.gmra.mxu0 %vm1265_vm3, %v13618_v29  ;;  %v2853_v30 = vsel %vm2747_vm2, %v2850_v25, %v2852_v31 }
  0xf5   : > { %v2856_v53 = vrot.slane %v18032_v32, 2  ;;  %18035 = vst [vmem:[#allocation82_spill] sm:$0xff] %v13644_v11  ;;  %18037 = vst [vmem:[#allocation165_spill] sm:$0xff] %v13652_v55  ;;  %10717 = vmatprep.mubr.msk.bf16.mxu0 %vm1265_vm3, %v13628_v60  ;;  %v2990_v32 = vsel %vm2747_vm2, %v2987_v27, %v2989_v8  ;;  %v2860_v26 = vsel %vm2747_vm2, %v2857_v4, %v13226_v48 }
  0xf6   : > { %v13654_v24 = vpop.f32.mrf.mxu1  ;;  %v2855_v42 = vsel %vm2747_vm2, %v2852_v31, %v2854_v43  ;;  %v2988_v63 = vsel %vm2747_vm2, %v13642_v51, %v2987_v27  ;;  %v18042_v27 = vld [vmem:[#allocation80_spill] sm:$0xff] }
  0xf7   : > { %18038 = vst [vmem:[#allocation166_spill] sm:$0xff] %v13654_v24  ;;  %v13663_v54 = vpop.f32.mrf.mxu0  ;;  %v2858_v28 = vsel %vm2747_vm2, %v2856_v53, %v2857_v4  ;;  %v13668_v29 = vpack.c.bf16 %v2990_v32, %v2988_v63  ;;  %10584 = vmatmul.mubr.msk.bf16.gmra.mxu1 %vm1265_vm3, %v13647_v45  ;;  %v13674_v25 = vpack.c.bf16 %v2855_v42, %v2853_v30  ;;  %v18043_v8 = vunpack.c.h.bf16 %v18042_v27  ;;  %v18044_v53 = vld [vmem:[#allocation84_spill] sm:$0xff]  ;;  %v18048_v30 = vld [vmem:[#allocation93_spill] sm:$0xff] }
  0xf8   : > { %v13670_v60 = vpop.f32.mrf.mxu1  ;;  %v18045_v24 = vunpack.c.l.bf16 %v18044_v53  ;;  %10587 = vmatprep.mubr.msk.bf16.mxu1 %vm1265_vm3, %v13652_v55  ;;  %v13686_v4 = vpack.c.bf16 %v2860_v26, %v2858_v28  ;;  %v18049_v42 = vunpack.c.l.bf16 %v18048_v30  ;;  %v13701_v53 = vld [vmem:[%s11866_s27 + $0xe4] sm:$0xff]   ;;  %v18062_v55 = vld [vmem:[#allocation92_spill] sm:$0xff] }
  0xf9   : > { %18039 = vst [vmem:[#allocation167_spill] sm:$0xff] %v13668_v29  ;;  %18040 = vst [vmem:[#allocation168_spill] sm:$0xff] %v13670_v60  ;;  %v13676_v43 = vpop.f32.mrf.mxu0  ;;  %v2996_v31 = vrot.slane %v18043_v8, 2  ;;  %v18050_v60 = vunpack.c.h.bf16 %v18048_v30  ;;  %v18051_v8 = vunpack.c.l.bf16 %v18042_v27 }
  0xfa   : > { %18041 = vst [vmem:[#allocation169_spill] sm:$0xff] %v13674_v25  ;;  %v2998_v11 = vrot.slane %v18045_v24, 2  ;;  %v13684_v48 = vpop.f32.mrf.mxu1  ;;  %18047 = vst [vmem:[#allocation84_spill] sm:$0xff] %v13686_v4  ;;  %v2865_v32 = vrot.slane %v18049_v42, 2 }
  0xfb   : > { %18046 = vst [vmem:[#allocation80_spill] sm:$0xff] %v13684_v48  ;;  %v13688_v63 = vpop.f32.mrf.mxu0  ;;  %v2866_v35 = vrot.slane %v18050_v60, 2  ;;  %v13696_v45 = vrot.slane %v18051_v8, 2  ;;  %18053 = vst [vmem:[#allocation170_spill] sm:$0xff] %v13701_v53  ;;  %v13710_v48 = vld [vmem:[%s11866_s27 + $0xf0] sm:$0xff]  }
  0xfc   : > { %v13698_v24 = vpop.f32.mrf.mxu1  ;;  %10718 = vmatmul.mubr.msk.bf16.gmra.mxu0 %vm1265_vm3, %v13674_v25  ;;  %18056 = vst [vmem:[#allocation173_spill] sm:$0xff] %v13710_v48  ;;  %v2999_v27 = vsel %vm2747_vm2, %v2996_v31, %v2998_v11 }
  0xfd   : > { %18052 = vst [vmem:[#allocation93_spill] sm:$0xff] %v13698_v24  ;;  %v13705_v28 = vpop.f32.mrf.mxu0  ;;  %10721 = vmatprep.mubr.msk.bf16.mxu0 %vm1265_vm3, %v13686_v4  ;;  %v2997_v60 = vsel %vm2747_vm2, %v13696_v45, %v2996_v31  ;;  %v2867_v42 = vsel %vm2747_vm2, %v2865_v32, %v2866_v35  ;;  %v2869_v8 = vsel %vm2747_vm2, %v2866_v35, %v13249_v40  ;;  %v18060_v24 = vld [vmem:[#allocation89_spill] sm:$0xff] }
  0xfe   : > { %18054 = vst [vmem:[#allocation171_spill] sm:$0xff] %v13705_v28  ;;  %v13707_v26 = vpop.f32.mrf.mxu1  ;;  %v13722_v25 = vpack.c.bf16 %v2999_v27, %v2997_v60  ;;  %v18061_v11 = vunpack.c.h.bf16 %v18060_v24  ;;  %v13738_v35 = vpack.c.bf16 %v2869_v8, %v2867_v42  ;;  %v18067_v60 = vunpack.c.l.bf16 %v18060_v24 }
  0xff   : > { %18055 = vst [vmem:[#allocation172_spill] sm:$0xff] %v13707_v26  ;;  %v13717_v30 = vpop.f32.mrf.mxu0  ;;  %10588 = vmatmul.mubr.msk.bf16.gmra.mxu1 %vm1265_vm3, %v13701_v53  ;;  %v13749_v53 = vld [vmem:[%s11866_s27 + $0xf8] sm:$0xff]  }
 0x100   : > { %18057 = vst [vmem:[#allocation174_spill] sm:$0xff] %v13717_v30  ;;  %18058 = vst [vmem:[#allocation175_spill] sm:$0xff] %v13722_v25  ;;  %v13724_v26 = vpop.f32.mrf.mxu1  ;;  %v3005_v31 = vrot.slane %v18061_v11, 2  ;;  %v18063_v30 = vunpack.c.l.bf16 %v18062_v55  ;;  %10591 = vmatprep.mubr.msk.bf16.mxu1 %vm1265_vm3, %v13710_v48  ;;  %v13744_v27 = vrot.slane %v18067_v60, 2  ;;  %v13758_v11 = vld [vmem:[%s11866_s27 + $0x104] sm:$0xff]  }
 0x101   : > { %18059 = vst [vmem:[#allocation176_spill] sm:$0xff] %v13724_v26  ;;  %v13728_v4 = vpop.f32.mrf.mxu0  ;;  %18065 = vst [vmem:[#allocation92_spill] sm:$0xff] %v13738_v35 }
 0x102   : > { %v3007_v28 = vrot.slane %v18063_v30, 2  ;;  %v13736_v40 = vpop.f32.mrf.mxu1  ;;  %18069 = vst [vmem:[#allocation179_spill] sm:$0xff] %v13749_v53  ;;  %18072 = vst [vmem:[#allocation182_spill] sm:$0xff] %v13758_v11  ;;  %v3006_v24 = vsel %vm2747_vm2, %v13744_v27, %v3005_v31 }
 0x103   : > { %18064 = vst [vmem:[#allocation89_spill] sm:$0xff] %v13736_v40  ;;  %v13740_v32 = vpop.f32.mrf.mxu0 }
 0x104   : > { %18066 = vst [vmem:[#allocation177_spill] sm:$0xff] %v13740_v32  ;;  %v13746_v26 = vpop.f32.mrf.mxu1  ;;  %10722 = vmatmul.mubr.msk.bf16.gmra.mxu0 %vm1265_vm3, %v13255_v47  ;;  %v3008_v42 = vsel %vm2747_vm2, %v3005_v31, %v3007_v28 }
 0x105   : > { %18068 = vst [vmem:[#allocation178_spill] sm:$0xff] %v13746_v26  ;;  %v13753_v55 = vpop.f32.mrf.mxu0  ;;  %10725 = vmatprep.mubr.msk.bf16.mxu0 %vm1265_vm3, %v13738_v35  ;;  %v13767_v60 = vpack.c.bf16 %v3008_v42, %v3006_v24  ;;  %v18077_v26 = vld [vmem:[#allocation98_spill] sm:$0xff]  ;;  %v18079_v35 = vld [vmem:[#allocation100_spill] sm:$0xff] }
 0x106   : > { %18070 = vst [vmem:[#allocation180_spill] sm:$0xff] %v13753_v55  ;;  %v13755_v30 = vpop.f32.mrf.mxu1  ;;  %v18078_v40 = vunpack.c.h.bf16 %v18077_v26  ;;  %v18080_v55 = vunpack.c.l.bf16 %v18079_v35  ;;  %v18083_v24 = vunpack.c.l.bf16 %v18077_v26 }
 0x107   : > { %18071 = vst [vmem:[#allocation181_spill] sm:$0xff] %v13755_v30  ;;  %v13765_v8 = vpop.f32.mrf.mxu0  ;;  %18074 = vst [vmem:[#allocation184_spill] sm:$0xff] %v13767_v60  ;;  %10592 = vmatmul.mubr.msk.bf16.gmra.mxu1 %vm1265_vm3, %v13749_v53  ;;  %v13792_v53 = vld [vmem:[%s11866_s27 + $0x10c] sm:$0xff]  }
 0x108   : > { %18073 = vst [vmem:[#allocation183_spill] sm:$0xff] %v13765_v8  ;;  %v13769_v47 = vpop.f32.mrf.mxu1  ;;  %v3014_v48 = vrot.slane %v18078_v40, 2  ;;  %v3016_v32 = vrot.slane %v18080_v55, 2  ;;  %10595 = vmatprep.mubr.msk.bf16.mxu1 %vm1265_vm3, %v13758_v11  ;;  %v13787_v42 = vrot.slane %v18083_v24, 2  ;;  %18085 = vst [vmem:[#allocation188_spill] sm:$0xff] %v13792_v53 }
 0x109   : > { %18075 = vst [vmem:[#allocation185_spill] sm:$0xff] %v13769_v47  ;;  %v13773_v30 = vpop.f32.mrf.mxu0 }
 0x10a   : > { %18076 = vst [vmem:[#allocation186_spill] sm:$0xff] %v13773_v30  ;;  %v13781_v28 = vpop.f32.mrf.mxu1  ;;  %v3015_v55 = vsel %vm2747_vm2, %v13787_v42, %v3014_v48  ;;  %v3017_v26 = vsel %vm2747_vm2, %v3014_v48, %v3016_v32 }
 0x10b   : > { %18081 = vst [vmem:[#allocation98_spill] sm:$0xff] %v13781_v28  ;;  %v13783_v31 = vpop.f32.mrf.mxu0 }
 0x10c   : > { %18082 = vst [vmem:[#allocation100_spill] sm:$0xff] %v13783_v31  ;;  %v13789_v47 = vpop.f32.mrf.mxu1  ;;  %10726 = vmatmul.mubr.msk.bf16.gmra.mxu0 %vm1265_vm3, %v13268_v0 }
 0x10d   : > { %18084 = vst [vmem:[#allocation187_spill] sm:$0xff] %v13789_v47  ;;  %v13796_v40 = vpop.f32.mrf.mxu0  ;;  %10729 = vmatprep.mubr.msk.bf16.mxu0 %vm1265_vm3, %v13292_v19  ;;  %v13807_v47 = vpack.c.bf16 %v3017_v26, %v3015_v55  ;;  %v18094_v19 = vld [vmem:[#allocation108_spill] sm:$0xff]  ;;  %v18097_v55 = vld [vmem:[#allocation2_spill] sm:$0xff] }
 0x10e   : > { %18086 = vst [vmem:[#allocation189_spill] sm:$0xff] %v13796_v40  ;;  %v13798_v35 = vpop.f32.mrf.mxu1  ;;  %v18095_v31 = vunpack.c.l.bf16 %v18094_v19  ;;  %v18098_v26 = vunpack.c.l.bf16 %v18097_v55 }
 0x10f   : > { %18087 = vst [vmem:[#allocation190_spill] sm:$0xff] %v13798_v35  ;;  %v13805_v24 = vpop.f32.mrf.mxu0  ;;  %18089 = vst [vmem:[#allocation192_spill] sm:$0xff] %v13807_v47  ;;  %10596 = vmatmul.mubr.msk.bf16.gmra.mxu1 %vm1265_vm3, %v13792_v53  ;;  %v18092_v35 = vld [vmem:[#allocation106_spill] sm:$0xff] }
 0x110   : > { %18088 = vst [vmem:[#allocation191_spill] sm:$0xff] %v13805_v24  ;;  %v13811_v0 = vpop.f32.mrf.mxu1  ;;  %v18093_v11 = vunpack.c.h.bf16 %v18092_v35  ;;  %v3025_v30 = vrot.slane %v18095_v31, 2  ;;  %10599 = vmatprep.mubr.msk.bf16.mxu1 %vm1265_vm3, %v12856_v13  ;;  %v2892_v53 = vrot.slane %v18098_v26, 2 }
 0x111   : > { %18090 = vst [vmem:[#allocation193_spill] sm:$0xff] %v13811_v0  ;;  %v13813_v28 = vpop.f32.mrf.mxu0  ;;  %v18099_v0 = vunpack.c.h.bf16 %v18097_v55 }
 0x112   : > { %18091 = vst [vmem:[#allocation194_spill] sm:$0xff] %v13813_v28  ;;  %v3023_v40 = vrot.slane %v18093_v11, 2  ;;  %v13821_v48 = vpop.f32.mrf.mxu1  ;;  %v18100_v28 = vunpack.c.l.bf16 %v18092_v35 }
 0x113   : > { %18096 = vst [vmem:[#allocation106_spill] sm:$0xff] %v13821_v48  ;;  %v13823_v32 = vpop.f32.mrf.mxu0  ;;  %v2893_v24 = vrot.slane %v18099_v0, 2 }
 0x114   : > { %v13831_v8 = vrot.slane %v18100_v28, 2  ;;  %10730 = vmatmul.mubr.msk.bf16.gmra.mxu0 %vm1265_vm3, %v13294_v2  ;;  %v13835_v19 = vpop.f32.mrf.mxu1  ;;  %v3026_v55 = vsel %vm2747_vm2, %v3023_v40, %v3025_v30 }
 0x115   : > { %18101 = vst [vmem:[#allocation108_spill] sm:$0xff] %v13835_v19  ;;  %v13837_v11 = vpop.f32.mrf.mxu0  ;;  %10733 = vmatprep.mubr.msk.bf16.mxu0 %vm1265_vm3, %v13318_v41  ;;  %v2894_v28 = vsel %vm2747_vm2, %v2892_v53, %v2893_v24  ;;  %v2896_v35 = vsel %vm2747_vm2, %v2893_v24, %v13313_v61  ;;  %v18105_v19 = vunpack.c.h.bf16 %v12956_v56 }
 0x116   : > { %v3024_v31 = vsel %vm2747_vm2, %v13831_v8, %v3023_v40  ;;  %v13844_v0 = vpop.f32.mrf.mxu1  ;;  %v18106_v40 = vunpack.c.l.bf16 %v12997_v9  ;;  %v13865_v53 = vpack.c.bf16 %v2896_v35, %v2894_v28  ;;  %v13886_v35 = vld [vmem:[%s11866_s27 + $0x140] sm:$0xff]  }
 0x117   : > { %18102 = vst [vmem:[#allocation2_spill] sm:$0xff] %v13844_v0  ;;  %v13849_v26 = vpack.c.bf16 %v3026_v55, %v3024_v31  ;;  %v13851_v2 = vpop.f32.mrf.mxu0  ;;  %10600 = vmatmul.mubr.msk.bf16.gmra.mxu1 %vm1265_vm3, %v12859_v14  ;;  %v3032_v30 = vrot.slane %v18105_v19, 2  ;;  %v18109_v31 = vld [vmem:[#allocation4_spill] sm:$0xff]  ;;  %v18112_v19 = vunpack.c.l.bf16 %v12956_v56  ;;  %18114 = vst [vmem:[#allocation199_spill] sm:$0xff] %v13886_v35 }
 0x118   : > { %v13855_v41 = vpop.f32.mrf.mxu1  ;;  %v3034_v0 = vrot.slane %v18106_v40, 2  ;;  %10603 = vmatprep.mubr.msk.bf16.mxu1 %vm1265_vm3, %v12928_v62  ;;  %18107 = vst [vmem:[#allocation197_spill] sm:$0xff] %v13865_v53  ;;  %v18110_v55 = vunpack.c.l.bf16 %v18109_v31 }
 0x119   : > { %18103 = vst [vmem:[#allocation195_spill] sm:$0xff] %v13849_v26  ;;  %18104 = vst [vmem:[#allocation196_spill] sm:$0xff] %v13855_v41  ;;  %v13863_v61 = vpop.f32.mrf.mxu0  ;;  %v18111_v41 = vunpack.c.h.bf16 %v18109_v31  ;;  %v13875_v13 = vrot.slane %v18112_v19, 2 }
 0x11a   : > { %v13867_v24 = vpop.f32.mrf.mxu1  ;;  %v2901_v48 = vrot.slane %v18110_v55, 2  ;;  %v3035_v56 = vsel %vm2747_vm2, %v3032_v30, %v3034_v0 }
 0x11b   : > { %18108 = vst [vmem:[#allocation198_spill] sm:$0xff] %v13867_v24  ;;  %v2902_v14 = vrot.slane %v18111_v41, 2  ;;  %v13877_v9 = vpop.f32.mrf.mxu0  ;;  %v3033_v41 = vsel %vm2747_vm2, %v13875_v13, %v3032_v30 }
 0x11c   : > { %10734 = vmatmul.mubr.msk.bf16.gmra.mxu0 %vm1265_vm3, %v13320_v50  ;;  %v13881_v40 = vpop.f32.mrf.mxu1  ;;  %v13898_v50 = vpack.c.bf16 %v3035_v56, %v3033_v41 }
 0x11d   : > { %18113 = vst [vmem:[#allocation4_spill] sm:$0xff] %v13881_v40  ;;  %v13883_v28 = vpop.f32.mrf.mxu0  ;;  %10737 = vmatprep.mubr.msk.bf16.mxu0 %vm1265_vm3, %v13865_v53  ;;  %v2903_v55 = vsel %vm2747_vm2, %v2901_v48, %v2902_v14  ;;  %v2905_v19 = vsel %vm2747_vm2, %v2902_v14, %v13346_v3  ;;  %v18119_v48 = vld [vmem:[#allocation7_spill] sm:$0xff] }
 0x11e   : > { %v13893_v31 = vpop.f32.mrf.mxu1  ;;  %18116 = vst [vmem:[#allocation201_spill] sm:$0xff] %v13898_v50  ;;  %v13910_v30 = vpack.c.bf16 %v2905_v19, %v2903_v55  ;;  %v18121_v3 = vunpack.c.h.bf16 %v18119_v48  ;;  %v13930_v55 = vld [vmem:[%s11866_s27 + $0x154] sm:$0xff]  }
 0x11f   : > { %18115 = vst [vmem:[#allocation200_spill] sm:$0xff] %v13893_v31  ;;  %v13900_v40 = vpop.f32.mrf.mxu0  ;;  %10604 = vmatmul.mubr.msk.bf16.gmra.mxu1 %vm1265_vm3, %v12944_v52  ;;  %v18120_v31 = vunpack.c.l.bf16 %v18119_v48  ;;  %v13921_v52 = vld [vmem:[%s11866_s27 + $0x148] sm:$0xff]   ;;  %18125 = vst [vmem:[#allocation206_spill] sm:$0xff] %v13930_v55 }
 0x120   : > { %10607 = vmatprep.mubr.msk.bf16.mxu1 %vm1265_vm3, %v13886_v35  ;;  %18118 = vst [vmem:[#allocation203_spill] sm:$0xff] %v13910_v30  ;;  %v2911_v41 = vrot.slane %v18121_v3, 2  ;;  %18123 = vst [vmem:[#allocation204_spill] sm:$0xff] %v13921_v52 }
 0x121   : > { %v13906_v53 = vpop.f32.mrf.mxu1  ;;  %v13908_v0 = vpop.f32.mrf.mxu0  ;;  %v2910_v14 = vrot.slane %v18120_v31, 2 }
 0x122   : > { %18117 = vst [vmem:[#allocation202_spill] sm:$0xff] %v13906_v53  ;;  %v2914_v19 = vsel %vm2747_vm2, %v2911_v41, %v13361_v39 }
 0x123   : > { %v13916_v56 = vpop.f32.mrf.mxu1  ;;  %v13918_v24 = vpop.f32.mrf.mxu0  ;;  %v2912_v31 = vsel %vm2747_vm2, %v2910_v14, %v2911_v41  ;;  %v13952_v14 = vld [vmem:[%s17112_s1 + $0xa] sm:$0x3]  ;;  %v18131_v41 = vld [vmem:[#allocation12_spill] sm:$0xff] }
 0x124   : > { %18122 = vst [vmem:[#allocation7_spill] sm:$0xff] %v13916_v56  ;;  %10738 = vmatmul.mubr.msk.bf16.gmra.mxu0 %vm1265_vm3, %v13336_v17  ;;  %v18133_v56 = vunpack.c.h.bf16 %v18131_v41  ;;  %11589 = vmatprep.subr.msk.bf16.mxu1 %vm1458_vm0, %v13952_v14 }
 0x125   : > { %v13925_v53 = vpop.f32.mrf.mxu1  ;;  %v13927_v35 = vpop.f32.mrf.mxu0  ;;  %10741 = vmatprep.mubr.msk.bf16.mxu0 %vm1265_vm3, %v13910_v30  ;;  %v13947_v30 = vpack.c.bf16 %v2914_v19, %v2912_v31  ;;  %v13967_v31 = vld [vmem:[%s17112_s1 + $0xc] sm:$0x3]  ;;  %v13970_v19 = vld [vmem:[%s11866_s27 + $0x15c] sm:$0xff]  }
 0x126   : > { %18124 = vst [vmem:[#allocation205_spill] sm:$0xff] %v13925_v53  ;;  %18135 = vst [vmem:[#allocation212_spill] sm:$0xff] %v13970_v19  ;;  %11590 = vmatprep.subr.msk.bf16.mxu0 %vm1458_vm0, %v13967_v31 }
 0x127   : > { %v13937_v48 = vpop.f32.mrf.mxu1  ;;  %10608 = vmatmul.mubr.msk.bf16.gmra.mxu1 %vm1265_vm3, %v13921_v52  ;;  %v13941_v3 = vpop.f32.mrf.mxu0  ;;  %18129 = vst [vmem:[#allocation210_spill] sm:$0xff] %v13947_v30  ;;  %v2920_v52 = vrot.slane %v18133_v56, 2 }
 0x128   : > { %18126 = vst [vmem:[#allocation207_spill] sm:$0xff] %v13937_v48  ;;  %18127 = vst [vmem:[#allocation208_spill] sm:$0xff] %v13941_v3  ;;  %10611 = vmatprep.mubr.msk.bf16.mxu1 %vm1265_vm3, %v13930_v55  ;;  %v18132_v48 = vunpack.c.l.bf16 %v18131_v41 }
 0x129   : > { %v13954_v39 = vpop.f32.mrf.mxu0 }
 0x12a   : > { %v13945_v17 = vpop.f32.mrf.mxu1  ;;  %18130 = vst [vmem:[#allocation211_spill] sm:$0xff] %v13954_v39  ;;  %v2919_v53 = vrot.slane %v18132_v48, 2  ;;  %v13981_v48 = vld [vmem:[%s11866_s27 + $0x168] sm:$0xff]  }
 0x12b   : > { %18128 = vst [vmem:[#allocation209_spill] sm:$0xff] %v13945_v17  ;;  %v13974_v17 = vpop.f32.mrf.mxu0  ;;  %18138 = vst [vmem:[#allocation215_spill] sm:$0xff] %v13981_v48 }
 0x12c   : > { %v13962_v55 = vpop.f32.mrf.mxu1  ;;  %10742 = vmatmul.mubr.msk.bf16.gmra.mxu0 %vm1265_vm3, %v13374_v59  ;;  %18136 = vst [vmem:[#allocation213_spill] sm:$0xff] %v13974_v17  ;;  %v2923_v59 = vsel %vm2747_vm2, %v2920_v52, %v13397_v46 }
 0x12d   : > { %18134 = vst [vmem:[#allocation12_spill] sm:$0xff] %v13962_v55  ;;  %10745 = vmatprep.mubr.msk.bf16.mxu0 %vm1265_vm3, %v13947_v30  ;;  %v13985_v41 = vpop.f32.mrf.mxu0  ;;  %v2921_v55 = vsel %vm2747_vm2, %v2919_v53, %v2920_v52  ;;  %v18143_v53 = vld [vmem:[#allocation18_spill] sm:$0xff] }
 0x12e   : > { %v13978_v56 = vpop.f32.mrf.mxu1  ;;  %18139 = vst [vmem:[#allocation216_spill] sm:$0xff] %v13985_v41  ;;  %v18144_v39 = vunpack.c.l.bf16 %v18143_v53  ;;  %v18145_v52 = vunpack.c.h.bf16 %v18143_v53 }
 0x12f   : > { %18137 = vst [vmem:[#allocation214_spill] sm:$0xff] %v13978_v56  ;;  %10612 = vmatmul.mubr.msk.bf16.gmra.mxu1 %vm1265_vm3, %v13970_v19  ;;  %v13998_v56 = vpack.c.bf16 %v2923_v59, %v2921_v55  ;;  %v14018_v59 = vld [vmem:[%s11866_s27 + $0x17c] sm:$0xff]  }
 0x130   : > { %v13990_v62 = vpop.f32.mrf.mxu1  ;;  %v13994_v17 = vpop.f32.mrf.mxu0  ;;  %10615 = vmatprep.mubr.msk.bf16.mxu1 %vm1265_vm3, %v13981_v48  ;;  %v2928_v3 = vrot.slane %v18144_v39, 2  ;;  %v2929_v46 = vrot.slane %v18145_v52, 2  ;;  %18149 = vst [vmem:[#allocation222_spill] sm:$0xff] %v14018_v59 }
 0x131   : > { %18140 = vst [vmem:[#allocation217_spill] sm:$0xff] %v13990_v62  ;;  %18141 = vst [vmem:[#allocation218_spill] sm:$0xff] %v13998_v56  ;;  %v14009_v62 = vld [vmem:[%s11866_s27 + $0x170] sm:$0xff]  }
 0x132   : > { %v14000_v30 = vpop.f32.mrf.mxu1  ;;  %v14002_v41 = vpop.f32.mrf.mxu0  ;;  %18146 = vst [vmem:[#allocation18_spill] sm:$0xff] %v14009_v62  ;;  %v2930_v53 = vsel %vm2747_vm2, %v2928_v3, %v2929_v46  ;;  %v2932_v52 = vsel %vm2747_vm2, %v2929_v46, %v13412_v15 }
 0x133   : > { %18142 = vst [vmem:[#allocation219_spill] sm:$0xff] %v14000_v30  ;;  %v18155_v30 = vld [vmem:[#allocation24_spill] sm:$0xff] }
 0x134   : > { %10746 = vmatmul.mubr.msk.bf16.gmra.mxu0 %vm1265_vm3, %v13393_v16  ;;  %v14013_v19 = vpop.f32.mrf.mxu1  ;;  %v14015_v48 = vpop.f32.mrf.mxu0 }
 0x135   : > { %18147 = vst [vmem:[#allocation220_spill] sm:$0xff] %v14013_v19  ;;  %18148 = vst [vmem:[#allocation221_spill] sm:$0xff] %v14015_v48  ;;  %10749 = vmatprep.mubr.msk.bf16.mxu0 %vm1265_vm3, %v13998_v56  ;;  %v14037_v56 = vpack.c.bf16 %v2932_v52, %v2930_v53  ;;  %v18157_v48 = vunpack.c.h.bf16 %v18155_v30  ;;  %v14057_v52 = vld [vmem:[%s11866_s27 + $0x190] sm:$0xff]  }
 0x136   : > { %v14022_v55 = vpop.f32.mrf.mxu1  ;;  %v14024_v39 = vpop.f32.mrf.mxu0  ;;  %18161 = vst [vmem:[#allocation230_spill] sm:$0xff] %v14057_v52 }
 0x137   : > { %18150 = vst [vmem:[#allocation223_spill] sm:$0xff] %v14022_v55  ;;  %18151 = vst [vmem:[#allocation224_spill] sm:$0xff] %v14024_v39  ;;  %10616 = vmatmul.mubr.msk.bf16.gmra.mxu1 %vm1265_vm3, %v14009_v62  ;;  %v18156_v39 = vunpack.c.l.bf16 %v18155_v30  ;;  %v2938_v15 = vrot.slane %v18157_v48, 2  ;;  %v14048_v62 = vld [vmem:[%s11866_s27 + $0x184] sm:$0xff]  }
 0x138   : > { %v14031_v16 = vpop.f32.mrf.mxu1  ;;  %10619 = vmatprep.mubr.msk.bf16.mxu1 %vm1265_vm3, %v14018_v59  ;;  %v14035_v19 = vpop.f32.mrf.mxu0  ;;  %18153 = vst [vmem:[#allocation226_spill] sm:$0xff] %v14037_v56  ;;  %18158 = vst [vmem:[#allocation24_spill] sm:$0xff] %v14048_v62 }
 0x139   : > { %18152 = vst [vmem:[#allocation225_spill] sm:$0xff] %v14031_v16  ;;  %v2937_v3 = vrot.slane %v18156_v39, 2  ;;  %v2941_v48 = vsel %vm2747_vm2, %v2938_v15, %v13445_v1 }
 0x13a   : > { %v14045_v46 = vpop.f32.mrf.mxu0 }
 0x13b   : > { %v14039_v55 = vpop.f32.mrf.mxu1  ;;  %v2939_v30 = vsel %vm2747_vm2, %v2937_v3, %v2938_v15 }
 0x13c   : > { %18154 = vst [vmem:[#allocation227_spill] sm:$0xff] %v14039_v55  ;;  %10750 = vmatmul.mubr.msk.bf16.gmra.mxu0 %vm1265_vm3, %v13422_v22  ;;  %v14054_v53 = vpop.f32.mrf.mxu0 }
 0x13d   : > { %v14052_v16 = vpop.f32.mrf.mxu1  ;;  %18160 = vst [vmem:[#allocation229_spill] sm:$0xff] %v14054_v53  ;;  %10753 = vmatprep.mubr.msk.bf16.mxu0 %vm1265_vm3, %v14037_v56  ;;  %v14076_v56 = vpack.c.bf16 %v2941_v48, %v2939_v30  ;;  %v14094_v30 = vld [vmem:[%s11866_s27 + $0x1a4] sm:$0xff]  }
 0x13e   : > { %18159 = vst [vmem:[#allocation228_spill] sm:$0xff] %v14052_v16  ;;  %v14066_v55 = vpop.f32.mrf.mxu0  ;;  %18172 = vst [vmem:[#allocation237_spill] sm:$0xff] %v14094_v30 }
 0x13f   : > { %v14061_v39 = vpop.f32.mrf.mxu1  ;;  %18163 = vst [vmem:[#allocation232_spill] sm:$0xff] %v14066_v55  ;;  %10620 = vmatmul.mubr.msk.bf16.gmra.mxu1 %vm1265_vm3, %v14048_v62  ;;  %18165 = vst [vmem:[#allocation234_spill] sm:$0xff] %v14076_v56  ;;  %v14085_v55 = vld [vmem:[%s11866_s27 + $0x198] sm:$0xff]  }
 0x140   : > { %18162 = vst [vmem:[#allocation231_spill] sm:$0xff] %v14061_v39  ;;  %10623 = vmatprep.mubr.msk.bf16.mxu1 %vm1265_vm3, %v14057_v52  ;;  %v18166_v39 = vld [vmem:[#allocation32_spill] sm:$0xff] }
 0x141   : > { %v14070_v22 = vpop.f32.mrf.mxu1  ;;  %v14074_v16 = vpop.f32.mrf.mxu0  ;;  %v18167_v59 = vunpack.c.l.bf16 %v18166_v39  ;;  %v18168_v53 = vunpack.c.h.bf16 %v18166_v39  ;;  %18169 = vst [vmem:[#allocation32_spill] sm:$0xff] %v14085_v55 }
 0x142   : > { %18164 = vst [vmem:[#allocation233_spill] sm:$0xff] %v14070_v22 }
 0x143   : > { %v2946_v3 = vrot.slane %v18167_v59, 2  ;;  %v2947_v1 = vrot.slane %v18168_v53, 2  ;;  %v14082_v15 = vpop.f32.mrf.mxu0 }
 0x144   : > { %10754 = vmatmul.mubr.msk.bf16.gmra.mxu0 %vm1265_vm3, %v13439_v37  ;;  %v14089_v22 = vpop.f32.mrf.mxu1 }
 0x145   : > { %18170 = vst [vmem:[#allocation235_spill] sm:$0xff] %v14089_v22  ;;  %v14091_v52 = vpop.f32.mrf.mxu0  ;;  %10757 = vmatprep.mubr.msk.bf16.mxu0 %vm1265_vm3, %v14076_v56  ;;  %v2948_v59 = vsel %vm2747_vm2, %v2946_v3, %v2947_v1  ;;  %v2950_v53 = vsel %vm2747_vm2, %v2947_v1, %v13462_v38  ;;  %v18177_v56 = vld [vmem:[#allocation38_spill] sm:$0xff] }
 0x146   : > { %18171 = vst [vmem:[#allocation236_spill] sm:$0xff] %v14091_v52  ;;  %v14101_v39 = vpop.f32.mrf.mxu1  ;;  %v14111_v22 = vpack.c.bf16 %v2950_v53, %v2948_v59  ;;  %v18178_v62 = vunpack.c.l.bf16 %v18177_v56  ;;  %v18179_v52 = vunpack.c.h.bf16 %v18177_v56 }
 0x147   : > { %18173 = vst [vmem:[#allocation238_spill] sm:$0xff] %v14101_v39  ;;  %v14103_v48 = vpop.f32.mrf.mxu0  ;;  %10624 = vmatmul.mubr.msk.bf16.gmra.mxu1 %vm1265_vm3, %v14085_v55 }
 0x148   : > { %18174 = vst [vmem:[#allocation239_spill] sm:$0xff] %v14103_v48  ;;  %v14107_v37 = vpop.f32.mrf.mxu1  ;;  %10627 = vmatprep.mubr.msk.bf16.mxu1 %vm1265_vm3, %v14094_v30  ;;  %18176 = vst [vmem:[#allocation241_spill] sm:$0xff] %v14111_v22  ;;  %v2955_v3 = vrot.slane %v18178_v62, 2  ;;  %v2956_v38 = vrot.slane %v18179_v52, 2  ;;  %v14122_v48 = vld [vmem:[%s11866_s27 + $0x1ac] sm:$0xff]   ;;  %v14129_v30 = vld [vmem:[%s11866_s27 + $0x1b8] sm:$0xff]  }
 0x149   : > { %18175 = vst [vmem:[#allocation240_spill] sm:$0xff] %v14107_v37  ;;  %18181 = vst [vmem:[#allocation242_spill] sm:$0xff] %v14122_v48 }
 0x14a   : > { %v14117_v1 = vpop.f32.mrf.mxu1  ;;  %v14119_v39 = vpop.f32.mrf.mxu0  ;;  %18182 = vst [vmem:[#allocation243_spill] sm:$0xff] %v14129_v30  ;;  %v2957_v56 = vsel %vm2747_vm2, %v2955_v3, %v2956_v38  ;;  %v2959_v52 = vsel %vm2747_vm2, %v2956_v38, %v13497_v18  ;;  %v18189_v3 = vld [vmem:[#allocation49_spill] sm:$0xff] }
 0x14b   : > { %18180 = vst [vmem:[#allocation38_spill] sm:$0xff] %v14117_v1  ;;  %v18190_v1 = vunpack.c.l.bf16 %v18189_v3  ;;  %v18191_v18 = vunpack.c.h.bf16 %v18189_v3 }
 0x14c   : > { %10758 = vmatmul.mubr.msk.bf16.gmra.mxu0 %vm1265_vm3, %v13477_v57  ;;  %v14126_v37 = vpop.f32.mrf.mxu0  ;;  %v14133_v62 = vpop.f32.mrf.mxu1 }
 0x14d   : > { %10761 = vmatprep.mubr.msk.bf16.mxu0 %vm1265_vm3, %v14111_v22  ;;  %18183 = vst [vmem:[#allocation244_spill] sm:$0xff] %v14133_v62  ;;  %v14148_v22 = vpack.c.bf16 %v2959_v52, %v2957_v56  ;;  %v2964_v55 = vrot.slane %v18190_v1, 2  ;;  %v2965_v38 = vrot.slane %v18191_v18, 2 }
 0x14e   : > { %v14138_v59 = vpop.f32.mrf.mxu0  ;;  %v14142_v53 = vpop.f32.mrf.mxu1 }
 0x14f   : > { %18184 = vst [vmem:[#allocation245_spill] sm:$0xff] %v14138_v59  ;;  %10628 = vmatmul.mubr.msk.bf16.gmra.mxu1 %vm1265_vm3, %v14122_v48  ;;  %18185 = vst [vmem:[#allocation246_spill] sm:$0xff] %v14142_v53  ;;  %v14161_v53 = vld [vmem:[%s11866_s27 + $0x1c0] sm:$0xff]   ;;  %v2966_v52 = vsel %vm2747_vm2, %v2964_v55, %v2965_v38  ;;  %v2968_v3 = vsel %vm2747_vm2, %v2965_v38, %v13526_v34 }
 0x150   : > { %v14144_v57 = vpop.f32.mrf.mxu0  ;;  %10631 = vmatprep.mubr.msk.bf16.mxu1 %vm1265_vm3, %v14129_v30  ;;  %18187 = vst [vmem:[#allocation248_spill] sm:$0xff] %v14148_v22  ;;  %v14150_v62 = vpop.f32.mrf.mxu1  ;;  %18194 = vst [vmem:[#allocation251_spill] sm:$0xff] %v14161_v53  ;;  %v14166_v30 = vld [vmem:[%s11866_s27 + $0x1cc] sm:$0xff]   ;;  %v18203_v55 = vld [vmem:[#allocation58_spill] sm:$0xff] }
 0x151   : > { %18186 = vst [vmem:[#allocation247_spill] sm:$0xff] %v14144_v57  ;;  %18188 = vst [vmem:[#allocation249_spill] sm:$0xff] %v14150_v62  ;;  %v18204_v62 = vunpack.c.l.bf16 %v18203_v55  ;;  %v18205_v34 = vunpack.c.h.bf16 %v18203_v55  ;;  %v14264_v57 = vld [vmem:[%s11866_s27 + $0x1fc] sm:$0xff]  }
 0x152   : > { %v14156_v59 = vpop.f32.mrf.mxu1  ;;  %v14158_v48 = vpop.f32.mrf.mxu0  ;;  %18195 = vst [vmem:[#allocation252_spill] sm:$0xff] %v14166_v30 }
 0x153   : > { %18192 = vst [vmem:[#allocation49_spill] sm:$0xff] %v14156_v59  ;;  %18193 = vst [vmem:[#allocation250_spill] sm:$0xff] %v14158_v48  ;;  %v2974_v38 = vrot.slane %v18205_v34, 2 }
 0x154   : > { %10762 = vmatmul.mubr.msk.bf16.gmra.mxu0 %vm1265_vm3, %v13493_v12  ;;  %v14170_v56 = vpop.f32.mrf.mxu1  ;;  %v14172_v1 = vpop.f32.mrf.mxu0 }
 0x155   : > { %10765 = vmatprep.mubr.msk.bf16.mxu0 %vm1265_vm3, %v14148_v22  ;;  %18196 = vst [vmem:[#allocation253_spill] sm:$0xff] %v14170_v56  ;;  %18197 = vst [vmem:[#allocation254_spill] sm:$0xff] %v14172_v1  ;;  %v14185_v22 = vpack.c.bf16 %v2968_v3, %v2966_v52  ;;  %v2973_v1 = vrot.slane %v18204_v62, 2  ;;  %v14205_v52 = vld [vmem:[%s11866_s27 + $0x1e0] sm:$0xff]   ;;  %v2977_v55 = vsel %vm2747_vm2, %v2974_v38, %v13585_v6 }
 0x156   : > { %v14179_v18 = vpop.f32.mrf.mxu1  ;;  %v14181_v12 = vpop.f32.mrf.mxu0  ;;  %18209 = vst [vmem:[#allocation262_spill] sm:$0xff] %v14205_v52 }
 0x157   : > { %10632 = vmatmul.mubr.msk.bf16.gmra.mxu1 %vm1265_vm3, %v14161_v53  ;;  %18198 = vst [vmem:[#allocation255_spill] sm:$0xff] %v14179_v18  ;;  %18199 = vst [vmem:[#allocation256_spill] sm:$0xff] %v14181_v12  ;;  %v14200_v12 = vld [vmem:[%s11866_s27 + $0x1d4] sm:$0xff]   ;;  %v2975_v62 = vsel %vm2747_vm2, %v2973_v1, %v2974_v38 }
 0x158   : > { %10635 = vmatprep.mubr.msk.bf16.mxu1 %vm1265_vm3, %v14166_v30  ;;  %18200 = vst [vmem:[#allocation257_spill] sm:$0xff] %v14185_v22  ;;  %v14187_v56 = vpop.f32.mrf.mxu1  ;;  %v14189_v59 = vpop.f32.mrf.mxu0  ;;  %18208 = vst [vmem:[#allocation261_spill] sm:$0xff] %v14200_v12  ;;  %v18216_v1 = vld [vmem:[#allocation69_spill] sm:$0xff] }
 0x159   : > { %18201 = vst [vmem:[#allocation258_spill] sm:$0xff] %v14187_v56  ;;  %18202 = vst [vmem:[#allocation259_spill] sm:$0xff] %v14189_v59  ;;  %v18217_v30 = vunpack.c.l.bf16 %v18216_v1  ;;  %v18218_v6 = vunpack.c.h.bf16 %v18216_v1 }
 0x15a   : > { %v14195_v53 = vpop.f32.mrf.mxu1 }
 0x15b   : > { %18206 = vst [vmem:[#allocation58_spill] sm:$0xff] %v14195_v53  ;;  %v14222_v53 = vpack.c.bf16 %v2977_v55, %v2975_v62  ;;  %v2983_v38 = vrot.slane %v18218_v6, 2  ;;  %v14240_v62 = vld [vmem:[%s11866_s27 + $0x1f4] sm:$0xff]  }
 0x15c   : > { %v14197_v18 = vpop.f32.mrf.mxu0  ;;  %10766 = vmatmul.mubr.msk.bf16.gmra.mxu0 %vm1265_vm3, %v13522_v21 }
 0x15d   : > { %18207 = vst [vmem:[#allocation260_spill] sm:$0xff] %v14197_v18  ;;  %10769 = vmatprep.mubr.msk.bf16.mxu0 %vm1265_vm3, %v14185_v22  ;;  %18213 = vst [vmem:[#allocation266_spill] sm:$0xff] %v14222_v53  ;;  %v2986_v1 = vsel %vm2747_vm2, %v2983_v38, %v13642_v51 }
 0x15e   : > { %v14209_v3 = vpop.f32.mrf.mxu0 }
 0x15f   : > { %18210 = vst [vmem:[#allocation263_spill] sm:$0xff] %v14209_v3  ;;  %v14214_v34 = vpop.f32.mrf.mxu1  ;;  %10636 = vmatmul.mubr.msk.bf16.gmra.mxu1 %vm1265_vm3, %v14200_v12  ;;  %v2982_v3 = vrot.slane %v18217_v30, 2  ;;  %v14235_v12 = vld [vmem:[%s11866_s27 + $0x1e8] sm:$0xff]  }
 0x160   : > { %18211 = vst [vmem:[#allocation264_spill] sm:$0xff] %v14214_v34  ;;  %v14218_v21 = vpop.f32.mrf.mxu0  ;;  %10639 = vmatprep.mubr.msk.bf16.mxu1 %vm1265_vm3, %v14205_v52  ;;  %18220 = vst [vmem:[#allocation269_spill] sm:$0xff] %v14235_v12 }
 0x161   : > { %18212 = vst [vmem:[#allocation265_spill] sm:$0xff] %v14218_v21  ;;  %v14224_v22 = vpop.f32.mrf.mxu1  ;;  %v2984_v30 = vsel %vm2747_vm2, %v2982_v3, %v2983_v38 }
 0x162   : > { %18214 = vst [vmem:[#allocation267_spill] sm:$0xff] %v14224_v22  ;;  %v14226_v56 = vpop.f32.mrf.mxu0 }
 0x163   : > { %18215 = vst [vmem:[#allocation268_spill] sm:$0xff] %v14226_v56  ;;  %v14232_v34 = vpop.f32.mrf.mxu1  ;;  %v18223_v56 = vld [vmem:[#allocation78_spill] sm:$0xff] }
 0x164   : > { %18219 = vst [vmem:[#allocation69_spill] sm:$0xff] %v14232_v34  ;;  %v10675_v21 = vpop.f32.mrf.mxu0  ;;  %10770 = vmatmul.mubr.msk.bf16.gmra.mxu0 %vm1265_vm3, %v13551_v7  ;;  %v18224_v3 = vunpack.c.l.bf16 %v18223_v56  ;;  %v18225_v51 = vunpack.c.h.bf16 %v18223_v56 }
 0x165   : > { %10773 = vmatprep.mubr.msk.bf16.mxu0 %vm1265_vm3, %v14222_v53  ;;  %v14244_v55 = vpop.f32.mrf.mxu1  ;;  %v14254_v53 = vpack.c.bf16 %v2986_v1, %v2984_v30 }
 0x166   : > { %18221 = vst [vmem:[#allocation270_spill] sm:$0xff] %v14244_v55  ;;  %v3459_v22 = vpop.f32.mrf.mxu0  ;;  %v2991_v18 = vrot.slane %v18224_v3, 2  ;;  %v2992_v38 = vrot.slane %v18225_v51, 2  ;;  %v18227_v51 = vld [vmem:[#allocation88_spill] sm:$0xff] }
 0x167   : > { %v10545_v6 = vpop.f32.mrf.mxu1  ;;  %10640 = vmatmul.mubr.msk.bf16.gmra.mxu1 %vm1265_vm3, %v14235_v12  ;;  %18222 = vst [vmem:[#allocation271_spill] sm:$0xff] %v14254_v53 }
 0x168   : > { %v10676_v34 = vpop.f32.mrf.mxu0  ;;  %v2245_v7 = vadd.f32 %v10545_v6, %v13458_v10  ;;  %10643 = vmatprep.mubr.msk.bf16.mxu1 %vm1265_vm3, %v14240_v62  ;;  %v14272_v6 = vld [vmem:[%s11866_s27 + $0x208] sm:$0xff]   ;;  %v2995_v56 = vsel %vm2747_vm2, %v2992_v38, %v13696_v45 }
 0x169   : > { %v2236_v55 = vpop.f32.mrf.mxu1 }
 0x16a   : > { %v3462_v52 = vpop.f32.mrf.mxu0  ;;  %v14260_v59 = vadd.f32 %v10675_v21, %v2245_v7  ;;  %v2237_v12 = vadd.f32 %v2236_v55, %v13473_v36  ;;  %v2993_v36 = vsel %vm2747_vm2, %v2991_v18, %v2992_v38  ;;  %v18228_v38 = vunpack.c.l.bf16 %v18227_v51 }
 0x16b   : > { %v10546_v48 = vpop.f32.mrf.mxu1  ;;  %v14289_v18 = vpack.c.bf16 %v2995_v56, %v2993_v36 }
 0x16c   : > { %v10679_v10 = vpop.f32.mrf.mxu0  ;;  %10774 = vmatmul.mubr.msk.bf16.gmra.mxu0 %vm1265_vm3, %v13610_v20  ;;  %v14268_v30 = vadd.f32 %v3459_v22, %v2237_v12  ;;  %v2248_v1 = vadd.f32 %v10546_v48, %v13491_v49  ;;  %v14299_v20 = vld [vmem:[%s11866_s27 + $0x210] sm:$0xff]  }
 0x16d   : > { %10777 = vmatprep.mubr.msk.bf16.mxu0 %vm1265_vm3, %v14254_v53  ;;  %v2239_v7 = vpop.f32.mrf.mxu1  ;;  %18226 = vst [vmem:[#allocation78_spill] sm:$0xff] %v14289_v18 }
 0x16e   : > { %v3475_v21 = vpop.f32.mrf.mxu0  ;;  %v14279_v55 = vadd.f32 %v10676_v34, %v2248_v1  ;;  %v2240_v22 = vadd.f32 %v2239_v7, %v13510_v58  ;;  %v3000_v58 = vrot.slane %v18228_v38, 2  ;;  %v18229_v1 = vunpack.c.h.bf16 %v18227_v51  ;;  %v18233_v38 = vld [vmem:[#allocation157_spill] sm:$0xff] }
 0x16f   : > { %v10549_v12 = vpop.f32.mrf.mxu1  ;;  %10644 = vmatmul.mubr.msk.bf16.gmra.mxu1 %vm1265_vm3, %v14264_v57 }
 0x170   : > { %v10680_v49 = vpop.f32.mrf.mxu0  ;;  %v14284_v48 = vadd.f32 %v3462_v52, %v2240_v22  ;;  %v2261_v3 = vadd.f32 %v10549_v12, %v13533_v44  ;;  %10647 = vmatprep.mubr.msk.bf16.mxu1 %vm1265_vm3, %v14272_v6  ;;  %v3001_v7 = vrot.slane %v18229_v1, 2  ;;  %v14307_v12 = vld [vmem:[%s11866_s27 + $0x21c] sm:$0xff]  }
 0x171   : > { %v2252_v45 = vpop.f32.mrf.mxu1  ;;  %18231 = vst [vmem:[#allocation272_spill] sm:$0xff] %v14307_v12 }
 0x172   : > { %v3478_v34 = vpop.f32.mrf.mxu0  ;;  %v14295_v53 = vadd.f32 %v10679_v10, %v2261_v3  ;;  %v2253_v52 = vadd.f32 %v2252_v45, %v13546_v33  ;;  %v3002_v33 = vsel %vm2747_vm2, %v3000_v58, %v3001_v7  ;;  %v3004_v45 = vsel %vm2747_vm2, %v3001_v7, %v13744_v27  ;;  %v18237_v7 = vld [vmem:[#allocation96_spill] sm:$0xff] }
 0x173   : > { %v10550_v22 = vpop.f32.mrf.mxu1  ;;  %v14324_v58 = vpack.c.bf16 %v3004_v45, %v3002_v33  ;;  %v18241_v45 = vld [vmem:[#allocation163_spill] sm:$0xff] }
 0x174   : > { %v10683_v44 = vpop.f32.mrf.mxu0  ;;  %10778 = vmatmul.mubr.msk.bf16.gmra.mxu0 %vm1265_vm3, %v13668_v29  ;;  %v14303_v36 = vadd.f32 %v3475_v21, %v2253_v52  ;;  %v2264_v56 = vadd.f32 %v10550_v22, %v13561_v5  ;;  %v18235_v22 = vld [vmem:[#allocation159_spill] sm:$0xff] }
 0x175   : > { %10781 = vmatprep.mubr.msk.bf16.mxu0 %vm1265_vm3, %v14289_v18  ;;  %v2255_v10 = vpop.f32.mrf.mxu1  ;;  %18236 = vst [vmem:[#allocation159_spill] sm:$0xff] %v14324_v58 }
 0x176   : > { %18230 = vst [vmem:[#allocation88_spill] sm:$0xff] %v14303_v36  ;;  %v3491_v3 = vpop.f32.mrf.mxu0  ;;  %v14314_v51 = vadd.f32 %v10680_v49, %v2264_v56  ;;  %v2256_v21 = vadd.f32 %v2255_v10, %v18233_v38  ;;  %v18238_v56 = vunpack.c.l.bf16 %v18237_v7  ;;  %v18239_v38 = vunpack.c.h.bf16 %v18237_v7  ;;  %v14334_v36 = vld [vmem:[%s11866_s27 + $0x224] sm:$0xff]  }
 0x177   : > { %v10553_v1 = vpop.f32.mrf.mxu1  ;;  %10648 = vmatmul.mubr.msk.bf16.gmra.mxu1 %vm1265_vm3, %v14299_v20 }
 0x178   : > { %18232 = vst [vmem:[#allocation273_spill] sm:$0xff] %v14314_v51  ;;  %v10684_v5 = vpop.f32.mrf.mxu0  ;;  %v14319_v52 = vadd.f32 %v3478_v34, %v2256_v21  ;;  %v2277_v18 = vadd.f32 %v10553_v1, %v18235_v22  ;;  %10651 = vmatprep.mubr.msk.bf16.mxu1 %vm1265_vm3, %v14307_v12  ;;  %v3009_v10 = vrot.slane %v18238_v56, 2  ;;  %v3010_v29 = vrot.slane %v18239_v38, 2  ;;  %v18240_v34 = vld [vmem:[#allocation160_spill] sm:$0xff] }
 0x179   : > { %v2268_v27 = vpop.f32.mrf.mxu1  ;;  %v14342_v12 = vld [vmem:[%s11866_s27 + $0x230] sm:$0xff]  }
 0x17a   : > { %18234 = vst [vmem:[#allocation157_spill] sm:$0xff] %v14319_v52  ;;  %v3494_v49 = vpop.f32.mrf.mxu0  ;;  %v14330_v51 = vadd.f32 %v10683_v44, %v2277_v18  ;;  %v2269_v21 = vadd.f32 %v2268_v27, %v18240_v34  ;;  %v3011_v27 = vsel %vm2747_vm2, %v3009_v10, %v3010_v29  ;;  %v3013_v7 = vsel %vm2747_vm2, %v3010_v29, %v13787_v42 }
 0x17b   : > { %v10554_v52 = vpop.f32.mrf.mxu1  ;;  %v14359_v10 = vpack.c.bf16 %v3013_v7, %v3011_v27 }
 0x17c   : > { %v10687_v1 = vpop.f32.mrf.mxu0  ;;  %10782 = vmatmul.mubr.msk.bf16.gmra.mxu0 %vm1265_vm3, %v13722_v25  ;;  %v14338_v33 = vadd.f32 %v3491_v3, %v2269_v21  ;;  %v2280_v22 = vadd.f32 %v10554_v52, %v18241_v45  ;;  %v14369_v25 = vld [vmem:[%s11866_s27 + $0x238] sm:$0xff]  }
 0x17d   : > { %10785 = vmatprep.mubr.msk.bf16.mxu0 %vm1265_vm3, %v14324_v58  ;;  %v2271_v18 = vpop.f32.mrf.mxu1  ;;  %18242 = vst [vmem:[#allocation96_spill] sm:$0xff] %v14359_v10 }
 0x17e   : > { %v3507_v44 = vpop.f32.mrf.mxu0  ;;  %v14349_v56 = vadd.f32 %v10684_v5, %v2280_v22  ;;  %v2272_v3 = vadd.f32 %v2271_v18, %v13634_v23  ;;  %v18243_v5 = vld [vmem:[#allocation105_spill] sm:$0xff] }
 0x17f   : > { %v10557_v38 = vpop.f32.mrf.mxu1  ;;  %10652 = vmatmul.mubr.msk.bf16.gmra.mxu1 %vm1265_vm3, %v14334_v36  ;;  %v18244_v45 = vunpack.c.l.bf16 %v18243_v5  ;;  %v18245_v22 = vunpack.c.h.bf16 %v18243_v5 }
 0x180   : > { %v10688_v52 = vpop.f32.mrf.mxu0  ;;  %v14354_v34 = vadd.f32 %v3494_v49, %v2272_v3  ;;  %v2293_v21 = vadd.f32 %v10557_v38, %v13663_v54  ;;  %10655 = vmatprep.mubr.msk.bf16.mxu1 %vm1265_vm3, %v14342_v12  ;;  %v14377_v38 = vld [vmem:[%s11866_s27 + $0x244] sm:$0xff]  }
 0x181   : > { %v2284_v29 = vpop.f32.mrf.mxu1  ;;  %v3018_v23 = vrot.slane %v18244_v45, 2  ;;  %v3019_v18 = vrot.slane %v18245_v22, 2  ;;  %v18248_v45 = vld [vmem:[#allocation171_spill] sm:$0xff] }
 0x182   : > { %v3510_v42 = vpop.f32.mrf.mxu0  ;;  %v14365_v58 = vadd.f32 %v10687_v1, %v2293_v21  ;;  %v2285_v49 = vadd.f32 %v2284_v29, %v13676_v43 }
 0x183   : > { %v10558_v3 = vpop.f32.mrf.mxu1  ;;  %v3020_v43 = vsel %vm2747_vm2, %v3018_v23, %v3019_v18  ;;  %v3022_v29 = vsel %vm2747_vm2, %v3019_v18, %v13831_v8  ;;  %v18252_v18 = vld [vmem:[#allocation114_spill] sm:$0xff] }
 0x184   : > { %v10691_v54 = vpop.f32.mrf.mxu0  ;;  %10786 = vmatmul.mubr.msk.bf16.gmra.mxu0 %vm1265_vm3, %v13767_v60  ;;  %v14373_v27 = vadd.f32 %v3507_v44, %v2285_v49  ;;  %v2296_v7 = vadd.f32 %v10558_v3, %v13688_v63  ;;  %v18250_v3 = vld [vmem:[#allocation174_spill] sm:$0xff]  ;;  %v14394_v23 = vpack.c.bf16 %v3022_v29, %v3020_v43  ;;  %v18256_v29 = vld [vmem:[#allocation177_spill] sm:$0xff] }
 0x185   : > { %10789 = vmatprep.mubr.msk.bf16.mxu0 %vm1265_vm3, %v14359_v10  ;;  %v2287_v1 = vpop.f32.mrf.mxu1 }
 0x186   : > { %18246 = vst [vmem:[#allocation160_spill] sm:$0xff] %v14373_v27  ;;  %v3523_v21 = vpop.f32.mrf.mxu0  ;;  %v14384_v5 = vadd.f32 %v10688_v52, %v2296_v7  ;;  %v2288_v44 = vadd.f32 %v2287_v1, %v18248_v45  ;;  %18251 = vst [vmem:[#allocation171_spill] sm:$0xff] %v14394_v23  ;;  %v18253_v7 = vunpack.c.l.bf16 %v18252_v18  ;;  %v18254_v45 = vunpack.c.h.bf16 %v18252_v18  ;;  %v14412_v27 = vld [vmem:[%s11866_s27 + $0x258] sm:$0xff]  }
 0x187   : > { %v10561_v22 = vpop.f32.mrf.mxu1  ;;  %10656 = vmatmul.mubr.msk.bf16.gmra.mxu1 %vm1265_vm3, %v14369_v25  ;;  %18257 = vst [vmem:[#allocation114_spill] sm:$0xff] %v14412_v27 }
 0x188   : > { %18247 = vst [vmem:[#allocation163_spill] sm:$0xff] %v14384_v5  ;;  %v10692_v63 = vpop.f32.mrf.mxu0  ;;  %v14389_v49 = vadd.f32 %v3510_v42, %v2288_v44  ;;  %v2309_v10 = vadd.f32 %v10561_v22, %v18250_v3  ;;  %10659 = vmatprep.mubr.msk.bf16.mxu1 %vm1265_vm3, %v14377_v38  ;;  %v3027_v1 = vrot.slane %v18253_v7, 2  ;;  %v3028_v60 = vrot.slane %v18254_v45, 2  ;;  %v18259_v7 = vld [vmem:[#allocation180_spill] sm:$0xff] }
 0x189   : > { %v2300_v8 = vpop.f32.mrf.mxu1 }
 0x18a   : > { %18249 = vst [vmem:[#allocation105_spill] sm:$0xff] %v14389_v49  ;;  %v3526_v52 = vpop.f32.mrf.mxu0  ;;  %v14400_v5 = vadd.f32 %v10691_v54, %v2309_v10  ;;  %v2301_v42 = vadd.f32 %v2300_v8, %v13728_v4  ;;  %v14404_v49 = vld [vmem:[%s11866_s27 + $0x24c] sm:$0xff]   ;;  %v3029_v4 = vsel %vm2747_vm2, %v3027_v1, %v3028_v60  ;;  %v3031_v8 = vsel %vm2747_vm2, %v3028_v60, %v13875_v13 }
 0x18b   : > { %v10562_v44 = vpop.f32.mrf.mxu1  ;;  %18255 = vst [vmem:[#allocation174_spill] sm:$0xff] %v14404_v49  ;;  %v14429_v1 = vpack.c.bf16 %v3031_v8, %v3029_v4  ;;  %v18266_v8 = vld [vmem:[#allocation189_spill] sm:$0xff] }
 0x18c   : > { %v10695_v22 = vpop.f32.mrf.mxu0  ;;  %10790 = vmatmul.mubr.msk.bf16.gmra.mxu0 %vm1265_vm3, %v13807_v47  ;;  %v14408_v43 = vadd.f32 %v3523_v21, %v2301_v42  ;;  %v2312_v3 = vadd.f32 %v10562_v44, %v18256_v29  ;;  %v18260_v29 = vld [vmem:[#allocation183_spill] sm:$0xff]  ;;  %v14435_v47 = vld [vmem:[%s11866_s27 + $0x260] sm:$0xff]  }
 0x18d   : > { %10793 = vmatprep.mubr.msk.bf16.mxu0 %vm1265_vm3, %v14394_v23  ;;  %v2303_v10 = vpop.f32.mrf.mxu1  ;;  %18261 = vst [vmem:[#allocation180_spill] sm:$0xff] %v14429_v1 }
 0x18e   : > { %v3539_v54 = vpop.f32.mrf.mxu0  ;;  %v14419_v18 = vadd.f32 %v10692_v63, %v2312_v3  ;;  %v2304_v21 = vadd.f32 %v2303_v10, %v18259_v7  ;;  %v18262_v3 = vld [vmem:[#allocation186_spill] sm:$0xff] }
 0x18f   : > { %v10565_v45 = vpop.f32.mrf.mxu1  ;;  %10660 = vmatmul.mubr.msk.bf16.gmra.mxu1 %vm1265_vm3, %v14404_v49 }
 0x190   : > { %18258 = vst [vmem:[#allocation177_spill] sm:$0xff] %v14419_v18  ;;  %v10696_v42 = vpop.f32.mrf.mxu0  ;;  %v14424_v44 = vadd.f32 %v3526_v52, %v2304_v21  ;;  %v2325_v23 = vadd.f32 %v10565_v45, %v18260_v29  ;;  %10663 = vmatprep.mubr.msk.bf16.mxu1 %vm1265_vm3, %v14412_v27  ;;  %v18264_v21 = vld [vmem:[#allocation100_spill] sm:$0xff] }
 0x191   : > { %v2316_v13 = vpop.f32.mrf.mxu1  ;;  %v14443_v29 = vld [vmem:[%s11866_s27 + $0x26c] sm:$0xff]  }
 0x192   : > { %v3542_v60 = vpop.f32.mrf.mxu0  ;;  %v14431_v63 = vadd.f32 %v10695_v22, %v2325_v23  ;;  %v2317_v10 = vadd.f32 %v2316_v13, %v18262_v3 }
 0x193   : > { %v10566_v7 = vpop.f32.mrf.mxu1 }
 0x194   : > { %v10699_v18 = vpop.f32.mrf.mxu0  ;;  %10794 = vmatmul.mubr.msk.bf16.gmra.mxu0 %vm1265_vm3, %v13849_v26  ;;  %v14439_v52 = vadd.f32 %v3539_v54, %v2317_v10  ;;  %v2328_v45 = vadd.f32 %v10566_v7, %v18264_v21  ;;  %v18268_v7 = vld [vmem:[#allocation191_spill] sm:$0xff] }
 0x195   : > { %10797 = vmatprep.mubr.msk.bf16.mxu0 %vm1265_vm3, %v14429_v1  ;;  %v2319_v23 = vpop.f32.mrf.mxu1 }
 0x196   : > { %18263 = vst [vmem:[#allocation183_spill] sm:$0xff] %v14439_v52  ;;  %v3555_v22 = vpop.f32.mrf.mxu0  ;;  %v14447_v4 = vadd.f32 %v10696_v42, %v2328_v45  ;;  %v2320_v13 = vadd.f32 %v2319_v23, %v18266_v8  ;;  %v18270_v42 = vld [vmem:[#allocation194_spill] sm:$0xff]  ;;  %v14461_v23 = vld [vmem:[%s11866_s27 + $0x274] sm:$0xff]  }
 0x197   : > { %v10569_v3 = vpop.f32.mrf.mxu1  ;;  %10664 = vmatmul.mubr.msk.bf16.gmra.mxu1 %vm1265_vm3, %v14435_v47 }
 0x198   : > { %18265 = vst [vmem:[#allocation186_spill] sm:$0xff] %v14447_v4  ;;  %v10700_v54 = vpop.f32.mrf.mxu0  ;;  %v14452_v10 = vadd.f32 %v3542_v60, %v2320_v13  ;;  %v2341_v21 = vadd.f32 %v10569_v3, %v18268_v7  ;;  %10667 = vmatprep.mubr.msk.bf16.mxu1 %vm1265_vm3, %v14443_v29  ;;  %v18271_v3 = vld [vmem:[#allocation6_spill] sm:$0xff] }
 0x199   : > { %v2332_v1 = vpop.f32.mrf.mxu1 }
 0x19a   : > { %18267 = vst [vmem:[#allocation100_spill] sm:$0xff] %v14452_v10  ;;  %v3558_v26 = vpop.f32.mrf.mxu0  ;;  %v14457_v52 = vadd.f32 %v10699_v18, %v2341_v21  ;;  %v2333_v45 = vadd.f32 %v2332_v1, %v18270_v42 }
 0x19b   : > { %v10570_v4 = vpop.f32.mrf.mxu1 }
 0x19c   : > { %18269 = vst [vmem:[#allocation189_spill] sm:$0xff] %v14457_v52  ;;  %v10703_v8 = vpop.f32.mrf.mxu0  ;;  %10798 = vmatmul.mubr.msk.bf16.gmra.mxu0 %vm1265_vm3, %v13898_v50  ;;  %v14465_v60 = vadd.f32 %v3555_v22, %v2333_v45  ;;  %v2344_v13 = vadd.f32 %v10570_v4, %v13823_v32  ;;  %v18272_v45 = vld [vmem:[#allocation122_spill] sm:$0xff]  ;;  %v18273_v50 = vld [vmem:[#allocation9_spill] sm:$0xff] }
 0x19d   : > { %10933 = vmatprep.mubr.msk.bf16.mxu0 %vm1265_vm3, %v18271_v3  ;;  %v2335_v7 = vpop.f32.mrf.mxu1 }
 0x19e   : > { %v3571_v10 = vpop.f32.mrf.mxu0  ;;  %v14470_v18 = vadd.f32 %v10700_v54, %v2344_v13  ;;  %v2336_v1 = vadd.f32 %v2335_v7, %v13837_v11  ;;  %v6198_v54 = vsel %vm1458_vm0, %v13967_v31, 0  ;;  %v5512_v31 = vsel %vm1458_vm0, %v13952_v14, 0 }
 0x19f   : > { %v10573_v21 = vpop.f32.mrf.mxu1  ;;  %10668 = vmatmul.mubr.msk.bf16.gmra.mxu1 %vm1265_vm3, %v14461_v23 }
 0x1a0   : > { %v10704_v42 = vpop.f32.mrf.mxu0  ;;  %v14475_v52 = vadd.f32 %v3558_v26, %v2336_v1  ;;  %v2357_v22 = vadd.f32 %v10573_v21, %v13851_v2  ;;  %10803 = vmatprep.mubr.msk.bf16.mxu1 %vm1265_vm3, %v18272_v45  ;;  %v18274_v1 = vld [vmem:[#allocation11_spill] sm:$0xff] }
 0x1a1   : > { %v2348_v32 = vpop.f32.mrf.mxu1 }
 0x1a2   : > { %v3574_v4 = vpop.f32.mrf.mxu0  ;;  %v14482_v13 = vadd.f32 %v10703_v8, %v2357_v22  ;;  %v2349_v11 = vadd.f32 %v2348_v32, %v13863_v61  ;;  %v18275_v32 = vld [vmem:[#allocation125_spill] sm:$0xff] }
 0x1a3   : > { %v10574_v3 = vpop.f32.mrf.mxu1 }
 0x1a4   : > { %v10707_v7 = vpop.f32.mrf.mxu0  ;;  %10934 = vmatmul.mubr.msk.bf16.vlgmr.msra.gmra.mxu0 %vm1265_vm3, %v18273_v50  ;;  %v14487_v26 = vadd.f32 %v3571_v10, %v2349_v11  ;;  %v2360_v2 = vadd.f32 %v10574_v3, %v13877_v9 }
 0x1a5   : > { %11192 = vmatpush3.bf16.msra.mxu0 %v6198_v54  ;;  %10937 = vmatprep.mubr.msk.bf16.mxu0 %vm1265_vm3, %v18274_v1  ;;  %v2351_v21 = vpop.f32.mrf.mxu1  ;;  %v18277_v54 = vld [vmem:[#allocation126_spill] sm:$0xff] }
 0x1a6   : > { %v3587_v8 = vpop.f32.mrf.mxu0  ;;  %v14494_v22 = vadd.f32 %v10704_v42, %v2360_v2  ;;  %v2352_v61 = vadd.f32 %v2351_v21, %v13883_v28  ;;  %v18279_v21 = vld [vmem:[#allocation14_spill] sm:$0xff] }
 0x1a7   : > { %v10577_v45 = vpop.f32.mrf.mxu1  ;;  %10804 = vmatmul.mubr.msk.bf16.vlgmr.msra.gmra.mxu1 %vm1265_vm3, %v18275_v32 }
 0x1a8   : > { %v10708_v50 = vpop.f32.mrf.mxu0  ;;  %v14499_v10 = vadd.f32 %v3574_v4, %v2352_v61  ;;  %v2373_v9 = vadd.f32 %v10577_v45, %v13900_v40  ;;  %11062 = vmatpush3.bf16.msra.mxu1 %v5512_v31  ;;  %10807 = vmatprep.mubr.msk.bf16.mxu1 %vm1265_vm3, %v18277_v54  ;;  %v18281_v40 = vld [vmem:[#allocation16_spill] sm:$0xff] }
 0x1a9   : > { %v2364_v11 = vpop.f32.mrf.mxu1 }
 0x1aa   : > { %18276 = vst [vmem:[#allocation191_spill] sm:$0xff] %v14499_v10  ;;  %v3590_v14 = vpop.f32.mrf.mxu0  ;;  %v14504_v3 = vadd.f32 %v10707_v7, %v2373_v9  ;;  %v2365_v42 = vadd.f32 %v2364_v11, %v13908_v0  ;;  %v18283_v0 = vld [vmem:[#allocation129_spill] sm:$0xff] }
 0x1ab   : > { %v10578_v28 = vpop.f32.mrf.mxu1 }
 0x1ac   : > { %18278 = vst [vmem:[#allocation194_spill] sm:$0xff] %v14504_v3  ;;  %v10711_v2 = vpop.f32.mrf.mxu0  ;;  %10938 = vmatmul.mubr.msk.bf16.gmra.mxu0 %vm1265_vm3, %v18279_v21  ;;  %v14509_v32 = vadd.f32 %v3587_v8, %v2365_v42  ;;  %v2376_v4 = vadd.f32 %v10578_v28, %v13918_v24  ;;  %v18285_v8 = vld [vmem:[#allocation208_spill] sm:$0xff]  ;;  %v18286_v21 = vld [vmem:[#allocation130_spill] sm:$0xff] }
 0x1ad   : > { %10941 = vmatprep.mubr.msk.bf16.mxu0 %vm1265_vm3, %v18281_v40  ;;  %v2367_v31 = vpop.f32.mrf.mxu1 }
 0x1ae   : > { %18280 = vst [vmem:[#allocation6_spill] sm:$0xff] %v14509_v32  ;;  %v3603_v61 = vpop.f32.mrf.mxu0  ;;  %v14514_v45 = vadd.f32 %v10708_v50, %v2376_v4  ;;  %v2368_v7 = vadd.f32 %v2367_v31, %v13927_v35  ;;  %v18288_v50 = vld [vmem:[#allocation211_spill] sm:$0xff]  ;;  %v18289_v31 = vld [vmem:[#allocation20_spill] sm:$0xff] }
 0x1af   : > { %v10581_v9 = vpop.f32.mrf.mxu1  ;;  %10808 = vmatmul.mubr.msk.bf16.gmra.mxu1 %vm1265_vm3, %v18283_v0 }
 0x1b0   : > { %18282 = vst [vmem:[#allocation122_spill] sm:$0xff] %v14514_v45  ;;  %v10712_v11 = vpop.f32.mrf.mxu0  ;;  %v14519_v1 = vadd.f32 %v3590_v14, %v2368_v7  ;;  %v2389_v42 = vadd.f32 %v10581_v9, %v18285_v8  ;;  %10811 = vmatprep.mubr.msk.bf16.mxu1 %vm1265_vm3, %v18286_v21  ;;  %v18291_v14 = vld [vmem:[#allocation213_spill] sm:$0xff] }
 0x1b1   : > { %v2380_v24 = vpop.f32.mrf.mxu1 }
 0x1b2   : > { %18284 = vst [vmem:[#allocation9_spill] sm:$0xff] %v14519_v1  ;;  %v3606_v28 = vpop.f32.mrf.mxu0  ;;  %v14524_v40 = vadd.f32 %v10711_v2, %v2389_v42  ;;  %v2381_v4 = vadd.f32 %v2380_v24, %v18288_v50  ;;  %v18292_v1 = vld [vmem:[#allocation23_spill] sm:$0xff]  ;;  %v18294_v2 = vld [vmem:[#allocation216_spill] sm:$0xff]  ;;  %v18295_v24 = vld [vmem:[#allocation133_spill] sm:$0xff] }
 0x1b3   : > { %v10582_v45 = vpop.f32.mrf.mxu1 }
 0x1b4   : > { %18287 = vst [vmem:[#allocation125_spill] sm:$0xff] %v14524_v40  ;;  %v10715_v35 = vpop.f32.mrf.mxu0  ;;  %10942 = vmatmul.mubr.msk.bf16.gmra.mxu0 %vm1265_vm3, %v18289_v31  ;;  %v14529_v32 = vadd.f32 %v3603_v61, %v2381_v4  ;;  %v2392_v7 = vadd.f32 %v10582_v45, %v18291_v14  ;;  %v18297_v4 = vld [vmem:[#allocation134_spill] sm:$0xff] }
 0x1b5   : > { %10945 = vmatprep.mubr.msk.bf16.mxu0 %vm1265_vm3, %v18292_v1  ;;  %v2383_v9 = vpop.f32.mrf.mxu1 }
 0x1b6   : > { %18290 = vst [vmem:[#allocation126_spill] sm:$0xff] %v14529_v32  ;;  %v3619_v8 = vpop.f32.mrf.mxu0  ;;  %v14534_v3 = vadd.f32 %v10712_v11, %v2392_v7  ;;  %v2384_v42 = vadd.f32 %v2383_v9, %v18294_v2  ;;  %v18299_v2 = vld [vmem:[#allocation27_spill] sm:$0xff] }
 0x1b7   : > { %v10585_v40 = vpop.f32.mrf.mxu1  ;;  %10812 = vmatmul.mubr.msk.bf16.gmra.mxu1 %vm1265_vm3, %v18295_v24 }
 0x1b8   : > { %18293 = vst [vmem:[#allocation129_spill] sm:$0xff] %v14534_v3  ;;  %v10716_v50 = vpop.f32.mrf.mxu0  ;;  %v14539_v10 = vadd.f32 %v3606_v28, %v2384_v42  ;;  %v2405_v61 = vadd.f32 %v10585_v40, %v13994_v17  ;;  %10815 = vmatprep.mubr.msk.bf16.mxu1 %vm1265_vm3, %v18297_v4  ;;  %v18301_v28 = vld [vmem:[#allocation221_spill] sm:$0xff] }
 0x1b9   : > { %v2396_v45 = vpop.f32.mrf.mxu1 }
 0x1ba   : > { %18296 = vst [vmem:[#allocation208_spill] sm:$0xff] %v14539_v10  ;;  %v3622_v14 = vpop.f32.mrf.mxu0  ;;  %v14544_v1 = vadd.f32 %v10715_v35, %v2405_v61  ;;  %v2397_v11 = vadd.f32 %v2396_v45, %v14002_v41  ;;  %v18302_v10 = vld [vmem:[#allocation30_spill] sm:$0xff]  ;;  %v18304_v35 = vld [vmem:[#allocation224_spill] sm:$0xff]  ;;  %v18305_v41 = vld [vmem:[#allocation137_spill] sm:$0xff] }
 0x1bb   : > { %v10586_v7 = vpop.f32.mrf.mxu1 }
 0x1bc   : > { %18298 = vst [vmem:[#allocation130_spill] sm:$0xff] %v14544_v1  ;;  %v10719_v9 = vpop.f32.mrf.mxu0  ;;  %10946 = vmatmul.mubr.msk.bf16.gmra.mxu0 %vm1265_vm3, %v18299_v2  ;;  %v14549_v31 = vadd.f32 %v3619_v8, %v2397_v11  ;;  %v2408_v42 = vadd.f32 %v10586_v7, %v18301_v28  ;;  %v18307_v11 = vld [vmem:[#allocation138_spill] sm:$0xff] }
 0x1bd   : > { %10949 = vmatprep.mubr.msk.bf16.mxu0 %vm1265_vm3, %v18302_v10  ;;  %v2399_v17 = vpop.f32.mrf.mxu1 }
 0x1be   : > { %18300 = vst [vmem:[#allocation211_spill] sm:$0xff] %v14549_v31  ;;  %v3635_v40 = vpop.f32.mrf.mxu0  ;;  %v14554_v3 = vadd.f32 %v10716_v50, %v2408_v42  ;;  %v2400_v61 = vadd.f32 %v2399_v17, %v18304_v35  ;;  %v18309_v35 = vld [vmem:[#allocation34_spill] sm:$0xff] }
 0x1bf   : > { %v10589_v1 = vpop.f32.mrf.mxu1  ;;  %10816 = vmatmul.mubr.msk.bf16.gmra.mxu1 %vm1265_vm3, %v18305_v41 }
 0x1c0   : > { %18303 = vst [vmem:[#allocation213_spill] sm:$0xff] %v14554_v3  ;;  %v10720_v45 = vpop.f32.mrf.mxu0  ;;  %v14559_v32 = vadd.f32 %v3622_v14, %v2400_v61  ;;  %v2421_v8 = vadd.f32 %v10589_v1, %v14035_v19  ;;  %10819 = vmatprep.mubr.msk.bf16.mxu1 %vm1265_vm3, %v18307_v11  ;;  %v18311_v14 = vld [vmem:[#allocation229_spill] sm:$0xff] }
 0x1c1   : > { %v2412_v7 = vpop.f32.mrf.mxu1 }
 0x1c2   : > { %18306 = vst [vmem:[#allocation216_spill] sm:$0xff] %v14559_v32  ;;  %v3638_v28 = vpop.f32.mrf.mxu0  ;;  %v14564_v10 = vadd.f32 %v10719_v9, %v2421_v8  ;;  %v2413_v50 = vadd.f32 %v2412_v7, %v14045_v46  ;;  %v18312_v32 = vld [vmem:[#allocation37_spill] sm:$0xff]  ;;  %v18314_v9 = vld [vmem:[#allocation232_spill] sm:$0xff] }
 0x1c3   : > { %v10590_v42 = vpop.f32.mrf.mxu1  ;;  %v18315_v46 = vld [vmem:[#allocation145_spill] sm:$0xff] }
 0x1c4   : > { %18308 = vst [vmem:[#allocation133_spill] sm:$0xff] %v14564_v10  ;;  %v10723_v17 = vpop.f32.mrf.mxu0  ;;  %10950 = vmatmul.mubr.msk.bf16.gmra.mxu0 %vm1265_vm3, %v18309_v35  ;;  %v14569_v2 = vadd.f32 %v3635_v40, %v2413_v50  ;;  %v2424_v61 = vadd.f32 %v10590_v42, %v18311_v14  ;;  %v18317_v50 = vld [vmem:[#allocation146_spill] sm:$0xff] }
 0x1c5   : > { %10953 = vmatprep.mubr.msk.bf16.mxu0 %vm1265_vm3, %v18312_v32  ;;  %v2415_v19 = vpop.f32.mrf.mxu1 }
 0x1c6   : > { %18310 = vst [vmem:[#allocation134_spill] sm:$0xff] %v14569_v2  ;;  %v3651_v1 = vpop.f32.mrf.mxu0  ;;  %v14574_v3 = vadd.f32 %v10720_v45, %v2424_v61  ;;  %v2416_v8 = vadd.f32 %v2415_v19, %v18314_v9  ;;  %v18319_v9 = vld [vmem:[#allocation41_spill] sm:$0xff] }
 0x1c7   : > { %v10593_v10 = vpop.f32.mrf.mxu1  ;;  %10820 = vmatmul.mubr.msk.bf16.gmra.mxu1 %vm1265_vm3, %v18315_v46 }
 0x1c8   : > { %18313 = vst [vmem:[#allocation221_spill] sm:$0xff] %v14574_v3  ;;  %v10724_v7 = vpop.f32.mrf.mxu0  ;;  %v14579_v31 = vadd.f32 %v3638_v28, %v2416_v8  ;;  %v2437_v40 = vadd.f32 %v10593_v10, %v14074_v16  ;;  %10823 = vmatprep.mubr.msk.bf16.mxu1 %vm1265_vm3, %v18317_v50  ;;  %v18321_v28 = vld [vmem:[#allocation236_spill] sm:$0xff] }
 0x1c9   : > { %v2428_v42 = vpop.f32.mrf.mxu1 }
 0x1ca   : > { %18316 = vst [vmem:[#allocation224_spill] sm:$0xff] %v14579_v31  ;;  %v3654_v14 = vpop.f32.mrf.mxu0  ;;  %v14584_v32 = vadd.f32 %v10723_v17, %v2437_v40  ;;  %v2429_v45 = vadd.f32 %v2428_v42, %v14082_v15  ;;  %v18322_v31 = vld [vmem:[#allocation46_spill] sm:$0xff]  ;;  %v18324_v17 = vld [vmem:[#allocation239_spill] sm:$0xff]  ;;  %v18325_v15 = vld [vmem:[#allocation45_spill] sm:$0xff] }
 0x1cb   : > { %v10594_v61 = vpop.f32.mrf.mxu1 }
 0x1cc   : > { %18318 = vst [vmem:[#allocation137_spill] sm:$0xff] %v14584_v32  ;;  %v10727_v19 = vpop.f32.mrf.mxu0  ;;  %10954 = vmatmul.mubr.msk.bf16.gmra.mxu0 %vm1265_vm3, %v18319_v9  ;;  %v14589_v35 = vadd.f32 %v3651_v1, %v2429_v45  ;;  %v2440_v8 = vadd.f32 %v10594_v61, %v18321_v28  ;;  %v18327_v45 = vld [vmem:[#allocation48_spill] sm:$0xff] }
 0x1cd   : > { %10957 = vmatprep.mubr.msk.bf16.mxu0 %vm1265_vm3, %v18322_v31  ;;  %v2431_v16 = vpop.f32.mrf.mxu1 }
 0x1ce   : > { %18320 = vst [vmem:[#allocation138_spill] sm:$0xff] %v14589_v35  ;;  %v3667_v10 = vpop.f32.mrf.mxu0  ;;  %v14594_v3 = vadd.f32 %v10724_v7, %v2440_v8  ;;  %v2432_v40 = vadd.f32 %v2431_v16, %v18324_v17  ;;  %v18329_v17 = vld [vmem:[#allocation51_spill] sm:$0xff] }
 0x1cf   : > { %v10597_v32 = vpop.f32.mrf.mxu1  ;;  %10824 = vmatmul.mubr.msk.bf16.gmra.mxu1 %vm1265_vm3, %v18325_v15 }
 0x1d0   : > { %18323 = vst [vmem:[#allocation229_spill] sm:$0xff] %v14594_v3  ;;  %v10728_v42 = vpop.f32.mrf.mxu0  ;;  %v14599_v2 = vadd.f32 %v3654_v14, %v2432_v40  ;;  %v2453_v1 = vadd.f32 %v10597_v32, %v14119_v39  ;;  %10827 = vmatprep.mubr.msk.bf16.mxu1 %vm1265_vm3, %v18327_v45  ;;  %v18331_v14 = vld [vmem:[#allocation245_spill] sm:$0xff] }
 0x1d1   : > { %v2444_v61 = vpop.f32.mrf.mxu1 }
 0x1d2   : > { %18326 = vst [vmem:[#allocation232_spill] sm:$0xff] %v14599_v2  ;;  %v3670_v28 = vpop.f32.mrf.mxu0  ;;  %v14604_v31 = vadd.f32 %v10727_v19, %v2453_v1  ;;  %v2445_v7 = vadd.f32 %v2444_v61, %v14126_v37  ;;  %v18332_v2 = vld [vmem:[#allocation56_spill] sm:$0xff]  ;;  %v18334_v19 = vld [vmem:[#allocation247_spill] sm:$0xff] }
 0x1d3   : > { %v10598_v8 = vpop.f32.mrf.mxu1  ;;  %v18335_v37 = vld [vmem:[#allocation36_spill] sm:$0xff] }
 0x1d4   : > { %18328 = vst [vmem:[#allocation145_spill] sm:$0xff] %v14604_v31  ;;  %v10731_v16 = vpop.f32.mrf.mxu0  ;;  %10958 = vmatmul.mubr.msk.bf16.gmra.mxu0 %vm1265_vm3, %v18329_v17  ;;  %v14609_v9 = vadd.f32 %v3667_v10, %v2445_v7  ;;  %v2456_v40 = vadd.f32 %v10598_v8, %v18331_v14  ;;  %v18337_v10 = vld [vmem:[#allocation250_spill] sm:$0xff]  ;;  %v18338_v17 = vld [vmem:[#allocation52_spill] sm:$0xff] }
 0x1d5   : > { %10961 = vmatprep.mubr.msk.bf16.mxu0 %vm1265_vm3, %v18332_v2  ;;  %v2447_v39 = vpop.f32.mrf.mxu1 }
 0x1d6   : > { %18330 = vst [vmem:[#allocation146_spill] sm:$0xff] %v14609_v9  ;;  %v3683_v32 = vpop.f32.mrf.mxu0  ;;  %v14614_v3 = vadd.f32 %v10728_v42, %v2456_v40  ;;  %v2448_v1 = vadd.f32 %v2447_v39, %v18334_v19  ;;  %v18340_v42 = vld [vmem:[#allocation254_spill] sm:$0xff]  ;;  %v18341_v19 = vld [vmem:[#allocation61_spill] sm:$0xff] }
 0x1d7   : > { %v10601_v31 = vpop.f32.mrf.mxu1  ;;  %10828 = vmatmul.mubr.msk.bf16.gmra.mxu1 %vm1265_vm3, %v18335_v37 }
 0x1d8   : > { %18333 = vst [vmem:[#allocation236_spill] sm:$0xff] %v14614_v3  ;;  %v10732_v61 = vpop.f32.mrf.mxu0  ;;  %v14619_v35 = vadd.f32 %v3670_v28, %v2448_v1  ;;  %v2469_v7 = vadd.f32 %v10601_v31, %v18337_v10  ;;  %10831 = vmatprep.mubr.msk.bf16.mxu1 %vm1265_vm3, %v18338_v17  ;;  %v18343_v28 = vld [vmem:[#allocation256_spill] sm:$0xff] }
 0x1d9   : > { %v2460_v8 = vpop.f32.mrf.mxu1 }
 0x1da   : > { %18336 = vst [vmem:[#allocation239_spill] sm:$0xff] %v14619_v35  ;;  %v3686_v14 = vpop.f32.mrf.mxu0  ;;  %v14624_v2 = vadd.f32 %v10731_v16, %v2469_v7  ;;  %v2461_v40 = vadd.f32 %v2460_v8, %v18340_v42  ;;  %v18344_v35 = vld [vmem:[#allocation66_spill] sm:$0xff]  ;;  %v18346_v16 = vld [vmem:[#allocation259_spill] sm:$0xff]  ;;  %v18347_v8 = vld [vmem:[#allocation68_spill] sm:$0xff] }
 0x1db   : > { %v10602_v3 = vpop.f32.mrf.mxu1 }
 0x1dc   : > { %18339 = vst [vmem:[#allocation245_spill] sm:$0xff] %v14624_v2  ;;  %v10735_v39 = vpop.f32.mrf.mxu0  ;;  %10962 = vmatmul.mubr.msk.bf16.gmra.mxu0 %vm1265_vm3, %v18341_v19  ;;  %v14629_v9 = vadd.f32 %v3683_v32, %v2461_v40  ;;  %v2472_v1 = vadd.f32 %v10602_v3, %v18343_v28  ;;  %v18349_v32 = vld [vmem:[#allocation260_spill] sm:$0xff]  ;;  %v18350_v19 = vld [vmem:[#allocation153_spill] sm:$0xff] }
 0x1dd   : > { %10965 = vmatprep.mubr.msk.bf16.mxu0 %vm1265_vm3, %v18344_v35  ;;  %v2463_v31 = vpop.f32.mrf.mxu1 }
 0x1de   : > { %18342 = vst [vmem:[#allocation247_spill] sm:$0xff] %v14629_v9  ;;  %v3699_v10 = vpop.f32.mrf.mxu0  ;;  %v14634_v17 = vadd.f32 %v10732_v61, %v2472_v1  ;;  %v2464_v7 = vadd.f32 %v2463_v31, %v18346_v16  ;;  %v18352_v61 = vld [vmem:[#allocation263_spill] sm:$0xff] }
 0x1df   : > { %v10605_v2 = vpop.f32.mrf.mxu1  ;;  %10832 = vmatmul.mubr.msk.bf16.gmra.mxu1 %vm1265_vm3, %v18347_v8  ;;  %v18353_v16 = vld [vmem:[#allocation71_spill] sm:$0xff] }
 0x1e0   : > { %18345 = vst [vmem:[#allocation250_spill] sm:$0xff] %v14634_v17  ;;  %v10736_v42 = vpop.f32.mrf.mxu0  ;;  %v14639_v37 = vadd.f32 %v3686_v14, %v2464_v7  ;;  %v2485_v40 = vadd.f32 %v10605_v2, %v18349_v32  ;;  %10835 = vmatprep.mubr.msk.bf16.mxu1 %vm1265_vm3, %v18350_v19  ;;  %v18355_v14 = vld [vmem:[#allocation265_spill] sm:$0xff] }
 0x1e1   : > { %v2476_v3 = vpop.f32.mrf.mxu1 }
 0x1e2   : > { %18348 = vst [vmem:[#allocation254_spill] sm:$0xff] %v14639_v37  ;;  %v3702_v28 = vpop.f32.mrf.mxu0  ;;  %v14644_v35 = vadd.f32 %v10735_v39, %v2485_v40  ;;  %v2477_v1 = vadd.f32 %v2476_v3, %v18352_v61  ;;  %v18356_v37 = vld [vmem:[#allocation76_spill] sm:$0xff]  ;;  %v18359_v3 = vld [vmem:[#allocation75_spill] sm:$0xff] }
 0x1e3   : > { %v10606_v17 = vpop.f32.mrf.mxu1  ;;  %v18358_v39 = vld [vmem:[#allocation268_spill] sm:$0xff] }
 0x1e4   : > { %18351 = vst [vmem:[#allocation256_spill] sm:$0xff] %v14644_v35  ;;  %v10739_v31 = vpop.f32.mrf.mxu0  ;;  %10966 = vmatmul.mubr.msk.bf16.gmra.mxu0 %vm1265_vm3, %v18353_v16  ;;  %v14649_v9 = vadd.f32 %v3699_v10, %v2477_v1  ;;  %v2488_v7 = vadd.f32 %v10606_v17, %v18355_v14  ;;  %v18361_v10 = vld [vmem:[#allocation55_spill] sm:$0xff]  ;;  %v18362_v16 = vld [vmem:[#allocation158_spill] sm:$0xff] }
 0x1e5   : > { %10969 = vmatprep.mubr.msk.bf16.mxu0 %vm1265_vm3, %v18356_v37  ;;  %v2479_v2 = vpop.f32.mrf.mxu1 }
 0x1e6   : > { %18354 = vst [vmem:[#allocation259_spill] sm:$0xff] %v14649_v9  ;;  %v3715_v32 = vpop.f32.mrf.mxu0  ;;  %v14654_v19 = vadd.f32 %v10736_v42, %v2488_v7  ;;  %v2480_v40 = vadd.f32 %v2479_v2, %v18358_v39  ;;  %v18364_v42 = vld [vmem:[#allocation40_spill] sm:$0xff]  ;;  %v18365_v39 = vld [vmem:[#allocation81_spill] sm:$0xff] }
 0x1e7   : > { %v10609_v35 = vpop.f32.mrf.mxu1  ;;  %10836 = vmatmul.mubr.msk.bf16.gmra.mxu1 %vm1265_vm3, %v18359_v3 }
 0x1e8   : > { %18357 = vst [vmem:[#allocation260_spill] sm:$0xff] %v14654_v19  ;;  %v10740_v61 = vpop.f32.mrf.mxu0  ;;  %v14659_v8 = vadd.f32 %v3702_v28, %v2480_v40  ;;  %v2501_v1 = vadd.f32 %v10609_v35, %v18361_v10  ;;  %10839 = vmatprep.mubr.msk.bf16.mxu1 %vm1265_vm3, %v18362_v16  ;;  %v18367_v28 = vld [vmem:[#allocation54_spill] sm:$0xff] }
 0x1e9   : > { %v2492_v17 = vpop.f32.mrf.mxu1 }
 0x1ea   : > { %18360 = vst [vmem:[#allocation263_spill] sm:$0xff] %v14659_v8  ;;  %v3718_v14 = vpop.f32.mrf.mxu0  ;;  %v14664_v37 = vadd.f32 %v10739_v31, %v2501_v1  ;;  %v2493_v7 = vadd.f32 %v2492_v17, %v18364_v42  ;;  %v18368_v8 = vld [vmem:[#allocation86_spill] sm:$0xff]  ;;  %v18371_v17 = vld [vmem:[#allocation85_spill] sm:$0xff] }
 0x1eb   : > { %v10610_v19 = vpop.f32.mrf.mxu1  ;;  %v18370_v31 = vld [vmem:[#allocation62_spill] sm:$0xff] }
 0x1ec   : > { %18363 = vst [vmem:[#allocation265_spill] sm:$0xff] %v14664_v37  ;;  %v10743_v2 = vpop.f32.mrf.mxu0  ;;  %10970 = vmatmul.mubr.msk.bf16.gmra.mxu0 %vm1265_vm3, %v18365_v39  ;;  %v14669_v9 = vadd.f32 %v3715_v32, %v2493_v7  ;;  %v2504_v40 = vadd.f32 %v10610_v19, %v18367_v28  ;;  %v18373_v32 = vld [vmem:[#allocation154_spill] sm:$0xff]  ;;  %v18374_v39 = vld [vmem:[#allocation165_spill] sm:$0xff] }
 0x1ed   : > { %10973 = vmatprep.mubr.msk.bf16.mxu0 %vm1265_vm3, %v18368_v8  ;;  %v2495_v35 = vpop.f32.mrf.mxu1 }
 0x1ee   : > { %18366 = vst [vmem:[#allocation268_spill] sm:$0xff] %v14669_v9  ;;  %v3731_v10 = vpop.f32.mrf.mxu0  ;;  %v14674_v16 = vadd.f32 %v10740_v61, %v2504_v40  ;;  %v2496_v1 = vadd.f32 %v2495_v35, %v18370_v31  ;;  %v18376_v61 = vld [vmem:[#allocation156_spill] sm:$0xff]  ;;  %v18377_v31 = vld [vmem:[#allocation90_spill] sm:$0xff] }
 0x1ef   : > { %v10613_v37 = vpop.f32.mrf.mxu1  ;;  %10840 = vmatmul.mubr.msk.bf16.gmra.mxu1 %vm1265_vm3, %v18371_v17 }
 0x1f0   : > { %18369 = vst [vmem:[#allocation55_spill] sm:$0xff] %v14674_v16  ;;  %v10744_v42 = vpop.f32.mrf.mxu0  ;;  %v14679_v3 = vadd.f32 %v3718_v14, %v2496_v1  ;;  %v2517_v7 = vadd.f32 %v10613_v37, %v18373_v32  ;;  %10843 = vmatprep.mubr.msk.bf16.mxu1 %vm1265_vm3, %v18374_v39  ;;  %v18379_v14 = vld [vmem:[#allocation72_spill] sm:$0xff] }
 0x1f1   : > { %v2508_v19 = vpop.f32.mrf.mxu1 }
 0x1f2   : > { %18372 = vst [vmem:[#allocation40_spill] sm:$0xff] %v14679_v3  ;;  %v3734_v28 = vpop.f32.mrf.mxu0  ;;  %v14684_v8 = vadd.f32 %v10743_v2, %v2517_v7  ;;  %v2509_v40 = vadd.f32 %v2508_v19, %v18376_v61  ;;  %v18380_v3 = vld [vmem:[#allocation94_spill] sm:$0xff]  ;;  %v18382_v2 = vld [vmem:[#allocation77_spill] sm:$0xff] }
 0x1f3   : > { %v10614_v16 = vpop.f32.mrf.mxu1  ;;  %v18383_v19 = vld [vmem:[#allocation170_spill] sm:$0xff] }
 0x1f4   : > { %18375 = vst [vmem:[#allocation54_spill] sm:$0xff] %v14684_v8  ;;  %v10747_v35 = vpop.f32.mrf.mxu0  ;;  %10974 = vmatmul.mubr.msk.bf16.gmra.mxu0 %vm1265_vm3, %v18377_v31  ;;  %v14689_v9 = vadd.f32 %v3731_v10, %v2509_v40  ;;  %v2520_v1 = vadd.f32 %v10614_v16, %v18379_v14  ;;  %v18385_v10 = vld [vmem:[#allocation162_spill] sm:$0xff]  ;;  %v18386_v31 = vld [vmem:[#allocation173_spill] sm:$0xff] }
 0x1f5   : > { %10977 = vmatprep.mubr.msk.bf16.mxu0 %vm1265_vm3, %v18380_v3  ;;  %v2511_v37 = vpop.f32.mrf.mxu1 }
 0x1f6   : > { %18378 = vst [vmem:[#allocation62_spill] sm:$0xff] %v14689_v9  ;;  %v3747_v32 = vpop.f32.mrf.mxu0  ;;  %v14694_v39 = vadd.f32 %v10744_v42, %v2520_v1  ;;  %v2512_v7 = vadd.f32 %v2511_v37, %v18382_v2  ;;  %v18388_v42 = vld [vmem:[#allocation74_spill] sm:$0xff]  ;;  %v18389_v2 = vld [vmem:[#allocation97_spill] sm:$0xff] }
 0x1f7   : > { %v10617_v8 = vpop.f32.mrf.mxu1  ;;  %10844 = vmatmul.mubr.msk.bf16.gmra.mxu1 %vm1265_vm3, %v18383_v19 }
 0x1f8   : > { %18381 = vst [vmem:[#allocation154_spill] sm:$0xff] %v14694_v39  ;;  %v10748_v61 = vpop.f32.mrf.mxu0  ;;  %v14699_v17 = vadd.f32 %v3734_v28, %v2512_v7  ;;  %v2533_v40 = vadd.f32 %v10617_v8, %v18385_v10  ;;  %10847 = vmatprep.mubr.msk.bf16.mxu1 %vm1265_vm3, %v18386_v31  ;;  %v18391_v28 = vld [vmem:[#allocation82_spill] sm:$0xff] }
 0x1f9   : > { %v2524_v16 = vpop.f32.mrf.mxu1 }
 0x1fa   : > { %18384 = vst [vmem:[#allocation156_spill] sm:$0xff] %v14699_v17  ;;  %v3750_v14 = vpop.f32.mrf.mxu0  ;;  %v14704_v3 = vadd.f32 %v10747_v35, %v2533_v40  ;;  %v2525_v1 = vadd.f32 %v2524_v16, %v18388_v42  ;;  %v18392_v17 = vld [vmem:[#allocation101_spill] sm:$0xff]  ;;  %v18394_v35 = vld [vmem:[#allocation166_spill] sm:$0xff]  ;;  %v18395_v16 = vld [vmem:[#allocation179_spill] sm:$0xff] }
 0x1fb   : > { %v10618_v39 = vpop.f32.mrf.mxu1 }
 0x1fc   : > { %18387 = vst [vmem:[#allocation72_spill] sm:$0xff] %v14704_v3  ;;  %v10751_v37 = vpop.f32.mrf.mxu0  ;;  %10978 = vmatmul.mubr.msk.bf16.gmra.mxu0 %vm1265_vm3, %v18389_v2  ;;  %v14709_v9 = vadd.f32 %v3747_v32, %v2525_v1  ;;  %v2536_v7 = vadd.f32 %v10618_v39, %v18391_v28  ;;  %v18397_v32 = vld [vmem:[#allocation168_spill] sm:$0xff]  ;;  %v18398_v2 = vld [vmem:[#allocation182_spill] sm:$0xff] }
 0x1fd   : > { %10981 = vmatprep.mubr.msk.bf16.mxu0 %vm1265_vm3, %v18392_v17  ;;  %v2527_v8 = vpop.f32.mrf.mxu1 }
 0x1fe   : > { %18390 = vst [vmem:[#allocation77_spill] sm:$0xff] %v14709_v9  ;;  %v3763_v10 = vpop.f32.mrf.mxu0  ;;  %v14714_v31 = vadd.f32 %v10748_v61, %v2536_v7  ;;  %v2528_v40 = vadd.f32 %v2527_v8, %v18394_v35  ;;  %v18400_v61 = vld [vmem:[#allocation80_spill] sm:$0xff]  ;;  %v18401_v35 = vld [vmem:[#allocation107_spill] sm:$0xff] }
 0x1ff   : > { %v10621_v3 = vpop.f32.mrf.mxu1  ;;  %10848 = vmatmul.mubr.msk.bf16.gmra.mxu1 %vm1265_vm3, %v18395_v16 }
 0x200   : > { %18393 = vst [vmem:[#allocation162_spill] sm:$0xff] %v14714_v31  ;;  %v10752_v42 = vpop.f32.mrf.mxu0  ;;  %v14719_v19 = vadd.f32 %v3750_v14, %v2528_v40  ;;  %v2549_v1 = vadd.f32 %v10621_v3, %v18397_v32  ;;  %10851 = vmatprep.mubr.msk.bf16.mxu1 %vm1265_vm3, %v18398_v2  ;;  %v18403_v14 = vld [vmem:[#allocation93_spill] sm:$0xff] }
 0x201   : > { %v2540_v39 = vpop.f32.mrf.mxu1 }
 0x202   : > { %18396 = vst [vmem:[#allocation74_spill] sm:$0xff] %v14719_v19  ;;  %v3766_v28 = vpop.f32.mrf.mxu0  ;;  %v14724_v17 = vadd.f32 %v10751_v37, %v2549_v1  ;;  %v2541_v7 = vadd.f32 %v2540_v39, %v18400_v61  ;;  %v18404_v19 = vld [vmem:[#allocation110_spill] sm:$0xff]  ;;  %v18406_v37 = vld [vmem:[#allocation172_spill] sm:$0xff] }
 0x203   : > { %v10622_v31 = vpop.f32.mrf.mxu1  ;;  %v18407_v39 = vld [vmem:[#allocation188_spill] sm:$0xff] }
 0x204   : > { %18399 = vst [vmem:[#allocation82_spill] sm:$0xff] %v14724_v17  ;;  %v10755_v8 = vpop.f32.mrf.mxu0  ;;  %10982 = vmatmul.mubr.msk.bf16.gmra.mxu0 %vm1265_vm3, %v18401_v35  ;;  %v14729_v9 = vadd.f32 %v3763_v10, %v2541_v7  ;;  %v2552_v40 = vadd.f32 %v10622_v31, %v18403_v14  ;;  %v18409_v10 = vld [vmem:[#allocation176_spill] sm:$0xff]  ;;  %v18410_v35 = vld [vmem:[#allocation102_spill] sm:$0xff] }
 0x205   : > { %10985 = vmatprep.mubr.msk.bf16.mxu0 %vm1265_vm3, %v18404_v19  ;;  %v2543_v3 = vpop.f32.mrf.mxu1 }
 0x206   : > { %18402 = vst [vmem:[#allocation166_spill] sm:$0xff] %v14729_v9  ;;  %v3779_v32 = vpop.f32.mrf.mxu0  ;;  %v14734_v2 = vadd.f32 %v10752_v42, %v2552_v40  ;;  %v2544_v1 = vadd.f32 %v2543_v3, %v18406_v37  ;;  %v18412_v42 = vld [vmem:[#allocation89_spill] sm:$0xff]  ;;  %v18413_v37 = vld [vmem:[#allocation115_spill] sm:$0xff] }
 0x207   : > { %v10625_v17 = vpop.f32.mrf.mxu1  ;;  %10852 = vmatmul.mubr.msk.bf16.gmra.mxu1 %vm1265_vm3, %v18407_v39 }
 0x208   : > { %18405 = vst [vmem:[#allocation168_spill] sm:$0xff] %v14734_v2  ;;  %v10756_v61 = vpop.f32.mrf.mxu0  ;;  %v14739_v16 = vadd.f32 %v3766_v28, %v2544_v1  ;;  %v2565_v7 = vadd.f32 %v10625_v17, %v18409_v10  ;;  %10855 = vmatprep.mubr.msk.bf16.mxu1 %vm1265_vm3, %v18410_v35  ;;  %v18415_v28 = vld [vmem:[#allocation178_spill] sm:$0xff] }
 0x209   : > { %v2556_v31 = vpop.f32.mrf.mxu1 }
 0x20a   : > { %18408 = vst [vmem:[#allocation80_spill] sm:$0xff] %v14739_v16  ;;  %v3782_v14 = vpop.f32.mrf.mxu0  ;;  %v14744_v19 = vadd.f32 %v10755_v8, %v2565_v7  ;;  %v2557_v40 = vadd.f32 %v2556_v31, %v18412_v42  ;;  %v18416_v16 = vld [vmem:[#allocation117_spill] sm:$0xff]  ;;  %v18419_v31 = vld [vmem:[#allocation103_spill] sm:$0xff] }
 0x20b   : > { %v10626_v2 = vpop.f32.mrf.mxu1  ;;  %v18418_v8 = vld [vmem:[#allocation181_spill] sm:$0xff] }
 0x20c   : > { %18411 = vst [vmem:[#allocation93_spill] sm:$0xff] %v14744_v19  ;;  %v10759_v3 = vpop.f32.mrf.mxu0  ;;  %10986 = vmatmul.mubr.msk.bf16.gmra.mxu0 %vm1265_vm3, %v18413_v37  ;;  %v14749_v9 = vadd.f32 %v3779_v32, %v2557_v40  ;;  %v2568_v1 = vadd.f32 %v10626_v2, %v18415_v28  ;;  %v18421_v32 = vld [vmem:[#allocation185_spill] sm:$0xff]  ;;  %v18422_v37 = vld [vmem:[#allocation111_spill] sm:$0xff] }
 0x20d   : > { %10989 = vmatprep.mubr.msk.bf16.mxu0 %vm1265_vm3, %v18416_v16  ;;  %v2559_v17 = vpop.f32.mrf.mxu1 }
 0x20e   : > { %18414 = vst [vmem:[#allocation172_spill] sm:$0xff] %v14749_v9  ;;  %v3795_v10 = vpop.f32.mrf.mxu0  ;;  %v14754_v35 = vadd.f32 %v10756_v61, %v2568_v1  ;;  %v2560_v7 = vadd.f32 %v2559_v17, %v18418_v8  ;;  %v18424_v61 = vld [vmem:[#allocation98_spill] sm:$0xff]  ;;  %v18425_v8 = vld [vmem:[#allocation119_spill] sm:$0xff] }
 0x20f   : > { %v10629_v19 = vpop.f32.mrf.mxu1  ;;  %10856 = vmatmul.mubr.msk.bf16.gmra.mxu1 %vm1265_vm3, %v18419_v31 }
 0x210   : > { %18417 = vst [vmem:[#allocation176_spill] sm:$0xff] %v14754_v35  ;;  %v10760_v42 = vpop.f32.mrf.mxu0  ;;  %v14759_v39 = vadd.f32 %v3782_v14, %v2560_v7  ;;  %v2581_v40 = vadd.f32 %v10629_v19, %v18421_v32  ;;  %10859 = vmatprep.mubr.msk.bf16.mxu1 %vm1265_vm3, %v18422_v37  ;;  %v18427_v14 = vld [vmem:[#allocation187_spill] sm:$0xff] }
 0x211   : > { %v2572_v2 = vpop.f32.mrf.mxu1 }
 0x212   : > { %18420 = vst [vmem:[#allocation89_spill] sm:$0xff] %v14759_v39  ;;  %v3798_v28 = vpop.f32.mrf.mxu0  ;;  %v14764_v16 = vadd.f32 %v10759_v3, %v2581_v40  ;;  %v2573_v1 = vadd.f32 %v2572_v2, %v18424_v61  ;;  %v18428_v39 = vld [vmem:[#allocation3_spill] sm:$0xff]  ;;  %v18430_v3 = vld [vmem:[#allocation190_spill] sm:$0xff]  ;;  %v18431_v2 = vld [vmem:[#allocation113_spill] sm:$0xff] }
 0x213   : > { %v10630_v35 = vpop.f32.mrf.mxu1 }
 0x214   : > { %18423 = vst [vmem:[#allocation178_spill] sm:$0xff] %v14764_v16  ;;  %v10763_v17 = vpop.f32.mrf.mxu0  ;;  %10990 = vmatmul.mubr.msk.bf16.gmra.mxu0 %vm1265_vm3, %v18425_v8  ;;  %v14769_v9 = vadd.f32 %v3795_v10, %v2573_v1  ;;  %v2584_v7 = vadd.f32 %v10630_v35, %v18427_v14  ;;  %v18433_v10 = vld [vmem:[#allocation193_spill] sm:$0xff]  ;;  %v18434_v8 = vld [vmem:[#allocation199_spill] sm:$0xff] }
 0x215   : > { %10993 = vmatprep.mubr.msk.bf16.mxu0 %vm1265_vm3, %v18428_v39  ;;  %v2575_v19 = vpop.f32.mrf.mxu1 }
 0x216   : > { %18426 = vst [vmem:[#allocation181_spill] sm:$0xff] %v14769_v9  ;;  %v3811_v32 = vpop.f32.mrf.mxu0  ;;  %v14774_v37 = vadd.f32 %v10760_v42, %v2584_v7  ;;  %v2576_v40 = vadd.f32 %v2575_v19, %v18430_v3  ;;  %v18436_v42 = vld [vmem:[#allocation106_spill] sm:$0xff]  ;;  %v18437_v3 = vld [vmem:[#allocation5_spill] sm:$0xff] }
 0x217   : > { %v10633_v16 = vpop.f32.mrf.mxu1  ;;  %10860 = vmatmul.mubr.msk.bf16.gmra.mxu1 %vm1265_vm3, %v18431_v2 }
 0x218   : > { %18429 = vst [vmem:[#allocation185_spill] sm:$0xff] %v14774_v37  ;;  %v10764_v61 = vpop.f32.mrf.mxu0  ;;  %v14779_v31 = vadd.f32 %v3798_v28, %v2576_v40  ;;  %v2597_v1 = vadd.f32 %v10633_v16, %v18433_v10  ;;  %10863 = vmatprep.mubr.msk.bf16.mxu1 %vm1265_vm3, %v18434_v8  ;;  %v18439_v28 = vld [vmem:[#allocation108_spill] sm:$0xff] }
 0x219   : > { %v2588_v35 = vpop.f32.mrf.mxu1 }
 0x21a   : > { %18432 = vst [vmem:[#allocation98_spill] sm:$0xff] %v14779_v31  ;;  %v3814_v14 = vpop.f32.mrf.mxu0  ;;  %v14784_v39 = vadd.f32 %v10763_v17, %v2597_v1  ;;  %v2589_v7 = vadd.f32 %v2588_v35, %v18436_v42  ;;  %v18440_v31 = vld [vmem:[#allocation8_spill] sm:$0xff]  ;;  %v18442_v17 = vld [vmem:[#allocation2_spill] sm:$0xff] }
 0x21b   : > { %v10634_v37 = vpop.f32.mrf.mxu1  ;;  %v18443_v35 = vld [vmem:[#allocation204_spill] sm:$0xff] }
 0x21c   : > { %18435 = vst [vmem:[#allocation187_spill] sm:$0xff] %v14784_v39  ;;  %v10767_v19 = vpop.f32.mrf.mxu0  ;;  %10994 = vmatmul.mubr.msk.bf16.gmra.mxu0 %vm1265_vm3, %v18437_v3  ;;  %v14789_v9 = vadd.f32 %v3811_v32, %v2589_v7  ;;  %v2600_v40 = vadd.f32 %v10634_v37, %v18439_v28  ;;  %v18445_v32 = vld [vmem:[#allocation196_spill] sm:$0xff]  ;;  %v18446_v3 = vld [vmem:[#allocation206_spill] sm:$0xff] }
 0x21d   : > { %10997 = vmatprep.mubr.msk.bf16.mxu0 %vm1265_vm3, %v18440_v31  ;;  %v2591_v16 = vpop.f32.mrf.mxu1 }
 0x21e   : > { %18438 = vst [vmem:[#allocation190_spill] sm:$0xff] %v14789_v9  ;;  %v3827_v10 = vpop.f32.mrf.mxu0  ;;  %v14794_v8 = vadd.f32 %v10764_v61, %v2600_v40  ;;  %v2592_v1 = vadd.f32 %v2591_v16, %v18442_v17  ;;  %v18448_v61 = vld [vmem:[#allocation198_spill] sm:$0xff] }
 0x21f   : > { %v10637_v39 = vpop.f32.mrf.mxu1  ;;  %10864 = vmatmul.mubr.msk.bf16.gmra.mxu1 %vm1265_vm3, %v18443_v35  ;;  %v18449_v17 = vld [vmem:[#allocation10_spill] sm:$0xff] }
 0x220   : > { %18441 = vst [vmem:[#allocation193_spill] sm:$0xff] %v14794_v8  ;;  %v10768_v42 = vpop.f32.mrf.mxu0  ;;  %v14799_v2 = vadd.f32 %v3814_v14, %v2592_v1  ;;  %v2613_v7 = vadd.f32 %v10637_v39, %v18445_v32  ;;  %10867 = vmatprep.mubr.msk.bf16.mxu1 %vm1265_vm3, %v18446_v3  ;;  %v18451_v14 = vld [vmem:[#allocation4_spill] sm:$0xff] }
 0x221   : > { %v2604_v37 = vpop.f32.mrf.mxu1 }
 0x222   : > { %18444 = vst [vmem:[#allocation106_spill] sm:$0xff] %v14799_v2  ;;  %v3830_v28 = vpop.f32.mrf.mxu0  ;;  %v14804_v31 = vadd.f32 %v10767_v19, %v2613_v7  ;;  %v2605_v40 = vadd.f32 %v2604_v37, %v18448_v61  ;;  %v18452_v2 = vld [vmem:[#allocation13_spill] sm:$0xff]  ;;  %v18454_v19 = vld [vmem:[#allocation200_spill] sm:$0xff] }
 0x223   : > { %v10638_v8 = vpop.f32.mrf.mxu1  ;;  %v18455_v37 = vld [vmem:[#allocation212_spill] sm:$0xff] }
 0x224   : > { %18447 = vst [vmem:[#allocation108_spill] sm:$0xff] %v14804_v31  ;;  %v10771_v16 = vpop.f32.mrf.mxu0  ;;  %10998 = vmatmul.mubr.msk.bf16.gmra.mxu0 %vm1265_vm3, %v18449_v17  ;;  %v14809_v9 = vadd.f32 %v3827_v10, %v2605_v40  ;;  %v2616_v1 = vadd.f32 %v10638_v8, %v18451_v14  ;;  %v18457_v10 = vld [vmem:[#allocation202_spill] sm:$0xff]  ;;  %v18458_v17 = vld [vmem:[#allocation215_spill] sm:$0xff] }
 0x225   : > { %11001 = vmatprep.mubr.msk.bf16.mxu0 %vm1265_vm3, %v18452_v2  ;;  %v2607_v39 = vpop.f32.mrf.mxu1  ;;  %v14827_v8 = vld [vmem:[%s17112_s1 + $0xe] sm:$0x3] }
 0x226   : > { %18450 = vst [vmem:[#allocation2_spill] sm:$0xff] %v14809_v9  ;;  %v3843_v32 = vpop.f32.mrf.mxu0  ;;  %v14814_v3 = vadd.f32 %v10768_v42, %v2616_v1  ;;  %v2608_v7 = vadd.f32 %v2607_v39, %v18454_v19  ;;  %11591 = vmatprep.subr.msk.bf16.mxu1 %vm1458_vm0, %v14827_v8  ;;  %v18460_v39 = vld [vmem:[#allocation7_spill] sm:$0xff] }
 0x227   : > { %v10641_v31 = vpop.f32.mrf.mxu1  ;;  %10868 = vmatmul.mubr.msk.bf16.gmra.mxu1 %vm1265_vm3, %v18455_v37  ;;  %v18467_v37 = vld [vmem:[#allocation18_spill] sm:$0xff] }
 0x228   : > { %18453 = vst [vmem:[#allocation196_spill] sm:$0xff] %v14814_v3  ;;  %v10772_v61 = vpop.f32.mrf.mxu0  ;;  %v14819_v35 = vadd.f32 %v3830_v28, %v2608_v7  ;;  %v2629_v40 = vadd.f32 %v10641_v31, %v18457_v10  ;;  %10871 = vmatprep.mubr.msk.bf16.mxu1 %vm1265_vm3, %v18458_v17  ;;  %v14837_v31 = vld [vmem:[%s17112_s1 + $0x10] sm:$0x3]  ;;  %v18461_v10 = vld [vmem:[#allocation15_spill] sm:$0xff] }
 0x229   : > { %v2620_v42 = vpop.f32.mrf.mxu1  ;;  %11592 = vmatprep.subr.msk.bf16.mxu0 %vm1458_vm0, %v14837_v31  ;;  %v18466_v3 = vld [vmem:[#allocation207_spill] sm:$0xff] }
 0x22a   : > { %18456 = vst [vmem:[#allocation198_spill] sm:$0xff] %v14819_v35  ;;  %v3846_v14 = vpop.f32.mrf.mxu0  ;;  %v14831_v1 = vadd.f32 %v10771_v16, %v2629_v40  ;;  %v2621_v28 = vadd.f32 %v2620_v42, %v18460_v39  ;;  %v18463_v35 = vld [vmem:[#allocation205_spill] sm:$0xff] }
 0x22b   : > { %v10642_v19 = vpop.f32.mrf.mxu1  ;;  %v18464_v40 = vld [vmem:[#allocation17_spill] sm:$0xff] }
 0x22c   : > { %18459 = vst [vmem:[#allocation4_spill] sm:$0xff] %v14831_v1  ;;  %v10775_v7 = vpop.f32.mrf.mxu0  ;;  %11002 = vmatmul.mubr.msk.bf16.gmra.mxu0 %vm1265_vm3, %v18461_v10  ;;  %v14843_v2 = vadd.f32 %v3843_v32, %v2621_v28  ;;  %v2632_v16 = vadd.f32 %v10642_v19, %v18463_v35  ;;  %v18469_v32 = vld [vmem:[#allocation209_spill] sm:$0xff] }
 0x22d   : > { %11005 = vmatprep.mubr.msk.bf16.mxu0 %vm1265_vm3, %v18464_v40  ;;  %v2623_v42 = vpop.f32.mrf.mxu1 }
 0x22e   : > { %18462 = vst [vmem:[#allocation200_spill] sm:$0xff] %v14843_v2  ;;  %v3859_v39 = vpop.f32.mrf.mxu0  ;;  %v14848_v1 = vadd.f32 %v10772_v61, %v2632_v16  ;;  %v2624_v9 = vadd.f32 %v2623_v42, %v18466_v3  ;;  %v18470_v2 = vld [vmem:[#allocation222_spill] sm:$0xff]  ;;  %v18472_v61 = vld [vmem:[#allocation12_spill] sm:$0xff]  ;;  %v18473_v42 = vld [vmem:[#allocation21_spill] sm:$0xff] }
 0x22f   : > { %v10645_v17 = vpop.f32.mrf.mxu1  ;;  %10872 = vmatmul.mubr.msk.bf16.gmra.mxu1 %vm1265_vm3, %v18467_v37 }
 0x230   : > { %18465 = vst [vmem:[#allocation202_spill] sm:$0xff] %v14848_v1  ;;  %v10776_v10 = vpop.f32.mrf.mxu0  ;;  %v14853_v45 = vadd.f32 %v3846_v14, %v2624_v9  ;;  %v2645_v28 = vadd.f32 %v10645_v17, %v18469_v32  ;;  %10875 = vmatprep.mubr.msk.bf16.mxu1 %vm1265_vm3, %v18470_v2  ;;  %v18475_v9 = vld [vmem:[#allocation214_spill] sm:$0xff] }
 0x231   : > { %v2636_v35 = vpop.f32.mrf.mxu1 }
 0x232   : > { %18468 = vst [vmem:[#allocation7_spill] sm:$0xff] %v14853_v45  ;;  %v3862_v19 = vpop.f32.mrf.mxu0  ;;  %v14858_v40 = vadd.f32 %v10775_v7, %v2645_v28  ;;  %v2637_v16 = vadd.f32 %v2636_v35, %v18472_v61  ;;  %v18476_v45 = vld [vmem:[#allocation25_spill] sm:$0xff]  ;;  %v18479_v35 = vld [vmem:[#allocation24_spill] sm:$0xff] }
 0x233   : > { %v10646_v1 = vpop.f32.mrf.mxu1  ;;  %v18478_v7 = vld [vmem:[#allocation217_spill] sm:$0xff] }
 0x234   : > { %18471 = vst [vmem:[#allocation205_spill] sm:$0xff] %v14858_v40  ;;  %v10779_v3 = vpop.f32.mrf.mxu0  ;;  %11006 = vmatmul.mubr.msk.bf16.gmra.mxu0 %vm1265_vm3, %v18473_v42  ;;  %v14863_v37 = vadd.f32 %v3859_v39, %v2637_v16  ;;  %v2648_v14 = vadd.f32 %v10646_v1, %v18475_v9  ;;  %v18481_v39 = vld [vmem:[#allocation219_spill] sm:$0xff]  ;;  %v18482_v42 = vld [vmem:[#allocation230_spill] sm:$0xff] }
 0x235   : > { %11009 = vmatprep.mubr.msk.bf16.mxu0 %vm1265_vm3, %v18476_v45  ;;  %v2639_v17 = vpop.f32.mrf.mxu1 }
 0x236   : > { %18474 = vst [vmem:[#allocation207_spill] sm:$0xff] %v14863_v37  ;;  %v3875_v32 = vpop.f32.mrf.mxu0  ;;  %v14868_v2 = vadd.f32 %v10776_v10, %v2648_v14  ;;  %v2640_v28 = vadd.f32 %v2639_v17, %v18478_v7  ;;  %v18484_v10 = vld [vmem:[#allocation220_spill] sm:$0xff] }
 0x237   : > { %v10649_v40 = vpop.f32.mrf.mxu1  ;;  %10876 = vmatmul.mubr.msk.bf16.gmra.mxu1 %vm1265_vm3, %v18479_v35  ;;  %v18485_v7 = vld [vmem:[#allocation28_spill] sm:$0xff] }
 0x238   : > { %18477 = vst [vmem:[#allocation209_spill] sm:$0xff] %v14868_v2  ;;  %v10780_v61 = vpop.f32.mrf.mxu0  ;;  %v14873_v15 = vadd.f32 %v3862_v19, %v2640_v28  ;;  %v2661_v16 = vadd.f32 %v10649_v40, %v18481_v39  ;;  %10879 = vmatprep.mubr.msk.bf16.mxu1 %vm1265_vm3, %v18482_v42  ;;  %v18487_v19 = vld [vmem:[#allocation223_spill] sm:$0xff] }
 0x239   : > { %v2652_v1 = vpop.f32.mrf.mxu1 }
 0x23a   : > { %18480 = vst [vmem:[#allocation12_spill] sm:$0xff] %v14873_v15  ;;  %v3878_v9 = vpop.f32.mrf.mxu0  ;;  %v14878_v45 = vadd.f32 %v10779_v3, %v2661_v16  ;;  %v2653_v14 = vadd.f32 %v2652_v1, %v18484_v10  ;;  %v18488_v15 = vld [vmem:[#allocation31_spill] sm:$0xff]  ;;  %v18490_v3 = vld [vmem:[#allocation225_spill] sm:$0xff]  ;;  %v18491_v1 = vld [vmem:[#allocation32_spill] sm:$0xff] }
 0x23b   : > { %v10650_v2 = vpop.f32.mrf.mxu1 }
 0x23c   : > { %18483 = vst [vmem:[#allocation214_spill] sm:$0xff] %v14878_v45  ;;  %v10783_v17 = vpop.f32.mrf.mxu0  ;;  %11010 = vmatmul.mubr.msk.bf16.gmra.mxu0 %vm1265_vm3, %v18485_v7  ;;  %v14883_v37 = vadd.f32 %v3875_v32, %v2653_v14  ;;  %v2664_v28 = vadd.f32 %v10650_v2, %v18487_v19  ;;  %v18493_v32 = vld [vmem:[#allocation227_spill] sm:$0xff]  ;;  %v18494_v7 = vld [vmem:[#allocation237_spill] sm:$0xff] }
 0x23d   : > { %11013 = vmatprep.mubr.msk.bf16.mxu0 %vm1265_vm3, %v18488_v15  ;;  %v2655_v40 = vpop.f32.mrf.mxu1 }
 0x23e   : > { %18486 = vst [vmem:[#allocation217_spill] sm:$0xff] %v14883_v37  ;;  %v3891_v39 = vpop.f32.mrf.mxu0  ;;  %v14888_v42 = vadd.f32 %v10780_v61, %v2664_v28  ;;  %v2656_v16 = vadd.f32 %v2655_v40, %v18490_v3  ;;  %v18496_v61 = vld [vmem:[#allocation228_spill] sm:$0xff]  ;;  %v18497_v3 = vld [vmem:[#allocation35_spill] sm:$0xff] }
 0x23f   : > { %v10653_v45 = vpop.f32.mrf.mxu1  ;;  %10880 = vmatmul.mubr.msk.bf16.gmra.mxu1 %vm1265_vm3, %v18491_v1 }
 0x240   : > { %18489 = vst [vmem:[#allocation219_spill] sm:$0xff] %v14888_v42  ;;  %v10784_v10 = vpop.f32.mrf.mxu0  ;;  %v14893_v35 = vadd.f32 %v3878_v9, %v2656_v16  ;;  %v2677_v14 = vadd.f32 %v10653_v45, %v18493_v32  ;;  %10883 = vmatprep.mubr.msk.bf16.mxu1 %vm1265_vm3, %v18494_v7  ;;  %v18499_v9 = vld [vmem:[#allocation231_spill] sm:$0xff] }
 0x241   : > { %v2668_v2 = vpop.f32.mrf.mxu1 }
 0x242   : > { %18492 = vst [vmem:[#allocation220_spill] sm:$0xff] %v14893_v35  ;;  %v3894_v19 = vpop.f32.mrf.mxu0  ;;  %v14898_v15 = vadd.f32 %v10783_v17, %v2677_v14  ;;  %v2669_v28 = vadd.f32 %v2668_v2, %v18496_v61  ;;  %v18500_v35 = vld [vmem:[#allocation39_spill] sm:$0xff]  ;;  %v18502_v17 = vld [vmem:[#allocation233_spill] sm:$0xff]  ;;  %v18503_v2 = vld [vmem:[#allocation242_spill] sm:$0xff] }
 0x243   : > { %v10654_v42 = vpop.f32.mrf.mxu1 }
 0x244   : > { %18495 = vst [vmem:[#allocation223_spill] sm:$0xff] %v14898_v15  ;;  %v10787_v40 = vpop.f32.mrf.mxu0  ;;  %11014 = vmatmul.mubr.msk.bf16.gmra.mxu0 %vm1265_vm3, %v18497_v3  ;;  %v14903_v37 = vadd.f32 %v3891_v39, %v2669_v28  ;;  %v2680_v16 = vadd.f32 %v10654_v42, %v18499_v9  ;;  %v18505_v39 = vld [vmem:[#allocation235_spill] sm:$0xff] }
 0x245   : > { %11017 = vmatprep.mubr.msk.bf16.mxu0 %vm1265_vm3, %v18500_v35  ;;  %v2671_v45 = vpop.f32.mrf.mxu1  ;;  %v18506_v3 = vld [vmem:[#allocation243_spill] sm:$0xff] }
 0x246   : > { %18498 = vst [vmem:[#allocation225_spill] sm:$0xff] %v14903_v37  ;;  %v3907_v32 = vpop.f32.mrf.mxu0  ;;  %v14908_v7 = vadd.f32 %v10784_v10, %v2680_v16  ;;  %v2672_v14 = vadd.f32 %v2671_v45, %v18502_v17  ;;  %v18508_v10 = vld [vmem:[#allocation238_spill] sm:$0xff]  ;;  %v18509_v17 = vld [vmem:[#allocation43_spill] sm:$0xff] }
 0x247   : > { %v10657_v15 = vpop.f32.mrf.mxu1  ;;  %10884 = vmatmul.mubr.msk.bf16.gmra.mxu1 %vm1265_vm3, %v18503_v2 }
 0x248   : > { %18501 = vst [vmem:[#allocation227_spill] sm:$0xff] %v14908_v7  ;;  %v10788_v61 = vpop.f32.mrf.mxu0  ;;  %v14913_v1 = vadd.f32 %v3894_v19, %v2672_v14  ;;  %v2693_v28 = vadd.f32 %v10657_v15, %v18505_v39  ;;  %10887 = vmatprep.mubr.msk.bf16.mxu1 %vm1265_vm3, %v18506_v3  ;;  %v18511_v19 = vld [vmem:[#allocation240_spill] sm:$0xff] }
 0x249   : > { %v2684_v42 = vpop.f32.mrf.mxu1 }
 0x24a   : > { %18504 = vst [vmem:[#allocation228_spill] sm:$0xff] %v14913_v1  ;;  %v3910_v9 = vpop.f32.mrf.mxu0  ;;  %v14918_v35 = vadd.f32 %v10787_v40, %v2693_v28  ;;  %v2685_v16 = vadd.f32 %v2684_v42, %v18508_v10  ;;  %v18512_v1 = vld [vmem:[#allocation47_spill] sm:$0xff]  ;;  %v18514_v40 = vld [vmem:[#allocation38_spill] sm:$0xff] }
 0x24b   : > { %v10658_v7 = vpop.f32.mrf.mxu1  ;;  %v18515_v42 = vld [vmem:[#allocation251_spill] sm:$0xff] }
 0x24c   : > { %18507 = vst [vmem:[#allocation231_spill] sm:$0xff] %v14918_v35  ;;  %v10791_v45 = vpop.f32.mrf.mxu0  ;;  %11018 = vmatmul.mubr.msk.bf16.gmra.mxu0 %vm1265_vm3, %v18509_v17  ;;  %v14923_v37 = vadd.f32 %v3907_v32, %v2685_v16  ;;  %v2696_v14 = vadd.f32 %v10658_v7, %v18511_v19  ;;  %v18517_v32 = vld [vmem:[#allocation244_spill] sm:$0xff] }
 0x24d   : > { %11021 = vmatprep.mubr.msk.bf16.mxu0 %vm1265_vm3, %v18512_v1  ;;  %v2687_v15 = vpop.f32.mrf.mxu1  ;;  %v18518_v17 = vld [vmem:[#allocation252_spill] sm:$0xff] }
 0x24e   : > { %18510 = vst [vmem:[#allocation233_spill] sm:$0xff] %v14923_v37  ;;  %v3923_v39 = vpop.f32.mrf.mxu0  ;;  %v14928_v3 = vadd.f32 %v10788_v61, %v2696_v14  ;;  %v2688_v28 = vadd.f32 %v2687_v15, %v18514_v40  ;;  %v18520_v61 = vld [vmem:[#allocation246_spill] sm:$0xff]  ;;  %v18521_v40 = vld [vmem:[#allocation53_spill] sm:$0xff] }
 0x24f   : > { %v10661_v35 = vpop.f32.mrf.mxu1  ;;  %10888 = vmatmul.mubr.msk.bf16.gmra.mxu1 %vm1265_vm3, %v18515_v42 }
 0x250   : > { %18513 = vst [vmem:[#allocation235_spill] sm:$0xff] %v14928_v3  ;;  %v10792_v10 = vpop.f32.mrf.mxu0  ;;  %v14933_v2 = vadd.f32 %v3910_v9, %v2688_v28  ;;  %v2709_v16 = vadd.f32 %v10661_v35, %v18517_v32  ;;  %10891 = vmatprep.mubr.msk.bf16.mxu1 %vm1265_vm3, %v18518_v17  ;;  %v18523_v9 = vld [vmem:[#allocation249_spill] sm:$0xff] }
 0x251   : > { %v2700_v7 = vpop.f32.mrf.mxu1 }
 0x252   : > { %18516 = vst [vmem:[#allocation238_spill] sm:$0xff] %v14933_v2  ;;  %v3926_v19 = vpop.f32.mrf.mxu0  ;;  %v14938_v1 = vadd.f32 %v10791_v45, %v2709_v16  ;;  %v2701_v14 = vadd.f32 %v2700_v7, %v18520_v61  ;;  %v18524_v2 = vld [vmem:[#allocation59_spill] sm:$0xff]  ;;  %v18526_v45 = vld [vmem:[#allocation49_spill] sm:$0xff] }
 0x253   : > { %v10662_v3 = vpop.f32.mrf.mxu1  ;;  %v18527_v7 = vld [vmem:[#allocation261_spill] sm:$0xff] }
 0x254   : > { %18519 = vst [vmem:[#allocation240_spill] sm:$0xff] %v14938_v1  ;;  %v10795_v15 = vpop.f32.mrf.mxu0  ;;  %11022 = vmatmul.mubr.msk.bf16.gmra.mxu0 %vm1265_vm3, %v18521_v40  ;;  %v14943_v37 = vadd.f32 %v3923_v39, %v2701_v14  ;;  %v2712_v28 = vadd.f32 %v10662_v3, %v18523_v9  ;;  %v18529_v39 = vld [vmem:[#allocation253_spill] sm:$0xff]  ;;  %v18530_v40 = vld [vmem:[#allocation262_spill] sm:$0xff] }
 0x255   : > { %11025 = vmatprep.mubr.msk.bf16.mxu0 %vm1265_vm3, %v18524_v2  ;;  %v2703_v35 = vpop.f32.mrf.mxu1 }
 0x256   : > { %18522 = vst [vmem:[#allocation38_spill] sm:$0xff] %v14943_v37  ;;  %v3939_v32 = vpop.f32.mrf.mxu0  ;;  %v14948_v17 = vadd.f32 %v10792_v10, %v2712_v28  ;;  %v2704_v16 = vadd.f32 %v2703_v35, %v18526_v45  ;;  %v18532_v10 = vld [vmem:[#allocation255_spill] sm:$0xff] }
 0x257   : > { %v10665_v1 = vpop.f32.mrf.mxu1  ;;  %10892 = vmatmul.mubr.msk.bf16.gmra.mxu1 %vm1265_vm3, %v18527_v7  ;;  %v18533_v45 = vld [vmem:[#allocation63_spill] sm:$0xff] }
 0x258   : > { %18525 = vst [vmem:[#allocation244_spill] sm:$0xff] %v14948_v17  ;;  %v10796_v61 = vpop.f32.mrf.mxu0  ;;  %v14953_v42 = vadd.f32 %v3926_v19, %v2704_v16  ;;  %v2725_v14 = vadd.f32 %v10665_v1, %v18529_v39  ;;  %10895 = vmatprep.mubr.msk.bf16.mxu1 %vm1265_vm3, %v18530_v40  ;;  %v18535_v19 = vld [vmem:[#allocation258_spill] sm:$0xff] }
 0x259   : > { %v2716_v3 = vpop.f32.mrf.mxu1 }
 0x25a   : > { %18528 = vst [vmem:[#allocation246_spill] sm:$0xff] %v14953_v42  ;;  %v3942_v9 = vpop.f32.mrf.mxu0  ;;  %v14958_v2 = vadd.f32 %v10795_v15, %v2725_v14  ;;  %v2717_v28 = vadd.f32 %v2716_v3, %v18532_v10  ;;  %v18536_v42 = vld [vmem:[#allocation67_spill] sm:$0xff]  ;;  %v18538_v15 = vld [vmem:[#allocation58_spill] sm:$0xff]  ;;  %v18539_v3 = vld [vmem:[#allocation269_spill] sm:$0xff] }
 0x25b   : > { %v10666_v17 = vpop.f32.mrf.mxu1 }
 0x25c   : > { %18531 = vst [vmem:[#allocation249_spill] sm:$0xff] %v14958_v2  ;;  %v10799_v35 = vpop.f32.mrf.mxu0  ;;  %11026 = vmatmul.mubr.msk.bf16.gmra.mxu0 %vm1265_vm3, %v18533_v45  ;;  %v14963_v37 = vadd.f32 %v3939_v32, %v2717_v28  ;;  %v2728_v16 = vadd.f32 %v10666_v17, %v18535_v19  ;;  %v18541_v32 = vld [vmem:[#allocation264_spill] sm:$0xff] }
 0x25d   : > { %11029 = vmatprep.mubr.msk.bf16.mxu0 %vm1265_vm3, %v18536_v42  ;;  %v2719_v1 = vpop.f32.mrf.mxu1 }
 0x25e   : > { %18534 = vst [vmem:[#allocation49_spill] sm:$0xff] %v14963_v37  ;;  %v3955_v39 = vpop.f32.mrf.mxu0  ;;  %v14968_v40 = vadd.f32 %v10796_v61, %v2728_v16  ;;  %v2720_v14 = vadd.f32 %v2719_v1, %v18538_v15  ;;  %v18543_v61 = vld [vmem:[#allocation267_spill] sm:$0xff]  ;;  %v18544_v15 = vld [vmem:[#allocation73_spill] sm:$0xff] }
 0x25f   : > { %v10669_v2 = vpop.f32.mrf.mxu1  ;;  %10896 = vmatmul.mubr.msk.bf16.gmra.mxu1 %vm1265_vm3, %v18539_v3 }
 0x260   : > { %18537 = vst [vmem:[#allocation253_spill] sm:$0xff] %v14968_v40  ;;  %v10800_v10 = vpop.f32.mrf.mxu0  ;;  %v14973_v7 = vadd.f32 %v3942_v9, %v2720_v14  ;;  %v2741_v28 = vadd.f32 %v10669_v2, %v18541_v32  ;;  %10899 = vmatprep.mubr.msk.bf16.mxu1 %vm1265_vm3, %v14240_v62  ;;  %v18545_v9 = vld [vmem:[#allocation69_spill] sm:$0xff] }
 0x261   : > { %v2732_v17 = vpop.f32.mrf.mxu1 }
 0x262   : > { %18540 = vst [vmem:[#allocation255_spill] sm:$0xff] %v14973_v7  ;;  %v3958_v19 = vpop.f32.mrf.mxu0  ;;  %v14978_v42 = vadd.f32 %v10799_v35, %v2741_v28  ;;  %v2733_v16 = vadd.f32 %v2732_v17, %v18543_v61  ;;  %v18546_v7 = vld [vmem:[#allocation79_spill] sm:$0xff]  ;;  %v18547_v35 = vld [vmem:[#allocation270_spill] sm:$0xff] }
 0x263   : > { %v10670_v45 = vpop.f32.mrf.mxu1 }
 0x264   : > { %18542 = vst [vmem:[#allocation258_spill] sm:$0xff] %v14978_v42  ;;  %v10935_v1 = vpop.f32.mrf.mxu0  ;;  %11030 = vmatmul.mubr.msk.bf16.gmra.mxu0 %vm1265_vm3, %v18544_v15  ;;  %v14983_v40 = vadd.f32 %v3955_v39, %v2733_v16  ;;  %v2744_v14 = vadd.f32 %v10670_v45, %v18545_v9 }
 0x265   : > { %11033 = vmatprep.mubr.msk.bf16.mxu0 %vm1265_vm3, %v18546_v7  ;;  %v2735_v2 = vpop.f32.mrf.mxu1 }
 0x266   : > { %v4849_v32 = vpop.f32.mrf.mxu0  ;;  %v14988_v37 = vadd.f32 %v10800_v10, %v2744_v14  ;;  %v2736_v28 = vadd.f32 %v2735_v2, %v18547_v35  ;;  %v18548_v35 = vld [vmem:[#allocation83_spill] sm:$0xff] }
 0x267   : > { %v10805_v42 = vpop.f32.mrf.mxu1  ;;  %10900 = vmatmul.mubr.msk.bf16.gmra.mxu1 %vm1265_vm3, %v14264_v57 }
 0x268   : > { %v10936_v17 = vpop.f32.mrf.mxu0  ;;  %v14993_v61 = vadd.f32 %v3958_v19, %v2736_v28  ;;  %v4658_v39 = vadd.f32 %v10805_v42, %v14260_v59  ;;  %10903 = vmatprep.mubr.msk.bf16.mxu1 %vm1265_vm3, %v14272_v6  ;;  %v18550_v28 = vld [vmem:[#allocation87_spill] sm:$0xff] }
 0x269   : > { %v4145_v45 = vpop.f32.mrf.mxu1 }
 0x26a   : > { %v4852_v16 = vpop.f32.mrf.mxu0  ;;  %v14998_v9 = vadd.f32 %v10935_v1, %v4658_v39  ;;  %v4656_v10 = vadd.f32 %v4145_v45, %v14268_v30 }
 0x26b   : > { %v10806_v14 = vpop.f32.mrf.mxu1 }
 0x26c   : > { %v10939_v2 = vpop.f32.mrf.mxu0  ;;  %11034 = vmatmul.mubr.msk.bf16.gmra.mxu0 %vm1265_vm3, %v18548_v35  ;;  %v15003_v7 = vadd.f32 %v4849_v32, %v4656_v10  ;;  %v4659_v19 = vadd.f32 %v10806_v14, %v14279_v55  ;;  %v18553_v10 = vld [vmem:[#allocation272_spill] sm:$0xff] }
 0x26d   : > { %11037 = vmatprep.mubr.msk.bf16.mxu0 %vm1265_vm3, %v18550_v28  ;;  %v4148_v59 = vpop.f32.mrf.mxu1 }
 0x26e   : > { %18549 = vst [vmem:[#allocation58_spill] sm:$0xff] %v15003_v7  ;;  %v4865_v42 = vpop.f32.mrf.mxu0  ;;  %v15008_v15 = vadd.f32 %v10936_v17, %v4659_v19  ;;  %v4657_v1 = vadd.f32 %v4148_v59, %v14284_v48  ;;  %v18555_v17 = vld [vmem:[#allocation88_spill] sm:$0xff]  ;;  %v18556_v59 = vld [vmem:[#allocation91_spill] sm:$0xff] }
 0x26f   : > { %v10809_v39 = vpop.f32.mrf.mxu1  ;;  %10904 = vmatmul.mubr.msk.bf16.gmra.mxu1 %vm1265_vm3, %v14299_v20 }
 0x270   : > { %18551 = vst [vmem:[#allocation269_spill] sm:$0xff] %v15008_v15  ;;  %v10940_v30 = vpop.f32.mrf.mxu0  ;;  %v15013_v45 = vadd.f32 %v4852_v16, %v4657_v1  ;;  %v4662_v32 = vadd.f32 %v10809_v39, %v14295_v53  ;;  %10907 = vmatprep.mubr.msk.bf16.mxu1 %vm1265_vm3, %v18553_v10  ;;  %v18557_v16 = vld [vmem:[#allocation273_spill] sm:$0xff] }
 0x271   : > { %v4161_v55 = vpop.f32.mrf.mxu1 }
 0x272   : > { %18552 = vst [vmem:[#allocation264_spill] sm:$0xff] %v15013_v45  ;;  %v4868_v14 = vpop.f32.mrf.mxu0  ;;  %v15018_v28 = vadd.f32 %v10939_v2, %v4662_v32  ;;  %v4660_v19 = vadd.f32 %v4161_v55, %v18555_v17  ;;  %v18558_v45 = vld [vmem:[#allocation95_spill] sm:$0xff]  ;;  %v18559_v2 = vld [vmem:[#allocation157_spill] sm:$0xff] }
 0x273   : > { %v10810_v35 = vpop.f32.mrf.mxu1 }
 0x274   : > { %18554 = vst [vmem:[#allocation267_spill] sm:$0xff] %v15018_v28  ;;  %v10943_v48 = vpop.f32.mrf.mxu0  ;;  %11038 = vmatmul.mubr.msk.bf16.gmra.mxu0 %vm1265_vm3, %v18556_v59  ;;  %v15023_v15 = vadd.f32 %v4865_v42, %v4660_v19  ;;  %v4663_v1 = vadd.f32 %v10810_v35, %v18557_v16 }
 0x275   : > { %11041 = vmatprep.mubr.msk.bf16.mxu0 %vm1265_vm3, %v18558_v45  ;;  %v4164_v53 = vpop.f32.mrf.mxu1 }
 0x276   : > { %v4881_v39 = vpop.f32.mrf.mxu0  ;;  %v15028_v7 = vadd.f32 %v10940_v30, %v4663_v1  ;;  %v4661_v32 = vadd.f32 %v4164_v53, %v18559_v2  ;;  %v18560_v2 = vld [vmem:[#allocation99_spill] sm:$0xff] }
 0x277   : > { %v10813_v28 = vpop.f32.mrf.mxu1  ;;  %10908 = vmatmul.mubr.msk.bf16.gmra.mxu1 %vm1265_vm3, %v14334_v36 }
 0x278   : > { %v10944_v55 = vpop.f32.mrf.mxu0  ;;  %v15033_v17 = vadd.f32 %v4868_v14, %v4661_v32  ;;  %v4666_v42 = vadd.f32 %v10813_v28, %v14330_v51  ;;  %10911 = vmatprep.mubr.msk.bf16.mxu1 %vm1265_vm3, %v14342_v12  ;;  %v18562_v32 = vld [vmem:[#allocation104_spill] sm:$0xff] }
 0x279   : > { %v4177_v35 = vpop.f32.mrf.mxu1 }
 0x27a   : > { %v4884_v19 = vpop.f32.mrf.mxu0  ;;  %v15038_v16 = vadd.f32 %v10943_v48, %v4666_v42  ;;  %v4664_v30 = vadd.f32 %v4177_v35, %v14338_v33 }
 0x27b   : > { %v10814_v1 = vpop.f32.mrf.mxu1 }
 0x27c   : > { %v10947_v53 = vpop.f32.mrf.mxu0  ;;  %11042 = vmatmul.mubr.msk.bf16.gmra.mxu0 %vm1265_vm3, %v18560_v2  ;;  %v15043_v45 = vadd.f32 %v4881_v39, %v4664_v30  ;;  %v4667_v14 = vadd.f32 %v10814_v1, %v14349_v56  ;;  %v15062_v2 = vld [vmem:[%s11866_s27 + $0x280] sm:$0xff]  }
 0x27d   : > { %11045 = vmatprep.mubr.msk.bf16.mxu0 %vm1265_vm3, %v18562_v32  ;;  %v4180_v51 = vpop.f32.mrf.mxu1 }
 0x27e   : > { %18561 = vst [vmem:[#allocation69_spill] sm:$0xff] %v15043_v45  ;;  %v4897_v28 = vpop.f32.mrf.mxu0  ;;  %v15048_v48 = vadd.f32 %v10944_v55, %v4667_v14  ;;  %v4665_v33 = vadd.f32 %v4180_v51, %v14354_v34  ;;  %v18566_v55 = vld [vmem:[#allocation160_spill] sm:$0xff]  ;;  %v15065_v34 = vld [vmem:[%s11866_s27 + $0x288] sm:$0xff]   ;;  %v18572_v45 = vld [vmem:[#allocation105_spill] sm:$0xff] }
 0x27f   : > { %v10817_v42 = vpop.f32.mrf.mxu1  ;;  %10912 = vmatmul.mubr.msk.bf16.gmra.mxu1 %vm1265_vm3, %v14369_v25 }
 0x280   : > { %18563 = vst [vmem:[#allocation270_spill] sm:$0xff] %v15048_v48  ;;  %v10948_v35 = vpop.f32.mrf.mxu0  ;;  %v15053_v39 = vadd.f32 %v4884_v19, %v4665_v33  ;;  %v4670_v56 = vadd.f32 %v10817_v42, %v14365_v58  ;;  %10915 = vmatprep.mubr.msk.bf16.mxu1 %vm1265_vm3, %v14377_v38  ;;  %v18567_v48 = vld [vmem:[#allocation109_spill] sm:$0xff]  ;;  %v18569_v58 = vld [vmem:[#allocation163_spill] sm:$0xff]  ;;  %v18570_v42 = vld [vmem:[#allocation112_spill] sm:$0xff] }
 0x281   : > { %v4193_v30 = vpop.f32.mrf.mxu1 }
 0x282   : > { %18564 = vst [vmem:[#allocation272_spill] sm:$0xff] %v15053_v39  ;;  %v4900_v1 = vpop.f32.mrf.mxu0  ;;  %v15058_v32 = vadd.f32 %v10947_v53, %v4670_v56  ;;  %v4668_v14 = vadd.f32 %v4193_v30, %v18566_v55 }
 0x283   : > { %v10818_v51 = vpop.f32.mrf.mxu1 }
 0x284   : > { %18565 = vst [vmem:[#allocation88_spill] sm:$0xff] %v15058_v32  ;;  %v10951_v59 = vpop.f32.mrf.mxu0  ;;  %11046 = vmatmul.mubr.msk.bf16.gmra.mxu0 %vm1265_vm3, %v18567_v48  ;;  %v15069_v19 = vadd.f32 %v4897_v28, %v4668_v14  ;;  %v4671_v33 = vadd.f32 %v10818_v51, %v18569_v58  ;;  %v18574_v32 = vunpack.c.l.bf16 %v15062_v2 }
 0x285   : > { %11049 = vmatprep.mubr.msk.bf16.mxu0 %vm1265_vm3, %v18570_v42  ;;  %v4196_v53 = vpop.f32.mrf.mxu1 }
 0x286   : > { %18568 = vst [vmem:[#allocation273_spill] sm:$0xff] %v15069_v19  ;;  %v4913_v56 = vpop.f32.mrf.mxu0  ;;  %v15077_v39 = vadd.f32 %v10948_v35, %v4671_v33  ;;  %v4669_v48 = vadd.f32 %v4196_v53, %v18572_v45  ;;  %v4789_v35 = vrot.slane %v18574_v32, 1  ;;  %v18575_v33 = vunpack.c.h.bf16 %v15062_v2 }
 0x287   : > { %v10821_v28 = vpop.f32.mrf.mxu1  ;;  %10916 = vmatmul.mubr.msk.bf16.gmra.mxu1 %vm1265_vm3, %v14404_v49  ;;  %v18576_v53 = vunpack.c.l.bf16 %v15065_v34  ;;  %v18582_v49 = vld [vmem:[#allocation118_spill] sm:$0xff] }
 0x288   : > { %18571 = vst [vmem:[#allocation157_spill] sm:$0xff] %v15077_v39  ;;  %v10952_v14 = vpop.f32.mrf.mxu0  ;;  %v15082_v51 = vadd.f32 %v4900_v1, %v4669_v48  ;;  %v4674_v58 = vadd.f32 %v10821_v28, %v14400_v5  ;;  %10919 = vmatprep.mubr.msk.bf16.mxu1 %vm1265_vm3, %v14412_v27  ;;  %v4790_v45 = vrot.slane %v18575_v33, 1  ;;  %v15094_v39 = vld [vmem:[%s11866_s27 + $0x290] sm:$0x1]  ;;  %v18581_v27 = vld [vmem:[#allocation177_spill] sm:$0xff] }
 0x289   : > { %v4209_v30 = vpop.f32.mrf.mxu1  ;;  %v4792_v42 = vrot.slane %v18576_v53, 1  ;;  %18577 = vst [vmem:[#allocation163_spill] sm:$0xff] %v15094_v39 }
 0x28a   : > { %18573 = vst [vmem:[#allocation160_spill] sm:$0xff] %v15082_v51  ;;  %v4916_v55 = vpop.f32.mrf.mxu0  ;;  %v15096_v48 = vadd.f32 %v10951_v59, %v4674_v58  ;;  %v4672_v5 = vadd.f32 %v4209_v30, %v14408_v43  ;;  %v18579_v51 = vld [vmem:[#allocation116_spill] sm:$0xff]  ;;  %v4791_v43 = vsel %vm782_vm1, %v4789_v35, %v4790_v45 }
 0x28b   : > { %v10822_v1 = vpop.f32.mrf.mxu1  ;;  %v4793_v30 = vsel %vm782_vm1, %v4790_v45, %v4792_v42 }
 0x28c   : > { %18578 = vst [vmem:[#allocation105_spill] sm:$0xff] %v15096_v48  ;;  %v10955_v28 = vpop.f32.mrf.mxu0  ;;  %11050 = vmatmul.mubr.msk.bf16.gmra.mxu0 %vm1265_vm3, %v18579_v51  ;;  %v15102_v32 = vadd.f32 %v4913_v56, %v4672_v5  ;;  %v4675_v33 = vadd.f32 %v10822_v1, %v18581_v27  ;;  %v18584_v56 = vunpack.c.h.bf16 %v15065_v34  ;;  %v15122_v35 = vpack.c.bf16 %v4793_v30, %v4791_v43 }
 0x28d   : > { %11053 = vmatprep.mubr.msk.bf16.mxu0 %vm1265_vm3, %v18582_v49  ;;  %v4212_v59 = vpop.f32.mrf.mxu1  ;;  %v18587_v49 = vld [vmem:[#allocation183_spill] sm:$0xff] }
 0x28e   : > { %18580 = vst [vmem:[#allocation274_spill] sm:$0xff] %v15102_v32  ;;  %v4929_v58 = vpop.f32.mrf.mxu0  ;;  %v15110_v48 = vadd.f32 %v10952_v14, %v4675_v33  ;;  %v4673_v51 = vadd.f32 %v4212_v59, %v14424_v44  ;;  %v4794_v5 = vrot.slane %v18584_v56, 1  ;;  %18585 = vst [vmem:[#allocation275_spill] sm:$0xff] %v15122_v35  ;;  %v18586_v14 = vunpack.c.l.bf16 %v15094_v39 }
 0x28f   : > { %v10825_v19 = vpop.f32.mrf.mxu1  ;;  %10920 = vmatmul.mubr.msk.bf16.gmra.mxu1 %vm1265_vm3, %v14435_v47 }
 0x290   : > { %18583 = vst [vmem:[#allocation177_spill] sm:$0xff] %v15110_v48  ;;  %v10956_v27 = vpop.f32.mrf.mxu0  ;;  %v15117_v1 = vadd.f32 %v4916_v55, %v4673_v51  ;;  %v4678_v53 = vadd.f32 %v10825_v19, %v14431_v63  ;;  %10923 = vmatprep.mubr.msk.bf16.mxu1 %vm1265_vm3, %v14443_v29  ;;  %v4796_v44 = vrot.slane %v18586_v14, 1  ;;  %v18588_v55 = vld [vmem:[#allocation120_spill] sm:$0xff]  ;;  %v18589_v19 = vld [vmem:[#allocation186_spill] sm:$0xff]  ;;  %v4795_v43 = vsel %vm782_vm1, %v4792_v42, %v4794_v5 }
 0x291   : > { %v4225_v45 = vpop.f32.mrf.mxu1 }
 0x292   : > { %v4932_v33 = vpop.f32.mrf.mxu0  ;;  %v15126_v59 = vadd.f32 %v10955_v28, %v4678_v53  ;;  %v4676_v48 = vadd.f32 %v4225_v45, %v18587_v49  ;;  %v4797_v30 = vsel %vm782_vm1, %v4794_v5, %v4796_v44  ;;  %v18590_v49 = vld [vmem:[#allocation100_spill] sm:$0xff] }
 0x293   : > { %v10826_v32 = vpop.f32.mrf.mxu1 }
 0x294   : > { %v10959_v56 = vpop.f32.mrf.mxu0  ;;  %11054 = vmatmul.mubr.msk.bf16.gmra.mxu0 %vm1265_vm3, %v18588_v55  ;;  %v15131_v63 = vadd.f32 %v4929_v58, %v4676_v48  ;;  %v4679_v51 = vadd.f32 %v10826_v32, %v18589_v19  ;;  %v15143_v58 = vpack.c.bf16 %v4797_v30, %v4795_v43  ;;  %v18592_v19 = vld [vmem:[#allocation189_spill] sm:$0xff] }
 0x295   : > { %11057 = vmatprep.mubr.msk.bf16.mxu0 %vm1265_vm3, %v15122_v35  ;;  %v4228_v28 = vpop.f32.mrf.mxu1 }
 0x296   : > { %v4945_v53 = vpop.f32.mrf.mxu0  ;;  %v15138_v14 = vadd.f32 %v10956_v27, %v4679_v51  ;;  %v4677_v45 = vadd.f32 %v4228_v28, %v18590_v49  ;;  %18591 = vst [vmem:[#allocation183_spill] sm:$0xff] %v15143_v58 }
 0x297   : > { %v10829_v39 = vpop.f32.mrf.mxu1  ;;  %10924 = vmatmul.mubr.msk.bf16.gmra.mxu1 %vm1265_vm3, %v14461_v23 }
 0x298   : > { %v10960_v48 = vpop.f32.mrf.mxu0  ;;  %v15145_v32 = vadd.f32 %v4932_v33, %v4677_v45  ;;  %v4682_v35 = vadd.f32 %v10829_v39, %v18592_v19  ;;  %10927 = vmatprep.mubr.msk.bf16.mxu1 %vm1265_vm3, %v15062_v2  ;;  %v18593_v19 = vld [vmem:[#allocation121_spill] sm:$0xff] }
 0x299   : > { %v4241_v42 = vpop.f32.mrf.mxu1 }
 0x29a   : > { %v4948_v5 = vpop.f32.mrf.mxu0  ;;  %v15150_v27 = vadd.f32 %v10959_v56, %v4682_v35  ;;  %v4680_v44 = vadd.f32 %v4241_v42, %v14465_v60 }
 0x29b   : > { %v10830_v51 = vpop.f32.mrf.mxu1 }
 0x29c   : > { %v10963_v28 = vpop.f32.mrf.mxu0  ;;  %11058 = vmatmul.mubr.msk.bf16.gmra.mxu0 %vm1265_vm3, %v15143_v58  ;;  %v15155_v43 = vadd.f32 %v4945_v53, %v4680_v44  ;;  %v4683_v33 = vadd.f32 %v10830_v51, %v14470_v18 }
 0x29d   : > { %11193 = vmatprep.mubr.msk.bf16.mxu0 %vm1265_vm3, %v18277_v54  ;;  %v4244_v39 = vpop.f32.mrf.mxu1 }
 0x29e   : > { %v4961_v30 = vpop.f32.mrf.mxu0  ;;  %v15160_v49 = vadd.f32 %v10960_v48, %v4683_v33  ;;  %v4681_v35 = vadd.f32 %v4244_v39, %v14475_v52  ;;  %v7601_v48 = vsel %vm1458_vm0, %v14837_v31, 0  ;;  %v6902_v31 = vsel %vm1458_vm0, %v14827_v8, 0 }
 0x29f   : > { %v10833_v56 = vpop.f32.mrf.mxu1  ;;  %10928 = vmatmul.mubr.msk.bf16.gmra.mxu1 %vm1265_vm3, %v15065_v34 }
 0x2a0   : > { %v10964_v60 = vpop.f32.mrf.mxu0  ;;  %v15165_v45 = vadd.f32 %v4948_v5, %v4681_v35  ;;  %v4686_v53 = vadd.f32 %v10833_v56, %v14482_v13  ;;  %11063 = vmatprep.mubr.msk.bf16.mxu1 %vm1265_vm3, %v18593_v19 }
 0x2a1   : > { %v4257_v18 = vpop.f32.mrf.mxu1 }
 0x2a2   : > { %v4964_v54 = vpop.f32.mrf.mxu0  ;;  %v15172_v42 = vadd.f32 %v10963_v28, %v4686_v53  ;;  %v4684_v52 = vadd.f32 %v4257_v18, %v14487_v26  ;;  %v18594_v26 = vld [vmem:[#allocation191_spill] sm:$0xff] }
 0x2a3   : > { %v10834_v44 = vpop.f32.mrf.mxu1  ;;  %v18595_v53 = vld [vmem:[#allocation123_spill] sm:$0xff] }
 0x2a4   : > { %v10967_v51 = vpop.f32.mrf.mxu0  ;;  %11194 = vmatmul.mubr.msk.bf16.vlgmr.msra.gmra.mxu0 %vm1265_vm3, %v18283_v0  ;;  %v15177_v5 = vadd.f32 %v4961_v30, %v4684_v52  ;;  %v4687_v13 = vadd.f32 %v10834_v44, %v14494_v22  ;;  %v18596_v22 = vld [vmem:[#allocation194_spill] sm:$0xff] }
 0x2a5   : > { %11452 = vmatpush3.bf16.msra.mxu0 %v7601_v48  ;;  %11197 = vmatprep.mubr.msk.bf16.mxu0 %vm1265_vm3, %v18286_v21  ;;  %v4260_v33 = vpop.f32.mrf.mxu1  ;;  %v18597_v21 = vld [vmem:[#allocation124_spill] sm:$0xff] }
 0x2a6   : > { %v4977_v28 = vpop.f32.mrf.mxu0  ;;  %v15184_v39 = vadd.f32 %v10964_v60, %v4687_v13  ;;  %v4685_v35 = vadd.f32 %v4260_v33, %v18594_v26  ;;  %v18598_v60 = vld [vmem:[#allocation6_spill] sm:$0xff] }
 0x2a7   : > { %v10837_v56 = vpop.f32.mrf.mxu1  ;;  %11064 = vmatmul.mubr.msk.bf16.vlgmr.msra.gmra.mxu1 %vm1265_vm3, %v18595_v53 }
 0x2a8   : > { %v10968_v0 = vpop.f32.mrf.mxu0  ;;  %v15189_v30 = vadd.f32 %v4964_v54, %v4685_v35  ;;  %v4690_v19 = vadd.f32 %v10837_v56, %v18596_v22  ;;  %11322 = vmatpush3.bf16.msra.mxu1 %v6902_v31  ;;  %11067 = vmatprep.mubr.msk.bf16.mxu1 %vm1265_vm3, %v18597_v21  ;;  %v18599_v54 = vld [vmem:[#allocation122_spill] sm:$0xff] }
 0x2a9   : > { %v4273_v18 = vpop.f32.mrf.mxu1 }
 0x2aa   : > { %v4980_v8 = vpop.f32.mrf.mxu0  ;;  %v15194_v48 = vadd.f32 %v10967_v51, %v4690_v19  ;;  %v4688_v52 = vadd.f32 %v4273_v18, %v18598_v60  ;;  %v18601_v51 = vld [vmem:[#allocation9_spill] sm:$0xff]  ;;  %v18602_v19 = vld [vmem:[#allocation127_spill] sm:$0xff] }
 0x2ab   : > { %v10838_v44 = vpop.f32.mrf.mxu1 }
 0x2ac   : > { %v10971_v13 = vpop.f32.mrf.mxu0  ;;  %11198 = vmatmul.mubr.msk.bf16.gmra.mxu0 %vm1265_vm3, %v18295_v24  ;;  %v15199_v33 = vadd.f32 %v4977_v28, %v4688_v52  ;;  %v4691_v26 = vadd.f32 %v10838_v44, %v18599_v54  ;;  %v18604_v24 = vld [vmem:[#allocation125_spill] sm:$0xff]  ;;  %v18605_v52 = vld [vmem:[#allocation128_spill] sm:$0xff] }
 0x2ad   : > { %11201 = vmatprep.mubr.msk.bf16.mxu0 %vm1265_vm3, %v18297_v4  ;;  %v4276_v31 = vpop.f32.mrf.mxu1 }
 0x2ae   : > { %v4993_v35 = vpop.f32.mrf.mxu0  ;;  %v15204_v56 = vadd.f32 %v10968_v0, %v4691_v26  ;;  %v4689_v53 = vadd.f32 %v4276_v31, %v18601_v51  ;;  %v18607_v0 = vld [vmem:[#allocation126_spill] sm:$0xff] }
 0x2af   : > { %v10841_v22 = vpop.f32.mrf.mxu1  ;;  %11068 = vmatmul.mubr.msk.bf16.gmra.mxu1 %vm1265_vm3, %v18602_v19 }
 0x2b0   : > { %18600 = vst [vmem:[#allocation186_spill] sm:$0xff] %v15204_v56  ;;  %v10972_v18 = vpop.f32.mrf.mxu0  ;;  %v15209_v60 = vadd.f32 %v4980_v8, %v4689_v53  ;;  %v4694_v28 = vadd.f32 %v10841_v22, %v18604_v24  ;;  %11071 = vmatprep.mubr.msk.bf16.mxu1 %vm1265_vm3, %v18605_v52  ;;  %v18609_v8 = vld [vmem:[#allocation129_spill] sm:$0xff]  ;;  %v18763_v56 = vld [vmem:[#allocation212_spill] sm:$0xff] }
 0x2b1   : > { %v4289_v44 = vpop.f32.mrf.mxu1 }
 0x2b2   : > { %18603 = vst [vmem:[#allocation100_spill] sm:$0xff] %v15209_v60  ;;  %v4996_v4 = vpop.f32.mrf.mxu0  ;;  %v15214_v54 = vadd.f32 %v10971_v13, %v4694_v28  ;;  %v4692_v26 = vadd.f32 %v4289_v44, %v18607_v0  ;;  %v18611_v13 = vld [vmem:[#allocation208_spill] sm:$0xff]  ;;  %v18612_v44 = vld [vmem:[#allocation131_spill] sm:$0xff] }
 0x2b3   : > { %v10842_v58 = vpop.f32.mrf.mxu1 }
 0x2b4   : > { %18606 = vst [vmem:[#allocation189_spill] sm:$0xff] %v15214_v54  ;;  %v10975_v31 = vpop.f32.mrf.mxu0  ;;  %11202 = vmatmul.mubr.msk.bf16.gmra.mxu0 %vm1265_vm3, %v18305_v41  ;;  %v15219_v51 = vadd.f32 %v4993_v35, %v4692_v26  ;;  %v4695_v53 = vadd.f32 %v10842_v58, %v18609_v8  ;;  %v18614_v41 = vld [vmem:[#allocation130_spill] sm:$0xff]  ;;  %v18615_v26 = vld [vmem:[#allocation132_spill] sm:$0xff] }
 0x2b5   : > { %11205 = vmatprep.mubr.msk.bf16.mxu0 %vm1265_vm3, %v18307_v11  ;;  %v4292_v22 = vpop.f32.mrf.mxu1 }
 0x2b6   : > { %18608 = vst [vmem:[#allocation121_spill] sm:$0xff] %v15219_v51  ;;  %v5009_v24 = vpop.f32.mrf.mxu0  ;;  %v15224_v55 = vadd.f32 %v10972_v18, %v4695_v53  ;;  %v4693_v28 = vadd.f32 %v4292_v22, %v18611_v13  ;;  %v18617_v18 = vld [vmem:[#allocation211_spill] sm:$0xff] }
 0x2b7   : > { %v10845_v54 = vpop.f32.mrf.mxu1  ;;  %11072 = vmatmul.mubr.msk.bf16.gmra.mxu1 %vm1265_vm3, %v18612_v44 }
 0x2b8   : > { %18610 = vst [vmem:[#allocation191_spill] sm:$0xff] %v15224_v55  ;;  %v10976_v0 = vpop.f32.mrf.mxu0  ;;  %v15229_v60 = vadd.f32 %v4996_v4, %v4693_v28  ;;  %v4698_v35 = vadd.f32 %v10845_v54, %v18614_v41  ;;  %11075 = vmatprep.mubr.msk.bf16.mxu1 %vm1265_vm3, %v18615_v26  ;;  %v18619_v4 = vld [vmem:[#allocation213_spill] sm:$0xff] }
 0x2b9   : > { %v4305_v58 = vpop.f32.mrf.mxu1 }
 0x2ba   : > { %18613 = vst [vmem:[#allocation123_spill] sm:$0xff] %v15229_v60  ;;  %v5012_v11 = vpop.f32.mrf.mxu0  ;;  %v15234_v8 = vadd.f32 %v10975_v31, %v4698_v35  ;;  %v4696_v53 = vadd.f32 %v4305_v58, %v18617_v18  ;;  %v18621_v31 = vld [vmem:[#allocation216_spill] sm:$0xff]  ;;  %v18622_v58 = vld [vmem:[#allocation135_spill] sm:$0xff] }
 0x2bb   : > { %v10846_v55 = vpop.f32.mrf.mxu1 }
 0x2bc   : > { %18616 = vst [vmem:[#allocation194_spill] sm:$0xff] %v15234_v8  ;;  %v10979_v22 = vpop.f32.mrf.mxu0  ;;  %11206 = vmatmul.mubr.msk.bf16.gmra.mxu0 %vm1265_vm3, %v18315_v46  ;;  %v15239_v13 = vadd.f32 %v5009_v24, %v4696_v53  ;;  %v4699_v28 = vadd.f32 %v10846_v55, %v18619_v4  ;;  %v18624_v46 = vld [vmem:[#allocation133_spill] sm:$0xff]  ;;  %v18625_v53 = vld [vmem:[#allocation136_spill] sm:$0xff] }
 0x2bd   : > { %11209 = vmatprep.mubr.msk.bf16.mxu0 %vm1265_vm3, %v18317_v50  ;;  %v4308_v54 = vpop.f32.mrf.mxu1 }
 0x2be   : > { %18618 = vst [vmem:[#allocation124_spill] sm:$0xff] %v15239_v13  ;;  %v5025_v41 = vpop.f32.mrf.mxu0  ;;  %v15244_v60 = vadd.f32 %v10976_v0, %v4699_v28  ;;  %v4697_v35 = vadd.f32 %v4308_v54, %v18621_v31  ;;  %v18627_v0 = vld [vmem:[#allocation134_spill] sm:$0xff]  ;;  %v18628_v31 = vld [vmem:[#allocation45_spill] sm:$0xff] }
 0x2bf   : > { %v10849_v8 = vpop.f32.mrf.mxu1  ;;  %11076 = vmatmul.mubr.msk.bf16.gmra.mxu1 %vm1265_vm3, %v18622_v58 }
 0x2c0   : > { %18620 = vst [vmem:[#allocation6_spill] sm:$0xff] %v15244_v60  ;;  %v10980_v18 = vpop.f32.mrf.mxu0  ;;  %v15249_v51 = vadd.f32 %v5012_v11, %v4697_v35  ;;  %v4702_v24 = vadd.f32 %v10849_v8, %v18624_v46  ;;  %11079 = vmatprep.mubr.msk.bf16.mxu1 %vm1265_vm3, %v18625_v53  ;;  %v18630_v11 = vld [vmem:[#allocation221_spill] sm:$0xff] }
 0x2c1   : > { %v4321_v55 = vpop.f32.mrf.mxu1 }
 0x2c2   : > { %18623 = vst [vmem:[#allocation122_spill] sm:$0xff] %v15249_v51  ;;  %v5028_v50 = vpop.f32.mrf.mxu0  ;;  %v15254_v4 = vadd.f32 %v10979_v22, %v4702_v24  ;;  %v4700_v28 = vadd.f32 %v4321_v55, %v18627_v0  ;;  %v18631_v51 = vld [vmem:[#allocation48_spill] sm:$0xff]  ;;  %v18634_v55 = vld [vmem:[#allocation139_spill] sm:$0xff] }
 0x2c3   : > { %v10850_v60 = vpop.f32.mrf.mxu1  ;;  %v18633_v22 = vld [vmem:[#allocation224_spill] sm:$0xff] }
 0x2c4   : > { %18626 = vst [vmem:[#allocation9_spill] sm:$0xff] %v15254_v4  ;;  %v10983_v54 = vpop.f32.mrf.mxu0  ;;  %11210 = vmatmul.mubr.msk.bf16.gmra.mxu0 %vm1265_vm3, %v18628_v31  ;;  %v15259_v13 = vadd.f32 %v5025_v41, %v4700_v28  ;;  %v4703_v35 = vadd.f32 %v10850_v60, %v18630_v11  ;;  %v18636_v41 = vld [vmem:[#allocation137_spill] sm:$0xff]  ;;  %v18637_v31 = vld [vmem:[#allocation142_spill] sm:$0xff] }
 0x2c5   : > { %11213 = vmatprep.mubr.msk.bf16.mxu0 %vm1265_vm3, %v18631_v51  ;;  %v4324_v8 = vpop.f32.mrf.mxu1 }
 0x2c6   : > { %18629 = vst [vmem:[#allocation127_spill] sm:$0xff] %v15259_v13  ;;  %v5041_v46 = vpop.f32.mrf.mxu0  ;;  %v15264_v53 = vadd.f32 %v10980_v18, %v4703_v35  ;;  %v4701_v24 = vadd.f32 %v4324_v8, %v18633_v22  ;;  %v18639_v18 = vld [vmem:[#allocation138_spill] sm:$0xff]  ;;  %v18640_v22 = vld [vmem:[#allocation36_spill] sm:$0xff] }
 0x2c7   : > { %v10853_v4 = vpop.f32.mrf.mxu1  ;;  %11080 = vmatmul.mubr.msk.bf16.gmra.mxu1 %vm1265_vm3, %v18634_v55 }
 0x2c8   : > { %18632 = vst [vmem:[#allocation125_spill] sm:$0xff] %v15264_v53  ;;  %v10984_v0 = vpop.f32.mrf.mxu0  ;;  %v15269_v58 = vadd.f32 %v5028_v50, %v4701_v24  ;;  %v4706_v28 = vadd.f32 %v10853_v4, %v18636_v41  ;;  %11083 = vmatprep.mubr.msk.bf16.mxu1 %vm1265_vm3, %v18637_v31  ;;  %v18642_v50 = vld [vmem:[#allocation229_spill] sm:$0xff] }
 0x2c9   : > { %v4337_v60 = vpop.f32.mrf.mxu1 }
 0x2ca   : > { %18635 = vst [vmem:[#allocation128_spill] sm:$0xff] %v15269_v58  ;;  %v5044_v51 = vpop.f32.mrf.mxu0  ;;  %v15274_v11 = vadd.f32 %v10983_v54, %v4706_v28  ;;  %v4704_v35 = vadd.f32 %v4337_v60, %v18639_v18  ;;  %v18643_v58 = vld [vmem:[#allocation52_spill] sm:$0xff]  ;;  %v18646_v60 = vld [vmem:[#allocation150_spill] sm:$0xff] }
 0x2cb   : > { %v10854_v53 = vpop.f32.mrf.mxu1  ;;  %v18645_v54 = vld [vmem:[#allocation232_spill] sm:$0xff] }
 0x2cc   : > { %18638 = vst [vmem:[#allocation126_spill] sm:$0xff] %v15274_v11  ;;  %v10987_v8 = vpop.f32.mrf.mxu0  ;;  %11214 = vmatmul.mubr.msk.bf16.gmra.mxu0 %vm1265_vm3, %v18640_v22  ;;  %v15279_v13 = vadd.f32 %v5041_v46, %v4704_v35  ;;  %v4707_v24 = vadd.f32 %v10854_v53, %v18642_v50  ;;  %v18648_v46 = vld [vmem:[#allocation145_spill] sm:$0xff]  ;;  %v18649_v22 = vld [vmem:[#allocation151_spill] sm:$0xff] }
 0x2cd   : > { %11217 = vmatprep.mubr.msk.bf16.mxu0 %vm1265_vm3, %v18643_v58  ;;  %v4340_v4 = vpop.f32.mrf.mxu1 }
 0x2ce   : > { %18641 = vst [vmem:[#allocation129_spill] sm:$0xff] %v15279_v13  ;;  %v5057_v41 = vpop.f32.mrf.mxu0  ;;  %v15284_v31 = vadd.f32 %v10984_v0, %v4707_v24  ;;  %v4705_v28 = vadd.f32 %v4340_v4, %v18645_v54  ;;  %v18651_v0 = vld [vmem:[#allocation146_spill] sm:$0xff]  ;;  %v18652_v54 = vld [vmem:[#allocation68_spill] sm:$0xff] }
 0x2cf   : > { %v10857_v11 = vpop.f32.mrf.mxu1  ;;  %11084 = vmatmul.mubr.msk.bf16.gmra.mxu1 %vm1265_vm3, %v18646_v60 }
 0x2d0   : > { %18644 = vst [vmem:[#allocation208_spill] sm:$0xff] %v15284_v31  ;;  %v10988_v18 = vpop.f32.mrf.mxu0  ;;  %v15289_v55 = vadd.f32 %v5044_v51, %v4705_v28  ;;  %v4710_v35 = vadd.f32 %v10857_v11, %v18648_v46  ;;  %11087 = vmatprep.mubr.msk.bf16.mxu1 %vm1265_vm3, %v18649_v22  ;;  %v18654_v51 = vld [vmem:[#allocation236_spill] sm:$0xff] }
 0x2d1   : > { %v4353_v53 = vpop.f32.mrf.mxu1 }
 0x2d2   : > { %18647 = vst [vmem:[#allocation131_spill] sm:$0xff] %v15289_v55  ;;  %v5060_v58 = vpop.f32.mrf.mxu0  ;;  %v15294_v50 = vadd.f32 %v10987_v8, %v4710_v35  ;;  %v4708_v24 = vadd.f32 %v4353_v53, %v18651_v0  ;;  %v18655_v55 = vld [vmem:[#allocation153_spill] sm:$0xff]  ;;  %v18657_v8 = vld [vmem:[#allocation239_spill] sm:$0xff]  ;;  %v18658_v53 = vld [vmem:[#allocation22_spill] sm:$0xff] }
 0x2d3   : > { %v10858_v31 = vpop.f32.mrf.mxu1 }
 0x2d4   : > { %18650 = vst [vmem:[#allocation130_spill] sm:$0xff] %v15294_v50  ;;  %v10991_v4 = vpop.f32.mrf.mxu0  ;;  %11218 = vmatmul.mubr.msk.bf16.gmra.mxu0 %vm1265_vm3, %v18652_v54  ;;  %v15299_v13 = vadd.f32 %v5057_v41, %v4708_v24  ;;  %v4711_v28 = vadd.f32 %v10858_v31, %v18654_v51  ;;  %v18660_v41 = vld [vmem:[#allocation245_spill] sm:$0xff] }
 0x2d5   : > { %11221 = vmatprep.mubr.msk.bf16.mxu0 %vm1265_vm3, %v18655_v55  ;;  %v4356_v11 = vpop.f32.mrf.mxu1  ;;  %v18661_v54 = vld [vmem:[#allocation29_spill] sm:$0xff] }
 0x2d6   : > { %18653 = vst [vmem:[#allocation211_spill] sm:$0xff] %v15299_v13  ;;  %v5073_v46 = vpop.f32.mrf.mxu0  ;;  %v15304_v22 = vadd.f32 %v10988_v18, %v4711_v28  ;;  %v4709_v35 = vadd.f32 %v4356_v11, %v18657_v8  ;;  %v18663_v18 = vld [vmem:[#allocation247_spill] sm:$0xff] }
 0x2d7   : > { %v10861_v50 = vpop.f32.mrf.mxu1  ;;  %11088 = vmatmul.mubr.msk.bf16.gmra.mxu1 %vm1265_vm3, %v18658_v53  ;;  %v18664_v8 = vld [vmem:[#allocation75_spill] sm:$0xff] }
 0x2d8   : > { %18656 = vst [vmem:[#allocation213_spill] sm:$0xff] %v15304_v22  ;;  %v10992_v0 = vpop.f32.mrf.mxu0  ;;  %v15309_v60 = vadd.f32 %v5060_v58, %v4709_v35  ;;  %v4714_v24 = vadd.f32 %v10861_v50, %v18660_v41  ;;  %11091 = vmatprep.mubr.msk.bf16.mxu1 %vm1265_vm3, %v18661_v54  ;;  %v18666_v58 = vld [vmem:[#allocation250_spill] sm:$0xff] }
 0x2d9   : > { %v4369_v31 = vpop.f32.mrf.mxu1 }
 0x2da   : > { %18659 = vst [vmem:[#allocation216_spill] sm:$0xff] %v15309_v60  ;;  %v5076_v55 = vpop.f32.mrf.mxu0  ;;  %v15314_v51 = vadd.f32 %v10991_v4, %v4714_v24  ;;  %v4712_v28 = vadd.f32 %v4369_v31, %v18663_v18  ;;  %v18667_v60 = vld [vmem:[#allocation158_spill] sm:$0xff]  ;;  %v18670_v31 = vld [vmem:[#allocation44_spill] sm:$0xff] }
 0x2db   : > { %v10862_v22 = vpop.f32.mrf.mxu1  ;;  %v18669_v4 = vld [vmem:[#allocation254_spill] sm:$0xff] }
 0x2dc   : > { %18662 = vst [vmem:[#allocation133_spill] sm:$0xff] %v15314_v51  ;;  %v10995_v11 = vpop.f32.mrf.mxu0  ;;  %11222 = vmatmul.mubr.msk.bf16.gmra.mxu0 %vm1265_vm3, %v18664_v8  ;;  %v15319_v13 = vadd.f32 %v5073_v46, %v4712_v28  ;;  %v4715_v35 = vadd.f32 %v10862_v22, %v18666_v58  ;;  %v18672_v46 = vld [vmem:[#allocation256_spill] sm:$0xff] }
 0x2dd   : > { %11225 = vmatprep.mubr.msk.bf16.mxu0 %vm1265_vm3, %v18667_v60  ;;  %v4372_v50 = vpop.f32.mrf.mxu1  ;;  %v18673_v8 = vld [vmem:[#allocation152_spill] sm:$0xff] }
 0x2de   : > { %18665 = vst [vmem:[#allocation134_spill] sm:$0xff] %v15319_v13  ;;  %v5089_v41 = vpop.f32.mrf.mxu0  ;;  %v15324_v54 = vadd.f32 %v10992_v0, %v4715_v35  ;;  %v4713_v24 = vadd.f32 %v4372_v50, %v18669_v4  ;;  %v18675_v0 = vld [vmem:[#allocation259_spill] sm:$0xff]  ;;  %v18676_v4 = vld [vmem:[#allocation85_spill] sm:$0xff] }
 0x2df   : > { %v10865_v51 = vpop.f32.mrf.mxu1  ;;  %11092 = vmatmul.mubr.msk.bf16.gmra.mxu1 %vm1265_vm3, %v18670_v31 }
 0x2e0   : > { %18668 = vst [vmem:[#allocation45_spill] sm:$0xff] %v15324_v54  ;;  %v10996_v18 = vpop.f32.mrf.mxu0  ;;  %v15329_v53 = vadd.f32 %v5076_v55, %v4713_v24  ;;  %v4718_v28 = vadd.f32 %v10865_v51, %v18672_v46  ;;  %11095 = vmatprep.mubr.msk.bf16.mxu1 %vm1265_vm3, %v18673_v8  ;;  %v18678_v55 = vld [vmem:[#allocation260_spill] sm:$0xff] }
 0x2e1   : > { %v4385_v22 = vpop.f32.mrf.mxu1 }
 0x2e2   : > { %18671 = vst [vmem:[#allocation221_spill] sm:$0xff] %v15329_v53  ;;  %v5092_v60 = vpop.f32.mrf.mxu0  ;;  %v15334_v58 = vadd.f32 %v10995_v11, %v4718_v28  ;;  %v4716_v35 = vadd.f32 %v4385_v22, %v18675_v0  ;;  %v18679_v53 = vld [vmem:[#allocation165_spill] sm:$0xff]  ;;  %v18681_v11 = vld [vmem:[#allocation263_spill] sm:$0xff]  ;;  %v18682_v22 = vld [vmem:[#allocation60_spill] sm:$0xff] }
 0x2e3   : > { %v10866_v54 = vpop.f32.mrf.mxu1 }
 0x2e4   : > { %18674 = vst [vmem:[#allocation48_spill] sm:$0xff] %v15334_v58  ;;  %v10999_v50 = vpop.f32.mrf.mxu0  ;;  %11226 = vmatmul.mubr.msk.bf16.gmra.mxu0 %vm1265_vm3, %v18676_v4  ;;  %v15339_v13 = vadd.f32 %v5089_v41, %v4716_v35  ;;  %v4719_v24 = vadd.f32 %v10866_v54, %v18678_v55  ;;  %v18684_v41 = vld [vmem:[#allocation265_spill] sm:$0xff]  ;;  %v18685_v4 = vld [vmem:[#allocation64_spill] sm:$0xff] }
 0x2e5   : > { %11229 = vmatprep.mubr.msk.bf16.mxu0 %vm1265_vm3, %v18679_v53  ;;  %v4388_v51 = vpop.f32.mrf.mxu1 }
 0x2e6   : > { %18677 = vst [vmem:[#allocation224_spill] sm:$0xff] %v15339_v13  ;;  %v5105_v46 = vpop.f32.mrf.mxu0  ;;  %v15344_v8 = vadd.f32 %v10996_v18, %v4719_v24  ;;  %v4717_v28 = vadd.f32 %v4388_v51, %v18681_v11  ;;  %v18687_v18 = vld [vmem:[#allocation268_spill] sm:$0xff]  ;;  %v18688_v11 = vld [vmem:[#allocation170_spill] sm:$0xff] }
 0x2e7   : > { %v10869_v58 = vpop.f32.mrf.mxu1  ;;  %11096 = vmatmul.mubr.msk.bf16.gmra.mxu1 %vm1265_vm3, %v18682_v22 }
 0x2e8   : > { %18680 = vst [vmem:[#allocation137_spill] sm:$0xff] %v15344_v8  ;;  %v11000_v0 = vpop.f32.mrf.mxu0  ;;  %v15349_v31 = vadd.f32 %v5092_v60, %v4717_v28  ;;  %v4722_v35 = vadd.f32 %v10869_v58, %v18684_v41  ;;  %11099 = vmatprep.mubr.msk.bf16.mxu1 %vm1265_vm3, %v18685_v4  ;;  %v18690_v60 = vld [vmem:[#allocation55_spill] sm:$0xff] }
 0x2e9   : > { %v4401_v54 = vpop.f32.mrf.mxu1 }
 0x2ea   : > { %18683 = vst [vmem:[#allocation138_spill] sm:$0xff] %v15349_v31  ;;  %v5108_v53 = vpop.f32.mrf.mxu0  ;;  %v15354_v55 = vadd.f32 %v10999_v50, %v4722_v35  ;;  %v4720_v24 = vadd.f32 %v4401_v54, %v18687_v18  ;;  %v18691_v31 = vld [vmem:[#allocation173_spill] sm:$0xff]  ;;  %v18693_v50 = vld [vmem:[#allocation40_spill] sm:$0xff]  ;;  %v18694_v54 = vld [vmem:[#allocation70_spill] sm:$0xff] }
 0x2eb   : > { %v10870_v8 = vpop.f32.mrf.mxu1 }
 0x2ec   : > { %18686 = vst [vmem:[#allocation36_spill] sm:$0xff] %v15354_v55  ;;  %v11003_v51 = vpop.f32.mrf.mxu0  ;;  %11230 = vmatmul.mubr.msk.bf16.gmra.mxu0 %vm1265_vm3, %v18688_v11  ;;  %v15359_v13 = vadd.f32 %v5105_v46, %v4720_v24  ;;  %v4723_v28 = vadd.f32 %v10870_v8, %v18690_v60  ;;  %v18696_v46 = vld [vmem:[#allocation54_spill] sm:$0xff]  ;;  %v18697_v11 = vld [vmem:[#allocation164_spill] sm:$0xff] }
 0x2ed   : > { %11233 = vmatprep.mubr.msk.bf16.mxu0 %vm1265_vm3, %v18691_v31  ;;  %v4404_v58 = vpop.f32.mrf.mxu1 }
 0x2ee   : > { %18689 = vst [vmem:[#allocation229_spill] sm:$0xff] %v15359_v13  ;;  %v5121_v41 = vpop.f32.mrf.mxu0  ;;  %v15364_v4 = vadd.f32 %v11000_v0, %v4723_v28  ;;  %v4721_v35 = vadd.f32 %v4404_v58, %v18693_v50  ;;  %v18699_v0 = vld [vmem:[#allocation62_spill] sm:$0xff]  ;;  %v18700_v50 = vld [vmem:[#allocation179_spill] sm:$0xff] }
 0x2ef   : > { %v10873_v55 = vpop.f32.mrf.mxu1  ;;  %11100 = vmatmul.mubr.msk.bf16.gmra.mxu1 %vm1265_vm3, %v18694_v54 }
 0x2f0   : > { %18692 = vst [vmem:[#allocation52_spill] sm:$0xff] %v15364_v4  ;;  %v11004_v18 = vpop.f32.mrf.mxu0  ;;  %v15369_v22 = vadd.f32 %v5108_v53, %v4721_v35  ;;  %v4726_v24 = vadd.f32 %v10873_v55, %v18696_v46  ;;  %11103 = vmatprep.mubr.msk.bf16.mxu1 %vm1265_vm3, %v18697_v11  ;;  %v18702_v53 = vld [vmem:[#allocation154_spill] sm:$0xff] }
 0x2f1   : > { %v4417_v8 = vpop.f32.mrf.mxu1 }
 0x2f2   : > { %18695 = vst [vmem:[#allocation232_spill] sm:$0xff] %v15369_v22  ;;  %v5124_v31 = vpop.f32.mrf.mxu0  ;;  %v15374_v60 = vadd.f32 %v11003_v51, %v4726_v24  ;;  %v4724_v28 = vadd.f32 %v4417_v8, %v18699_v0  ;;  %v18703_v22 = vld [vmem:[#allocation182_spill] sm:$0xff]  ;;  %v18705_v51 = vld [vmem:[#allocation156_spill] sm:$0xff]  ;;  %v18706_v8 = vld [vmem:[#allocation169_spill] sm:$0xff] }
 0x2f3   : > { %v10874_v4 = vpop.f32.mrf.mxu1 }
 0x2f4   : > { %18698 = vst [vmem:[#allocation145_spill] sm:$0xff] %v15374_v60  ;;  %v11007_v58 = vpop.f32.mrf.mxu0  ;;  %11234 = vmatmul.mubr.msk.bf16.gmra.mxu0 %vm1265_vm3, %v18700_v50  ;;  %v15379_v13 = vadd.f32 %v5121_v41, %v4724_v28  ;;  %v4727_v35 = vadd.f32 %v10874_v4, %v18702_v53  ;;  %v18708_v41 = vld [vmem:[#allocation72_spill] sm:$0xff] }
 0x2f5   : > { %11237 = vmatprep.mubr.msk.bf16.mxu0 %vm1265_vm3, %v18703_v22  ;;  %v4420_v55 = vpop.f32.mrf.mxu1  ;;  %v18709_v50 = vld [vmem:[#allocation84_spill] sm:$0xff] }
 0x2f6   : > { %18701 = vst [vmem:[#allocation146_spill] sm:$0xff] %v15379_v13  ;;  %v5137_v46 = vpop.f32.mrf.mxu0  ;;  %v15384_v11 = vadd.f32 %v11004_v18, %v4727_v35  ;;  %v4725_v24 = vadd.f32 %v4420_v55, %v18705_v51  ;;  %v18711_v18 = vld [vmem:[#allocation77_spill] sm:$0xff]  ;;  %v18712_v51 = vld [vmem:[#allocation188_spill] sm:$0xff] }
 0x2f7   : > { %v10877_v60 = vpop.f32.mrf.mxu1  ;;  %11104 = vmatmul.mubr.msk.bf16.gmra.mxu1 %vm1265_vm3, %v18706_v8 }
 0x2f8   : > { %18704 = vst [vmem:[#allocation68_spill] sm:$0xff] %v15384_v11  ;;  %v11008_v0 = vpop.f32.mrf.mxu0  ;;  %v15389_v54 = vadd.f32 %v5124_v31, %v4725_v24  ;;  %v4730_v28 = vadd.f32 %v10877_v60, %v18708_v41  ;;  %11107 = vmatprep.mubr.msk.bf16.mxu1 %vm1265_vm3, %v18709_v50  ;;  %v18714_v31 = vld [vmem:[#allocation162_spill] sm:$0xff] }
 0x2f9   : > { %v4433_v4 = vpop.f32.mrf.mxu1 }
 0x2fa   : > { %18707 = vst [vmem:[#allocation236_spill] sm:$0xff] %v15389_v54  ;;  %v5140_v22 = vpop.f32.mrf.mxu0  ;;  %v15394_v53 = vadd.f32 %v11007_v58, %v4730_v28  ;;  %v4728_v35 = vadd.f32 %v4433_v4, %v18711_v18  ;;  %v18715_v54 = vld [vmem:[#allocation102_spill] sm:$0xff]  ;;  %v18718_v4 = vld [vmem:[#allocation140_spill] sm:$0xff] }
 0x2fb   : > { %v10878_v11 = vpop.f32.mrf.mxu1  ;;  %v18717_v58 = vld [vmem:[#allocation74_spill] sm:$0xff] }
 0x2fc   : > { %18710 = vst [vmem:[#allocation153_spill] sm:$0xff] %v15394_v53  ;;  %v11011_v55 = vpop.f32.mrf.mxu0  ;;  %11238 = vmatmul.mubr.msk.bf16.gmra.mxu0 %vm1265_vm3, %v18712_v51  ;;  %v15399_v13 = vadd.f32 %v5137_v46, %v4728_v35  ;;  %v4731_v24 = vadd.f32 %v10878_v11, %v18714_v31  ;;  %v18720_v46 = vld [vmem:[#allocation82_spill] sm:$0xff]  ;;  %v18721_v51 = vld [vmem:[#allocation92_spill] sm:$0xff] }
 0x2fd   : > { %11241 = vmatprep.mubr.msk.bf16.mxu0 %vm1265_vm3, %v18715_v54  ;;  %v4436_v60 = vpop.f32.mrf.mxu1 }
 0x2fe   : > { %18713 = vst [vmem:[#allocation239_spill] sm:$0xff] %v15399_v13  ;;  %v5153_v41 = vpop.f32.mrf.mxu0  ;;  %v15404_v50 = vadd.f32 %v11008_v0, %v4731_v24  ;;  %v4729_v28 = vadd.f32 %v4436_v60, %v18717_v58  ;;  %v18723_v0 = vld [vmem:[#allocation166_spill] sm:$0xff]  ;;  %v18724_v58 = vld [vmem:[#allocation103_spill] sm:$0xff] }
 0x2ff   : > { %v10881_v53 = vpop.f32.mrf.mxu1  ;;  %11108 = vmatmul.mubr.msk.bf16.gmra.mxu1 %vm1265_vm3, %v18718_v4 }
 0x300   : > { %18716 = vst [vmem:[#allocation245_spill] sm:$0xff] %v15404_v50  ;;  %v11012_v18 = vpop.f32.mrf.mxu0  ;;  %v15409_v8 = vadd.f32 %v5140_v22, %v4729_v28  ;;  %v4734_v35 = vadd.f32 %v10881_v53, %v18720_v46  ;;  %11111 = vmatprep.mubr.msk.bf16.mxu1 %vm1265_vm3, %v18721_v51  ;;  %v18726_v22 = vld [vmem:[#allocation168_spill] sm:$0xff] }
 0x301   : > { %v4449_v11 = vpop.f32.mrf.mxu1 }
 0x302   : > { %18719 = vst [vmem:[#allocation247_spill] sm:$0xff] %v15409_v8  ;;  %v5156_v54 = vpop.f32.mrf.mxu0  ;;  %v15414_v31 = vadd.f32 %v11011_v55, %v4734_v35  ;;  %v4732_v24 = vadd.f32 %v4449_v11, %v18723_v0  ;;  %v18727_v8 = vld [vmem:[#allocation111_spill] sm:$0xff]  ;;  %v18729_v55 = vld [vmem:[#allocation80_spill] sm:$0xff]  ;;  %v18730_v11 = vld [vmem:[#allocation141_spill] sm:$0xff] }
 0x303   : > { %v10882_v50 = vpop.f32.mrf.mxu1 }
 0x304   : > { %18722 = vst [vmem:[#allocation75_spill] sm:$0xff] %v15414_v31  ;;  %v11015_v60 = vpop.f32.mrf.mxu0  ;;  %11242 = vmatmul.mubr.msk.bf16.gmra.mxu0 %vm1265_vm3, %v18724_v58  ;;  %v15419_v13 = vadd.f32 %v5153_v41, %v4732_v24  ;;  %v4735_v28 = vadd.f32 %v10882_v50, %v18726_v22  ;;  %v18732_v41 = vld [vmem:[#allocation93_spill] sm:$0xff]  ;;  %v18733_v58 = vld [vmem:[#allocation143_spill] sm:$0xff] }
 0x305   : > { %11245 = vmatprep.mubr.msk.bf16.mxu0 %vm1265_vm3, %v18727_v8  ;;  %v4452_v53 = vpop.f32.mrf.mxu1 }
 0x306   : > { %18725 = vst [vmem:[#allocation250_spill] sm:$0xff] %v15419_v13  ;;  %v5169_v46 = vpop.f32.mrf.mxu0  ;;  %v15424_v51 = vadd.f32 %v11012_v18, %v4735_v28  ;;  %v4733_v35 = vadd.f32 %v4452_v53, %v18729_v55  ;;  %v18735_v18 = vld [vmem:[#allocation172_spill] sm:$0xff]  ;;  %v18736_v55 = vld [vmem:[#allocation113_spill] sm:$0xff] }
 0x307   : > { %v10885_v31 = vpop.f32.mrf.mxu1  ;;  %11112 = vmatmul.mubr.msk.bf16.gmra.mxu1 %vm1265_vm3, %v18730_v11 }
 0x308   : > { %18728 = vst [vmem:[#allocation158_spill] sm:$0xff] %v15424_v51  ;;  %v11016_v0 = vpop.f32.mrf.mxu0  ;;  %v15429_v4 = vadd.f32 %v5156_v54, %v4733_v35  ;;  %v4738_v24 = vadd.f32 %v10885_v31, %v18732_v41  ;;  %11115 = vmatprep.mubr.msk.bf16.mxu1 %vm1265_vm3, %v18733_v58  ;;  %v18738_v54 = vld [vmem:[#allocation176_spill] sm:$0xff] }
 0x309   : > { %v4465_v50 = vpop.f32.mrf.mxu1 }
 0x30a   : > { %18731 = vst [vmem:[#allocation254_spill] sm:$0xff] %v15429_v4  ;;  %v5172_v8 = vpop.f32.mrf.mxu0  ;;  %v15434_v22 = vadd.f32 %v11015_v60, %v4738_v24  ;;  %v4736_v28 = vadd.f32 %v4465_v50, %v18735_v18  ;;  %v18739_v4 = vld [vmem:[#allocation199_spill] sm:$0xff]  ;;  %v18741_v60 = vld [vmem:[#allocation89_spill] sm:$0xff]  ;;  %v18742_v50 = vld [vmem:[#allocation144_spill] sm:$0xff] }
 0x30b   : > { %v10886_v51 = vpop.f32.mrf.mxu1 }
 0x30c   : > { %18734 = vst [vmem:[#allocation256_spill] sm:$0xff] %v15434_v22  ;;  %v11019_v53 = vpop.f32.mrf.mxu0  ;;  %11246 = vmatmul.mubr.msk.bf16.gmra.mxu0 %vm1265_vm3, %v18736_v55  ;;  %v15439_v13 = vadd.f32 %v5169_v46, %v4736_v28  ;;  %v4739_v35 = vadd.f32 %v10886_v51, %v18738_v54  ;;  %v18744_v46 = vld [vmem:[#allocation178_spill] sm:$0xff]  ;;  %v18745_v55 = vld [vmem:[#allocation147_spill] sm:$0xff] }
 0x30d   : > { %11249 = vmatprep.mubr.msk.bf16.mxu0 %vm1265_vm3, %v18739_v4  ;;  %v4468_v31 = vpop.f32.mrf.mxu1 }
 0x30e   : > { %18737 = vst [vmem:[#allocation259_spill] sm:$0xff] %v15439_v13  ;;  %v5185_v41 = vpop.f32.mrf.mxu0  ;;  %v15444_v58 = vadd.f32 %v11016_v0, %v4739_v35  ;;  %v4737_v24 = vadd.f32 %v4468_v31, %v18741_v60  ;;  %v18747_v0 = vld [vmem:[#allocation181_spill] sm:$0xff]  ;;  %v18748_v60 = vld [vmem:[#allocation204_spill] sm:$0xff] }
 0x30f   : > { %v10889_v22 = vpop.f32.mrf.mxu1  ;;  %11116 = vmatmul.mubr.msk.bf16.gmra.mxu1 %vm1265_vm3, %v18742_v50 }
 0x310   : > { %18740 = vst [vmem:[#allocation85_spill] sm:$0xff] %v15444_v58  ;;  %v11020_v18 = vpop.f32.mrf.mxu0  ;;  %v15449_v11 = vadd.f32 %v5172_v8, %v4737_v24  ;;  %v4742_v28 = vadd.f32 %v10889_v22, %v18744_v46  ;;  %11119 = vmatprep.mubr.msk.bf16.mxu1 %vm1265_vm3, %v18745_v55  ;;  %v18750_v8 = vld [vmem:[#allocation185_spill] sm:$0xff] }
 0x311   : > { %v4481_v51 = vpop.f32.mrf.mxu1 }
 0x312   : > { %18743 = vst [vmem:[#allocation260_spill] sm:$0xff] %v15449_v11  ;;  %v5188_v4 = vpop.f32.mrf.mxu0  ;;  %v15454_v54 = vadd.f32 %v11019_v53, %v4742_v28  ;;  %v4740_v35 = vadd.f32 %v4481_v51, %v18747_v0  ;;  %v18751_v11 = vld [vmem:[#allocation206_spill] sm:$0xff]  ;;  %v18754_v51 = vunpack.c.l.bf16 %v15062_v2 }
 0x313   : > { %v10890_v58 = vpop.f32.mrf.mxu1  ;;  %v18753_v53 = vld [vmem:[#allocation98_spill] sm:$0xff] }
 0x314   : > { %18746 = vst [vmem:[#allocation165_spill] sm:$0xff] %v15454_v54  ;;  %v11023_v31 = vpop.f32.mrf.mxu0  ;;  %11250 = vmatmul.mubr.msk.bf16.gmra.mxu0 %vm1265_vm3, %v18748_v60  ;;  %v15459_v13 = vadd.f32 %v5185_v41, %v4740_v35  ;;  %v4743_v24 = vadd.f32 %v10890_v58, %v18750_v8  ;;  %v5488_v0 = vrot.slane %v18754_v51, 2  ;;  %v18755_v54 = vunpack.c.h.bf16 %v15062_v2  ;;  %v18756_v41 = vld [vmem:[#allocation148_spill] sm:$0xff] }
 0x315   : > { %11253 = vmatprep.mubr.msk.bf16.mxu0 %vm1265_vm3, %v18751_v11  ;;  %v4484_v22 = vpop.f32.mrf.mxu1  ;;  %v18758_v11 = vld [vmem:[#allocation187_spill] sm:$0xff] }
 0x316   : > { %18749 = vst [vmem:[#allocation263_spill] sm:$0xff] %v15459_v13  ;;  %v5201_v46 = vpop.f32.mrf.mxu0  ;;  %v15464_v55 = vadd.f32 %v11020_v18, %v4743_v24  ;;  %v4741_v28 = vadd.f32 %v4484_v22, %v18753_v53  ;;  %v5489_v50 = vrot.slane %v18755_v54, 2  ;;  %v18759_v13 = vld [vmem:[#allocation197_spill] sm:$0xff]  ;;  %v18760_v22 = vunpack.c.l.bf16 %v15065_v34  ;;  %v18762_v54 = vld [vmem:[#allocation190_spill] sm:$0xff] }
 0x317   : > { %v10893_v60 = vpop.f32.mrf.mxu1  ;;  %11120 = vmatmul.mubr.msk.bf16.gmra.mxu1 %vm1265_vm3, %v18756_v41 }
 0x318   : > { %18752 = vst [vmem:[#allocation265_spill] sm:$0xff] %v15464_v55  ;;  %v11024_v58 = vpop.f32.mrf.mxu0  ;;  %v15473_v35 = vadd.f32 %v5188_v4, %v4741_v28  ;;  %v4746_v8 = vadd.f32 %v10893_v60, %v18758_v11  ;;  %11123 = vmatprep.mubr.msk.bf16.mxu1 %vm1265_vm3, %v18759_v13  ;;  %v15480_v53 = vrot.slane %v18760_v22, 2  ;;  %v5490_v4 = vsel %vm2747_vm2, %v5488_v0, %v5489_v50  ;;  %v18765_v11 = vld [vmem:[#allocation193_spill] sm:$0xff]  ;;  %v18766_v22 = vld [vmem:[#allocation215_spill] sm:$0xff] }
 0x319   : > { %v4497_v18 = vpop.f32.mrf.mxu1  ;;  %v18769_v0 = vld [vmem:[#allocation149_spill] sm:$0xff] }
 0x31a   : > { %18757 = vst [vmem:[#allocation268_spill] sm:$0xff] %v15473_v35  ;;  %v5204_v24 = vpop.f32.mrf.mxu0  ;;  %v15482_v51 = vadd.f32 %v11023_v31, %v4746_v8  ;;  %v4744_v55 = vadd.f32 %v4497_v18, %v18762_v54  ;;  %v5492_v28 = vsel %vm2747_vm2, %v5489_v50, %v15480_v53 }
 0x31b   : > { %v10894_v26 = vpop.f32.mrf.mxu1  ;;  %v15495_v31 = vpack.c.bf16 %v5492_v28, %v5490_v4 }
 0x31c   : > { %18761 = vst [vmem:[#allocation170_spill] sm:$0xff] %v15482_v51  ;;  %v11027_v41 = vpop.f32.mrf.mxu0  ;;  %11254 = vmatmul.mubr.msk.bf16.gmra.mxu0 %vm1265_vm3, %v18763_v56  ;;  %v15490_v60 = vadd.f32 %v5201_v46, %v4744_v55  ;;  %v4747_v35 = vadd.f32 %v10894_v26, %v18765_v11  ;;  %v18768_v51 = vld [vmem:[#allocation106_spill] sm:$0xff]  ;;  %v18771_v46 = vld [vmem:[#allocation108_spill] sm:$0xff]  ;;  %v18772_v11 = vld [vmem:[#allocation203_spill] sm:$0xff] }
 0x31d   : > { %11257 = vmatprep.mubr.msk.bf16.mxu0 %vm1265_vm3, %v18766_v22  ;;  %v4500_v8 = vpop.f32.mrf.mxu1 }
 0x31e   : > { %18764 = vst [vmem:[#allocation55_spill] sm:$0xff] %v15490_v60  ;;  %v5217_v18 = vpop.f32.mrf.mxu0  ;;  %v15497_v54 = vadd.f32 %v11024_v58, %v4747_v35  ;;  %v4745_v56 = vadd.f32 %v4500_v8, %v18768_v51  ;;  %v18774_v58 = vld [vmem:[#allocation2_spill] sm:$0xff] }
 0x31f   : > { %v10897_v13 = vpop.f32.mrf.mxu1  ;;  %11124 = vmatmul.mubr.msk.bf16.gmra.mxu1 %vm1265_vm3, %v18769_v0  ;;  %v18775_v8 = vld [vmem:[#allocation18_spill] sm:$0xff] }
 0x320   : > { %18767 = vst [vmem:[#allocation173_spill] sm:$0xff] %v15497_v54  ;;  %v11028_v50 = vpop.f32.mrf.mxu0  ;;  %v15502_v55 = vadd.f32 %v5204_v24, %v4745_v56  ;;  %v4750_v26 = vadd.f32 %v10897_v13, %v18771_v46  ;;  %11127 = vmatprep.mubr.msk.bf16.mxu1 %vm1265_vm3, %v18772_v11  ;;  %v18777_v24 = vld [vmem:[#allocation196_spill] sm:$0xff] }
 0x321   : > { %v4513_v4 = vpop.f32.mrf.mxu1 }
 0x322   : > { %18770 = vst [vmem:[#allocation40_spill] sm:$0xff] %v15502_v55  ;;  %v5220_v28 = vpop.f32.mrf.mxu0  ;;  %v15507_v22 = vadd.f32 %v11027_v41, %v4750_v26  ;;  %v4748_v35 = vadd.f32 %v4513_v4, %v18774_v58  ;;  %v18778_v55 = vld [vmem:[#allocation222_spill] sm:$0xff] }
 0x323   : > { %v10898_v54 = vpop.f32.mrf.mxu1  ;;  %v18780_v41 = vld [vmem:[#allocation198_spill] sm:$0xff] }
 0x324   : > { %18773 = vst [vmem:[#allocation54_spill] sm:$0xff] %v15507_v22  ;;  %v11031_v51 = vpop.f32.mrf.mxu0  ;;  %11258 = vmatmul.mubr.msk.bf16.gmra.mxu0 %vm1265_vm3, %v18775_v8  ;;  %v15512_v60 = vadd.f32 %v5217_v18, %v4748_v35  ;;  %v4751_v56 = vadd.f32 %v10898_v54, %v18777_v24  ;;  %v18781_v4 = vld [vmem:[#allocation42_spill] sm:$0xff]  ;;  %v18783_v18 = vld [vmem:[#allocation4_spill] sm:$0xff] }
 0x325   : > { %11261 = vmatprep.mubr.msk.bf16.mxu0 %vm1265_vm3, %v18778_v55  ;;  %v4516_v13 = vpop.f32.mrf.mxu1  ;;  %v18784_v8 = vld [vmem:[#allocation210_spill] sm:$0xff] }
 0x326   : > { %18776 = vst [vmem:[#allocation62_spill] sm:$0xff] %v15512_v60  ;;  %v5233_v46 = vpop.f32.mrf.mxu0  ;;  %v15517_v11 = vadd.f32 %v11028_v50, %v4751_v56  ;;  %v4749_v26 = vadd.f32 %v4516_v13, %v18780_v41  ;;  %v18786_v50 = vld [vmem:[#allocation200_spill] sm:$0xff] }
 0x327   : > { %v10901_v22 = vpop.f32.mrf.mxu1  ;;  %11128 = vmatmul.mubr.msk.bf16.gmra.mxu1 %vm1265_vm3, %v18781_v4  ;;  %v18787_v41 = vld [vmem:[#allocation24_spill] sm:$0xff] }
 0x328   : > { %18779 = vst [vmem:[#allocation179_spill] sm:$0xff] %v15517_v11  ;;  %v11032_v58 = vpop.f32.mrf.mxu0  ;;  %v15522_v0 = vadd.f32 %v5220_v28, %v4749_v26  ;;  %v4754_v35 = vadd.f32 %v10901_v22, %v18783_v18  ;;  %11131 = vmatprep.mubr.msk.bf16.mxu1 %vm1265_vm3, %v18784_v8  ;;  %v18789_v28 = vld [vmem:[#allocation202_spill] sm:$0xff] }
 0x329   : > { %v4529_v54 = vpop.f32.mrf.mxu1 }
 0x32a   : > { %18782 = vst [vmem:[#allocation154_spill] sm:$0xff] %v15522_v0  ;;  %v5236_v55 = vpop.f32.mrf.mxu0  ;;  %v15527_v24 = vadd.f32 %v11031_v51, %v4754_v35  ;;  %v4752_v56 = vadd.f32 %v4529_v54, %v18786_v50  ;;  %v18790_v0 = vld [vmem:[#allocation230_spill] sm:$0xff]  ;;  %v18792_v51 = vld [vmem:[#allocation7_spill] sm:$0xff] }
 0x32b   : > { %v10902_v11 = vpop.f32.mrf.mxu1  ;;  %v18793_v54 = vld [vmem:[#allocation19_spill] sm:$0xff] }
 0x32c   : > { %18785 = vst [vmem:[#allocation182_spill] sm:$0xff] %v15527_v24  ;;  %v11035_v13 = vpop.f32.mrf.mxu0  ;;  %11262 = vmatmul.mubr.msk.bf16.gmra.mxu0 %vm1265_vm3, %v18787_v41  ;;  %v15532_v60 = vadd.f32 %v5233_v46, %v4752_v56  ;;  %v4755_v26 = vadd.f32 %v10902_v11, %v18789_v28  ;;  %v18795_v46 = vld [vmem:[#allocation205_spill] sm:$0xff]  ;;  %v18796_v41 = vld [vmem:[#allocation218_spill] sm:$0xff] }
 0x32d   : > { %11265 = vmatprep.mubr.msk.bf16.mxu0 %vm1265_vm3, %v18790_v0  ;;  %v4532_v22 = vpop.f32.mrf.mxu1 }
 0x32e   : > { %18788 = vst [vmem:[#allocation156_spill] sm:$0xff] %v15532_v60  ;;  %v5249_v18 = vpop.f32.mrf.mxu0  ;;  %v15537_v8 = vadd.f32 %v11032_v58, %v4755_v26  ;;  %v4753_v35 = vadd.f32 %v4532_v22, %v18792_v51  ;;  %v18798_v58 = vld [vmem:[#allocation207_spill] sm:$0xff]  ;;  %v18799_v51 = vld [vmem:[#allocation32_spill] sm:$0xff] }
 0x32f   : > { %v10905_v24 = vpop.f32.mrf.mxu1  ;;  %11132 = vmatmul.mubr.msk.bf16.gmra.mxu1 %vm1265_vm3, %v18793_v54 }
 0x330   : > { %18791 = vst [vmem:[#allocation72_spill] sm:$0xff] %v15537_v8  ;;  %v11036_v50 = vpop.f32.mrf.mxu0  ;;  %v15542_v4 = vadd.f32 %v5236_v55, %v4753_v35  ;;  %v4758_v56 = vadd.f32 %v10905_v24, %v18795_v46  ;;  %11135 = vmatprep.mubr.msk.bf16.mxu1 %vm1265_vm3, %v18796_v41  ;;  %v18801_v55 = vld [vmem:[#allocation209_spill] sm:$0xff] }
 0x331   : > { %v4545_v11 = vpop.f32.mrf.mxu1 }
 0x332   : > { %18794 = vst [vmem:[#allocation77_spill] sm:$0xff] %v15542_v4  ;;  %v5252_v0 = vpop.f32.mrf.mxu0  ;;  %v15547_v28 = vadd.f32 %v11035_v13, %v4758_v56  ;;  %v4756_v26 = vadd.f32 %v4545_v11, %v18798_v58  ;;  %v18802_v4 = vld [vmem:[#allocation237_spill] sm:$0xff]  ;;  %v18804_v13 = vld [vmem:[#allocation12_spill] sm:$0xff]  ;;  %v18805_v11 = vld [vmem:[#allocation26_spill] sm:$0xff] }
 0x333   : > { %v10906_v8 = vpop.f32.mrf.mxu1 }
 0x334   : > { %18797 = vst [vmem:[#allocation188_spill] sm:$0xff] %v15547_v28  ;;  %v11039_v22 = vpop.f32.mrf.mxu0  ;;  %11266 = vmatmul.mubr.msk.bf16.gmra.mxu0 %vm1265_vm3, %v18799_v51  ;;  %v15552_v60 = vadd.f32 %v5249_v18, %v4756_v26  ;;  %v4759_v35 = vadd.f32 %v10906_v8, %v18801_v55  ;;  %v18807_v18 = vld [vmem:[#allocation214_spill] sm:$0xff] }
 0x335   : > { %11269 = vmatprep.mubr.msk.bf16.mxu0 %vm1265_vm3, %v18802_v4  ;;  %v4548_v24 = vpop.f32.mrf.mxu1  ;;  %v18808_v51 = vld [vmem:[#allocation226_spill] sm:$0xff] }
 0x336   : > { %18800 = vst [vmem:[#allocation162_spill] sm:$0xff] %v15552_v60  ;;  %v5265_v46 = vpop.f32.mrf.mxu0  ;;  %v15557_v41 = vadd.f32 %v11036_v50, %v4759_v35  ;;  %v4757_v56 = vadd.f32 %v4548_v24, %v18804_v13  ;;  %v18810_v50 = vld [vmem:[#allocation217_spill] sm:$0xff]  ;;  %v18811_v13 = vld [vmem:[#allocation242_spill] sm:$0xff] }
 0x337   : > { %v10909_v28 = vpop.f32.mrf.mxu1  ;;  %11136 = vmatmul.mubr.msk.bf16.gmra.mxu1 %vm1265_vm3, %v18805_v11 }
 0x338   : > { %18803 = vst [vmem:[#allocation102_spill] sm:$0xff] %v15557_v41  ;;  %v11040_v58 = vpop.f32.mrf.mxu0  ;;  %v15562_v54 = vadd.f32 %v5252_v0, %v4757_v56  ;;  %v4762_v26 = vadd.f32 %v10909_v28, %v18807_v18  ;;  %11139 = vmatprep.mubr.msk.bf16.mxu1 %vm1265_vm3, %v18808_v51  ;;  %v18813_v0 = vld [vmem:[#allocation219_spill] sm:$0xff] }
 0x339   : > { %v4561_v8 = vpop.f32.mrf.mxu1 }
 0x33a   : > { %18806 = vst [vmem:[#allocation74_spill] sm:$0xff] %v15562_v54  ;;  %v5268_v4 = vpop.f32.mrf.mxu0  ;;  %v15567_v55 = vadd.f32 %v11039_v22, %v4762_v26  ;;  %v4760_v35 = vadd.f32 %v4561_v8, %v18810_v50  ;;  %v18814_v54 = vld [vmem:[#allocation243_spill] sm:$0xff]  ;;  %v18816_v22 = vld [vmem:[#allocation220_spill] sm:$0xff]  ;;  %v18817_v8 = vld [vmem:[#allocation33_spill] sm:$0xff] }
 0x33b   : > { %v10910_v41 = vpop.f32.mrf.mxu1 }
 0x33c   : > { %18809 = vst [vmem:[#allocation82_spill] sm:$0xff] %v15567_v55  ;;  %v11043_v24 = vpop.f32.mrf.mxu0  ;;  %11270 = vmatmul.mubr.msk.bf16.gmra.mxu0 %vm1265_vm3, %v18811_v13  ;;  %v15572_v60 = vadd.f32 %v5265_v46, %v4760_v35  ;;  %v4763_v56 = vadd.f32 %v10910_v41, %v18813_v0  ;;  %v18819_v46 = vld [vmem:[#allocation223_spill] sm:$0xff]  ;;  %v18820_v13 = vld [vmem:[#allocation234_spill] sm:$0xff] }
 0x33d   : > { %11273 = vmatprep.mubr.msk.bf16.mxu0 %vm1265_vm3, %v18814_v54  ;;  %v4564_v28 = vpop.f32.mrf.mxu1 }
 0x33e   : > { %18812 = vst [vmem:[#allocation166_spill] sm:$0xff] %v15572_v60  ;;  %v5281_v18 = vpop.f32.mrf.mxu0  ;;  %v15577_v51 = vadd.f32 %v11040_v58, %v4763_v56  ;;  %v4761_v26 = vadd.f32 %v4564_v28, %v18816_v22  ;;  %v18822_v58 = vld [vmem:[#allocation225_spill] sm:$0xff]  ;;  %v18823_v22 = vld [vmem:[#allocation251_spill] sm:$0xff] }
 0x33f   : > { %v10913_v55 = vpop.f32.mrf.mxu1  ;;  %11140 = vmatmul.mubr.msk.bf16.gmra.mxu1 %vm1265_vm3, %v18817_v8 }
 0x340   : > { %18815 = vst [vmem:[#allocation103_spill] sm:$0xff] %v15577_v51  ;;  %v11044_v50 = vpop.f32.mrf.mxu0  ;;  %v15582_v11 = vadd.f32 %v5268_v4, %v4761_v26  ;;  %v4766_v35 = vadd.f32 %v10913_v55, %v18819_v46  ;;  %11143 = vmatprep.mubr.msk.bf16.mxu1 %vm1265_vm3, %v18820_v13  ;;  %v18825_v4 = vld [vmem:[#allocation227_spill] sm:$0xff] }
 0x341   : > { %v4577_v41 = vpop.f32.mrf.mxu1 }
 0x342   : > { %18818 = vst [vmem:[#allocation168_spill] sm:$0xff] %v15582_v11  ;;  %v5284_v54 = vpop.f32.mrf.mxu0  ;;  %v15587_v0 = vadd.f32 %v11043_v24, %v4766_v35  ;;  %v4764_v56 = vadd.f32 %v4577_v41, %v18822_v58  ;;  %v18826_v11 = vld [vmem:[#allocation252_spill] sm:$0xff]  ;;  %v18829_v41 = vld [vmem:[#allocation57_spill] sm:$0xff] }
 0x343   : > { %v10914_v51 = vpop.f32.mrf.mxu1  ;;  %v18828_v24 = vld [vmem:[#allocation228_spill] sm:$0xff] }
 0x344   : > { %18821 = vst [vmem:[#allocation111_spill] sm:$0xff] %v15587_v0  ;;  %v11047_v28 = vpop.f32.mrf.mxu0  ;;  %11274 = vmatmul.mubr.msk.bf16.gmra.mxu0 %vm1265_vm3, %v18823_v22  ;;  %v15592_v60 = vadd.f32 %v5281_v18, %v4764_v56  ;;  %v4767_v26 = vadd.f32 %v10914_v51, %v18825_v4  ;;  %v18831_v18 = vld [vmem:[#allocation231_spill] sm:$0xff]  ;;  %v18832_v22 = vld [vmem:[#allocation241_spill] sm:$0xff] }
 0x345   : > { %11277 = vmatprep.mubr.msk.bf16.mxu0 %vm1265_vm3, %v18826_v11  ;;  %v4580_v55 = vpop.f32.mrf.mxu1 }
 0x346   : > { %18824 = vst [vmem:[#allocation80_spill] sm:$0xff] %v15592_v60  ;;  %v5297_v46 = vpop.f32.mrf.mxu0  ;;  %v15597_v13 = vadd.f32 %v11044_v50, %v4767_v26  ;;  %v4765_v35 = vadd.f32 %v4580_v55, %v18828_v24  ;;  %v18834_v50 = vld [vmem:[#allocation233_spill] sm:$0xff] }
 0x347   : > { %v10917_v0 = vpop.f32.mrf.mxu1  ;;  %11144 = vmatmul.mubr.msk.bf16.gmra.mxu1 %vm1265_vm3, %v18829_v41  ;;  %v18835_v24 = vld [vmem:[#allocation261_spill] sm:$0xff] }
 0x348   : > { %18827 = vst [vmem:[#allocation93_spill] sm:$0xff] %v15597_v13  ;;  %v11048_v58 = vpop.f32.mrf.mxu0  ;;  %v15602_v8 = vadd.f32 %v5284_v54, %v4765_v35  ;;  %v4770_v56 = vadd.f32 %v10917_v0, %v18831_v18  ;;  %11147 = vmatprep.mubr.msk.bf16.mxu1 %vm1265_vm3, %v18832_v22  ;;  %v18837_v54 = vld [vmem:[#allocation235_spill] sm:$0xff] }
 0x349   : > { %v4593_v51 = vpop.f32.mrf.mxu1 }
 0x34a   : > { %18830 = vst [vmem:[#allocation172_spill] sm:$0xff] %v15602_v8  ;;  %v5300_v11 = vpop.f32.mrf.mxu0  ;;  %v15607_v4 = vadd.f32 %v11047_v28, %v4770_v56  ;;  %v4768_v26 = vadd.f32 %v4593_v51, %v18834_v50  ;;  %v18838_v8 = vld [vmem:[#allocation262_spill] sm:$0xff] }
 0x34b   : > { %v10918_v13 = vpop.f32.mrf.mxu1  ;;  %v18840_v28 = vld [vmem:[#allocation238_spill] sm:$0xff] }
 0x34c   : > { %18833 = vst [vmem:[#allocation113_spill] sm:$0xff] %v15607_v4  ;;  %v11051_v55 = vpop.f32.mrf.mxu0  ;;  %11278 = vmatmul.mubr.msk.bf16.gmra.mxu0 %vm1265_vm3, %v18835_v24  ;;  %v15612_v60 = vadd.f32 %v5297_v46, %v4768_v26  ;;  %v4771_v35 = vadd.f32 %v10918_v13, %v18837_v54  ;;  %v18841_v51 = vld [vmem:[#allocation50_spill] sm:$0xff]  ;;  %v18843_v46 = vld [vmem:[#allocation240_spill] sm:$0xff] }
 0x34d   : > { %11281 = vmatprep.mubr.msk.bf16.mxu0 %vm1265_vm3, %v18838_v8  ;;  %v4596_v0 = vpop.f32.mrf.mxu1  ;;  %v18844_v24 = vld [vmem:[#allocation248_spill] sm:$0xff] }
 0x34e   : > { %18836 = vst [vmem:[#allocation176_spill] sm:$0xff] %v15612_v60  ;;  %v5313_v18 = vpop.f32.mrf.mxu0  ;;  %v15617_v22 = vadd.f32 %v11048_v58, %v4771_v35  ;;  %v4769_v56 = vadd.f32 %v4596_v0, %v18840_v28  ;;  %v18846_v58 = vld [vmem:[#allocation38_spill] sm:$0xff] }
 0x34f   : > { %v10921_v4 = vpop.f32.mrf.mxu1  ;;  %11148 = vmatmul.mubr.msk.bf16.gmra.mxu1 %vm1265_vm3, %v18841_v51 }
 0x350   : > { %18839 = vst [vmem:[#allocation199_spill] sm:$0xff] %v15617_v22  ;;  %v11052_v50 = vpop.f32.mrf.mxu0  ;;  %v15622_v41 = vadd.f32 %v5300_v11, %v4769_v56  ;;  %v4774_v26 = vadd.f32 %v10921_v4, %v18843_v46  ;;  %11151 = vmatprep.mubr.msk.bf16.mxu1 %vm1265_vm3, %v18844_v24  ;;  %v18848_v11 = vld [vmem:[#allocation244_spill] sm:$0xff] }
 0x351   : > { %v4609_v13 = vpop.f32.mrf.mxu1 }
 0x352   : > { %18842 = vst [vmem:[#allocation89_spill] sm:$0xff] %v15622_v41  ;;  %v5316_v8 = vpop.f32.mrf.mxu0  ;;  %v15627_v54 = vadd.f32 %v11051_v55, %v4774_v26  ;;  %v4772_v35 = vadd.f32 %v4609_v13, %v18846_v58  ;;  %v18850_v55 = vld [vmem:[#allocation246_spill] sm:$0xff]  ;;  %v18851_v13 = vld [vmem:[#allocation65_spill] sm:$0xff] }
 0x353   : > { %v10922_v22 = vpop.f32.mrf.mxu1 }
 0x354   : > { %18845 = vst [vmem:[#allocation178_spill] sm:$0xff] %v15627_v54  ;;  %v11055_v0 = vpop.f32.mrf.mxu0  ;;  %11282 = vmatmul.mubr.msk.bf16.gmra.mxu0 %vm1265_vm3, %v18539_v3  ;;  %v15632_v28 = vadd.f32 %v5313_v18, %v4772_v35  ;;  %v4775_v56 = vadd.f32 %v10922_v22, %v18848_v11  ;;  %v18853_v3 = vld [vmem:[#allocation249_spill] sm:$0xff] }
 0x355   : > { %11285 = vmatprep.mubr.msk.bf16.mxu0 %vm1265_vm3, %v14240_v62  ;;  %v4612_v4 = vpop.f32.mrf.mxu1  ;;  %v18854_v35 = vld [vmem:[#allocation257_spill] sm:$0xff] }
 0x356   : > { %18847 = vst [vmem:[#allocation181_spill] sm:$0xff] %v15632_v28  ;;  %v5329_v46 = vpop.f32.mrf.mxu0  ;;  %v15637_v41 = vadd.f32 %v11052_v50, %v4775_v56  ;;  %v4773_v26 = vadd.f32 %v4612_v4, %v18850_v55  ;;  %v18856_v50 = vld [vmem:[#allocation49_spill] sm:$0xff] }
 0x357   : > { %v10925_v54 = vpop.f32.mrf.mxu1  ;;  %11152 = vmatmul.mubr.msk.bf16.gmra.mxu1 %vm1265_vm3, %v18851_v13 }
 0x358   : > { %18849 = vst [vmem:[#allocation204_spill] sm:$0xff] %v15637_v41  ;;  %v11056_v58 = vpop.f32.mrf.mxu0  ;;  %v15642_v60 = vadd.f32 %v5316_v8, %v4773_v26  ;;  %v4778_v18 = vadd.f32 %v10925_v54, %v18853_v3  ;;  %11155 = vmatprep.mubr.msk.bf16.mxu1 %vm1265_vm3, %v18854_v35  ;;  %v18857_v8 = vld [vmem:[#allocation253_spill] sm:$0xff] }
 0x359   : > { %v4625_v22 = vpop.f32.mrf.mxu1 }
 0x35a   : > { %18852 = vst [vmem:[#allocation185_spill] sm:$0xff] %v15642_v60  ;;  %v5332_v62 = vpop.f32.mrf.mxu0  ;;  %v15647_v11 = vadd.f32 %v11055_v0, %v4778_v18  ;;  %v4776_v56 = vadd.f32 %v4625_v22, %v18856_v50  ;;  %v18858_v0 = vld [vmem:[#allocation255_spill] sm:$0xff] }
 0x35b   : > { %v10926_v41 = vpop.f32.mrf.mxu1  ;;  %v18859_v22 = vld [vmem:[#allocation155_spill] sm:$0xff] }
 0x35c   : > { %18855 = vst [vmem:[#allocation206_spill] sm:$0xff] %v15647_v11  ;;  %v11059_v4 = vpop.f32.mrf.mxu0  ;;  %11286 = vmatmul.mubr.msk.bf16.gmra.mxu0 %vm1265_vm3, %v14264_v57  ;;  %v15652_v55 = vadd.f32 %v5329_v46, %v4776_v56  ;;  %v4779_v26 = vadd.f32 %v10926_v41, %v18857_v8  ;;  %v18860_v57 = vld [vmem:[#allocation258_spill] sm:$0xff] }
 0x35d   : > { %11289 = vmatprep.mubr.msk.bf16.mxu0 %vm1265_vm3, %v14272_v6  ;;  %v4628_v54 = vpop.f32.mrf.mxu1  ;;  %v18861_v56 = vld [vmem:[#allocation266_spill] sm:$0xff] }
 0x35e   : > { %v5345_v3 = vpop.f32.mrf.mxu0  ;;  %v15657_v60 = vadd.f32 %v11056_v58, %v4779_v26  ;;  %v4777_v18 = vadd.f32 %v4628_v54, %v18858_v0 }
 0x35f   : > { %v10929_v11 = vpop.f32.mrf.mxu1  ;;  %11156 = vmatmul.mubr.msk.bf16.gmra.mxu1 %vm1265_vm3, %v18859_v22 }
 0x360   : > { %v11060_v50 = vpop.f32.mrf.mxu0  ;;  %v15662_v28 = vadd.f32 %v5332_v62, %v4777_v18  ;;  %v4782_v46 = vadd.f32 %v10929_v11, %v18860_v57  ;;  %11159 = vmatprep.mubr.msk.bf16.mxu1 %vm1265_vm3, %v18861_v56 }
 0x361   : > { %v4641_v41 = vpop.f32.mrf.mxu1 }
 0x362   : > { %v5348_v6 = vpop.f32.mrf.mxu0  ;;  %v15667_v8 = vadd.f32 %v11059_v4, %v4782_v46  ;;  %v4780_v58 = vadd.f32 %v4641_v41, %v14983_v40  ;;  %v18864_v40 = vld [vmem:[#allocation161_spill] sm:$0xff] }
 0x363   : > { %v10930_v26 = vpop.f32.mrf.mxu1 }
 0x364   : > { %18862 = vst [vmem:[#allocation98_spill] sm:$0xff] %v15667_v8  ;;  %v11195_v54 = vpop.f32.mrf.mxu0  ;;  %11290 = vmatmul.mubr.msk.bf16.gmra.mxu0 %vm1265_vm3, %v14299_v20  ;;  %v15672_v0 = vadd.f32 %v5345_v3, %v4780_v58  ;;  %v4783_v62 = vadd.f32 %v10930_v26, %v14988_v37  ;;  %v18866_v3 = vld [vmem:[#allocation271_spill] sm:$0xff] }
 0x365   : > { %11293 = vmatprep.mubr.msk.bf16.mxu0 %vm1265_vm3, %v18553_v10  ;;  %v4644_v11 = vpop.f32.mrf.mxu1 }
 0x366   : > { %v6234_v18 = vpop.f32.mrf.mxu0  ;;  %v15677_v57 = vadd.f32 %v11060_v50, %v4783_v62  ;;  %v4781_v4 = vadd.f32 %v4644_v11, %v14993_v61  ;;  %v18868_v50 = vld [vmem:[#allocation58_spill] sm:$0xff] }
 0x367   : > { %v11065_v46 = vpop.f32.mrf.mxu1  ;;  %11160 = vmatmul.mubr.msk.bf16.gmra.mxu1 %vm1265_vm3, %v18864_v40 }
 0x368   : > { %18863 = vst [vmem:[#allocation187_spill] sm:$0xff] %v15677_v57  ;;  %v11196_v41 = vpop.f32.mrf.mxu0  ;;  %v15682_v8 = vadd.f32 %v5348_v6, %v4781_v4  ;;  %v6061_v20 = vadd.f32 %v11065_v46, %v14998_v9  ;;  %11163 = vmatprep.mubr.msk.bf16.mxu1 %vm1265_vm3, %v18866_v3  ;;  %v18869_v6 = vld [vmem:[#allocation269_spill] sm:$0xff] }
 0x369   : > { %v5548_v37 = vpop.f32.mrf.mxu1 }
 0x36a   : > { %18865 = vst [vmem:[#allocation190_spill] sm:$0xff] %v15682_v8  ;;  %v6237_v10 = vpop.f32.mrf.mxu0  ;;  %v15687_v58 = vadd.f32 %v11195_v54, %v6061_v20  ;;  %v6059_v26 = vadd.f32 %v5548_v37, %v18868_v50  ;;  %v18870_v54 = vld [vmem:[#allocation264_spill] sm:$0xff]  ;;  %v18871_v37 = vld [vmem:[#allocation167_spill] sm:$0xff] }
 0x36b   : > { %v11066_v62 = vpop.f32.mrf.mxu1 }
 0x36c   : > { %18867 = vst [vmem:[#allocation212_spill] sm:$0xff] %v15687_v58  ;;  %v11199_v61 = vpop.f32.mrf.mxu0  ;;  %11294 = vmatmul.mubr.msk.bf16.gmra.mxu0 %vm1265_vm3, %v14334_v36  ;;  %v15692_v11 = vadd.f32 %v6234_v18, %v6059_v26  ;;  %v6062_v4 = vadd.f32 %v11066_v62, %v18869_v6  ;;  %v18873_v36 = vld [vmem:[#allocation267_spill] sm:$0xff]  ;;  %v18874_v26 = vld [vmem:[#allocation78_spill] sm:$0xff] }
 0x36d   : > { %11297 = vmatprep.mubr.msk.bf16.mxu0 %vm1265_vm3, %v14342_v12  ;;  %v5551_v9 = vpop.f32.mrf.mxu1 }
 0x36e   : > { %v6250_v46 = vpop.f32.mrf.mxu0  ;;  %v15697_v8 = vadd.f32 %v11196_v41, %v6062_v4  ;;  %v6060_v20 = vadd.f32 %v5551_v9, %v18870_v54 }
 0x36f   : > { %v11069_v58 = vpop.f32.mrf.mxu1  ;;  %11164 = vmatmul.mubr.msk.bf16.gmra.mxu1 %vm1265_vm3, %v18871_v37 }
 0x370   : > { %v11200_v50 = vpop.f32.mrf.mxu0  ;;  %v15702_v57 = vadd.f32 %v6237_v10, %v6060_v20  ;;  %v6065_v18 = vadd.f32 %v11069_v58, %v18873_v36  ;;  %11167 = vmatprep.mubr.msk.bf16.mxu1 %vm1265_vm3, %v18874_v26 }
 0x371   : > { %v5564_v62 = vpop.f32.mrf.mxu1 }
 0x372   : > { %18872 = vst [vmem:[#allocation193_spill] sm:$0xff] %v15702_v57  ;;  %v6253_v12 = vpop.f32.mrf.mxu0  ;;  %v15707_v6 = vadd.f32 %v11199_v61, %v6065_v18  ;;  %v6063_v41 = vadd.f32 %v5564_v62, %v15023_v15  ;;  %v18878_v15 = vld [vmem:[#allocation175_spill] sm:$0xff] }
 0x373   : > { %v11070_v4 = vpop.f32.mrf.mxu1 }
 0x374   : > { %18875 = vst [vmem:[#allocation215_spill] sm:$0xff] %v15707_v6  ;;  %v11203_v9 = vpop.f32.mrf.mxu0  ;;  %11298 = vmatmul.mubr.msk.bf16.gmra.mxu0 %vm1265_vm3, %v14369_v25  ;;  %v15712_v54 = vadd.f32 %v6250_v46, %v6063_v41  ;;  %v6066_v10 = vadd.f32 %v11070_v4, %v15028_v7  ;;  %v18880_v46 = vld [vmem:[#allocation159_spill] sm:$0xff] }
 0x375   : > { %11301 = vmatprep.mubr.msk.bf16.mxu0 %vm1265_vm3, %v14377_v38  ;;  %v5567_v58 = vpop.f32.mrf.mxu1 }
 0x376   : > { %18876 = vst [vmem:[#allocation106_spill] sm:$0xff] %v15712_v54  ;;  %v6266_v20 = vpop.f32.mrf.mxu0  ;;  %v15717_v36 = vadd.f32 %v11200_v50, %v6066_v10  ;;  %v6064_v61 = vadd.f32 %v5567_v58, %v15033_v17  ;;  %v18882_v50 = vld [vmem:[#allocation69_spill] sm:$0xff]  ;;  %v18883_v58 = vld [vmem:[#allocation174_spill] sm:$0xff] }
 0x377   : > { %v11073_v18 = vpop.f32.mrf.mxu1  ;;  %11168 = vmatmul.mubr.msk.bf16.gmra.mxu1 %vm1265_vm3, %v18878_v15 }
 0x378   : > { %18877 = vst [vmem:[#allocation108_spill] sm:$0xff] %v15717_v36  ;;  %v11204_v62 = vpop.f32.mrf.mxu0  ;;  %v15722_v6 = vadd.f32 %v6253_v12, %v6064_v61  ;;  %v6069_v25 = vadd.f32 %v11073_v18, %v15038_v16  ;;  %11171 = vmatprep.mubr.msk.bf16.mxu1 %vm1265_vm3, %v18880_v46  ;;  %v18884_v12 = vld [vmem:[#allocation270_spill] sm:$0xff] }
 0x379   : > { %v5580_v7 = vpop.f32.mrf.mxu1 }
 0x37a   : > { %18879 = vst [vmem:[#allocation2_spill] sm:$0xff] %v15722_v6  ;;  %v6269_v38 = vpop.f32.mrf.mxu0  ;;  %v15727_v41 = vadd.f32 %v11203_v9, %v6069_v25  ;;  %v6067_v4 = vadd.f32 %v5580_v7, %v18882_v50  ;;  %v18885_v6 = vld [vmem:[#allocation114_spill] sm:$0xff]  ;;  %v18887_v9 = vld [vmem:[#allocation272_spill] sm:$0xff] }
 0x37b   : > { %v11074_v10 = vpop.f32.mrf.mxu1  ;;  %v18888_v7 = vld [vmem:[#allocation184_spill] sm:$0xff] }
 0x37c   : > { %18881 = vst [vmem:[#allocation18_spill] sm:$0xff] %v15727_v41  ;;  %v11207_v17 = vpop.f32.mrf.mxu0  ;;  %11302 = vmatmul.mubr.msk.bf16.gmra.mxu0 %vm1265_vm3, %v18883_v58  ;;  %v15732_v36 = vadd.f32 %v6266_v20, %v6067_v4  ;;  %v6070_v61 = vadd.f32 %v11074_v10, %v18884_v12  ;;  %v18890_v20 = vld [vmem:[#allocation88_spill] sm:$0xff] }
 0x37d   : > { %11305 = vmatprep.mubr.msk.bf16.mxu0 %vm1265_vm3, %v18885_v6  ;;  %v5583_v16 = vpop.f32.mrf.mxu1  ;;  %v18891_v58 = vld [vmem:[#allocation96_spill] sm:$0xff] }
 0x37e   : > { %v6282_v18 = vpop.f32.mrf.mxu0  ;;  %v15737_v54 = vadd.f32 %v11204_v62, %v6070_v61  ;;  %v6068_v25 = vadd.f32 %v5583_v16, %v18887_v9  ;;  %v18893_v62 = vld [vmem:[#allocation273_spill] sm:$0xff] }
 0x37f   : > { %v11077_v41 = vpop.f32.mrf.mxu1  ;;  %11172 = vmatmul.mubr.msk.bf16.gmra.mxu1 %vm1265_vm3, %v18888_v7 }
 0x380   : > { %18886 = vst [vmem:[#allocation196_spill] sm:$0xff] %v15737_v54  ;;  %v11208_v50 = vpop.f32.mrf.mxu0  ;;  %v15742_v57 = vadd.f32 %v6269_v38, %v6068_v25  ;;  %v6073_v4 = vadd.f32 %v11077_v41, %v18890_v20  ;;  %11175 = vmatprep.mubr.msk.bf16.mxu1 %vm1265_vm3, %v18891_v58  ;;  %v18895_v38 = vld [vmem:[#allocation157_spill] sm:$0xff] }
 0x381   : > { %v5596_v10 = vpop.f32.mrf.mxu1 }
 0x382   : > { %18889 = vst [vmem:[#allocation222_spill] sm:$0xff] %v15742_v57  ;;  %v6285_v6 = vpop.f32.mrf.mxu0  ;;  %v15747_v12 = vadd.f32 %v11207_v17, %v6073_v4  ;;  %v6071_v61 = vadd.f32 %v5596_v10, %v18893_v62  ;;  %v18897_v17 = vld [vmem:[#allocation160_spill] sm:$0xff] }
 0x383   : > { %v11078_v54 = vpop.f32.mrf.mxu1  ;;  %v18898_v10 = vld [vmem:[#allocation192_spill] sm:$0xff] }
 0x384   : > { %18892 = vst [vmem:[#allocation198_spill] sm:$0xff] %v15747_v12  ;;  %v11211_v16 = vpop.f32.mrf.mxu0  ;;  %11306 = vmatmul.mubr.msk.bf16.gmra.mxu0 %vm1265_vm3, %v14435_v47  ;;  %v15752_v9 = vadd.f32 %v6282_v18, %v6071_v61  ;;  %v6074_v25 = vadd.f32 %v11078_v54, %v18895_v38  ;;  %v18900_v18 = vld [vmem:[#allocation105_spill] sm:$0xff]  ;;  %v18901_v54 = vld [vmem:[#allocation171_spill] sm:$0xff] }
 0x385   : > { %11309 = vmatprep.mubr.msk.bf16.mxu0 %vm1265_vm3, %v14443_v29  ;;  %v5599_v41 = vpop.f32.mrf.mxu1 }
 0x386   : > { %18894 = vst [vmem:[#allocation4_spill] sm:$0xff] %v15752_v9  ;;  %v6298_v20 = vpop.f32.mrf.mxu0  ;;  %v15757_v57 = vadd.f32 %v11208_v50, %v6074_v25  ;;  %v6072_v4 = vadd.f32 %v5599_v41, %v18897_v17  ;;  %v18902_v50 = vld [vmem:[#allocation274_spill] sm:$0xff] }
 0x387   : > { %v11081_v12 = vpop.f32.mrf.mxu1  ;;  %11176 = vmatmul.mubr.msk.bf16.gmra.mxu1 %vm1265_vm3, %v18898_v10 }
 0x388   : > { %18896 = vst [vmem:[#allocation200_spill] sm:$0xff] %v15757_v57  ;;  %v11212_v62 = vpop.f32.mrf.mxu0  ;;  %v15762_v47 = vadd.f32 %v6285_v6, %v6072_v4  ;;  %v6077_v61 = vadd.f32 %v11081_v12, %v18900_v18  ;;  %11179 = vmatprep.mubr.msk.bf16.mxu1 %vm1265_vm3, %v18901_v54  ;;  %v18904_v6 = vld [vmem:[#allocation177_spill] sm:$0xff] }
 0x389   : > { %v5612_v29 = vpop.f32.mrf.mxu1 }
 0x38a   : > { %18899 = vst [vmem:[#allocation24_spill] sm:$0xff] %v15762_v47  ;;  %v6301_v38 = vpop.f32.mrf.mxu0  ;;  %v15767_v9 = vadd.f32 %v11211_v16, %v6077_v61  ;;  %v6075_v25 = vadd.f32 %v5612_v29, %v18902_v50  ;;  %v15778_v47 = vld [vmem:[%s11866_s27 + $0x294] sm:$0xff]   ;;  %v18906_v50 = vld [vmem:[#allocation195_spill] sm:$0xff] }
 0x38b   : > { %v11082_v41 = vpop.f32.mrf.mxu1 }
 0x38c   : > { %v11215_v17 = vpop.f32.mrf.mxu0  ;;  %11310 = vmatmul.mubr.msk.bf16.gmra.mxu0 %vm1265_vm3, %v14461_v23  ;;  %v15772_v57 = vadd.f32 %v6298_v20, %v6075_v25  ;;  %v6078_v4 = vadd.f32 %v11082_v41, %v18904_v6  ;;  %v18908_v41 = vld [vmem:[#allocation180_spill] sm:$0xff] }
 0x38d   : > { %11313 = vmatprep.mubr.msk.bf16.mxu0 %vm1265_vm3, %v15062_v2  ;;  %v5615_v12 = vpop.f32.mrf.mxu1 }
 0x38e   : > { %18903 = vst [vmem:[#allocation202_spill] sm:$0xff] %v15772_v57  ;;  %v6314_v18 = vpop.f32.mrf.mxu0  ;;  %v15780_v16 = vadd.f32 %v11212_v62, %v6078_v4  ;;  %v6076_v61 = vadd.f32 %v5615_v12, %v15117_v1  ;;  %v18910_v12 = vunpack.c.h.bf16 %v15065_v34 }
 0x38f   : > { %v11085_v29 = vpop.f32.mrf.mxu1  ;;  %11180 = vmatmul.mubr.msk.bf16.gmra.mxu1 %vm1265_vm3, %v18906_v50 }
 0x390   : > { %18905 = vst [vmem:[#allocation230_spill] sm:$0xff] %v15780_v16  ;;  %v11216_v23 = vpop.f32.mrf.mxu0  ;;  %v15785_v20 = vadd.f32 %v6301_v38, %v6076_v61  ;;  %v6081_v25 = vadd.f32 %v11085_v29, %v15126_v59  ;;  %11183 = vmatprep.mubr.msk.bf16.mxu1 %vm1265_vm3, %v18908_v41  ;;  %v5493_v38 = vrot.slane %v18910_v12, 2  ;;  %v18911_v29 = vld [vmem:[#allocation163_spill] sm:$0xff]  ;;  %v18914_v12 = vld [vmem:[#allocation201_spill] sm:$0xff] }
 0x391   : > { %v5628_v2 = vpop.f32.mrf.mxu1 }
 0x392   : > { %18907 = vst [vmem:[#allocation7_spill] sm:$0xff] %v15785_v20  ;;  %v6317_v6 = vpop.f32.mrf.mxu0  ;;  %v15790_v57 = vadd.f32 %v11215_v17, %v6081_v25  ;;  %v6079_v62 = vadd.f32 %v5628_v2, %v15131_v63  ;;  %v18912_v17 = vunpack.c.l.bf16 %v18911_v29 }
 0x393   : > { %v11086_v1 = vpop.f32.mrf.mxu1 }
 0x394   : > { %18909 = vst [vmem:[#allocation205_spill] sm:$0xff] %v15790_v57  ;;  %v11219_v4 = vpop.f32.mrf.mxu0  ;;  %11314 = vmatmul.mubr.msk.bf16.gmra.mxu0 %vm1265_vm3, %v15065_v34  ;;  %v15797_v61 = vadd.f32 %v6314_v18, %v6079_v62  ;;  %v6082_v59 = vadd.f32 %v11086_v1, %v15138_v14  ;;  %v5495_v25 = vrot.slane %v18912_v17, 2  ;;  %v15805_v57 = vld [vmem:[%s11866_s27 + $0x29c] sm:$0xff]   ;;  %v5494_v1 = vsel %vm2747_vm2, %v15480_v53, %v5493_v38 }
 0x395   : > { %11317 = vmatprep.mubr.msk.bf16.mxu0 %vm1265_vm3, %v15778_v47  ;;  %v5631_v63 = vpop.f32.mrf.mxu1 }
 0x396   : > { %v6330_v2 = vpop.f32.mrf.mxu0  ;;  %v15807_v20 = vadd.f32 %v11216_v23, %v6082_v59  ;;  %v6080_v16 = vadd.f32 %v5631_v63, %v15145_v32  ;;  %v5496_v23 = vsel %vm2747_vm2, %v5493_v38, %v5495_v25 }
 0x397   : > { %v11089_v34 = vpop.f32.mrf.mxu1  ;;  %11184 = vmatmul.mubr.msk.bf16.gmra.mxu1 %vm1265_vm3, %v18914_v12 }
 0x398   : > { %18913 = vst [vmem:[#allocation207_spill] sm:$0xff] %v15807_v20  ;;  %v11220_v18 = vpop.f32.mrf.mxu0  ;;  %v15812_v14 = vadd.f32 %v6317_v6, %v6080_v16  ;;  %v6085_v62 = vadd.f32 %v11089_v34, %v15150_v27  ;;  %11187 = vmatprep.mubr.msk.bf16.mxu1 %vm1265_vm3, %v15495_v31  ;;  %v15823_v20 = vpack.c.bf16 %v5496_v23, %v5494_v1  ;;  %v18915_v1 = vld [vmem:[#allocation11_spill] sm:$0xff] }
 0x399   : > { %v5644_v59 = vpop.f32.mrf.mxu1 }
 0x39a   : > { %v6333_v29 = vpop.f32.mrf.mxu0  ;;  %v15820_v32 = vadd.f32 %v11219_v4, %v6085_v62  ;;  %v6083_v17 = vadd.f32 %v5644_v59, %v15155_v43 }
 0x39b   : > { %v11090_v63 = vpop.f32.mrf.mxu1 }
 0x39c   : > { %v11223_v16 = vpop.f32.mrf.mxu0  ;;  %11318 = vmatmul.mubr.msk.bf16.gmra.mxu0 %vm1265_vm3, %v15805_v57  ;;  %v15827_v27 = vadd.f32 %v6330_v2, %v6083_v17  ;;  %v6086_v6 = vadd.f32 %v11090_v63, %v15160_v49 }
 0x39d   : > { %11453 = vmatprep.mubr.msk.bf16.mxu0 %vm1265_vm3, %v18597_v21  ;;  %v5647_v53 = vpop.f32.mrf.mxu1 }
 0x39e   : > { %v6346_v38 = vpop.f32.mrf.mxu0  ;;  %v15832_v4 = vadd.f32 %v11220_v18, %v6086_v6  ;;  %v6084_v43 = vadd.f32 %v5647_v53, %v15165_v45 }
 0x39f   : > { %v11093_v25 = vpop.f32.mrf.mxu1  ;;  %11188 = vmatmul.mubr.msk.bf16.gmra.mxu1 %vm1265_vm3, %v15823_v20 }
 0x3a0   : > { %v11224_v34 = vpop.f32.mrf.mxu0  ;;  %v15837_v62 = vadd.f32 %v6333_v29, %v6084_v43  ;;  %v6089_v2 = vadd.f32 %v11093_v25, %v15172_v42  ;;  %11323 = vmatprep.mubr.msk.bf16.mxu1 %vm1265_vm3, %v18915_v1 }
 0x3a1   : > { %v5660_v49 = vpop.f32.mrf.mxu1 }
 0x3a2   : > { %v6349_v21 = vpop.f32.mrf.mxu0  ;;  %v15842_v23 = vadd.f32 %v11223_v16, %v6089_v2  ;;  %v6087_v18 = vadd.f32 %v5660_v49, %v15177_v5  ;;  %v18916_v5 = vld [vmem:[#allocation14_spill] sm:$0xff] }
 0x3a3   : > { %v11094_v59 = vpop.f32.mrf.mxu1 }
 0x3a4   : > { %v11227_v45 = vpop.f32.mrf.mxu0  ;;  %11454 = vmatmul.mubr.msk.bf16.vlgmr.msra.gmra.mxu0 %vm1265_vm3, %v18602_v19  ;;  %v15847_v17 = vadd.f32 %v6346_v38, %v6087_v18  ;;  %v6090_v29 = vadd.f32 %v11094_v59, %v15184_v39  ;;  %v18918_v38 = vld [vmem:[#allocation16_spill] sm:$0xff] }
 0x3a5   : > { %11457 = vmatprep.mubr.msk.bf16.mxu0 %vm1265_vm3, %v18605_v52  ;;  %v5663_v42 = vpop.f32.mrf.mxu1  ;;  %v18922_v59 = vld [vmem:[#allocation132_spill] sm:$0xff] }
 0x3a6   : > { %v6362_v63 = vpop.f32.mrf.mxu0  ;;  %v15852_v6 = vadd.f32 %v11224_v34, %v6090_v29  ;;  %v6088_v16 = vadd.f32 %v5663_v42, %v15189_v30 }
 0x3a7   : > { %v11097_v53 = vpop.f32.mrf.mxu1  ;;  %11324 = vmatmul.mubr.msk.bf16.vlgmr.msra.gmra.mxu1 %vm1265_vm3, %v18916_v5 }
 0x3a8   : > { %v11228_v43 = vpop.f32.mrf.mxu0  ;;  %v15857_v25 = vadd.f32 %v6349_v21, %v6088_v16  ;;  %v6093_v19 = vadd.f32 %v11097_v53, %v15194_v48  ;;  %11327 = vmatprep.mubr.msk.bf16.mxu1 %vm1265_vm3, %v18918_v38  ;;  %v18921_v21 = vld [vmem:[#allocation186_spill] sm:$0xff]  ;;  %v18928_v38 = vld [vmem:[#allocation23_spill] sm:$0xff] }
 0x3a9   : > { %v5676_v39 = vpop.f32.mrf.mxu1 }
 0x3aa   : > { %18917 = vst [vmem:[#allocation32_spill] sm:$0xff] %v15857_v25  ;;  %v6365_v52 = vpop.f32.mrf.mxu0  ;;  %v15862_v2 = vadd.f32 %v11227_v45, %v6093_v19  ;;  %v6091_v34 = vadd.f32 %v5676_v39, %v15199_v33  ;;  %v18924_v45 = vld [vmem:[#allocation100_spill] sm:$0xff] }
 0x3ab   : > { %v11098_v1 = vpop.f32.mrf.mxu1  ;;  %v18925_v33 = vld [vmem:[#allocation20_spill] sm:$0xff] }
 0x3ac   : > { %18919 = vst [vmem:[#allocation209_spill] sm:$0xff] %v15862_v2  ;;  %v11231_v30 = vpop.f32.mrf.mxu0  ;;  %11458 = vmatmul.mubr.msk.bf16.gmra.mxu0 %vm1265_vm3, %v18612_v44  ;;  %v15867_v49 = vadd.f32 %v6362_v63, %v6091_v34  ;;  %v6094_v18 = vadd.f32 %v11098_v1, %v18921_v21  ;;  %v18927_v44 = vld [vmem:[#allocation189_spill] sm:$0xff] }
 0x3ad   : > { %11461 = vmatprep.mubr.msk.bf16.mxu0 %vm1265_vm3, %v18922_v59  ;;  %v5679_v48 = vpop.f32.mrf.mxu1 }
 0x3ae   : > { %18920 = vst [vmem:[#allocation237_spill] sm:$0xff] %v15867_v49  ;;  %v6378_v29 = vpop.f32.mrf.mxu0  ;;  %v15872_v42 = vadd.f32 %v11228_v43, %v6094_v18  ;;  %v6092_v16 = vadd.f32 %v5679_v48, %v18924_v45  ;;  %v18930_v43 = vld [vmem:[#allocation121_spill] sm:$0xff]  ;;  %v18931_v48 = vld [vmem:[#allocation135_spill] sm:$0xff] }
 0x3af   : > { %v11101_v53 = vpop.f32.mrf.mxu1  ;;  %11328 = vmatmul.mubr.msk.bf16.gmra.mxu1 %vm1265_vm3, %v18925_v33  ;;  %v18934_v33 = vld [vmem:[#allocation136_spill] sm:$0xff] }
 0x3b0   : > { %18923 = vst [vmem:[#allocation12_spill] sm:$0xff] %v15872_v42  ;;  %v11232_v5 = vpop.f32.mrf.mxu0  ;;  %v15877_v19 = vadd.f32 %v6365_v52, %v6092_v16  ;;  %v6097_v63 = vadd.f32 %v11101_v53, %v18927_v44  ;;  %11331 = vmatprep.mubr.msk.bf16.mxu1 %vm1265_vm3, %v18928_v38  ;;  %v18933_v52 = vld [vmem:[#allocation191_spill] sm:$0xff] }
 0x3b1   : > { %v5692_v39 = vpop.f32.mrf.mxu1 }
 0x3b2   : > { %18926 = vst [vmem:[#allocation214_spill] sm:$0xff] %v15877_v19  ;;  %v6381_v34 = vpop.f32.mrf.mxu0  ;;  %v15882_v1 = vadd.f32 %v11231_v30, %v6097_v63  ;;  %v6095_v21 = vadd.f32 %v5692_v39, %v18930_v43  ;;  %v18936_v30 = vld [vmem:[#allocation123_spill] sm:$0xff] }
 0x3b3   : > { %v11102_v18 = vpop.f32.mrf.mxu1  ;;  %v18937_v39 = vld [vmem:[#allocation27_spill] sm:$0xff] }
 0x3b4   : > { %18929 = vst [vmem:[#allocation217_spill] sm:$0xff] %v15882_v1  ;;  %v11235_v59 = vpop.f32.mrf.mxu0  ;;  %11462 = vmatmul.mubr.msk.bf16.gmra.mxu0 %vm1265_vm3, %v18931_v48  ;;  %v15887_v45 = vadd.f32 %v6378_v29, %v6095_v21  ;;  %v6098_v16 = vadd.f32 %v11102_v18, %v18933_v52  ;;  %v18939_v29 = vld [vmem:[#allocation194_spill] sm:$0xff] }
 0x3b5   : > { %11465 = vmatprep.mubr.msk.bf16.mxu0 %vm1265_vm3, %v18934_v33  ;;  %v5695_v53 = vpop.f32.mrf.mxu1  ;;  %v18940_v48 = vld [vmem:[#allocation30_spill] sm:$0xff] }
 0x3b6   : > { %18932 = vst [vmem:[#allocation242_spill] sm:$0xff] %v15887_v45  ;;  %v6394_v44 = vpop.f32.mrf.mxu0  ;;  %v15892_v38 = vadd.f32 %v11232_v5, %v6098_v16  ;;  %v6096_v63 = vadd.f32 %v5695_v53, %v18936_v30  ;;  %v18942_v5 = vld [vmem:[#allocation124_spill] sm:$0xff]  ;;  %v18943_v30 = vld [vmem:[#allocation139_spill] sm:$0xff] }
 0x3b7   : > { %v11105_v1 = vpop.f32.mrf.mxu1  ;;  %11332 = vmatmul.mubr.msk.bf16.gmra.mxu1 %vm1265_vm3, %v18937_v39 }
 0x3b8   : > { %18935 = vst [vmem:[#allocation219_spill] sm:$0xff] %v15892_v38  ;;  %v11236_v43 = vpop.f32.mrf.mxu0  ;;  %v15897_v19 = vadd.f32 %v6381_v34, %v6096_v63  ;;  %v6101_v21 = vadd.f32 %v11105_v1, %v18939_v29  ;;  %11335 = vmatprep.mubr.msk.bf16.mxu1 %vm1265_vm3, %v18940_v48  ;;  %v18945_v34 = vld [vmem:[#allocation6_spill] sm:$0xff] }
 0x3b9   : > { %v5708_v18 = vpop.f32.mrf.mxu1 }
 0x3ba   : > { %18938 = vst [vmem:[#allocation243_spill] sm:$0xff] %v15897_v19  ;;  %v6397_v52 = vpop.f32.mrf.mxu0  ;;  %v15902_v33 = vadd.f32 %v11235_v59, %v6101_v21  ;;  %v6099_v16 = vadd.f32 %v5708_v18, %v18942_v5  ;;  %v18946_v19 = vld [vmem:[#allocation142_spill] sm:$0xff] }
 0x3bb   : > { %v11106_v38 = vpop.f32.mrf.mxu1  ;;  %v18948_v59 = vld [vmem:[#allocation122_spill] sm:$0xff] }
 0x3bc   : > { %18941 = vst [vmem:[#allocation220_spill] sm:$0xff] %v15902_v33  ;;  %v11239_v53 = vpop.f32.mrf.mxu0  ;;  %11466 = vmatmul.mubr.msk.bf16.gmra.mxu0 %vm1265_vm3, %v18943_v30  ;;  %v15907_v39 = vadd.f32 %v6394_v44, %v6099_v16  ;;  %v6102_v63 = vadd.f32 %v11106_v38, %v18945_v34  ;;  %v18949_v18 = vld [vmem:[#allocation34_spill] sm:$0xff]  ;;  %v18951_v44 = vld [vmem:[#allocation9_spill] sm:$0xff] }
 0x3bd   : > { %11469 = vmatprep.mubr.msk.bf16.mxu0 %vm1265_vm3, %v18946_v19  ;;  %v5711_v1 = vpop.f32.mrf.mxu1  ;;  %v18952_v30 = vld [vmem:[#allocation37_spill] sm:$0xff] }
 0x3be   : > { %18944 = vst [vmem:[#allocation223_spill] sm:$0xff] %v15907_v39  ;;  %v6410_v29 = vpop.f32.mrf.mxu0  ;;  %v15912_v48 = vadd.f32 %v11236_v43, %v6102_v63  ;;  %v6100_v21 = vadd.f32 %v5711_v1, %v18948_v59  ;;  %v18954_v43 = vld [vmem:[#allocation127_spill] sm:$0xff]  ;;  %v18955_v59 = vld [vmem:[#allocation150_spill] sm:$0xff] }
 0x3bf   : > { %v11109_v33 = vpop.f32.mrf.mxu1  ;;  %11336 = vmatmul.mubr.msk.bf16.gmra.mxu1 %vm1265_vm3, %v18949_v18 }
 0x3c0   : > { %18947 = vst [vmem:[#allocation225_spill] sm:$0xff] %v15912_v48  ;;  %v11240_v5 = vpop.f32.mrf.mxu0  ;;  %v15917_v45 = vadd.f32 %v6397_v52, %v6100_v21  ;;  %v6105_v16 = vadd.f32 %v11109_v33, %v18951_v44  ;;  %11339 = vmatprep.mubr.msk.bf16.mxu1 %vm1265_vm3, %v18952_v30  ;;  %v18957_v52 = vld [vmem:[#allocation125_spill] sm:$0xff] }
 0x3c1   : > { %v5724_v38 = vpop.f32.mrf.mxu1 }
 0x3c2   : > { %18950 = vst [vmem:[#allocation251_spill] sm:$0xff] %v15917_v45  ;;  %v6413_v19 = vpop.f32.mrf.mxu0  ;;  %v15922_v34 = vadd.f32 %v11239_v53, %v6105_v16  ;;  %v6103_v63 = vadd.f32 %v5724_v38, %v18954_v43  ;;  %v18958_v45 = vld [vmem:[#allocation151_spill] sm:$0xff]  ;;  %v18960_v53 = vld [vmem:[#allocation128_spill] sm:$0xff]  ;;  %v18961_v38 = vld [vmem:[#allocation41_spill] sm:$0xff] }
 0x3c3   : > { %v11110_v48 = vpop.f32.mrf.mxu1 }
 0x3c4   : > { %18953 = vst [vmem:[#allocation227_spill] sm:$0xff] %v15922_v34  ;;  %v11243_v1 = vpop.f32.mrf.mxu0  ;;  %11470 = vmatmul.mubr.msk.bf16.gmra.mxu0 %vm1265_vm3, %v18955_v59  ;;  %v15927_v18 = vadd.f32 %v6410_v29, %v6103_v63  ;;  %v6106_v21 = vadd.f32 %v11110_v48, %v18957_v52  ;;  %v18963_v29 = vld [vmem:[#allocation126_spill] sm:$0xff] }
 0x3c5   : > { %11473 = vmatprep.mubr.msk.bf16.mxu0 %vm1265_vm3, %v18958_v45  ;;  %v5727_v33 = vpop.f32.mrf.mxu1  ;;  %v18964_v59 = vld [vmem:[#allocation46_spill] sm:$0xff] }
 0x3c6   : > { %18956 = vst [vmem:[#allocation252_spill] sm:$0xff] %v15927_v18  ;;  %v6426_v44 = vpop.f32.mrf.mxu0  ;;  %v15932_v30 = vadd.f32 %v11240_v5, %v6106_v21  ;;  %v6104_v16 = vadd.f32 %v5727_v33, %v18960_v53  ;;  %v18966_v5 = vld [vmem:[#allocation129_spill] sm:$0xff]  ;;  %v18967_v53 = vld [vmem:[#allocation22_spill] sm:$0xff] }
 0x3c7   : > { %v11113_v34 = vpop.f32.mrf.mxu1  ;;  %11340 = vmatmul.mubr.msk.bf16.gmra.mxu1 %vm1265_vm3, %v18961_v38 }
 0x3c8   : > { %18959 = vst [vmem:[#allocation228_spill] sm:$0xff] %v15932_v30  ;;  %v11244_v43 = vpop.f32.mrf.mxu0  ;;  %v15937_v39 = vadd.f32 %v6413_v19, %v6104_v16  ;;  %v6109_v63 = vadd.f32 %v11113_v34, %v18963_v29  ;;  %11343 = vmatprep.mubr.msk.bf16.mxu1 %vm1265_vm3, %v18964_v59  ;;  %v18969_v19 = vld [vmem:[#allocation208_spill] sm:$0xff] }
 0x3c9   : > { %v5740_v48 = vpop.f32.mrf.mxu1 }
 0x3ca   : > { %18962 = vst [vmem:[#allocation231_spill] sm:$0xff] %v15937_v39  ;;  %v6429_v45 = vpop.f32.mrf.mxu0  ;;  %v15942_v52 = vadd.f32 %v11243_v1, %v6109_v63  ;;  %v6107_v21 = vadd.f32 %v5740_v48, %v18966_v5  ;;  %v18970_v39 = vld [vmem:[#allocation29_spill] sm:$0xff]  ;;  %v18972_v1 = vld [vmem:[#allocation131_spill] sm:$0xff] }
 0x3cb   : > { %v11114_v30 = vpop.f32.mrf.mxu1  ;;  %v18973_v48 = vld [vmem:[#allocation51_spill] sm:$0xff] }
 0x3cc   : > { %18965 = vst [vmem:[#allocation233_spill] sm:$0xff] %v15942_v52  ;;  %v11247_v33 = vpop.f32.mrf.mxu0  ;;  %11474 = vmatmul.mubr.msk.bf16.gmra.mxu0 %vm1265_vm3, %v18967_v53  ;;  %v15947_v38 = vadd.f32 %v6426_v44, %v6107_v21  ;;  %v6110_v16 = vadd.f32 %v11114_v30, %v18969_v19  ;;  %v18975_v44 = vld [vmem:[#allocation130_spill] sm:$0xff]  ;;  %v18976_v53 = vld [vmem:[#allocation56_spill] sm:$0xff] }
 0x3cd   : > { %11477 = vmatprep.mubr.msk.bf16.mxu0 %vm1265_vm3, %v18970_v39  ;;  %v5743_v34 = vpop.f32.mrf.mxu1 }
 0x3ce   : > { %18968 = vst [vmem:[#allocation261_spill] sm:$0xff] %v15947_v38  ;;  %v6442_v29 = vpop.f32.mrf.mxu0  ;;  %v15952_v59 = vadd.f32 %v11244_v43, %v6110_v16  ;;  %v6108_v63 = vadd.f32 %v5743_v34, %v18972_v1  ;;  %v18978_v43 = vld [vmem:[#allocation211_spill] sm:$0xff]  ;;  %v18979_v1 = vld [vmem:[#allocation44_spill] sm:$0xff] }
 0x3cf   : > { %v11117_v52 = vpop.f32.mrf.mxu1  ;;  %11344 = vmatmul.mubr.msk.bf16.gmra.mxu1 %vm1265_vm3, %v18973_v48 }
 0x3d0   : > { %18971 = vst [vmem:[#allocation235_spill] sm:$0xff] %v15952_v59  ;;  %v11248_v5 = vpop.f32.mrf.mxu0  ;;  %v15957_v18 = vadd.f32 %v6429_v45, %v6108_v63  ;;  %v6113_v21 = vadd.f32 %v11117_v52, %v18975_v44  ;;  %11347 = vmatprep.mubr.msk.bf16.mxu1 %vm1265_vm3, %v18976_v53  ;;  %v18981_v45 = vld [vmem:[#allocation213_spill] sm:$0xff] }
 0x3d1   : > { %v5756_v30 = vpop.f32.mrf.mxu1 }
 0x3d2   : > { %18974 = vst [vmem:[#allocation262_spill] sm:$0xff] %v15957_v18  ;;  %v6445_v39 = vpop.f32.mrf.mxu0  ;;  %v15962_v19 = vadd.f32 %v11247_v33, %v6113_v21  ;;  %v6111_v16 = vadd.f32 %v5756_v30, %v18978_v43  ;;  %v18982_v18 = vld [vmem:[#allocation152_spill] sm:$0xff]  ;;  %v18985_v30 = vld [vmem:[#allocation61_spill] sm:$0xff] }
 0x3d3   : > { %v11118_v59 = vpop.f32.mrf.mxu1  ;;  %v18984_v33 = vld [vmem:[#allocation216_spill] sm:$0xff] }
 0x3d4   : > { %18977 = vst [vmem:[#allocation238_spill] sm:$0xff] %v15962_v19  ;;  %v11251_v34 = vpop.f32.mrf.mxu0  ;;  %11478 = vmatmul.mubr.msk.bf16.gmra.mxu0 %vm1265_vm3, %v18979_v1  ;;  %v15967_v48 = vadd.f32 %v6442_v29, %v6111_v16  ;;  %v6114_v63 = vadd.f32 %v11118_v59, %v18981_v45  ;;  %v18987_v29 = vld [vmem:[#allocation133_spill] sm:$0xff]  ;;  %v18988_v1 = vld [vmem:[#allocation66_spill] sm:$0xff] }
 0x3d5   : > { %11481 = vmatprep.mubr.msk.bf16.mxu0 %vm1265_vm3, %v18982_v18  ;;  %v5759_v52 = vpop.f32.mrf.mxu1 }
 0x3d6   : > { %18980 = vst [vmem:[#allocation50_spill] sm:$0xff] %v15967_v48  ;;  %v6458_v44 = vpop.f32.mrf.mxu0  ;;  %v15972_v53 = vadd.f32 %v11248_v5, %v6114_v63  ;;  %v6112_v21 = vadd.f32 %v5759_v52, %v18984_v33  ;;  %v18990_v5 = vld [vmem:[#allocation134_spill] sm:$0xff]  ;;  %v18991_v33 = vld [vmem:[#allocation60_spill] sm:$0xff] }
 0x3d7   : > { %v11121_v19 = vpop.f32.mrf.mxu1  ;;  %11348 = vmatmul.mubr.msk.bf16.gmra.mxu1 %vm1265_vm3, %v18985_v30 }
 0x3d8   : > { %18983 = vst [vmem:[#allocation240_spill] sm:$0xff] %v15972_v53  ;;  %v11252_v43 = vpop.f32.mrf.mxu0  ;;  %v15977_v38 = vadd.f32 %v6445_v39, %v6112_v21  ;;  %v6117_v16 = vadd.f32 %v11121_v19, %v18987_v29  ;;  %11351 = vmatprep.mubr.msk.bf16.mxu1 %vm1265_vm3, %v18988_v1  ;;  %v18993_v39 = vld [vmem:[#allocation45_spill] sm:$0xff] }
 0x3d9   : > { %v5772_v59 = vpop.f32.mrf.mxu1 }
 0x3da   : > { %18986 = vst [vmem:[#allocation248_spill] sm:$0xff] %v15977_v38  ;;  %v6461_v18 = vpop.f32.mrf.mxu0  ;;  %v15982_v45 = vadd.f32 %v11251_v34, %v6117_v16  ;;  %v6115_v63 = vadd.f32 %v5772_v59, %v18990_v5  ;;  %v18994_v38 = vld [vmem:[#allocation64_spill] sm:$0xff]  ;;  %v18996_v34 = vld [vmem:[#allocation221_spill] sm:$0xff]  ;;  %v18997_v59 = vld [vmem:[#allocation71_spill] sm:$0xff] }
 0x3db   : > { %v11122_v53 = vpop.f32.mrf.mxu1 }
 0x3dc   : > { %18989 = vst [vmem:[#allocation38_spill] sm:$0xff] %v15982_v45  ;;  %v11255_v52 = vpop.f32.mrf.mxu0  ;;  %11482 = vmatmul.mubr.msk.bf16.gmra.mxu0 %vm1265_vm3, %v18991_v33  ;;  %v15987_v30 = vadd.f32 %v6458_v44, %v6115_v63  ;;  %v6118_v21 = vadd.f32 %v11122_v53, %v18993_v39  ;;  %v18999_v44 = vld [vmem:[#allocation48_spill] sm:$0xff] }
 0x3dd   : > { %11485 = vmatprep.mubr.msk.bf16.mxu0 %vm1265_vm3, %v18994_v38  ;;  %v5775_v19 = vpop.f32.mrf.mxu1  ;;  %v19000_v33 = vld [vmem:[#allocation76_spill] sm:$0xff] }
 0x3de   : > { %18992 = vst [vmem:[#allocation244_spill] sm:$0xff] %v15987_v30  ;;  %v6474_v29 = vpop.f32.mrf.mxu0  ;;  %v15992_v1 = vadd.f32 %v11252_v43, %v6118_v21  ;;  %v6116_v16 = vadd.f32 %v5775_v19, %v18996_v34  ;;  %v19002_v43 = vld [vmem:[#allocation224_spill] sm:$0xff]  ;;  %v19003_v34 = vld [vmem:[#allocation70_spill] sm:$0xff] }
 0x3df   : > { %v11125_v45 = vpop.f32.mrf.mxu1  ;;  %11352 = vmatmul.mubr.msk.bf16.gmra.mxu1 %vm1265_vm3, %v18997_v59 }
 0x3e0   : > { %18995 = vst [vmem:[#allocation246_spill] sm:$0xff] %v15992_v1  ;;  %v11256_v5 = vpop.f32.mrf.mxu0  ;;  %v15997_v48 = vadd.f32 %v6461_v18, %v6116_v16  ;;  %v6121_v63 = vadd.f32 %v11125_v45, %v18999_v44  ;;  %11355 = vmatprep.mubr.msk.bf16.mxu1 %vm1265_vm3, %v19000_v33  ;;  %v19005_v18 = vld [vmem:[#allocation137_spill] sm:$0xff] }
 0x3e1   : > { %v5788_v53 = vpop.f32.mrf.mxu1 }
 0x3e2   : > { %18998 = vst [vmem:[#allocation65_spill] sm:$0xff] %v15997_v48  ;;  %v6477_v38 = vpop.f32.mrf.mxu0  ;;  %v16002_v39 = vadd.f32 %v11255_v52, %v6121_v63  ;;  %v6119_v21 = vadd.f32 %v5788_v53, %v19002_v43  ;;  %v19006_v48 = vld [vmem:[#allocation164_spill] sm:$0xff]  ;;  %v19008_v52 = vld [vmem:[#allocation138_spill] sm:$0xff]  ;;  %v19009_v53 = vld [vmem:[#allocation81_spill] sm:$0xff] }
 0x3e3   : > { %v11126_v1 = vpop.f32.mrf.mxu1 }
 0x3e4   : > { %19001 = vst [vmem:[#allocation249_spill] sm:$0xff] %v16002_v39  ;;  %v11259_v19 = vpop.f32.mrf.mxu0  ;;  %11486 = vmatmul.mubr.msk.bf16.gmra.mxu0 %vm1265_vm3, %v19003_v34  ;;  %v16007_v59 = vadd.f32 %v6474_v29, %v6119_v21  ;;  %v6122_v16 = vadd.f32 %v11126_v1, %v19005_v18  ;;  %v19011_v29 = vld [vmem:[#allocation36_spill] sm:$0xff]  ;;  %v19012_v34 = vld [vmem:[#allocation86_spill] sm:$0xff] }
 0x3e5   : > { %11489 = vmatprep.mubr.msk.bf16.mxu0 %vm1265_vm3, %v19006_v48  ;;  %v5791_v45 = vpop.f32.mrf.mxu1 }
 0x3e6   : > { %19004 = vst [vmem:[#allocation257_spill] sm:$0xff] %v16007_v59  ;;  %v6490_v44 = vpop.f32.mrf.mxu0  ;;  %v16012_v33 = vadd.f32 %v11256_v5, %v6122_v16  ;;  %v6120_v63 = vadd.f32 %v5791_v45, %v19008_v52  ;;  %v19014_v5 = vld [vmem:[#allocation229_spill] sm:$0xff] }
 0x3e7   : > { %v11129_v39 = vpop.f32.mrf.mxu1  ;;  %11356 = vmatmul.mubr.msk.bf16.gmra.mxu1 %vm1265_vm3, %v19009_v53  ;;  %v19015_v52 = vld [vmem:[#allocation169_spill] sm:$0xff] }
 0x3e8   : > { %19007 = vst [vmem:[#allocation49_spill] sm:$0xff] %v16012_v33  ;;  %v11260_v43 = vpop.f32.mrf.mxu0  ;;  %v16017_v30 = vadd.f32 %v6477_v38, %v6120_v63  ;;  %v6125_v21 = vadd.f32 %v11129_v39, %v19011_v29  ;;  %11359 = vmatprep.mubr.msk.bf16.mxu1 %vm1265_vm3, %v19012_v34  ;;  %v19017_v38 = vld [vmem:[#allocation52_spill] sm:$0xff] }
 0x3e9   : > { %v5804_v1 = vpop.f32.mrf.mxu1 }
 0x3ea   : > { %19010 = vst [vmem:[#allocation253_spill] sm:$0xff] %v16017_v30  ;;  %v6493_v48 = vpop.f32.mrf.mxu0  ;;  %v16022_v18 = vadd.f32 %v11259_v19, %v6125_v21  ;;  %v6123_v16 = vadd.f32 %v5804_v1, %v19014_v5  ;;  %v19018_v30 = vld [vmem:[#allocation84_spill] sm:$0xff]  ;;  %v19021_v1 = vld [vmem:[#allocation90_spill] sm:$0xff] }
 0x3eb   : > { %v11130_v33 = vpop.f32.mrf.mxu1  ;;  %v19020_v19 = vld [vmem:[#allocation232_spill] sm:$0xff] }
 0x3ec   : > { %19013 = vst [vmem:[#allocation255_spill] sm:$0xff] %v16022_v18  ;;  %v11263_v45 = vpop.f32.mrf.mxu0  ;;  %11490 = vmatmul.mubr.msk.bf16.gmra.mxu0 %vm1265_vm3, %v19015_v52  ;;  %v16027_v53 = vadd.f32 %v6490_v44, %v6123_v16  ;;  %v6126_v63 = vadd.f32 %v11130_v33, %v19017_v38  ;;  %v19023_v44 = vld [vmem:[#allocation145_spill] sm:$0xff]  ;;  %v19024_v52 = vld [vmem:[#allocation94_spill] sm:$0xff] }
 0x3ed   : > { %11493 = vmatprep.mubr.msk.bf16.mxu0 %vm1265_vm3, %v19018_v30  ;;  %v5807_v39 = vpop.f32.mrf.mxu1 }
 0x3ee   : > { %19016 = vst [vmem:[#allocation155_spill] sm:$0xff] %v16027_v53  ;;  %v6506_v29 = vpop.f32.mrf.mxu0  ;;  %v16032_v34 = vadd.f32 %v11260_v43, %v6126_v63  ;;  %v6124_v21 = vadd.f32 %v5807_v39, %v19020_v19  ;;  %v19026_v43 = vld [vmem:[#allocation146_spill] sm:$0xff]  ;;  %v19027_v19 = vld [vmem:[#allocation140_spill] sm:$0xff] }
 0x3ef   : > { %v11133_v18 = vpop.f32.mrf.mxu1  ;;  %11360 = vmatmul.mubr.msk.bf16.gmra.mxu1 %vm1265_vm3, %v19021_v1 }
 0x3f0   : > { %19019 = vst [vmem:[#allocation258_spill] sm:$0xff] %v16032_v34  ;;  %v11264_v5 = vpop.f32.mrf.mxu0  ;;  %v16037_v59 = vadd.f32 %v6493_v48, %v6124_v21  ;;  %v6129_v16 = vadd.f32 %v11133_v18, %v19023_v44  ;;  %11363 = vmatprep.mubr.msk.bf16.mxu1 %vm1265_vm3, %v19024_v52  ;;  %v19029_v48 = vld [vmem:[#allocation68_spill] sm:$0xff] }
 0x3f1   : > { %v5820_v33 = vpop.f32.mrf.mxu1 }
 0x3f2   : > { %19022 = vst [vmem:[#allocation266_spill] sm:$0xff] %v16037_v59  ;;  %v6509_v30 = vpop.f32.mrf.mxu0  ;;  %v16042_v38 = vadd.f32 %v11263_v45, %v6129_v16  ;;  %v6127_v63 = vadd.f32 %v5820_v33, %v19026_v43  ;;  %v19030_v59 = vld [vmem:[#allocation92_spill] sm:$0xff]  ;;  %v19033_v33 = vld [vmem:[#allocation97_spill] sm:$0xff] }
 0x3f3   : > { %v11134_v34 = vpop.f32.mrf.mxu1  ;;  %v19032_v45 = vld [vmem:[#allocation236_spill] sm:$0xff] }
 0x3f4   : > { %19025 = vst [vmem:[#allocation161_spill] sm:$0xff] %v16042_v38  ;;  %v11267_v39 = vpop.f32.mrf.mxu0  ;;  %11494 = vmatmul.mubr.msk.bf16.gmra.mxu0 %vm1265_vm3, %v19027_v19  ;;  %v16047_v1 = vadd.f32 %v6506_v29, %v6127_v63  ;;  %v6130_v21 = vadd.f32 %v11134_v34, %v19029_v48  ;;  %v19035_v29 = vld [vmem:[#allocation153_spill] sm:$0xff] }
 0x3f5   : > { %11497 = vmatprep.mubr.msk.bf16.mxu0 %vm1265_vm3, %v19030_v59  ;;  %v5823_v18 = vpop.f32.mrf.mxu1  ;;  %v19036_v19 = vld [vmem:[#allocation101_spill] sm:$0xff] }
 0x3f6   : > { %19028 = vst [vmem:[#allocation271_spill] sm:$0xff] %v16047_v1  ;;  %v6522_v44 = vpop.f32.mrf.mxu0  ;;  %v16052_v52 = vadd.f32 %v11264_v5, %v6130_v21  ;;  %v6128_v16 = vadd.f32 %v5823_v18, %v19032_v45  ;;  %v19038_v5 = vld [vmem:[#allocation239_spill] sm:$0xff]  ;;  %v19039_v45 = vld [vmem:[#allocation141_spill] sm:$0xff] }
 0x3f7   : > { %v11137_v38 = vpop.f32.mrf.mxu1  ;;  %11364 = vmatmul.mubr.msk.bf16.gmra.mxu1 %vm1265_vm3, %v19033_v33 }
 0x3f8   : > { %19031 = vst [vmem:[#allocation58_spill] sm:$0xff] %v16052_v52  ;;  %v11268_v43 = vpop.f32.mrf.mxu0  ;;  %v16057_v53 = vadd.f32 %v6509_v30, %v6128_v16  ;;  %v6133_v63 = vadd.f32 %v11137_v38, %v19035_v29  ;;  %11367 = vmatprep.mubr.msk.bf16.mxu1 %vm1265_vm3, %v19036_v19  ;;  %v19041_v30 = vld [vmem:[#allocation245_spill] sm:$0xff] }
 0x3f9   : > { %v5836_v34 = vpop.f32.mrf.mxu1 }
 0x3fa   : > { %19034 = vst [vmem:[#allocation269_spill] sm:$0xff] %v16057_v53  ;;  %v6525_v59 = vpop.f32.mrf.mxu0  ;;  %v16062_v48 = vadd.f32 %v11267_v39, %v6133_v63  ;;  %v6131_v21 = vadd.f32 %v5836_v34, %v19038_v5  ;;  %v19042_v53 = vld [vmem:[#allocation143_spill] sm:$0xff] }
 0x3fb   : > { %v11138_v52 = vpop.f32.mrf.mxu1  ;;  %v19044_v39 = vld [vmem:[#allocation247_spill] sm:$0xff] }
 0x3fc   : > { %19037 = vst [vmem:[#allocation264_spill] sm:$0xff] %v16062_v48  ;;  %v11271_v18 = vpop.f32.mrf.mxu0  ;;  %11498 = vmatmul.mubr.msk.bf16.gmra.mxu0 %vm1265_vm3, %v19039_v45  ;;  %v16067_v33 = vadd.f32 %v6522_v44, %v6131_v21  ;;  %v6134_v16 = vadd.f32 %v11138_v52, %v19041_v30  ;;  %v19045_v34 = vld [vmem:[#allocation107_spill] sm:$0xff]  ;;  %v19048_v45 = vld [vmem:[#allocation110_spill] sm:$0xff] }
 0x3fd   : > { %11501 = vmatprep.mubr.msk.bf16.mxu0 %vm1265_vm3, %v19042_v53  ;;  %v5839_v38 = vpop.f32.mrf.mxu1  ;;  %v19047_v44 = vld [vmem:[#allocation75_spill] sm:$0xff] }
 0x3fe   : > { %19040 = vst [vmem:[#allocation167_spill] sm:$0xff] %v16067_v33  ;;  %v6538_v29 = vpop.f32.mrf.mxu0  ;;  %v16072_v19 = vadd.f32 %v11268_v43, %v6134_v16  ;;  %v6132_v63 = vadd.f32 %v5839_v38, %v19044_v39  ;;  %v19050_v43 = vld [vmem:[#allocation250_spill] sm:$0xff]  ;;  %v19051_v39 = vld [vmem:[#allocation144_spill] sm:$0xff] }
 0x3ff   : > { %v11141_v48 = vpop.f32.mrf.mxu1  ;;  %11368 = vmatmul.mubr.msk.bf16.gmra.mxu1 %vm1265_vm3, %v19045_v34 }
 0x400   : > { %19043 = vst [vmem:[#allocation267_spill] sm:$0xff] %v16072_v19  ;;  %v11272_v5 = vpop.f32.mrf.mxu0  ;;  %v16077_v1 = vadd.f32 %v6525_v59, %v6132_v63  ;;  %v6137_v21 = vadd.f32 %v11141_v48, %v19047_v44  ;;  %11371 = vmatprep.mubr.msk.bf16.mxu1 %vm1265_vm3, %v19048_v45  ;;  %v19053_v59 = vld [vmem:[#allocation158_spill] sm:$0xff] }
 0x401   : > { %v5852_v52 = vpop.f32.mrf.mxu1 }
 0x402   : > { %19046 = vst [vmem:[#allocation78_spill] sm:$0xff] %v16077_v1  ;;  %v6541_v53 = vpop.f32.mrf.mxu0  ;;  %v16082_v30 = vadd.f32 %v11271_v18, %v6137_v21  ;;  %v6135_v16 = vadd.f32 %v5852_v52, %v19050_v43  ;;  %v19054_v1 = vld [vmem:[#allocation147_spill] sm:$0xff]  ;;  %v19056_v18 = vld [vmem:[#allocation254_spill] sm:$0xff] }
 0x403   : > { %v11142_v19 = vpop.f32.mrf.mxu1  ;;  %v19057_v52 = vld [vmem:[#allocation115_spill] sm:$0xff] }
 0x404   : > { %19049 = vst [vmem:[#allocation175_spill] sm:$0xff] %v16082_v30  ;;  %v11275_v38 = vpop.f32.mrf.mxu0  ;;  %11502 = vmatmul.mubr.msk.bf16.gmra.mxu0 %vm1265_vm3, %v19051_v39  ;;  %v16087_v34 = vadd.f32 %v6538_v29, %v6135_v16  ;;  %v6138_v63 = vadd.f32 %v11142_v19, %v19053_v59  ;;  %v19059_v29 = vld [vmem:[#allocation256_spill] sm:$0xff]  ;;  %v19060_v39 = vld [vmem:[#allocation117_spill] sm:$0xff] }
 0x405   : > { %11505 = vmatprep.mubr.msk.bf16.mxu0 %vm1265_vm3, %v19054_v1  ;;  %v5855_v48 = vpop.f32.mrf.mxu1 }
 0x406   : > { %19052 = vst [vmem:[#allocation159_spill] sm:$0xff] %v16087_v34  ;;  %v6554_v44 = vpop.f32.mrf.mxu0  ;;  %v16092_v45 = vadd.f32 %v11272_v5, %v6138_v63  ;;  %v6136_v21 = vadd.f32 %v5855_v48, %v19056_v18  ;;  %v19062_v5 = vld [vmem:[#allocation259_spill] sm:$0xff]  ;;  %v19063_v18 = vld [vmem:[#allocation148_spill] sm:$0xff] }
 0x407   : > { %v11145_v30 = vpop.f32.mrf.mxu1  ;;  %11372 = vmatmul.mubr.msk.bf16.gmra.mxu1 %vm1265_vm3, %v19057_v52 }
 0x408   : > { %19055 = vst [vmem:[#allocation69_spill] sm:$0xff] %v16092_v45  ;;  %v11276_v43 = vpop.f32.mrf.mxu0  ;;  %v16097_v33 = vadd.f32 %v6541_v53, %v6136_v21  ;;  %v6141_v16 = vadd.f32 %v11145_v30, %v19059_v29  ;;  %11375 = vmatprep.mubr.msk.bf16.mxu1 %vm1265_vm3, %v19060_v39  ;;  %v19065_v53 = vld [vmem:[#allocation85_spill] sm:$0xff] }
 0x409   : > { %v5868_v19 = vpop.f32.mrf.mxu1 }
 0x40a   : > { %19058 = vst [vmem:[#allocation174_spill] sm:$0xff] %v16097_v33  ;;  %v6557_v1 = vpop.f32.mrf.mxu0  ;;  %v16102_v59 = vadd.f32 %v11275_v38, %v6141_v16  ;;  %v6139_v63 = vadd.f32 %v5868_v19, %v19062_v5  ;;  %v19066_v33 = vld [vmem:[#allocation197_spill] sm:$0xff]  ;;  %v19068_v38 = vld [vmem:[#allocation260_spill] sm:$0xff]  ;;  %v19069_v19 = vld [vmem:[#allocation119_spill] sm:$0xff] }
 0x40b   : > { %v11146_v45 = vpop.f32.mrf.mxu1 }
 0x40c   : > { %19061 = vst [vmem:[#allocation270_spill] sm:$0xff] %v16102_v59  ;;  %v11279_v48 = vpop.f32.mrf.mxu0  ;;  %11506 = vmatmul.mubr.msk.bf16.gmra.mxu0 %vm1265_vm3, %v19063_v18  ;;  %v16107_v52 = vadd.f32 %v6554_v44, %v6139_v63  ;;  %v6142_v21 = vadd.f32 %v11146_v45, %v19065_v53  ;;  %v19071_v44 = vld [vmem:[#allocation165_spill] sm:$0xff]  ;;  %v19072_v18 = vld [vmem:[#allocation3_spill] sm:$0xff] }
 0x40d   : > { %11509 = vmatprep.mubr.msk.bf16.mxu0 %vm1265_vm3, %v19066_v33  ;;  %v5871_v30 = vpop.f32.mrf.mxu1 }
 0x40e   : > { %19064 = vst [vmem:[#allocation114_spill] sm:$0xff] %v16107_v52  ;;  %v6570_v29 = vpop.f32.mrf.mxu0  ;;  %v16112_v39 = vadd.f32 %v11276_v43, %v6142_v21  ;;  %v6140_v16 = vadd.f32 %v5871_v30, %v19068_v38  ;;  %v19074_v43 = vld [vmem:[#allocation263_spill] sm:$0xff]  ;;  %v19075_v38 = vld [vmem:[#allocation149_spill] sm:$0xff] }
 0x40f   : > { %v11149_v59 = vpop.f32.mrf.mxu1  ;;  %11376 = vmatmul.mubr.msk.bf16.gmra.mxu1 %vm1265_vm3, %v19069_v19  ;;  %v552_v19 = vunpack.c.l.bf16 %v15778_v47  ;;  %v19081_v52 = vld [vmem:[#allocation5_spill] sm:$0xff] }
 0x410   : > { %19067 = vst [vmem:[#allocation272_spill] sm:$0xff] %v16112_v39  ;;  %v11280_v5 = vpop.f32.mrf.mxu0  ;;  %v16117_v34 = vadd.f32 %v6557_v1, %v6140_v16  ;;  %v6145_v63 = vadd.f32 %v11149_v59, %v19071_v44  ;;  %11379 = vmatprep.mubr.msk.bf16.mxu1 %vm1265_vm3, %v19072_v18  ;;  %v553_v1 = vunpack.c.h.bf16 %v15778_v47  ;;  %v19077_v59 = vld [vmem:[#allocation265_spill] sm:$0xff]  ;;  %v19078_v18 = vld [vmem:[#allocation203_spill] sm:$0xff] }
 0x411   : > { %v5884_v45 = vpop.f32.mrf.mxu1  ;;  %v7577_v42 = vrot.slane %v552_v19, 2 }
 0x412   : > { %19070 = vst [vmem:[#allocation184_spill] sm:$0xff] %v16117_v34  ;;  %v6573_v33 = vpop.f32.mrf.mxu0  ;;  %v16122_v53 = vadd.f32 %v11279_v48, %v6145_v63  ;;  %v6143_v21 = vadd.f32 %v5884_v45, %v19074_v43  ;;  %v554_v45 = vunpack.c.l.bf16 %v15805_v57  ;;  %v7578_v57 = vrot.slane %v553_v1, 2 }
 0x413   : > { %v11150_v39 = vpop.f32.mrf.mxu1 }
 0x414   : > { %19073 = vst [vmem:[#allocation88_spill] sm:$0xff] %v16122_v53  ;;  %v11283_v30 = vpop.f32.mrf.mxu0  ;;  %11510 = vmatmul.mubr.msk.bf16.gmra.mxu0 %vm1265_vm3, %v19075_v38  ;;  %v16129_v16 = vadd.f32 %v6570_v29, %v6143_v21  ;;  %v6146_v44 = vadd.f32 %v11150_v39, %v19077_v59  ;;  %v19080_v53 = vld [vmem:[#allocation268_spill] sm:$0xff]  ;;  %v6878_v29 = vrot.slane %v552_v19, 1  ;;  %v6879_v21 = vrot.slane %v553_v1, 1  ;;  %v19083_v39 = vld [vmem:[#allocation170_spill] sm:$0xff] }
 0x415   : > { %11513 = vmatprep.mubr.msk.bf16.mxu0 %vm1265_vm3, %v19078_v18  ;;  %v5887_v48 = vpop.f32.mrf.mxu1  ;;  %v19084_v18 = vld [vmem:[#allocation8_spill] sm:$0xff]  ;;  %v16148_v49 = vrot.slane %v554_v45, 1  ;;  %v19090_v1 = vld [vmem:[#allocation210_spill] sm:$0xff] }
 0x416   : > { %19076 = vst [vmem:[#allocation96_spill] sm:$0xff] %v16129_v16  ;;  %v6586_v63 = vpop.f32.mrf.mxu0  ;;  %v16135_v43 = vadd.f32 %v11280_v5, %v6146_v44  ;;  %v6144_v34 = vadd.f32 %v5887_v48, %v19080_v53  ;;  %v19086_v53 = vld [vmem:[#allocation55_spill] sm:$0xff] }
 0x417   : > { %v11153_v38 = vpop.f32.mrf.mxu1  ;;  %11380 = vmatmul.mubr.msk.bf16.gmra.mxu1 %vm1265_vm3, %v19081_v52  ;;  %v16150_v52 = vrot.slane %v554_v45, 2 }
 0x418   : > { %19079 = vst [vmem:[#allocation273_spill] sm:$0xff] %v16135_v43  ;;  %v11284_v47 = vpop.f32.mrf.mxu0  ;;  %v16140_v16 = vadd.f32 %v6573_v33, %v6144_v34  ;;  %v6149_v59 = vadd.f32 %v11153_v38, %v19083_v39  ;;  %11383 = vmatprep.mubr.msk.bf16.mxu1 %vm1265_vm3, %v19084_v18  ;;  %v19087_v33 = vld [vmem:[#allocation42_spill] sm:$0xff]  ;;  %v19089_v39 = vld [vmem:[#allocation173_spill] sm:$0xff] }
 0x419   : > { %v5900_v5 = vpop.f32.mrf.mxu1 }
 0x41a   : > { %19082 = vst [vmem:[#allocation157_spill] sm:$0xff] %v16140_v16  ;;  %v6589_v44 = vpop.f32.mrf.mxu0  ;;  %v16145_v43 = vadd.f32 %v11283_v30, %v6149_v59  ;;  %v6147_v48 = vadd.f32 %v5900_v5, %v19086_v53  ;;  %v16160_v30 = vsel %vm782_vm1, %v6878_v29, %v6879_v21  ;;  %v16164_v59 = vsel %vm782_vm1, %v6879_v21, %v16148_v49  ;;  %v19092_v29 = vld [vmem:[#allocation40_spill] sm:$0xff]  ;;  %v19099_v16 = vld [vmem:[#allocation19_spill] sm:$0xff] }
 0x41b   : > { %v11154_v2 = vpop.f32.mrf.mxu1 }
 0x41c   : > { %19085 = vst [vmem:[#allocation160_spill] sm:$0xff] %v16145_v43  ;;  %v11287_v34 = vpop.f32.mrf.mxu0  ;;  %11514 = vmatmul.mubr.msk.bf16.gmra.mxu0 %vm1265_vm3, %v19087_v33  ;;  %v16154_v38 = vadd.f32 %v6586_v63, %v6147_v48  ;;  %v6150_v19 = vadd.f32 %v11154_v2, %v19089_v39  ;;  %v16169_v63 = vsel %vm2747_vm2, %v7577_v42, %v7578_v57  ;;  %v19093_v39 = vld [vmem:[#allocation10_spill] sm:$0xff]  ;;  %v19096_v43 = vld [vmem:[#allocation13_spill] sm:$0xff] }
 0x41d   : > { %11517 = vmatprep.mubr.msk.bf16.mxu0 %vm1265_vm3, %v19090_v1  ;;  %v5903_v45 = vpop.f32.mrf.mxu1  ;;  %v16173_v2 = vsel %vm2747_vm2, %v7578_v57, %v16150_v52  ;;  %v19095_v42 = vld [vmem:[#allocation54_spill] sm:$0xff] }
 0x41e   : > { %19088 = vst [vmem:[#allocation192_spill] sm:$0xff] %v16154_v38  ;;  %v6602_v18 = vpop.f32.mrf.mxu0  ;;  %v16175_v53 = vadd.f32 %v11284_v47, %v6150_v19  ;;  %v6148_v48 = vadd.f32 %v5903_v45, %v19092_v29  ;;  %v19098_v45 = vld [vmem:[#allocation62_spill] sm:$0xff] }
 0x41f   : > { %v11157_v33 = vpop.f32.mrf.mxu1  ;;  %11384 = vmatmul.mubr.msk.bf16.gmra.mxu1 %vm1265_vm3, %v19093_v39 }
 0x420   : > { %19091 = vst [vmem:[#allocation105_spill] sm:$0xff] %v16175_v53  ;;  %v11288_v1 = vpop.f32.mrf.mxu0  ;;  %v16182_v5 = vadd.f32 %v6589_v44, %v6148_v48  ;;  %v6153_v38 = vadd.f32 %v11157_v33, %v19095_v42  ;;  %11387 = vmatprep.mubr.msk.bf16.mxu1 %vm1265_vm3, %v19096_v43  ;;  %v19101_v44 = vld [vmem:[#allocation179_spill] sm:$0xff] }
 0x421   : > { %v5916_v57 = vpop.f32.mrf.mxu1 }
 0x422   : > { %19094 = vst [vmem:[#allocation171_spill] sm:$0xff] %v16182_v5  ;;  %v6605_v47 = vpop.f32.mrf.mxu0  ;;  %v16187_v19 = vadd.f32 %v11287_v34, %v6153_v38  ;;  %v6151_v29 = vadd.f32 %v5916_v57, %v19098_v45  ;;  %v19102_v5 = vld [vmem:[#allocation218_spill] sm:$0xff]  ;;  %v19105_v57 = vld [vmem:[#allocation15_spill] sm:$0xff] }
 0x423   : > { %v11158_v53 = vpop.f32.mrf.mxu1  ;;  %v19104_v34 = vld [vmem:[#allocation154_spill] sm:$0xff] }
 0x424   : > { %19097 = vst [vmem:[#allocation274_spill] sm:$0xff] %v16187_v19  ;;  %v11291_v21 = vpop.f32.mrf.mxu0  ;;  %11518 = vmatmul.mubr.msk.bf16.gmra.mxu0 %vm1265_vm3, %v19099_v16  ;;  %v16192_v39 = vadd.f32 %v6602_v18, %v6151_v29  ;;  %v6154_v48 = vadd.f32 %v11158_v53, %v19101_v44  ;;  %v19107_v16 = vld [vmem:[#allocation182_spill] sm:$0xff]  ;;  %v19108_v29 = vld [vmem:[#allocation17_spill] sm:$0xff] }
 0x425   : > { %11521 = vmatprep.mubr.msk.bf16.mxu0 %vm1265_vm3, %v19102_v5  ;;  %v5919_v33 = vpop.f32.mrf.mxu1 }
 0x426   : > { %19100 = vst [vmem:[#allocation177_spill] sm:$0xff] %v16192_v39  ;;  %v6618_v43 = vpop.f32.mrf.mxu0  ;;  %v16197_v42 = vadd.f32 %v11288_v1, %v6154_v48  ;;  %v6152_v38 = vadd.f32 %v5919_v33, %v19104_v34  ;;  %v19110_v1 = vld [vmem:[#allocation156_spill] sm:$0xff]  ;;  %v19111_v34 = vld [vmem:[#allocation26_spill] sm:$0xff] }
 0x427   : > { %v11161_v19 = vpop.f32.mrf.mxu1  ;;  %11388 = vmatmul.mubr.msk.bf16.gmra.mxu1 %vm1265_vm3, %v19105_v57 }
 0x428   : > { %19103 = vst [vmem:[#allocation195_spill] sm:$0xff] %v16197_v42  ;;  %v11292_v45 = vpop.f32.mrf.mxu0  ;;  %v16202_v25 = vadd.f32 %v6605_v47, %v6152_v38  ;;  %v6157_v18 = vadd.f32 %v11161_v19, %v19107_v16  ;;  %11391 = vmatprep.mubr.msk.bf16.mxu1 %vm1265_vm3, %v19108_v29  ;;  %v19113_v47 = vld [vmem:[#allocation72_spill] sm:$0xff] }
 0x429   : > { %v5932_v53 = vpop.f32.mrf.mxu1 }
 0x42a   : > { %19106 = vst [vmem:[#allocation180_spill] sm:$0xff] %v16202_v25  ;;  %v6621_v5 = vpop.f32.mrf.mxu0  ;;  %v16207_v44 = vadd.f32 %v11291_v21, %v6157_v18  ;;  %v6155_v48 = vadd.f32 %v5932_v53, %v19110_v1  ;;  %v19114_v25 = vld [vmem:[#allocation226_spill] sm:$0xff]  ;;  %v19116_v21 = vld [vmem:[#allocation77_spill] sm:$0xff] }
 0x42b   : > { %v11162_v42 = vpop.f32.mrf.mxu1  ;;  %v19117_v53 = vld [vmem:[#allocation21_spill] sm:$0xff] }
 0x42c   : > { %19109 = vst [vmem:[#allocation163_spill] sm:$0xff] %v16207_v44  ;;  %v11295_v33 = vpop.f32.mrf.mxu0  ;;  %11522 = vmatmul.mubr.msk.bf16.gmra.mxu0 %vm1265_vm3, %v19111_v34  ;;  %v16212_v57 = vadd.f32 %v6618_v43, %v6155_v48  ;;  %v6158_v38 = vadd.f32 %v11162_v42, %v19113_v47  ;;  %v19119_v43 = vld [vmem:[#allocation188_spill] sm:$0xff]  ;;  %v19120_v34 = vld [vmem:[#allocation25_spill] sm:$0xff] }
 0x42d   : > { %11525 = vmatprep.mubr.msk.bf16.mxu0 %vm1265_vm3, %v19114_v25  ;;  %v5935_v19 = vpop.f32.mrf.mxu1 }
 0x42e   : > { %19112 = vst [vmem:[#allocation201_spill] sm:$0xff] %v16212_v57  ;;  %v6634_v16 = vpop.f32.mrf.mxu0  ;;  %v16217_v29 = vadd.f32 %v11292_v45, %v6158_v38  ;;  %v6156_v18 = vadd.f32 %v5935_v19, %v19116_v21  ;;  %v19122_v45 = vld [vmem:[#allocation162_spill] sm:$0xff]  ;;  %v19123_v21 = vld [vmem:[#allocation33_spill] sm:$0xff] }
 0x42f   : > { %v11165_v44 = vpop.f32.mrf.mxu1  ;;  %11392 = vmatmul.mubr.msk.bf16.gmra.mxu1 %vm1265_vm3, %v19117_v53 }
 0x430   : > { %19115 = vst [vmem:[#allocation11_spill] sm:$0xff] %v16217_v29  ;;  %v11296_v1 = vpop.f32.mrf.mxu0  ;;  %v16222_v39 = vadd.f32 %v6621_v5, %v6156_v18  ;;  %v6161_v48 = vadd.f32 %v11165_v44, %v19119_v43  ;;  %11395 = vmatprep.mubr.msk.bf16.mxu1 %vm1265_vm3, %v19120_v34  ;;  %v19125_v5 = vld [vmem:[#allocation102_spill] sm:$0xff] }
 0x431   : > { %v5948_v42 = vpop.f32.mrf.mxu1 }
 0x432   : > { %19118 = vst [vmem:[#allocation14_spill] sm:$0xff] %v16222_v39  ;;  %v6637_v25 = vpop.f32.mrf.mxu0  ;;  %v16227_v47 = vadd.f32 %v11295_v33, %v6161_v48  ;;  %v6159_v38 = vadd.f32 %v5948_v42, %v19122_v45  ;;  %v19126_v39 = vld [vmem:[#allocation234_spill] sm:$0xff]  ;;  %v19129_v42 = vld [vmem:[#allocation28_spill] sm:$0xff] }
 0x433   : > { %v11166_v29 = vpop.f32.mrf.mxu1  ;;  %v19128_v33 = vld [vmem:[#allocation74_spill] sm:$0xff] }
 0x434   : > { %19121 = vst [vmem:[#allocation16_spill] sm:$0xff] %v16227_v47  ;;  %v11299_v19 = vpop.f32.mrf.mxu0  ;;  %11526 = vmatmul.mubr.msk.bf16.gmra.mxu0 %vm1265_vm3, %v19123_v21  ;;  %v16232_v53 = vadd.f32 %v6634_v16, %v6159_v38  ;;  %v6162_v18 = vadd.f32 %v11166_v29, %v19125_v5  ;;  %v19131_v16 = vld [vmem:[#allocation82_spill] sm:$0xff]  ;;  %v19132_v21 = vld [vmem:[#allocation31_spill] sm:$0xff] }
 0x435   : > { %11529 = vmatprep.mubr.msk.bf16.mxu0 %vm1265_vm3, %v19126_v39  ;;  %v5951_v44 = vpop.f32.mrf.mxu1 }
 0x436   : > { %19124 = vst [vmem:[#allocation186_spill] sm:$0xff] %v16232_v53  ;;  %v6650_v43 = vpop.f32.mrf.mxu0  ;;  %v16237_v34 = vadd.f32 %v11296_v1, %v6162_v18  ;;  %v6160_v48 = vadd.f32 %v5951_v44, %v19128_v33  ;;  %v19134_v1 = vld [vmem:[#allocation166_spill] sm:$0xff]  ;;  %v19135_v33 = vld [vmem:[#allocation57_spill] sm:$0xff] }
 0x437   : > { %v11169_v47 = vpop.f32.mrf.mxu1  ;;  %11396 = vmatmul.mubr.msk.bf16.gmra.mxu1 %vm1265_vm3, %v19129_v42 }
 0x438   : > { %19127 = vst [vmem:[#allocation132_spill] sm:$0xff] %v16237_v34  ;;  %v11300_v45 = vpop.f32.mrf.mxu0  ;;  %v16242_v57 = vadd.f32 %v6637_v25, %v6160_v48  ;;  %v6165_v38 = vadd.f32 %v11169_v47, %v19131_v16  ;;  %11399 = vmatprep.mubr.msk.bf16.mxu1 %vm1265_vm3, %v19132_v21  ;;  %v19136_v25 = vld [vmem:[#allocation103_spill] sm:$0xff] }
 0x439   : > { %v5964_v29 = vpop.f32.mrf.mxu1 }
 0x43a   : > { %19130 = vst [vmem:[#allocation100_spill] sm:$0xff] %v16242_v57  ;;  %v6653_v39 = vpop.f32.mrf.mxu0  ;;  %v16247_v5 = vadd.f32 %v11299_v19, %v6165_v38  ;;  %v6163_v18 = vadd.f32 %v5964_v29, %v19134_v1  ;;  %v19137_v57 = vld [vmem:[#allocation241_spill] sm:$0xff]  ;;  %v19139_v19 = vld [vmem:[#allocation168_spill] sm:$0xff]  ;;  %v19140_v29 = vld [vmem:[#allocation35_spill] sm:$0xff] }
 0x43b   : > { %v11170_v34 = vpop.f32.mrf.mxu1 }
 0x43c   : > { %19133 = vst [vmem:[#allocation20_spill] sm:$0xff] %v16247_v5  ;;  %v11303_v44 = vpop.f32.mrf.mxu0  ;;  %11530 = vmatmul.mubr.msk.bf16.gmra.mxu0 %vm1265_vm3, %v19135_v33  ;;  %v16252_v42 = vadd.f32 %v6650_v43, %v6163_v18  ;;  %v6166_v48 = vadd.f32 %v11170_v34, %v19136_v25  ;;  %v19141_v43 = vld [vmem:[#allocation111_spill] sm:$0xff] }
 0x43d   : > { %11533 = vmatprep.mubr.msk.bf16.mxu0 %vm1265_vm3, %v19137_v57  ;;  %v5967_v47 = vpop.f32.mrf.mxu1  ;;  %v19142_v33 = vld [vmem:[#allocation39_spill] sm:$0xff] }
 0x43e   : > { %v6666_v16 = vpop.f32.mrf.mxu0  ;;  %v16257_v21 = vadd.f32 %v11300_v45, %v6166_v48  ;;  %v6164_v38 = vadd.f32 %v5967_v47, %v19139_v19  ;;  %v19144_v45 = vld [vmem:[#allocation80_spill] sm:$0xff] }
 0x43f   : > { %v11173_v5 = vpop.f32.mrf.mxu1  ;;  %11400 = vmatmul.mubr.msk.bf16.gmra.mxu1 %vm1265_vm3, %v19140_v29 }
 0x440   : > { %19138 = vst [vmem:[#allocation189_spill] sm:$0xff] %v16257_v21  ;;  %v11304_v1 = vpop.f32.mrf.mxu0  ;;  %v16262_v53 = vadd.f32 %v6653_v39, %v6164_v38  ;;  %v6169_v18 = vadd.f32 %v11173_v5, %v19141_v43  ;;  %11403 = vmatprep.mubr.msk.bf16.mxu1 %vm1265_vm3, %v19142_v33  ;;  %v19145_v39 = vld [vmem:[#allocation93_spill] sm:$0xff] }
 0x441   : > { %v5980_v34 = vpop.f32.mrf.mxu1 }
 0x442   : > { %v6669_v57 = vpop.f32.mrf.mxu0  ;;  %v16267_v25 = vadd.f32 %v11303_v44, %v6169_v18  ;;  %v6167_v48 = vadd.f32 %v5980_v34, %v19144_v45  ;;  %v19147_v44 = vld [vmem:[#allocation172_spill] sm:$0xff]  ;;  %v19148_v34 = vld [vmem:[#allocation43_spill] sm:$0xff] }
 0x443   : > { %v11174_v21 = vpop.f32.mrf.mxu1 }
 0x444   : > { %19143 = vst [vmem:[#allocation23_spill] sm:$0xff] %v16267_v25  ;;  %v11307_v47 = vpop.f32.mrf.mxu0  ;;  %11534 = vmatmul.mubr.msk.bf16.gmra.mxu0 %vm1265_vm3, %v18841_v51  ;;  %v16272_v19 = vadd.f32 %v6666_v16, %v6167_v48  ;;  %v6170_v38 = vadd.f32 %v11174_v21, %v19145_v39  ;;  %v19149_v51 = vld [vmem:[#allocation113_spill] sm:$0xff]  ;;  %v19150_v48 = vld [vmem:[#allocation47_spill] sm:$0xff] }
 0x445   : > { %11537 = vmatprep.mubr.msk.bf16.mxu0 %vm1265_vm3, %v18844_v24  ;;  %v5983_v5 = vpop.f32.mrf.mxu1 }
 0x446   : > { %v6682_v29 = vpop.f32.mrf.mxu0  ;;  %v16277_v43 = vadd.f32 %v11304_v1, %v6170_v38  ;;  %v6168_v18 = vadd.f32 %v5983_v5, %v19147_v44  ;;  %v19152_v1 = vld [vmem:[#allocation176_spill] sm:$0xff] }
 0x447   : > { %v11177_v33 = vpop.f32.mrf.mxu1  ;;  %11404 = vmatmul.mubr.msk.bf16.gmra.mxu1 %vm1265_vm3, %v19148_v34 }
 0x448   : > { %19146 = vst [vmem:[#allocation121_spill] sm:$0xff] %v16277_v43  ;;  %v11308_v45 = vpop.f32.mrf.mxu0  ;;  %v16282_v25 = vadd.f32 %v6669_v57, %v6168_v18  ;;  %v6173_v16 = vadd.f32 %v11177_v33, %v19149_v51  ;;  %11407 = vmatprep.mubr.msk.bf16.mxu1 %vm1265_vm3, %v19150_v48  ;;  %v19153_v57 = vld [vmem:[#allocation199_spill] sm:$0xff] }
 0x449   : > { %v5996_v21 = vpop.f32.mrf.mxu1 }
 0x44a   : > { %v6685_v24 = vpop.f32.mrf.mxu0  ;;  %v16287_v39 = vadd.f32 %v11307_v47, %v6173_v16  ;;  %v6171_v38 = vadd.f32 %v5996_v21, %v19152_v1  ;;  %v19155_v47 = vld [vmem:[#allocation89_spill] sm:$0xff] }
 0x44b   : > { %v11178_v43 = vpop.f32.mrf.mxu1  ;;  %v19156_v21 = vld [vmem:[#allocation53_spill] sm:$0xff] }
 0x44c   : > { %19151 = vst [vmem:[#allocation135_spill] sm:$0xff] %v16287_v39  ;;  %v11311_v5 = vpop.f32.mrf.mxu0  ;;  %11538 = vmatmul.mubr.msk.bf16.gmra.mxu0 %vm1265_vm3, %v18851_v13  ;;  %v16292_v44 = vadd.f32 %v6682_v29, %v6171_v38  ;;  %v6174_v18 = vadd.f32 %v11178_v43, %v19153_v57  ;;  %v19157_v13 = vld [vmem:[#allocation178_spill] sm:$0xff]  ;;  %v19158_v38 = vld [vmem:[#allocation59_spill] sm:$0xff] }
 0x44d   : > { %11541 = vmatprep.mubr.msk.bf16.mxu0 %vm1265_vm3, %v18854_v35  ;;  %v5999_v33 = vpop.f32.mrf.mxu1 }
 0x44e   : > { %v6698_v34 = vpop.f32.mrf.mxu0  ;;  %v16297_v51 = vadd.f32 %v11308_v45, %v6174_v18  ;;  %v6172_v16 = vadd.f32 %v5999_v33, %v19155_v47  ;;  %v19159_v45 = vld [vmem:[#allocation181_spill] sm:$0xff] }
 0x44f   : > { %v11181_v48 = vpop.f32.mrf.mxu1  ;;  %11408 = vmatmul.mubr.msk.bf16.gmra.mxu1 %vm1265_vm3, %v19156_v21 }
 0x450   : > { %19154 = vst [vmem:[#allocation191_spill] sm:$0xff] %v16297_v51  ;;  %v11312_v1 = vpop.f32.mrf.mxu0  ;;  %v16302_v39 = vadd.f32 %v6685_v24, %v6172_v16  ;;  %v6177_v29 = vadd.f32 %v11181_v48, %v19157_v13  ;;  %11411 = vmatprep.mubr.msk.bf16.mxu1 %vm1265_vm3, %v19158_v38  ;;  %v19161_v24 = vld [vmem:[#allocation204_spill] sm:$0xff] }
 0x451   : > { %v6012_v43 = vpop.f32.mrf.mxu1 }
 0x452   : > { %v6701_v35 = vpop.f32.mrf.mxu0  ;;  %v16307_v57 = vadd.f32 %v11311_v5, %v6177_v29  ;;  %v6175_v18 = vadd.f32 %v6012_v43, %v19159_v45  ;;  %v19162_v5 = vld [vmem:[#allocation185_spill] sm:$0xff]  ;;  %v19163_v43 = vld [vmem:[#allocation63_spill] sm:$0xff] }
 0x453   : > { %v11182_v51 = vpop.f32.mrf.mxu1 }
 0x454   : > { %v11315_v33 = vpop.f32.mrf.mxu0  ;;  %11542 = vmatmul.mubr.msk.bf16.gmra.mxu0 %vm1265_vm3, %v18859_v22  ;;  %v16312_v47 = vadd.f32 %v6698_v34, %v6175_v18  ;;  %v6178_v16 = vadd.f32 %v11182_v51, %v19161_v24  ;;  %v19164_v34 = vld [vmem:[#allocation206_spill] sm:$0xff]  ;;  %v19165_v51 = vld [vmem:[#allocation67_spill] sm:$0xff] }
 0x455   : > { %11545 = vmatprep.mubr.msk.bf16.mxu0 %vm1265_vm3, %v18861_v56  ;;  %v6015_v48 = vpop.f32.mrf.mxu1 }
 0x456   : > { %19160 = vst [vmem:[#allocation136_spill] sm:$0xff] %v16312_v47  ;;  %v6714_v21 = vpop.f32.mrf.mxu0  ;;  %v16317_v13 = vadd.f32 %v11312_v1, %v6178_v16  ;;  %v6176_v29 = vadd.f32 %v6015_v48, %v19162_v5 }
 0x457   : > { %v11185_v38 = vpop.f32.mrf.mxu1  ;;  %11412 = vmatmul.mubr.msk.bf16.gmra.mxu1 %vm1265_vm3, %v19163_v43 }
 0x458   : > { %v11316_v45 = vpop.f32.mrf.mxu0  ;;  %v16322_v22 = vadd.f32 %v6701_v35, %v6176_v29  ;;  %v6181_v18 = vadd.f32 %v11185_v38, %v19164_v34  ;;  %11415 = vmatprep.mubr.msk.bf16.mxu1 %vm1265_vm3, %v19165_v51  ;;  %v19166_v34 = vld [vmem:[#allocation73_spill] sm:$0xff] }
 0x459   : > { %v6028_v56 = vpop.f32.mrf.mxu1 }
 0x45a   : > { %v6717_v24 = vpop.f32.mrf.mxu0  ;;  %v16327_v47 = vadd.f32 %v11315_v33, %v6181_v18  ;;  %v6179_v1 = vadd.f32 %v6028_v56, %v15652_v55 }
 0x45b   : > { %v11186_v16 = vpop.f32.mrf.mxu1 }
 0x45c   : > { %v11319_v48 = vpop.f32.mrf.mxu0  ;;  %11546 = vmatmul.mubr.msk.bf16.gmra.mxu0 %vm1265_vm3, %v18864_v40  ;;  %v16333_v5 = vadd.f32 %v6714_v21, %v6179_v1  ;;  %v6182_v35 = vadd.f32 %v11186_v16, %v15657_v60  ;;  %v19168_v21 = vld [vmem:[#allocation98_spill] sm:$0xff]  ;;  %v19169_v60 = vld [vmem:[#allocation79_spill] sm:$0xff] }
 0x45d   : > { %11549 = vmatprep.mubr.msk.bf16.mxu0 %vm1265_vm3, %v18866_v3  ;;  %v6031_v29 = vpop.f32.mrf.mxu1 }
 0x45e   : > { %v6730_v38 = vpop.f32.mrf.mxu0  ;;  %v16338_v43 = vadd.f32 %v11316_v45, %v6182_v35  ;;  %v6180_v33 = vadd.f32 %v6031_v29, %v15662_v28 }
 0x45f   : > { %v11189_v55 = vpop.f32.mrf.mxu1  ;;  %11416 = vmatmul.mubr.msk.bf16.gmra.mxu1 %vm1265_vm3, %v19166_v34 }
 0x460   : > { %v11320_v40 = vpop.f32.mrf.mxu0  ;;  %v16343_v18 = vadd.f32 %v6717_v24, %v6180_v33  ;;  %v6185_v51 = vadd.f32 %v11189_v55, %v19168_v21  ;;  %11419 = vmatprep.mubr.msk.bf16.mxu1 %vm1265_vm3, %v19169_v60  ;;  %v19172_v24 = vld [vmem:[#allocation187_spill] sm:$0xff] }
 0x461   : > { %v6044_v3 = vpop.f32.mrf.mxu1 }
 0x462   : > { %19167 = vst [vmem:[#allocation123_spill] sm:$0xff] %v16343_v18  ;;  %v6733_v56 = vpop.f32.mrf.mxu0  ;;  %v16348_v1 = vadd.f32 %v11319_v48, %v6185_v51  ;;  %v6183_v45 = vadd.f32 %v6044_v3, %v15672_v0  ;;  %v19174_v48 = vld [vmem:[#allocation190_spill] sm:$0xff]  ;;  %v19175_v51 = vld [vmem:[#allocation83_spill] sm:$0xff] }
 0x463   : > { %v11190_v28 = vpop.f32.mrf.mxu1  ;;  %v19186_v18 = vld [vmem:[#allocation99_spill] sm:$0xff] }
 0x464   : > { %19170 = vst [vmem:[#allocation27_spill] sm:$0xff] %v16348_v1  ;;  %v11455_v16 = vpop.f32.mrf.mxu0  ;;  %11550 = vmatmul.mubr.msk.bf16.gmra.mxu0 %vm1265_vm3, %v18871_v37  ;;  %v16353_v35 = vadd.f32 %v6730_v38, %v6183_v45  ;;  %v6186_v29 = vadd.f32 %v11190_v28, %v19172_v24  ;;  %v19177_v38 = vld [vmem:[#allocation212_spill] sm:$0xff]  ;;  %v19178_v45 = vld [vmem:[#allocation87_spill] sm:$0xff] }
 0x465   : > { %11553 = vmatprep.mubr.msk.bf16.mxu0 %vm1265_vm3, %v18874_v26  ;;  %v6047_v33 = vpop.f32.mrf.mxu1 }
 0x466   : > { %19171 = vst [vmem:[#allocation194_spill] sm:$0xff] %v16353_v35  ;;  %v7637_v55 = vpop.f32.mrf.mxu0  ;;  %v16358_v34 = vadd.f32 %v11320_v40, %v6186_v29  ;;  %v6184_v21 = vadd.f32 %v6047_v33, %v19174_v48 }
 0x467   : > { %v11325_v0 = vpop.f32.mrf.mxu1  ;;  %11420 = vmatmul.mubr.msk.bf16.gmra.mxu1 %vm1265_vm3, %v19175_v51 }
 0x468   : > { %19173 = vst [vmem:[#allocation30_spill] sm:$0xff] %v16358_v34  ;;  %v11456_v60 = vpop.f32.mrf.mxu0  ;;  %v16363_v37 = vadd.f32 %v6733_v56, %v6184_v21  ;;  %v7451_v3 = vadd.f32 %v11325_v0, %v19177_v38  ;;  %11423 = vmatprep.mubr.msk.bf16.mxu1 %vm1265_vm3, %v19178_v45  ;;  %v19182_v45 = vld [vmem:[#allocation95_spill] sm:$0xff] }
 0x469   : > { %v6938_v26 = vpop.f32.mrf.mxu1 }
 0x46a   : > { %19176 = vst [vmem:[#allocation124_spill] sm:$0xff] %v16363_v37  ;;  %v7640_v40 = vpop.f32.mrf.mxu0  ;;  %v8150_v28 = vadd.f32 %v11455_v16, %v7451_v3  ;;  %v7449_v24 = vadd.f32 %v6938_v26, %v15692_v11  ;;  %v19179_v11 = vld [vmem:[#allocation193_spill] sm:$0xff]  ;;  %v19180_v3 = vld [vmem:[#allocation91_spill] sm:$0xff] }
 0x46b   : > { %v11326_v56 = vpop.f32.mrf.mxu1 }
 0x46c   : > { %v11459_v29 = vpop.f32.mrf.mxu0  ;;  %11554 = vmatmul.mubr.msk.bf16.gmra.mxu0 %vm1265_vm3, %v18878_v15  ;;  %8279 = vst.msk [vmem:[%s16371_s24 + $0x10] sm:$0xff] %vm8276_vm4, %v8150_v28  ;;  %v8148_v33 = vadd.f32 %v7637_v55, %v7449_v24  ;;  %v7452_v48 = vadd.f32 %v11326_v56, %v15697_v8  ;;  %v19181_v55 = vld [vmem:[#allocation215_spill] sm:$0xff]  ;;  %v8670_v56 = vmul.f32 %v8150_v28, %v8150_v28 }
 0x46d   : > { %11557 = vmatprep.mubr.msk.bf16.mxu0 %vm1265_vm3, %v18880_v46  ;;  %v6941_v21 = vpop.f32.mrf.mxu1 }
 0x46e   : > { %v7653_v0 = vpop.f32.mrf.mxu0  ;;  %8277 = vst.msk [vmem:[%s16371_s24] sm:$0xff] %vm8276_vm4, %v8148_v33  ;;  %v8151_v16 = vadd.f32 %v11456_v60, %v7452_v48  ;;  %v7450_v51 = vadd.f32 %v6941_v21, %v19179_v11  ;;  %v8668_v46 = vmul.f32 %v8148_v33, %v8148_v33  ;;  %v19183_v21 = vld [vmem:[#allocation106_spill] sm:$0xff]  ;;  %v8405_v37 = vsel %vm8276_vm4, %v8148_v33, 0.0 }
 0x46f   : > { %v11329_v38 = vpop.f32.mrf.mxu1  ;;  %11424 = vmatmul.mubr.msk.bf16.gmra.mxu1 %vm1265_vm3, %v19180_v3 }
 0x470   : > { %v11460_v15 = vpop.f32.mrf.mxu0  ;;  %8280 = vst.msk [vmem:[%s16371_s24 + $0x18] sm:$0xff] %vm8276_vm4, %v8151_v16  ;;  %v7455_v8 = vadd.f32 %v11329_v38, %v19181_v55  ;;  %11427 = vmatprep.mubr.msk.bf16.mxu1 %vm1265_vm3, %v19182_v45  ;;  %v8149_v26 = vadd.f32 %v7640_v40, %v7450_v51  ;;  %v8408_v40 = vsel %vm8276_vm4, %v8150_v28, 0.0  ;;  %v8796_v33 = vsel %vm8276_vm4, %v8668_v46, 0.0 }
 0x471   : > { %v6954_v24 = vpop.f32.mrf.mxu1  ;;  %v8410_v28 = vsel %vm8276_vm4, %v8151_v16, 0.0 }
 0x472   : > { %v7656_v60 = vpop.f32.mrf.mxu0  ;;  %v8154_v48 = vadd.f32 %v11459_v29, %v7455_v8  ;;  %v7453_v11 = vadd.f32 %v6954_v24, %v19183_v21  ;;  %8278 = vst.msk [vmem:[%s16371_s24 + $0x8] sm:$0xff] %vm8276_vm4, %v8149_v26  ;;  %v8406_v3 = vsel %vm8276_vm4, %v8149_v26, 0.0  ;;  %v8669_v34 = vmul.f32 %v8149_v26, %v8149_v26  ;;  %v19184_v26 = vld [vmem:[#allocation108_spill] sm:$0xff] }
 0x473   : > { %v11330_v38 = vpop.f32.mrf.mxu1  ;;  %v8407_v51 = vadd.f32 %v8406_v3, %v8405_v37  ;;  %v8671_v8 = vmul.f32 %v8151_v16, %v8151_v16 }
 0x474   : > { %v11463_v55 = vpop.f32.mrf.mxu0  ;;  %11558 = vmatmul.mubr.msk.bf16.gmra.mxu0 %vm1265_vm3, %v18888_v7  ;;  %8283 = vst.msk [vmem:[%s16371_s24 + $0x30] sm:$0xff] %vm8276_vm4, %v8154_v48  ;;  %v8152_v29 = vadd.f32 %v7653_v0, %v7453_v11  ;;  %v8797_v45 = vsel %vm8276_vm4, %v8669_v34, 0.0  ;;  %v7456_v24 = vadd.f32 %v11330_v38, %v19184_v26  ;;  %v8799_v7 = vsel %vm8276_vm4, %v8670_v56, 0.0  ;;  %v19185_v11 = vld [vmem:[#allocation2_spill] sm:$0xff] }
 0x475   : > { %11561 = vmatprep.mubr.msk.bf16.mxu0 %vm1265_vm3, %v18891_v58  ;;  %v6957_v21 = vpop.f32.mrf.mxu1  ;;  %v8409_v1 = vadd.f32 %v8408_v40, %v8407_v51  ;;  %v8798_v37 = vadd.f32 %v8797_v45, %v8796_v33  ;;  %v19187_v56 = vld [vmem:[#allocation18_spill] sm:$0xff]  ;;  %v19188_v51 = vld [vmem:[#allocation104_spill] sm:$0xff]  ;;  %v8801_v33 = vsel %vm8276_vm4, %v8671_v8, 0.0 }
 0x476   : > { %v7669_v35 = vpop.f32.mrf.mxu0  ;;  %8281 = vst.msk [vmem:[%s16371_s24 + $0x20] sm:$0xff] %vm8276_vm4, %v8152_v29  ;;  %v8672_v0 = vmul.f32 %v8152_v29, %v8152_v29  ;;  %v8155_v58 = vadd.f32 %v11460_v15, %v7456_v24  ;;  %v7454_v46 = vadd.f32 %v6957_v21, %v19185_v11  ;;  %v8412_v16 = vsel %vm8276_vm4, %v8152_v29, 0.0 }
 0x477   : > { %v11333_v3 = vpop.f32.mrf.mxu1  ;;  %11428 = vmatmul.mubr.msk.bf16.gmra.mxu1 %vm1265_vm3, %v19186_v18  ;;  %v8411_v38 = vadd.f32 %v8410_v28, %v8409_v1  ;;  %v8800_v26 = vadd.f32 %v8799_v7, %v8798_v37  ;;  %v8674_v37 = vmul.f32 %v8154_v48, %v8154_v48 }
 0x478   : > { %v11464_v34 = vpop.f32.mrf.mxu0  ;;  %v7459_v40 = vadd.f32 %v11333_v3, %v19187_v56  ;;  %11431 = vmatprep.mubr.msk.bf16.mxu1 %vm1265_vm3, %v19188_v51  ;;  %8284 = vst.msk [vmem:[%s16371_s24 + $0x38] sm:$0xff] %vm8276_vm4, %v8155_v58  ;;  %v8153_v15 = vadd.f32 %v7656_v60, %v7454_v46  ;;  %v8803_v28 = vsel %vm8276_vm4, %v8672_v0, 0.0  ;;  %v8416_v60 = vsel %vm8276_vm4, %v8154_v48, 0.0  ;;  %v19190_v48 = vld [vmem:[#allocation222_spill] sm:$0xff] }
 0x479   : > { %v6970_v45 = vpop.f32.mrf.mxu1  ;;  %v8802_v18 = vadd.f32 %v8801_v33, %v8800_v26  ;;  %v8413_v21 = vadd.f32 %v8412_v16, %v8411_v38  ;;  %v19189_v26 = vld [vmem:[#allocation196_spill] sm:$0xff] }
 0x47a   : > { %v7672_v24 = vpop.f32.mrf.mxu0  ;;  %v16420_v1 = vadd.f32 %v11463_v55, %v7459_v40  ;;  %v7457_v7 = vadd.f32 %v6970_v45, %v15732_v36  ;;  %8282 = vst.msk [vmem:[%s16371_s24 + $0x28] sm:$0xff] %vm8276_vm4, %v8153_v15  ;;  %v8414_v8 = vsel %vm8276_vm4, %v8153_v15, 0.0  ;;  %v8673_v29 = vmul.f32 %v8153_v15, %v8153_v15  ;;  %v16439_v15 = vld [vmem:[%s11866_s27 + $0x2a4] sm:$0x1] }
 0x47b   : > { %v11334_v11 = vpop.f32.mrf.mxu1  ;;  %v8804_v55 = vadd.f32 %v8803_v28, %v8802_v18  ;;  %v8415_v46 = vadd.f32 %v8414_v8, %v8413_v21  ;;  %v8675_v36 = vmul.f32 %v8155_v58, %v8155_v58  ;;  %v8807_v45 = vsel %vm8276_vm4, %v8674_v37, 0.0 }
 0x47c   : > { %v11467_v3 = vpop.f32.mrf.mxu0  ;;  %11562 = vmatmul.mubr.msk.bf16.gmra.mxu0 %vm1265_vm3, %v18898_v10  ;;  %8287 = vst.msk [vmem:[%s16371_s24 + $0x50] sm:$0xff] %vm8276_vm4, %v16420_v1  ;;  %v8805_v0 = vsel %vm8276_vm4, %v8673_v29, 0.0  ;;  %v8156_v38 = vadd.f32 %v7669_v35, %v7457_v7  ;;  %v7460_v56 = vadd.f32 %v11334_v11, %v19189_v26  ;;  %v8418_v18 = vsel %vm8276_vm4, %v8155_v58, 0.0  ;;  %v19191_v7 = vld [vmem:[#allocation109_spill] sm:$0xff] }
 0x47d   : > { %11565 = vmatprep.mubr.msk.bf16.mxu0 %vm1265_vm3, %v18901_v54  ;;  %v6973_v40 = vpop.f32.mrf.mxu1  ;;  %v8417_v10 = vadd.f32 %v8416_v60, %v8415_v46  ;;  %v8806_v33 = vadd.f32 %v8805_v0, %v8804_v55  ;;  %v19192_v60 = vld [vmem:[#allocation198_spill] sm:$0xff]  ;;  %v19193_v46 = vld [vmem:[#allocation112_spill] sm:$0xff]  ;;  %v8809_v0 = vsel %vm8276_vm4, %v8675_v36, 0.0 }
 0x47e   : > { %v7685_v51 = vpop.f32.mrf.mxu0  ;;  %v7458_v16 = vadd.f32 %v6973_v40, %v19190_v48  ;;  %8285 = vst.msk [vmem:[%s16371_s24 + $0x40] sm:$0xff] %vm8276_vm4, %v8156_v38  ;;  %v8676_v54 = vmul.f32 %v8156_v38, %v8156_v38  ;;  %v8159_v35 = vadd.f32 %v11464_v34, %v7460_v56  ;;  %v11800_v58 = vld [vmem:[%s11866_s27 + $0x29c] sm:$0xff]   ;;  %v8420_v34 = vsel %vm8276_vm4, %v8156_v38, 0.0  ;;  %s212_s27 = scalar_lea.vmem %s17114_s3, %s11858_s23 }
 0x47f   : > { %v11337_v21 = vpop.f32.mrf.mxu1  ;;  %11432 = vmatmul.mubr.msk.bf16.gmra.mxu1 %vm1265_vm3, %v19191_v7  ;;  %v8419_v8 = vadd.f32 %v8418_v18, %v8417_v10  ;;  %v8808_v29 = vadd.f32 %v8807_v45, %v8806_v33  ;;  %v555_v37 = vunpack.c.h.bf16 %v11800_v58  ;;  %v556_v40 = vunpack.c.l.bf16 %v16439_v15  ;;  %v19194_v45 = vld [vmem:[#allocation4_spill] sm:$0xff] }
 0x480   : > { %v11468_v28 = vpop.f32.mrf.mxu0  ;;  %v8157_v11 = vadd.f32 %v7672_v24, %v7458_v16  ;;  %v7463_v55 = vadd.f32 %v11337_v21, %v19192_v60  ;;  %11435 = vmatprep.mubr.msk.bf16.mxu1 %vm1265_vm3, %v19193_v46  ;;  %8288 = vst.msk [vmem:[%s16371_s24 + $0x58] sm:$0xff] %vm8276_vm4, %v8159_v35  ;;  %v8678_v16 = vmul.f32 %v16420_v1, %v16420_v1  ;;  %v8811_v36 = vsel %vm8276_vm4, %v8676_v54, 0.0  ;;  %v19195_v46 = vld [vmem:[#allocation200_spill] sm:$0xff] }
 0x481   : > { %v6986_v26 = vpop.f32.mrf.mxu1  ;;  %v8810_v10 = vadd.f32 %v8809_v0, %v8808_v29  ;;  %v8421_v33 = vadd.f32 %v8420_v34, %v8419_v8  ;;  %v8679_v54 = vmul.f32 %v8159_v35, %v8159_v35 }
 0x482   : > { %v7688_v56 = vpop.f32.mrf.mxu0  ;;  %8286 = vst.msk [vmem:[%s16371_s24 + $0x48] sm:$0xff] %vm8276_vm4, %v8157_v11  ;;  %v8422_v24 = vsel %vm8276_vm4, %v8157_v11, 0.0  ;;  %v8677_v48 = vmul.f32 %v8157_v11, %v8157_v11  ;;  %v8162_v38 = vadd.f32 %v11467_v3, %v7463_v55  ;;  %v7461_v18 = vadd.f32 %v6986_v26, %v19194_v45  ;;  %v19197_v45 = vld [vmem:[#allocation116_spill] sm:$0xff] }
 0x483   : > { %v11338_v21 = vpop.f32.mrf.mxu1  ;;  %v8812_v8 = vadd.f32 %v8811_v36, %v8810_v10  ;;  %v8423_v29 = vadd.f32 %v8422_v24, %v8421_v33  ;;  %v8424_v3 = vsel %vm8276_vm4, %v16420_v1, 0.0  ;;  %v19196_v10 = vld [vmem:[#allocation24_spill] sm:$0xff]  ;;  %v16474_v24 = vrot.slane %v555_v37, 1 }
 0x484   : > { %v11471_v7 = vpop.f32.mrf.mxu0  ;;  %11566 = vmatmul.mubr.msk.bf16.gmra.mxu0 %vm1265_vm3, %v18906_v50  ;;  %v8813_v60 = vsel %vm8276_vm4, %v8677_v48, 0.0  ;;  %v7464_v11 = vadd.f32 %v11338_v21, %v19195_v46  ;;  %8291 = vst.msk [vmem:[%s16371_s24 + $0x70] sm:$0xff] %vm8276_vm4, %v8162_v38  ;;  %v8160_v55 = vadd.f32 %v7685_v51, %v7461_v18  ;;  %v8815_v48 = vsel %vm8276_vm4, %v8678_v16, 0.0 }
 0x485   : > { %11569 = vmatprep.mubr.msk.bf16.mxu0 %vm1265_vm3, %v18908_v41  ;;  %v6989_v58 = vpop.f32.mrf.mxu1  ;;  %v8425_v50 = vadd.f32 %v8424_v3, %v8423_v29  ;;  %v8814_v34 = vadd.f32 %v8813_v60, %v8812_v8  ;;  %v8426_v41 = vsel %vm8276_vm4, %v8159_v35, 0.0  ;;  %v7582_v18 = vrot.slane %v555_v37, 2  ;;  %v19198_v8 = vld [vmem:[#allocation118_spill] sm:$0xff] }
 0x486   : > { %v7701_v0 = vpop.f32.mrf.mxu0  ;;  %v8163_v26 = vadd.f32 %v11468_v28, %v7464_v11  ;;  %v7462_v33 = vadd.f32 %v6989_v58, %v19196_v10  ;;  %8289 = vst.msk [vmem:[%s16371_s24 + $0x60] sm:$0xff] %vm8276_vm4, %v8160_v55  ;;  %v8680_v1 = vmul.f32 %v8160_v55, %v8160_v55  ;;  %v16488_v35 = vrot.slane %v556_v40, 1 }
 0x487   : > { %v11341_v36 = vpop.f32.mrf.mxu1  ;;  %11436 = vmatmul.mubr.msk.bf16.gmra.mxu1 %vm1265_vm3, %v19197_v45  ;;  %v8427_v21 = vadd.f32 %v8426_v41, %v8425_v50  ;;  %v8816_v28 = vadd.f32 %v8815_v48, %v8814_v34  ;;  %v8817_v16 = vsel %vm8276_vm4, %v8679_v54, 0.0  ;;  %v8428_v29 = vsel %vm8276_vm4, %v8160_v55, 0.0  ;;  %v19199_v34 = vld [vmem:[#allocation202_spill] sm:$0xff] }
 0x488   : > { %v11472_v51 = vpop.f32.mrf.mxu0  ;;  %8292 = vst.msk [vmem:[%s16371_s24 + $0x78] sm:$0xff] %vm8276_vm4, %v8163_v26  ;;  %11439 = vmatprep.mubr.msk.bf16.mxu1 %vm1265_vm3, %v19198_v8  ;;  %v8161_v60 = vadd.f32 %v7688_v56, %v7462_v33  ;;  %v7467_v46 = vadd.f32 %v11341_v36, %v15767_v9  ;;  %v8682_v58 = vmul.f32 %v8162_v38, %v8162_v38  ;;  %v8819_v48 = vsel %vm8276_vm4, %v8680_v1, 0.0 }
 0x489   : > { %v7002_v37 = vpop.f32.mrf.mxu1  ;;  %v8818_v3 = vadd.f32 %v8817_v16, %v8816_v28  ;;  %v8429_v50 = vadd.f32 %v8428_v29, %v8427_v21  ;;  %v19200_v21 = vld [vmem:[#allocation230_spill] sm:$0xff]  ;;  %v8432_v1 = vsel %vm8276_vm4, %v8162_v38, 0.0  ;;  %v8683_v8 = vmul.f32 %v8163_v26, %v8163_v26 }
 0x48a   : > { %v7704_v11 = vpop.f32.mrf.mxu0  ;;  %v7465_v10 = vadd.f32 %v7002_v37, %v19199_v34  ;;  %8290 = vst.msk [vmem:[%s16371_s24 + $0x68] sm:$0xff] %vm8276_vm4, %v8161_v60  ;;  %v8430_v41 = vsel %vm8276_vm4, %v8161_v60, 0.0  ;;  %v8681_v54 = vmul.f32 %v8161_v60, %v8161_v60  ;;  %v8166_v45 = vadd.f32 %v11471_v7, %v7467_v46 }
 0x48b   : > { %v11342_v55 = vpop.f32.mrf.mxu1  ;;  %v8820_v9 = vadd.f32 %v8819_v48, %v8818_v3  ;;  %v8431_v33 = vadd.f32 %v8430_v41, %v8429_v50  ;;  %v8823_v60 = vsel %vm8276_vm4, %v8682_v58, 0.0  ;;  %v8434_v38 = vsel %vm8276_vm4, %v8163_v26, 0.0  ;;  %v19201_v50 = vld [vmem:[#allocation7_spill] sm:$0xff]  ;;  %v19203_v41 = vld [vmem:[#allocation205_spill] sm:$0xff] }
 0x48c   : > { %v11475_v56 = vpop.f32.mrf.mxu0  ;;  %11570 = vmatmul.mubr.msk.bf16.gmra.mxu0 %vm1265_vm3, %v18914_v12  ;;  %v8164_v36 = vadd.f32 %v7701_v0, %v7465_v10  ;;  %v7468_v28 = vadd.f32 %v11342_v55, %v19200_v21  ;;  %v8821_v16 = vsel %vm8276_vm4, %v8681_v54, 0.0  ;;  %8295 = vst.msk [vmem:[%s16371_s24 + $0x90] sm:$0xff] %vm8276_vm4, %v8166_v45  ;;  %v7584_v12 = vrot.slane %v556_v40, 2  ;;  %v19202_v40 = vld [vmem:[#allocation120_spill] sm:$0xff]  ;;  %v19204_v55 = vld [vmem:[#allocation275_spill] sm:$0xff] }
 0x48d   : > { %11573 = vmatprep.mubr.msk.bf16.mxu0 %vm1265_vm3, %v15495_v31  ;;  %v7005_v7 = vpop.f32.mrf.mxu1  ;;  %v8433_v0 = vadd.f32 %v8432_v1, %v8431_v33  ;;  %v8822_v46 = vadd.f32 %v8821_v16, %v8820_v9  ;;  %v16515_v31 = vsel %vm782_vm1, %v16148_v49, %v16474_v24  ;;  %v16526_v49 = vsel %vm2747_vm2, %v16150_v52, %v7582_v18 }
 0x48e   : > { %v7717_v29 = vpop.f32.mrf.mxu0  ;;  %8293 = vst.msk [vmem:[%s16371_s24 + $0x80] sm:$0xff] %vm8276_vm4, %v8164_v36  ;;  %v8684_v37 = vmul.f32 %v8164_v36, %v8164_v36  ;;  %v8167_v3 = vadd.f32 %v11472_v51, %v7468_v28  ;;  %v7466_v34 = vadd.f32 %v7005_v7, %v19201_v50  ;;  %v8825_v26 = vsel %vm8276_vm4, %v8683_v8, 0.0 }
 0x48f   : > { %v11345_v15 = vpop.f32.mrf.mxu1  ;;  %11440 = vmatmul.mubr.msk.bf16.gmra.mxu1 %vm1265_vm3, %v19202_v40  ;;  %v8435_v10 = vadd.f32 %v8434_v38, %v8433_v0  ;;  %v8824_v48 = vadd.f32 %v8823_v60, %v8822_v46  ;;  %v8436_v51 = vsel %vm8276_vm4, %v8164_v36, 0.0  ;;  %v7585_v28 = vsel %vm2747_vm2, %v7582_v18, %v7584_v12 }
 0x490   : > { %v11476_v58 = vpop.f32.mrf.mxu0  ;;  %v7471_v54 = vadd.f32 %v11345_v15, %v19203_v41  ;;  %11443 = vmatprep.mubr.msk.bf16.mxu1 %vm1265_vm3, %v19204_v55  ;;  %8296 = vst.msk [vmem:[%s16371_s24 + $0x98] sm:$0xff] %vm8276_vm4, %v8167_v3  ;;  %v8165_v9 = vadd.f32 %v7704_v11, %v7466_v34  ;;  %v8686_v0 = vmul.f32 %v8166_v45, %v8166_v45  ;;  %v8827_v52 = vsel %vm8276_vm4, %v8684_v37, 0.0  ;;  %v19206_v34 = vld [vmem:[#allocation207_spill] sm:$0xff] }
 0x491   : > { %v7018_v33 = vpop.f32.mrf.mxu1  ;;  %v8826_v1 = vadd.f32 %v8825_v26, %v8824_v48  ;;  %v8437_v16 = vadd.f32 %v8436_v51, %v8435_v10  ;;  %v8440_v18 = vsel %vm8276_vm4, %v8166_v45, 0.0  ;;  %v8687_v37 = vmul.f32 %v8167_v3, %v8167_v3  ;;  %v19207_v55 = vld [vmem:[#allocation183_spill] sm:$0xff] }
 0x492   : > { %v7720_v21 = vpop.f32.mrf.mxu0  ;;  %v8170_v7 = vadd.f32 %v11475_v56, %v7471_v54  ;;  %v7469_v60 = vadd.f32 %v7018_v33, %v15797_v61  ;;  %8294 = vst.msk [vmem:[%s16371_s24 + $0x88] sm:$0xff] %vm8276_vm4, %v8165_v9  ;;  %v8438_v36 = vsel %vm8276_vm4, %v8165_v9, 0.0  ;;  %v8685_v8 = vmul.f32 %v8165_v9, %v8165_v9 }
 0x493   : > { %v11346_v46 = vpop.f32.mrf.mxu1  ;;  %v8828_v12 = vadd.f32 %v8827_v52, %v8826_v1  ;;  %v8439_v38 = vadd.f32 %v8438_v36, %v8437_v16  ;;  %v19205_v61 = vpack.c.bf16 %v16173_v2, %v16169_v63  ;;  %v6886_v56 = vsel %vm782_vm1, %v16474_v24, %v16488_v35 }
 0x494   : > { %v11479_v11 = vpop.f32.mrf.mxu0  ;;  %11574 = vmatmul.mubr.msk.bf16.gmra.mxu0 %vm1265_vm3, %v15823_v20  ;;  %8299 = vst.msk [vmem:[%s16371_s24 + $0xb0] sm:$0xff] %vm8276_vm4, %v8170_v7  ;;  %v8829_v50 = vsel %vm8276_vm4, %v8685_v8, 0.0  ;;  %v8168_v20 = vadd.f32 %v7717_v29, %v7469_v60  ;;  %v7472_v45 = vadd.f32 %v11346_v46, %v19206_v34  ;;  %v7591_v63 = vpack.c.bf16 %v7585_v28, %v16526_v49 }
 0x495   : > { %11577 = vmatprep.mubr.msk.bf16.mxu0 %vm1265_vm3, %v19205_v61  ;;  %v7021_v15 = vpop.f32.mrf.mxu1  ;;  %v8441_v10 = vadd.f32 %v8440_v18, %v8439_v38  ;;  %v8830_v48 = vadd.f32 %v8829_v50, %v8828_v12  ;;  %v8831_v2 = vsel %vm8276_vm4, %v8686_v0, 0.0  ;;  %v8442_v54 = vsel %vm8276_vm4, %v8167_v3, 0.0 }
 0x496   : > { %v7733_v40 = vpop.f32.mrf.mxu0  ;;  %v7470_v41 = vadd.f32 %v7021_v15, %v15812_v14  ;;  %8297 = vst.msk [vmem:[%s16371_s24 + $0xa0] sm:$0xff] %vm8276_vm4, %v8168_v20  ;;  %v8688_v24 = vmul.f32 %v8168_v20, %v8168_v20  ;;  %v8171_v35 = vadd.f32 %v11476_v58, %v7472_v45  ;;  %v19208_v33 = vpack.c.bf16 %v16164_v59, %v16160_v30 }
 0x497   : > { %v11349_v29 = vpop.f32.mrf.mxu1  ;;  %11444 = vmatmul.mubr.msk.bf16.gmra.mxu1 %vm1265_vm3, %v19207_v55  ;;  %v8443_v51 = vadd.f32 %v8442_v54, %v8441_v10  ;;  %v8832_v9 = vadd.f32 %v8831_v2, %v8830_v48  ;;  %v8833_v3 = vsel %vm8276_vm4, %v8687_v37, 0.0  ;;  %v8444_v58 = vsel %vm8276_vm4, %v8168_v20, 0.0 }
 0x498   : > { %v11480_v26 = vpop.f32.mrf.mxu0  ;;  %v8169_v14 = vadd.f32 %v7720_v21, %v7470_v41  ;;  %v7475_v49 = vadd.f32 %v11349_v29, %v15820_v32  ;;  %11447 = vmatprep.mubr.msk.bf16.mxu1 %vm1265_vm3, %v19208_v33  ;;  %8300 = vst.msk [vmem:[%s16371_s24 + $0xb8] sm:$0xff] %vm8276_vm4, %v8171_v35  ;;  %v6892_v16 = vpack.c.bf16 %v6886_v56, %v16515_v31  ;;  %v8835_v21 = vsel %vm8276_vm4, %v8688_v24, 0.0 }
 0x499   : > { %v7034_v28 = vpop.f32.mrf.mxu1  ;;  %v8834_v60 = vadd.f32 %v8833_v3, %v8832_v9  ;;  %v8445_v0 = vadd.f32 %v8444_v58, %v8443_v51  ;;  %v8690_v59 = vmul.f32 %v8170_v7, %v8170_v7  ;;  %v8448_v61 = vsel %vm8276_vm4, %v8170_v7, 0.0 }
 0x49a   : > { %v7736_v1 = vpop.f32.mrf.mxu0  ;;  %8298 = vst.msk [vmem:[%s16371_s24 + $0xa8] sm:$0xff] %vm8276_vm4, %v8169_v14  ;;  %v8446_v32 = vsel %vm8276_vm4, %v8169_v14, 0.0  ;;  %v8689_v30 = vmul.f32 %v8169_v14, %v8169_v14  ;;  %v8174_v52 = vadd.f32 %v11479_v11, %v7475_v49  ;;  %v7473_v36 = vadd.f32 %v7034_v28, %v15827_v27 }
 0x49b   : > { %v11350_v8 = vpop.f32.mrf.mxu1  ;;  %v8836_v18 = vadd.f32 %v8835_v21, %v8834_v60  ;;  %v8447_v31 = vadd.f32 %v8446_v32, %v8445_v0  ;;  %v8691_v56 = vmul.f32 %v8171_v35, %v8171_v35  ;;  %v8839_v15 = vsel %vm8276_vm4, %v8690_v59, 0.0 }
 0x49c   : > { %v11483_v46 = vpop.f32.mrf.mxu0  ;;  %11578 = vmatmul.mubr.msk.bf16.gmra.mxu0 %vm1265_vm3, %v7591_v63  ;;  %v8837_v12 = vsel %vm8276_vm4, %v8689_v30, 0.0  ;;  %v7476_v38 = vadd.f32 %v11350_v8, %v15832_v4  ;;  %8303 = vst.msk [vmem:[%s16371_s24 + $0xd0] sm:$0xff] %vm8276_vm4, %v8174_v52  ;;  %v8172_v37 = vadd.f32 %v7733_v40, %v7473_v36  ;;  %v8450_v10 = vsel %vm8276_vm4, %v8171_v35, 0.0 }
 0x49d   : > { %v7037_v11 = vpop.f32.mrf.mxu1  ;;  %v8449_v50 = vadd.f32 %v8448_v61, %v8447_v31  ;;  %v8838_v20 = vadd.f32 %v8837_v12, %v8836_v18  ;;  %v8841_v63 = vsel %vm8276_vm4, %v8691_v56, 0.0  ;;  %v8694_v55 = vmul.f32 %v8174_v52, %v8174_v52  ;;  %v19209_v18 = vld [vmem:[#allocation32_spill] sm:$0xff]  ;;  %v19210_v56 = vld [vmem:[#allocation209_spill] sm:$0xff] }
 0x49e   : > { %v7749_v27 = vpop.f32.mrf.mxu0  ;;  %v8175_v34 = vadd.f32 %v11480_v26, %v7476_v38  ;;  %v7474_v45 = vadd.f32 %v7037_v11, %v15837_v62  ;;  %8301 = vst.msk [vmem:[%s16371_s24 + $0xc0] sm:$0xff] %vm8276_vm4, %v8172_v37  ;;  %v8692_v4 = vmul.f32 %v8172_v37, %v8172_v37  ;;  %v8452_v62 = vsel %vm8276_vm4, %v8172_v37, 0.0 }
 0x49f   : > { %v11353_v7 = vpop.f32.mrf.mxu1  ;;  %11448 = vmatmul.mubr.msk.bf16.gmra.mxu1 %vm1265_vm3, %v6892_v16  ;;  %v8451_v48 = vadd.f32 %v8450_v10, %v8449_v50  ;;  %v8840_v41 = vadd.f32 %v8839_v15, %v8838_v20  ;;  %v8456_v60 = vsel %vm8276_vm4, %v8174_v52, 0.0  ;;  %v8847_v59 = vsel %vm8276_vm4, %v8694_v55, 0.0 }
 0x4a0   : > { %v11484_v40 = vpop.f32.mrf.mxu0  ;;  %8304 = vst.msk [vmem:[%s16371_s24 + $0xd8] sm:$0xff] %vm8276_vm4, %v8175_v34  ;;  %v8173_v2 = vadd.f32 %v7736_v1, %v7474_v45  ;;  %v7479_v54 = vadd.f32 %v11353_v7, %v15842_v23  ;;  %v8843_v9 = vsel %vm8276_vm4, %v8692_v4, 0.0  ;;  %v8695_v0 = vmul.f32 %v8175_v34, %v8175_v34  ;;  %v19211_v4 = vld [vmem:[#allocation237_spill] sm:$0xff] }
 0x4a1   : > { %v7050_v24 = vpop.f32.mrf.mxu1  ;;  %v8842_v29 = vadd.f32 %v8841_v63, %v8840_v41  ;;  %v8453_v26 = vadd.f32 %v8452_v62, %v8451_v48  ;;  %v8458_v8 = vsel %vm8276_vm4, %v8175_v34, 0.0 }
 0x4a2   : > { %v7752_v35 = vpop.f32.mrf.mxu0  ;;  %v7477_v51 = vadd.f32 %v7050_v24, %v15847_v17  ;;  %8302 = vst.msk [vmem:[%s16371_s24 + $0xc8] sm:$0xff] %vm8276_vm4, %v8173_v2  ;;  %v8454_v14 = vsel %vm8276_vm4, %v8173_v2, 0.0  ;;  %v8693_v49 = vmul.f32 %v8173_v2, %v8173_v2  ;;  %v8178_v33 = vadd.f32 %v11483_v46, %v7479_v54 }
 0x4a3   : > { %v11354_v3 = vpop.f32.mrf.mxu1  ;;  %v8844_v23 = vadd.f32 %v8843_v9, %v8842_v29  ;;  %v8455_v28 = vadd.f32 %v8454_v14, %v8453_v26  ;;  %v8849_v11 = vsel %vm8276_vm4, %v8695_v0, 0.0 }
 0x4a4   : > { %v11487_v58 = vpop.f32.mrf.mxu0  ;;  %v8176_v1 = vadd.f32 %v7749_v27, %v7477_v51  ;;  %v7480_v16 = vadd.f32 %v11354_v3, %v15852_v6  ;;  %v8845_v17 = vsel %vm8276_vm4, %v8693_v49, 0.0  ;;  %8307 = vst.msk [vmem:[%s16371_s24 + $0xf0] sm:$0xff] %vm8276_vm4, %v8178_v33  ;;  %v8464_v54 = vsel %vm8276_vm4, %v8178_v33, 0.0  ;;  %v19212_v51 = vld [vmem:[#allocation12_spill] sm:$0xff] }
 0x4a5   : > { %v7053_v32 = vpop.f32.mrf.mxu1  ;;  %v8457_v21 = vadd.f32 %v8456_v60, %v8455_v28  ;;  %v8846_v36 = vadd.f32 %v8845_v17, %v8844_v23  ;;  %v19213_v23 = vld [vmem:[#allocation214_spill] sm:$0xff] }
 0x4a6   : > { %v7765_v30 = vpop.f32.mrf.mxu0  ;;  %8305 = vst.msk [vmem:[%s16371_s24 + $0xe0] sm:$0xff] %vm8276_vm4, %v8176_v1  ;;  %v8696_v46 = vmul.f32 %v8176_v1, %v8176_v1  ;;  %v8179_v6 = vadd.f32 %v11484_v40, %v7480_v16  ;;  %v7478_v52 = vadd.f32 %v7053_v32, %v19209_v18  ;;  %v8460_v27 = vsel %vm8276_vm4, %v8176_v1, 0.0 }
 0x4a7   : > { %v11357_v31 = vpop.f32.mrf.mxu1  ;;  %v8459_v38 = vadd.f32 %v8458_v8, %v8457_v21  ;;  %v8848_v61 = vadd.f32 %v8847_v59, %v8846_v36  ;;  %v8698_v40 = vmul.f32 %v8178_v33, %v8178_v33  ;;  %v19214_v21 = vld [vmem:[#allocation217_spill] sm:$0xff] }
 0x4a8   : > { %v11488_v12 = vpop.f32.mrf.mxu0  ;;  %v7483_v37 = vadd.f32 %v11357_v31, %v19210_v56  ;;  %8308 = vst.msk [vmem:[%s16371_s24 + $0xf8] sm:$0xff] %vm8276_vm4, %v8179_v6  ;;  %v8177_v50 = vadd.f32 %v7752_v35, %v7478_v52  ;;  %v8851_v48 = vsel %vm8276_vm4, %v8696_v46, 0.0  ;;  %v8699_v29 = vmul.f32 %v8179_v6, %v8179_v6 }
 0x4a9   : > { %v7066_v20 = vpop.f32.mrf.mxu1  ;;  %v8850_v45 = vadd.f32 %v8849_v11, %v8848_v61  ;;  %v8461_v15 = vadd.f32 %v8460_v27, %v8459_v38  ;;  %v8855_v1 = vsel %vm8276_vm4, %v8698_v40, 0.0  ;;  %v8466_v33 = vsel %vm8276_vm4, %v8179_v6, 0.0  ;;  %v19215_v11 = vld [vmem:[#allocation242_spill] sm:$0xff] }
 0x4aa   : > { %v7768_v34 = vpop.f32.mrf.mxu0  ;;  %v8182_v10 = vadd.f32 %v11487_v58, %v7483_v37  ;;  %v7481_v7 = vadd.f32 %v7066_v20, %v19211_v4  ;;  %8306 = vst.msk [vmem:[%s16371_s24 + $0xe8] sm:$0xff] %vm8276_vm4, %v8177_v50  ;;  %v8462_v41 = vsel %vm8276_vm4, %v8177_v50, 0.0  ;;  %v8697_v63 = vmul.f32 %v8177_v50, %v8177_v50  ;;  %v19216_v4 = vld [vmem:[#allocation219_spill] sm:$0xff] }
 0x4ab   : > { %v11358_v62 = vpop.f32.mrf.mxu1  ;;  %v8852_v24 = vadd.f32 %v8851_v48, %v8850_v45  ;;  %v8463_v35 = vadd.f32 %v8462_v41, %v8461_v15  ;;  %v8857_v8 = vsel %vm8276_vm4, %v8699_v29, 0.0 }
 0x4ac   : > { %v11491_v2 = vpop.f32.mrf.mxu0  ;;  %8311 = vst.msk [vmem:[%s16371_s24 + $0x110] sm:$0xff] %vm8276_vm4, %v8182_v10  ;;  %v8853_v55 = vsel %vm8276_vm4, %v8697_v63, 0.0  ;;  %v8180_v26 = vadd.f32 %v7765_v30, %v7481_v7  ;;  %v7484_v9 = vadd.f32 %v11358_v62, %v19212_v51  ;;  %v8702_v61 = vmul.f32 %v8182_v10, %v8182_v10 }
 0x4ad   : > { %v7069_v14 = vpop.f32.mrf.mxu1  ;;  %v8465_v3 = vadd.f32 %v8464_v54, %v8463_v35  ;;  %v8854_v58 = vadd.f32 %v8853_v55, %v8852_v24  ;;  %v8472_v40 = vsel %vm8276_vm4, %v8182_v10, 0.0  ;;  %v19217_v35 = vld [vmem:[#allocation243_spill] sm:$0xff] }
 0x4ae   : > { %v7781_v49 = vpop.f32.mrf.mxu0  ;;  %v7482_v28 = vadd.f32 %v7069_v14, %v19213_v23  ;;  %8309 = vst.msk [vmem:[%s16371_s24 + $0x100] sm:$0xff] %vm8276_vm4, %v8180_v26  ;;  %v8700_v16 = vmul.f32 %v8180_v26, %v8180_v26  ;;  %v8183_v60 = vadd.f32 %v11488_v12, %v7484_v9  ;;  %v8468_v46 = vsel %vm8276_vm4, %v8180_v26, 0.0 }
 0x4af   : > { %v11361_v0 = vpop.f32.mrf.mxu1  ;;  %v8467_v32 = vadd.f32 %v8466_v33, %v8465_v3  ;;  %v8856_v30 = vadd.f32 %v8855_v1, %v8854_v58  ;;  %v8863_v55 = vsel %vm8276_vm4, %v8702_v61, 0.0 }
 0x4b0   : > { %v11492_v17 = vpop.f32.mrf.mxu0  ;;  %v8181_v59 = vadd.f32 %v7768_v34, %v7482_v28  ;;  %v7487_v36 = vadd.f32 %v11361_v0, %v19214_v21  ;;  %8312 = vst.msk [vmem:[%s16371_s24 + $0x118] sm:$0xff] %vm8276_vm4, %v8183_v60  ;;  %v8859_v56 = vsel %vm8276_vm4, %v8700_v16, 0.0  ;;  %v8703_v48 = vmul.f32 %v8183_v60, %v8183_v60  ;;  %v19218_v28 = vld [vmem:[#allocation220_spill] sm:$0xff] }
 0x4b1   : > { %v7082_v18 = vpop.f32.mrf.mxu1  ;;  %v8858_v52 = vadd.f32 %v8857_v8, %v8856_v30  ;;  %v8469_v31 = vadd.f32 %v8468_v46, %v8467_v32  ;;  %v8474_v26 = vsel %vm8276_vm4, %v8183_v60, 0.0  ;;  %v19219_v32 = vld [vmem:[#allocation223_spill] sm:$0xff] }
 0x4b2   : > { %v7784_v6 = vpop.f32.mrf.mxu0  ;;  %8310 = vst.msk [vmem:[%s16371_s24 + $0x108] sm:$0xff] %vm8276_vm4, %v8181_v59  ;;  %v8470_v12 = vsel %vm8276_vm4, %v8181_v59, 0.0  ;;  %v8701_v38 = vmul.f32 %v8181_v59, %v8181_v59  ;;  %v8186_v37 = vadd.f32 %v11491_v2, %v7487_v36  ;;  %v7485_v27 = vadd.f32 %v7082_v18, %v19215_v11 }
 0x4b3   : > { %v11362_v50 = vpop.f32.mrf.mxu1  ;;  %v8860_v34 = vadd.f32 %v8859_v56, %v8858_v52  ;;  %v8471_v45 = vadd.f32 %v8470_v12, %v8469_v31  ;;  %v19220_v12 = vld [vmem:[#allocation225_spill] sm:$0xff] }
 0x4b4   : > { %v11495_v20 = vpop.f32.mrf.mxu0  ;;  %v8861_v15 = vsel %vm8276_vm4, %v8701_v38, 0.0  ;;  %v7488_v7 = vadd.f32 %v11362_v50, %v19216_v4  ;;  %8315 = vst.msk [vmem:[%s16371_s24 + $0x130] sm:$0xff] %vm8276_vm4, %v8186_v37  ;;  %v8184_v41 = vadd.f32 %v7781_v49, %v7485_v27  ;;  %v8865_v49 = vsel %vm8276_vm4, %v8703_v48, 0.0 }
 0x4b5   : > { %v7085_v63 = vpop.f32.mrf.mxu1  ;;  %v8473_v2 = vadd.f32 %v8472_v40, %v8471_v45  ;;  %v8862_v54 = vadd.f32 %v8861_v15, %v8860_v34  ;;  %v8706_v0 = vmul.f32 %v8186_v37, %v8186_v37  ;;  %v8480_v61 = vsel %vm8276_vm4, %v8186_v37, 0.0  ;;  %v19221_v40 = vld [vmem:[#allocation251_spill] sm:$0xff] }
 0x4b6   : > { %v7797_v62 = vpop.f32.mrf.mxu0  ;;  %v8187_v24 = vadd.f32 %v11492_v17, %v7488_v7  ;;  %v7486_v29 = vadd.f32 %v7085_v63, %v19217_v35  ;;  %8313 = vst.msk [vmem:[%s16371_s24 + $0x120] sm:$0xff] %vm8276_vm4, %v8184_v41  ;;  %v8704_v51 = vmul.f32 %v8184_v41, %v8184_v41  ;;  %v8476_v58 = vsel %vm8276_vm4, %v8184_v41, 0.0 }
 0x4b7   : > { %v11365_v10 = vpop.f32.mrf.mxu1  ;;  %v8475_v14 = vadd.f32 %v8474_v26, %v8473_v2  ;;  %v8864_v3 = vadd.f32 %v8863_v55, %v8862_v54  ;;  %v19222_v2 = vld [vmem:[#allocation227_spill] sm:$0xff] }
 0x4b8   : > { %v11496_v9 = vpop.f32.mrf.mxu0  ;;  %8316 = vst.msk [vmem:[%s16371_s24 + $0x138] sm:$0xff] %vm8276_vm4, %v8187_v24  ;;  %v8185_v23 = vadd.f32 %v7784_v6, %v7486_v29  ;;  %v7491_v1 = vadd.f32 %v11365_v10, %v19218_v28  ;;  %v8867_v59 = vsel %vm8276_vm4, %v8704_v51, 0.0  ;;  %v8707_v56 = vmul.f32 %v8187_v24, %v8187_v24 }
 0x4b9   : > { %v7098_v33 = vpop.f32.mrf.mxu1  ;;  %v8866_v60 = vadd.f32 %v8865_v49, %v8864_v3  ;;  %v8477_v17 = vadd.f32 %v8476_v58, %v8475_v14  ;;  %v8482_v15 = vsel %vm8276_vm4, %v8187_v24, 0.0  ;;  %v19223_v14 = vld [vmem:[#allocation252_spill] sm:$0xff] }
 0x4ba   : > { %v7800_v16 = vpop.f32.mrf.mxu0  ;;  %v7489_v30 = vadd.f32 %v7098_v33, %v19219_v32  ;;  %8314 = vst.msk [vmem:[%s16371_s24 + $0x128] sm:$0xff] %vm8276_vm4, %v8185_v23  ;;  %v8478_v21 = vsel %vm8276_vm4, %v8185_v23, 0.0  ;;  %v8705_v36 = vmul.f32 %v8185_v23, %v8185_v23  ;;  %v8190_v8 = vadd.f32 %v11495_v20, %v7491_v1 }
 0x4bb   : > { %v11366_v46 = vpop.f32.mrf.mxu1  ;;  %v8868_v6 = vadd.f32 %v8867_v59, %v8866_v60  ;;  %v8479_v52 = vadd.f32 %v8478_v21, %v8477_v17  ;;  %v8871_v20 = vsel %vm8276_vm4, %v8706_v0, 0.0  ;;  %v8873_v35 = vsel %vm8276_vm4, %v8707_v56, 0.0  ;;  %v19224_v59 = vld [vmem:[#allocation228_spill] sm:$0xff] }
 0x4bc   : > { %v11499_v18 = vpop.f32.mrf.mxu0  ;;  %v8188_v31 = vadd.f32 %v7797_v62, %v7489_v30  ;;  %v7492_v38 = vadd.f32 %v11366_v46, %v19220_v12  ;;  %v8869_v11 = vsel %vm8276_vm4, %v8705_v36, 0.0  ;;  %8319 = vst.msk [vmem:[%s16371_s24 + $0x150] sm:$0xff] %vm8276_vm4, %v8190_v8  ;;  %v8710_v49 = vmul.f32 %v8190_v8, %v8190_v8 }
 0x4bd   : > { %v7101_v27 = vpop.f32.mrf.mxu1  ;;  %v8481_v34 = vadd.f32 %v8480_v61, %v8479_v52  ;;  %v8870_v45 = vadd.f32 %v8869_v11, %v8868_v6  ;;  %v19225_v52 = vld [vmem:[#allocation231_spill] sm:$0xff] }
 0x4be   : > { %v7813_v50 = vpop.f32.mrf.mxu0  ;;  %8317 = vst.msk [vmem:[%s16371_s24 + $0x140] sm:$0xff] %vm8276_vm4, %v8188_v31  ;;  %v8708_v4 = vmul.f32 %v8188_v31, %v8188_v31  ;;  %v8191_v7 = vadd.f32 %v11496_v9, %v7492_v38  ;;  %v7490_v37 = vadd.f32 %v7101_v27, %v19221_v40  ;;  %v8484_v29 = vsel %vm8276_vm4, %v8188_v31, 0.0 }
 0x4bf   : > { %v11369_v48 = vpop.f32.mrf.mxu1  ;;  %v8483_v63 = vadd.f32 %v8482_v15, %v8481_v34  ;;  %v8872_v62 = vadd.f32 %v8871_v20, %v8870_v45  ;;  %v8879_v12 = vsel %vm8276_vm4, %v8710_v49, 0.0  ;;  %v19226_v34 = vld [vmem:[#allocation233_spill] sm:$0xff] }
 0x4c0   : > { %v11500_v41 = vpop.f32.mrf.mxu0  ;;  %v7495_v54 = vadd.f32 %v11369_v48, %v19222_v2  ;;  %8320 = vst.msk [vmem:[%s16371_s24 + $0x158] sm:$0xff] %vm8276_vm4, %v8191_v7  ;;  %v8189_v55 = vadd.f32 %v7800_v16, %v7490_v37  ;;  %v8875_v58 = vsel %vm8276_vm4, %v8708_v4, 0.0  ;;  %v8488_v16 = vsel %vm8276_vm4, %v8190_v8, 0.0 }
 0x4c1   : > { %v7114_v26 = vpop.f32.mrf.mxu1  ;;  %v8874_v51 = vadd.f32 %v8873_v35, %v8872_v62  ;;  %v8485_v10 = vadd.f32 %v8484_v29, %v8483_v63  ;;  %v8711_v17 = vmul.f32 %v8191_v7, %v8191_v7  ;;  %v8490_v8 = vsel %vm8276_vm4, %v8191_v7, 0.0  ;;  %v19227_v35 = vld [vmem:[#allocation261_spill] sm:$0xff] }
 0x4c2   : > { %v7816_v24 = vpop.f32.mrf.mxu0  ;;  %v8194_v9 = vadd.f32 %v11499_v18, %v7495_v54  ;;  %v7493_v3 = vadd.f32 %v7114_v26, %v19223_v14  ;;  %8318 = vst.msk [vmem:[%s16371_s24 + $0x148] sm:$0xff] %vm8276_vm4, %v8189_v55  ;;  %v8486_v23 = vsel %vm8276_vm4, %v8189_v55, 0.0  ;;  %v8709_v28 = vmul.f32 %v8189_v55, %v8189_v55  ;;  %v19228_v14 = vld [vmem:[#allocation235_spill] sm:$0xff] }
 0x4c3   : > { %v11370_v1 = vpop.f32.mrf.mxu1  ;;  %v8876_v60 = vadd.f32 %v8875_v58, %v8874_v51  ;;  %v8487_v0 = vadd.f32 %v8486_v23, %v8485_v10  ;;  %v8881_v15 = vsel %vm8276_vm4, %v8711_v17, 0.0 }
 0x4c4   : > { %v11503_v33 = vpop.f32.mrf.mxu0  ;;  %8323 = vst.msk [vmem:[%s16371_s24 + $0x170] sm:$0xff] %vm8276_vm4, %v8194_v9  ;;  %v8877_v32 = vsel %vm8276_vm4, %v8709_v28, 0.0  ;;  %v8192_v30 = vadd.f32 %v7813_v50, %v7493_v3  ;;  %v7496_v21 = vadd.f32 %v11370_v1, %v19224_v59  ;;  %v8714_v62 = vmul.f32 %v8194_v9, %v8194_v9 }
 0x4c5   : > { %v7117_v36 = vpop.f32.mrf.mxu1  ;;  %v8489_v18 = vadd.f32 %v8488_v16, %v8487_v0  ;;  %v8878_v6 = vadd.f32 %v8877_v32, %v8876_v60  ;;  %v8496_v49 = vsel %vm8276_vm4, %v8194_v9, 0.0  ;;  %v19229_v0 = vld [vmem:[#allocation262_spill] sm:$0xff] }
 0x4c6   : > { %v7829_v46 = vpop.f32.mrf.mxu0  ;;  %v7494_v31 = vadd.f32 %v7117_v36, %v19225_v52  ;;  %8321 = vst.msk [vmem:[%s16371_s24 + $0x160] sm:$0xff] %vm8276_vm4, %v8192_v30  ;;  %v8712_v38 = vmul.f32 %v8192_v30, %v8192_v30  ;;  %v8195_v61 = vadd.f32 %v11500_v41, %v7496_v21  ;;  %v8492_v4 = vsel %vm8276_vm4, %v8192_v30, 0.0 }
 0x4c7   : > { %v11373_v56 = vpop.f32.mrf.mxu1  ;;  %v8491_v27 = vadd.f32 %v8490_v8, %v8489_v18  ;;  %v8880_v50 = vadd.f32 %v8879_v12, %v8878_v6  ;;  %v8887_v32 = vsel %vm8276_vm4, %v8714_v62, 0.0 }
 0x4c8   : > { %v11504_v11 = vpop.f32.mrf.mxu0  ;;  %v8193_v20 = vadd.f32 %v7816_v24, %v7494_v31  ;;  %v7499_v45 = vadd.f32 %v11373_v56, %v19226_v34  ;;  %8324 = vst.msk [vmem:[%s16371_s24 + $0x178] sm:$0xff] %vm8276_vm4, %v8195_v61  ;;  %v8883_v2 = vsel %vm8276_vm4, %v8712_v38, 0.0  ;;  %v8715_v58 = vmul.f32 %v8195_v61, %v8195_v61  ;;  %v19230_v31 = vld [vmem:[#allocation238_spill] sm:$0xff] }
 0x4c9   : > { %v7130_v40 = vpop.f32.mrf.mxu1  ;;  %v8882_v37 = vadd.f32 %v8881_v15, %v8880_v50  ;;  %v8493_v48 = vadd.f32 %v8492_v4, %v8491_v27  ;;  %v8498_v30 = vsel %vm8276_vm4, %v8195_v61, 0.0  ;;  %v19231_v27 = vld [vmem:[#allocation50_spill] sm:$0xff] }
 0x4ca   : > { %v7832_v7 = vpop.f32.mrf.mxu0  ;;  %8322 = vst.msk [vmem:[%s16371_s24 + $0x168] sm:$0xff] %vm8276_vm4, %v8193_v20  ;;  %v8494_v41 = vsel %vm8276_vm4, %v8193_v20, 0.0  ;;  %v8713_v63 = vmul.f32 %v8193_v20, %v8193_v20  ;;  %v8198_v54 = vadd.f32 %v11503_v33, %v7499_v45  ;;  %v7497_v29 = vadd.f32 %v7130_v40, %v19227_v35 }
 0x4cb   : > { %v11374_v55 = vpop.f32.mrf.mxu1  ;;  %v8884_v24 = vadd.f32 %v8883_v2, %v8882_v37  ;;  %v8495_v51 = vadd.f32 %v8494_v41, %v8493_v48  ;;  %v19232_v41 = vld [vmem:[#allocation240_spill] sm:$0xff] }
 0x4cc   : > { %v11507_v26 = vpop.f32.mrf.mxu0  ;;  %v8885_v10 = vsel %vm8276_vm4, %v8713_v63, 0.0  ;;  %v7500_v3 = vadd.f32 %v11374_v55, %v19228_v14  ;;  %8327 = vst.msk [vmem:[%s16371_s24 + $0x190] sm:$0xff] %vm8276_vm4, %v8198_v54  ;;  %v8196_v23 = vadd.f32 %v7829_v46, %v7497_v29  ;;  %v8889_v46 = vsel %vm8276_vm4, %v8715_v58, 0.0 }
 0x4cd   : > { %v7133_v28 = vpop.f32.mrf.mxu1  ;;  %v8497_v33 = vadd.f32 %v8496_v49, %v8495_v51  ;;  %v8886_v16 = vadd.f32 %v8885_v10, %v8884_v24  ;;  %v8718_v56 = vmul.f32 %v8198_v54, %v8198_v54  ;;  %v8504_v62 = vsel %vm8276_vm4, %v8198_v54, 0.0  ;;  %v19233_v49 = vld [vmem:[#allocation248_spill] sm:$0xff] }
 0x4ce   : > { %v7845_v1 = vpop.f32.mrf.mxu0  ;;  %v8199_v60 = vadd.f32 %v11504_v11, %v7500_v3  ;;  %v7498_v17 = vadd.f32 %v7133_v28, %v19229_v0  ;;  %8325 = vst.msk [vmem:[%s16371_s24 + $0x180] sm:$0xff] %vm8276_vm4, %v8196_v23  ;;  %v8716_v59 = vmul.f32 %v8196_v23, %v8196_v23  ;;  %v8500_v6 = vsel %vm8276_vm4, %v8196_v23, 0.0 }
 0x4cf   : > { %v11377_v9 = vpop.f32.mrf.mxu1  ;;  %v8499_v36 = vadd.f32 %v8498_v30, %v8497_v33  ;;  %v8888_v18 = vadd.f32 %v8887_v32, %v8886_v16  ;;  %v19234_v33 = vld [vmem:[#allocation38_spill] sm:$0xff] }
 0x4d0   : > { %v11508_v21 = vpop.f32.mrf.mxu0  ;;  %8328 = vst.msk [vmem:[%s16371_s24 + $0x198] sm:$0xff] %vm8276_vm4, %v8199_v60  ;;  %v8197_v52 = vadd.f32 %v7832_v7, %v7498_v17  ;;  %v7503_v12 = vadd.f32 %v11377_v9, %v19230_v31  ;;  %v8891_v20 = vsel %vm8276_vm4, %v8716_v59, 0.0  ;;  %v8719_v2 = vmul.f32 %v8199_v60, %v8199_v60 }
 0x4d1   : > { %v7146_v8 = vpop.f32.mrf.mxu1  ;;  %v8890_v61 = vadd.f32 %v8889_v46, %v8888_v18  ;;  %v8501_v11 = vadd.f32 %v8500_v6, %v8499_v36  ;;  %v8506_v10 = vsel %vm8276_vm4, %v8199_v60, 0.0  ;;  %v19235_v36 = vld [vmem:[#allocation244_spill] sm:$0xff] }
 0x4d2   : > { %v7848_v38 = vpop.f32.mrf.mxu0  ;;  %v7501_v50 = vadd.f32 %v7146_v8, %v19231_v27  ;;  %8326 = vst.msk [vmem:[%s16371_s24 + $0x188] sm:$0xff] %vm8276_vm4, %v8197_v52  ;;  %v8502_v34 = vsel %vm8276_vm4, %v8197_v52, 0.0  ;;  %v8717_v45 = vmul.f32 %v8197_v52, %v8197_v52  ;;  %v8202_v15 = vadd.f32 %v11507_v26, %v7503_v12 }
 0x4d3   : > { %v11378_v4 = vpop.f32.mrf.mxu1  ;;  %v8892_v7 = vadd.f32 %v8891_v20, %v8890_v61  ;;  %v8503_v37 = vadd.f32 %v8502_v34, %v8501_v11  ;;  %v8895_v26 = vsel %vm8276_vm4, %v8718_v56, 0.0  ;;  %v8897_v0 = vsel %vm8276_vm4, %v8719_v2, 0.0  ;;  %v19236_v20 = vld [vmem:[#allocation246_spill] sm:$0xff] }
 0x4d4   : > { %v11511_v40 = vpop.f32.mrf.mxu0  ;;  %v8200_v48 = vadd.f32 %v7845_v1, %v7501_v50  ;;  %v7504_v63 = vadd.f32 %v11378_v4, %v19232_v41  ;;  %v8893_v35 = vsel %vm8276_vm4, %v8717_v45, 0.0  ;;  %8331 = vst.msk [vmem:[%s16371_s24 + $0x1b0] sm:$0xff] %vm8276_vm4, %v8202_v15  ;;  %v8722_v46 = vmul.f32 %v8202_v15, %v8202_v15 }
 0x4d5   : > { %v7149_v29 = vpop.f32.mrf.mxu1  ;;  %v8505_v24 = vadd.f32 %v8504_v62, %v8503_v37  ;;  %v8894_v51 = vadd.f32 %v8893_v35, %v8892_v7  ;;  %v19237_v37 = vld [vmem:[#allocation65_spill] sm:$0xff] }
 0x4d6   : > { %v7861_v55 = vpop.f32.mrf.mxu0  ;;  %8329 = vst.msk [vmem:[%s16371_s24 + $0x1a0] sm:$0xff] %vm8276_vm4, %v8200_v48  ;;  %v8720_v14 = vmul.f32 %v8200_v48, %v8200_v48  ;;  %v8203_v3 = vadd.f32 %v11508_v21, %v7504_v63  ;;  %v7502_v54 = vadd.f32 %v7149_v29, %v19233_v49  ;;  %v8508_v17 = vsel %vm8276_vm4, %v8200_v48, 0.0 }
 0x4d7   : > { %v11381_v58 = vpop.f32.mrf.mxu1  ;;  %v8507_v28 = vadd.f32 %v8506_v10, %v8505_v24  ;;  %v8896_v1 = vadd.f32 %v8895_v26, %v8894_v51  ;;  %v8903_v41 = vsel %vm8276_vm4, %v8722_v46, 0.0  ;;  %v19238_v24 = vld [vmem:[#allocation249_spill] sm:$0xff] }
 0x4d8   : > { %v11512_v23 = vpop.f32.mrf.mxu0  ;;  %v7507_v16 = vadd.f32 %v11381_v58, %v19234_v33  ;;  %8332 = vst.msk [vmem:[%s16371_s24 + $0x1b8] sm:$0xff] %vm8276_vm4, %v8203_v3  ;;  %v8201_v32 = vadd.f32 %v7848_v38, %v7502_v54  ;;  %v8899_v6 = vsel %vm8276_vm4, %v8720_v14, 0.0  ;;  %v8512_v38 = vsel %vm8276_vm4, %v8202_v15, 0.0 }
 0x4d9   : > { %v7162_v30 = vpop.f32.mrf.mxu1  ;;  %v8898_v59 = vadd.f32 %v8897_v0, %v8896_v1  ;;  %v8509_v9 = vadd.f32 %v8508_v17, %v8507_v28  ;;  %v8723_v11 = vmul.f32 %v8203_v3, %v8203_v3  ;;  %v8514_v15 = vsel %vm8276_vm4, %v8203_v3, 0.0  ;;  %v19239_v0 = vld [vmem:[#allocation257_spill] sm:$0xff] }
 0x4da   : > { %v7864_v60 = vpop.f32.mrf.mxu0  ;;  %v8206_v21 = vadd.f32 %v11511_v40, %v7507_v16  ;;  %v7505_v18 = vadd.f32 %v7162_v30, %v19235_v36  ;;  %8330 = vst.msk [vmem:[%s16371_s24 + $0x1a8] sm:$0xff] %vm8276_vm4, %v8201_v32  ;;  %v8510_v52 = vsel %vm8276_vm4, %v8201_v32, 0.0  ;;  %v8721_v31 = vmul.f32 %v8201_v32, %v8201_v32  ;;  %v19240_v36 = vld [vmem:[#allocation49_spill] sm:$0xff] }
 0x4db   : > { %v11382_v12 = vpop.f32.mrf.mxu1  ;;  %v8900_v61 = vadd.f32 %v8899_v6, %v8898_v59  ;;  %v8511_v56 = vadd.f32 %v8510_v52, %v8509_v9  ;;  %v8905_v10 = vsel %vm8276_vm4, %v8723_v11, 0.0 }
 0x4dc   : > { %v11515_v8 = vpop.f32.mrf.mxu0  ;;  %8335 = vst.msk [vmem:[%s16371_s24 + $0x1d0] sm:$0xff] %vm8276_vm4, %v8206_v21  ;;  %v8901_v27 = vsel %vm8276_vm4, %v8721_v31, 0.0  ;;  %v8204_v50 = vadd.f32 %v7861_v55, %v7505_v18  ;;  %v7508_v34 = vadd.f32 %v11382_v12, %v19236_v20  ;;  %v8726_v1 = vmul.f32 %v8206_v21, %v8206_v21 }
 0x4dd   : > { %v7165_v45 = vpop.f32.mrf.mxu1  ;;  %v8513_v40 = vadd.f32 %v8512_v38, %v8511_v56  ;;  %v8902_v7 = vadd.f32 %v8901_v27, %v8900_v61  ;;  %v8520_v46 = vsel %vm8276_vm4, %v8206_v21, 0.0  ;;  %v19241_v56 = vld [vmem:[#allocation253_spill] sm:$0xff] }
 0x4de   : > { %v7877_v4 = vpop.f32.mrf.mxu0  ;;  %v7506_v48 = vadd.f32 %v7165_v45, %v19237_v37  ;;  %8333 = vst.msk [vmem:[%s16371_s24 + $0x1c0] sm:$0xff] %vm8276_vm4, %v8204_v50  ;;  %v8724_v63 = vmul.f32 %v8204_v50, %v8204_v50  ;;  %v8207_v62 = vadd.f32 %v11512_v23, %v7508_v34  ;;  %v8516_v14 = vsel %vm8276_vm4, %v8204_v50, 0.0 }
 0x4df   : > { %v11385_v2 = vpop.f32.mrf.mxu1  ;;  %v8515_v29 = vadd.f32 %v8514_v15, %v8513_v40  ;;  %v8904_v55 = vadd.f32 %v8903_v41, %v8902_v7  ;;  %v8911_v27 = vsel %vm8276_vm4, %v8726_v1, 0.0 }
 0x4e0   : > { %v11516_v35 = vpop.f32.mrf.mxu0  ;;  %v8205_v26 = vadd.f32 %v7864_v60, %v7506_v48  ;;  %v7511_v51 = vadd.f32 %v11385_v2, %v19238_v24  ;;  %8336 = vst.msk [vmem:[%s16371_s24 + $0x1d8] sm:$0xff] %vm8276_vm4, %v8207_v62  ;;  %v8907_v33 = vsel %vm8276_vm4, %v8724_v63, 0.0  ;;  %v8727_v6 = vmul.f32 %v8207_v62, %v8207_v62  ;;  %v19242_v48 = vld [vmem:[#allocation255_spill] sm:$0xff] }
 0x4e1   : > { %v7178_v49 = vpop.f32.mrf.mxu1  ;;  %v8906_v54 = vadd.f32 %v8905_v10, %v8904_v55  ;;  %v8517_v58 = vadd.f32 %v8516_v14, %v8515_v29  ;;  %v8522_v50 = vsel %vm8276_vm4, %v8207_v62, 0.0  ;;  %v19243_v29 = vld [vmem:[#allocation155_spill] sm:$0xff] }
 0x4e2   : > { %v7880_v3 = vpop.f32.mrf.mxu0  ;;  %8334 = vst.msk [vmem:[%s16371_s24 + $0x1c8] sm:$0xff] %vm8276_vm4, %v8205_v26  ;;  %v8518_v23 = vsel %vm8276_vm4, %v8205_v26, 0.0  ;;  %v8725_v28 = vmul.f32 %v8205_v26, %v8205_v26  ;;  %v8210_v16 = vadd.f32 %v11515_v8, %v7511_v51  ;;  %v7509_v17 = vadd.f32 %v7178_v49, %v19239_v0 }
 0x4e3   : > { %v11386_v32 = vpop.f32.mrf.mxu1  ;;  %v8908_v60 = vadd.f32 %v8907_v33, %v8906_v54  ;;  %v8519_v59 = vadd.f32 %v8518_v23, %v8517_v58  ;;  %v19244_v23 = vld [vmem:[#allocation258_spill] sm:$0xff] }
 0x4e4   : > { %v11519_v30 = vpop.f32.mrf.mxu0  ;;  %v8909_v9 = vsel %vm8276_vm4, %v8725_v28, 0.0  ;;  %v7512_v18 = vadd.f32 %v11386_v32, %v19240_v36  ;;  %8339 = vst.msk [vmem:[%s16371_s24 + $0x1f0] sm:$0xff] %vm8276_vm4, %v8210_v16  ;;  %v8208_v52 = vadd.f32 %v7877_v4, %v7509_v17  ;;  %v8913_v4 = vsel %vm8276_vm4, %v8727_v6, 0.0 }
 0x4e5   : > { %v7181_v31 = vpop.f32.mrf.mxu1  ;;  %v8521_v8 = vadd.f32 %v8520_v46, %v8519_v59  ;;  %v8910_v38 = vadd.f32 %v8909_v9, %v8908_v60  ;;  %v8730_v2 = vmul.f32 %v8210_v16, %v8210_v16  ;;  %v8528_v1 = vsel %vm8276_vm4, %v8210_v16, 0.0  ;;  %v19245_v46 = vld [vmem:[#allocation266_spill] sm:$0xff] }
 0x4e6   : > { %v7893_v12 = vpop.f32.mrf.mxu0  ;;  %v8211_v61 = vadd.f32 %v11516_v35, %v7512_v18  ;;  %v7510_v11 = vadd.f32 %v7181_v31, %v19241_v56  ;;  %8337 = vst.msk [vmem:[%s16371_s24 + $0x1e0] sm:$0xff] %vm8276_vm4, %v8208_v52  ;;  %v8728_v20 = vmul.f32 %v8208_v52, %v8208_v52  ;;  %v8524_v7 = vsel %vm8276_vm4, %v8208_v52, 0.0 }
 0x4e7   : > { %v11389_v21 = vpop.f32.mrf.mxu1  ;;  %v8523_v45 = vadd.f32 %v8522_v50, %v8521_v8  ;;  %v8912_v40 = vadd.f32 %v8911_v27, %v8910_v38  ;;  %v19246_v8 = vld [vmem:[#allocation161_spill] sm:$0xff] }
 0x4e8   : > { %v11520_v34 = vpop.f32.mrf.mxu0  ;;  %8340 = vst.msk [vmem:[%s16371_s24 + $0x1f8] sm:$0xff] %vm8276_vm4, %v8211_v61  ;;  %v8209_v37 = vadd.f32 %v7880_v3, %v7510_v11  ;;  %v7515_v41 = vadd.f32 %v11389_v21, %v19242_v48  ;;  %v8915_v26 = vsel %vm8276_vm4, %v8728_v20, 0.0  ;;  %v8731_v33 = vmul.f32 %v8211_v61, %v8211_v61 }
 0x4e9   : > { %v7194_v15 = vpop.f32.mrf.mxu1  ;;  %v8914_v62 = vadd.f32 %v8913_v4, %v8912_v40  ;;  %v8525_v35 = vadd.f32 %v8524_v7, %v8523_v45  ;;  %v8530_v9 = vsel %vm8276_vm4, %v8211_v61, 0.0  ;;  %v19247_v45 = vld [vmem:[#allocation271_spill] sm:$0xff] }
 0x4ea   : > { %v7896_v63 = vpop.f32.mrf.mxu0  ;;  %v7513_v55 = vadd.f32 %v7194_v15, %v19243_v29  ;;  %8338 = vst.msk [vmem:[%s16371_s24 + $0x1e8] sm:$0xff] %vm8276_vm4, %v8209_v37  ;;  %v8526_v24 = vsel %vm8276_vm4, %v8209_v37, 0.0  ;;  %v8729_v51 = vmul.f32 %v8209_v37, %v8209_v37  ;;  %v8214_v10 = vadd.f32 %v11519_v30, %v7515_v41 }
 0x4eb   : > { %v11390_v14 = vpop.f32.mrf.mxu1  ;;  %v8916_v3 = vadd.f32 %v8915_v26, %v8914_v62  ;;  %v8527_v54 = vadd.f32 %v8526_v24, %v8525_v35  ;;  %v8919_v30 = vsel %vm8276_vm4, %v8730_v2, 0.0  ;;  %v8921_v56 = vsel %vm8276_vm4, %v8731_v33, 0.0  ;;  %v19248_v26 = vld [vmem:[#allocation58_spill] sm:$0xff] }
 0x4ec   : > { %v11523_v49 = vpop.f32.mrf.mxu0  ;;  %v8212_v58 = vadd.f32 %v7893_v12, %v7513_v55  ;;  %v7516_v28 = vadd.f32 %v11390_v14, %v19244_v23  ;;  %v8917_v0 = vsel %vm8276_vm4, %v8729_v51, 0.0  ;;  %8343 = vst.msk [vmem:[%s16371_s24 + $0x210] sm:$0xff] %vm8276_vm4, %v8214_v10  ;;  %v8734_v4 = vmul.f32 %v8214_v10, %v8214_v10 }
 0x4ed   : > { %v7197_v17 = vpop.f32.mrf.mxu1  ;;  %v8529_v60 = vadd.f32 %v8528_v1, %v8527_v54  ;;  %v8918_v59 = vadd.f32 %v8917_v0, %v8916_v3  ;;  %v19249_v54 = vld [vmem:[#allocation269_spill] sm:$0xff] }
 0x4ee   : > { %v7909_v32 = vpop.f32.mrf.mxu0  ;;  %8341 = vst.msk [vmem:[%s16371_s24 + $0x200] sm:$0xff] %vm8276_vm4, %v8212_v58  ;;  %v8732_v36 = vmul.f32 %v8212_v58, %v8212_v58  ;;  %v8215_v18 = vadd.f32 %v11520_v34, %v7516_v28  ;;  %v7514_v16 = vadd.f32 %v7197_v17, %v19245_v46  ;;  %v8532_v11 = vsel %vm8276_vm4, %v8212_v58, 0.0 }
 0x4ef   : > { %v11393_v6 = vpop.f32.mrf.mxu1  ;;  %v8531_v31 = vadd.f32 %v8530_v9, %v8529_v60  ;;  %v8920_v12 = vadd.f32 %v8919_v30, %v8918_v59  ;;  %v8927_v23 = vsel %vm8276_vm4, %v8734_v4, 0.0  ;;  %v19250_v60 = vld [vmem:[#allocation264_spill] sm:$0xff] }
 0x4f0   : > { %v11524_v52 = vpop.f32.mrf.mxu0  ;;  %v7519_v38 = vadd.f32 %v11393_v6, %v19246_v8  ;;  %8344 = vst.msk [vmem:[%s16371_s24 + $0x218] sm:$0xff] %vm8276_vm4, %v8215_v18  ;;  %v8213_v27 = vadd.f32 %v7896_v63, %v7514_v16  ;;  %v8923_v7 = vsel %vm8276_vm4, %v8732_v36, 0.0  ;;  %v8536_v63 = vsel %vm8276_vm4, %v8214_v10, 0.0 }
 0x4f1   : > { %v7210_v50 = vpop.f32.mrf.mxu1  ;;  %v8922_v20 = vadd.f32 %v8921_v56, %v8920_v12  ;;  %v8533_v21 = vadd.f32 %v8532_v11, %v8531_v31  ;;  %v8735_v35 = vmul.f32 %v8215_v18, %v8215_v18  ;;  %v8538_v10 = vsel %vm8276_vm4, %v8215_v18, 0.0  ;;  %v19251_v56 = vld [vmem:[#allocation167_spill] sm:$0xff] }
 0x4f2   : > { %v7912_v61 = vpop.f32.mrf.mxu0  ;;  %v8218_v34 = vadd.f32 %v11523_v49, %v7519_v38  ;;  %v7517_v40 = vadd.f32 %v7210_v50, %v19247_v45  ;;  %8342 = vst.msk [vmem:[%s16371_s24 + $0x208] sm:$0xff] %vm8276_vm4, %v8213_v27  ;;  %v8534_v37 = vsel %vm8276_vm4, %v8213_v27, 0.0  ;;  %v8733_v48 = vmul.f32 %v8213_v27, %v8213_v27  ;;  %v19252_v45 = vld [vmem:[#allocation267_spill] sm:$0xff] }
 0x4f3   : > { %v11394_v41 = vpop.f32.mrf.mxu1  ;;  %v8924_v62 = vadd.f32 %v8923_v7, %v8922_v20  ;;  %v8535_v2 = vadd.f32 %v8534_v37, %v8533_v21  ;;  %v8929_v9 = vsel %vm8276_vm4, %v8735_v35, 0.0 }
 0x4f4   : > { %v11527_v15 = vpop.f32.mrf.mxu0  ;;  %8347 = vst.msk [vmem:[%s16371_s24 + $0x230] sm:$0xff] %vm8276_vm4, %v8218_v34  ;;  %v8925_v29 = vsel %vm8276_vm4, %v8733_v48, 0.0  ;;  %v8216_v55 = vadd.f32 %v7909_v32, %v7517_v40  ;;  %v7520_v24 = vadd.f32 %v11394_v41, %v19248_v26  ;;  %v8738_v12 = vmul.f32 %v8218_v34, %v8218_v34 }
 0x4f5   : > { %v7213_v51 = vpop.f32.mrf.mxu1  ;;  %v8537_v49 = vadd.f32 %v8536_v63, %v8535_v2  ;;  %v8926_v3 = vadd.f32 %v8925_v29, %v8924_v62  ;;  %v8544_v4 = vsel %vm8276_vm4, %v8218_v34, 0.0  ;;  %v19253_v2 = vld [vmem:[#allocation78_spill] sm:$0xff] }
 0x4f6   : > { %v7925_v14 = vpop.f32.mrf.mxu0  ;;  %v7518_v58 = vadd.f32 %v7213_v51, %v19249_v54  ;;  %8345 = vst.msk [vmem:[%s16371_s24 + $0x220] sm:$0xff] %vm8276_vm4, %v8216_v55  ;;  %v8736_v28 = vmul.f32 %v8216_v55, %v8216_v55  ;;  %v8219_v1 = vadd.f32 %v11524_v52, %v7520_v24  ;;  %v8540_v36 = vsel %vm8276_vm4, %v8216_v55, 0.0 }
 0x4f7   : > { %v11397_v33 = vpop.f32.mrf.mxu1  ;;  %v8928_v17 = vadd.f32 %v8927_v23, %v8926_v3  ;;  %v8539_v32 = vadd.f32 %v8538_v10, %v8537_v49  ;;  %v8935_v29 = vsel %vm8276_vm4, %v8738_v12, 0.0 }
 0x4f8   : > { %v11528_v0 = vpop.f32.mrf.mxu0  ;;  %v8217_v30 = vadd.f32 %v7912_v61, %v7518_v58  ;;  %v7523_v59 = vadd.f32 %v11397_v33, %v19250_v60  ;;  %8348 = vst.msk [vmem:[%s16371_s24 + $0x238] sm:$0xff] %vm8276_vm4, %v8219_v1  ;;  %v8931_v8 = vsel %vm8276_vm4, %v8736_v28, 0.0  ;;  %v8739_v7 = vmul.f32 %v8219_v1, %v8219_v1  ;;  %v19254_v58 = vld [vmem:[#allocation175_spill] sm:$0xff] }
 0x4f9   : > { %v7226_v46 = vpop.f32.mrf.mxu1  ;;  %v8541_v16 = vadd.f32 %v8540_v36, %v8539_v32  ;;  %v8930_v6 = vadd.f32 %v8929_v9, %v8928_v17  ;;  %v8546_v55 = vsel %vm8276_vm4, %v8219_v1, 0.0  ;;  %v19255_v17 = vld [vmem:[#allocation159_spill] sm:$0xff] }
 0x4fa   : > { %v7928_v18 = vpop.f32.mrf.mxu0  ;;  %8346 = vst.msk [vmem:[%s16371_s24 + $0x228] sm:$0xff] %vm8276_vm4, %v8217_v30  ;;  %v8542_v52 = vsel %vm8276_vm4, %v8217_v30, 0.0  ;;  %v8737_v31 = vmul.f32 %v8217_v30, %v8217_v30  ;;  %v8222_v38 = vadd.f32 %v11527_v15, %v7523_v59  ;;  %v7521_v11 = vadd.f32 %v7226_v46, %v19251_v56 }
 0x4fb   : > { %v11398_v27 = vpop.f32.mrf.mxu1  ;;  %v8932_v61 = vadd.f32 %v8931_v8, %v8930_v6  ;;  %v8543_v20 = vadd.f32 %v8542_v52, %v8541_v16  ;;  %v19256_v52 = vld [vmem:[#allocation69_spill] sm:$0xff] }
 0x4fc   : > { %v11531_v50 = vpop.f32.mrf.mxu0  ;;  %v8933_v21 = vsel %vm8276_vm4, %v8737_v31, 0.0  ;;  %v7524_v40 = vadd.f32 %v11398_v27, %v19252_v45  ;;  %8351 = vst.msk [vmem:[%s16371_s24 + $0x250] sm:$0xff] %vm8276_vm4, %v8222_v38  ;;  %v8220_v37 = vadd.f32 %v7925_v14, %v7521_v11  ;;  %v8937_v14 = vsel %vm8276_vm4, %v8739_v7, 0.0 }
 0x4fd   : > { %v7229_v48 = vpop.f32.mrf.mxu1  ;;  %v8545_v15 = vadd.f32 %v8544_v4, %v8543_v20  ;;  %v8934_v63 = vadd.f32 %v8933_v21, %v8932_v61  ;;  %v8742_v1 = vmul.f32 %v8222_v38, %v8222_v38  ;;  %v8552_v12 = vsel %vm8276_vm4, %v8222_v38, 0.0  ;;  %v19257_v4 = vld [vmem:[#allocation174_spill] sm:$0xff] }
 0x4fe   : > { %v7941_v41 = vpop.f32.mrf.mxu0  ;;  %v8223_v62 = vadd.f32 %v11528_v0, %v7524_v40  ;;  %v7522_v35 = vadd.f32 %v7229_v48, %v19253_v2  ;;  %8349 = vst.msk [vmem:[%s16371_s24 + $0x240] sm:$0xff] %vm8276_vm4, %v8220_v37  ;;  %v8740_v26 = vmul.f32 %v8220_v37, %v8220_v37  ;;  %v8548_v3 = vsel %vm8276_vm4, %v8220_v37, 0.0 }
 0x4ff   : > { %v11401_v34 = vpop.f32.mrf.mxu1  ;;  %v8936_v51 = vadd.f32 %v8935_v29, %v8934_v63  ;;  %v8547_v49 = vadd.f32 %v8546_v55, %v8545_v15  ;;  %v19258_v15 = vld [vmem:[#allocation270_spill] sm:$0xff] }
 0x500   : > { %v11532_v24 = vpop.f32.mrf.mxu0  ;;  %8352 = vst.msk [vmem:[%s16371_s24 + $0x258] sm:$0xff] %vm8276_vm4, %v8223_v62  ;;  %v8221_v54 = vadd.f32 %v7928_v18, %v7522_v35  ;;  %v7527_v23 = vadd.f32 %v11401_v34, %v19254_v58  ;;  %v8939_v30 = vsel %vm8276_vm4, %v8740_v26, 0.0  ;;  %v8743_v8 = vmul.f32 %v8223_v62, %v8223_v62 }
 0x501   : > { %v7242_v10 = vpop.f32.mrf.mxu1  ;;  %v8549_v33 = vadd.f32 %v8548_v3, %v8547_v49  ;;  %v8938_v0 = vadd.f32 %v8937_v14, %v8936_v51  ;;  %v8554_v21 = vsel %vm8276_vm4, %v8223_v62, 0.0  ;;  %v19259_v51 = vld [vmem:[#allocation114_spill] sm:$0xff] }
 0x502   : > { %v7944_v28 = vpop.f32.mrf.mxu0  ;;  %v7525_v32 = vadd.f32 %v7242_v10, %v19255_v17  ;;  %8350 = vst.msk [vmem:[%s16371_s24 + $0x248] sm:$0xff] %vm8276_vm4, %v8221_v54  ;;  %v8550_v60 = vsel %vm8276_vm4, %v8221_v54, 0.0  ;;  %v8741_v59 = vmul.f32 %v8221_v54, %v8221_v54  ;;  %v8226_v9 = vadd.f32 %v11531_v50, %v7527_v23 }
 0x503   : > { %v11402_v36 = vpop.f32.mrf.mxu1  ;;  %v8940_v18 = vadd.f32 %v8939_v30, %v8938_v0  ;;  %v8551_v16 = vadd.f32 %v8550_v60, %v8549_v33  ;;  %v8943_v50 = vsel %vm8276_vm4, %v8742_v1, 0.0  ;;  %v8945_v2 = vsel %vm8276_vm4, %v8743_v8, 0.0  ;;  %v19260_v30 = vld [vmem:[#allocation272_spill] sm:$0xff] }
 0x504   : > { %v11535_v46 = vpop.f32.mrf.mxu0  ;;  %v8224_v6 = vadd.f32 %v7941_v41, %v7525_v32  ;;  %v7528_v31 = vadd.f32 %v11402_v36, %v19256_v52  ;;  %v8941_v56 = vsel %vm8276_vm4, %v8741_v59, 0.0  ;;  %8355 = vst.msk [vmem:[%s16371_s24 + $0x270] sm:$0xff] %vm8276_vm4, %v8226_v9  ;;  %v8746_v14 = vmul.f32 %v8226_v9, %v8226_v9 }
 0x505   : > { %v7245_v11 = vpop.f32.mrf.mxu1  ;;  %v8553_v61 = vadd.f32 %v8552_v12, %v8551_v16  ;;  %v8942_v20 = vadd.f32 %v8941_v56, %v8940_v18  ;;  %v19261_v16 = vld [vmem:[#allocation184_spill] sm:$0xff] }
 0x506   : > { %v7957_v27 = vpop.f32.mrf.mxu0  ;;  %8353 = vst.msk [vmem:[%s16371_s24 + $0x260] sm:$0xff] %vm8276_vm4, %v8224_v6  ;;  %v8744_v45 = vmul.f32 %v8224_v6, %v8224_v6  ;;  %v8227_v40 = vadd.f32 %v11532_v24, %v7528_v31  ;;  %v7526_v38 = vadd.f32 %v7245_v11, %v19257_v4  ;;  %v8556_v35 = vsel %vm8276_vm4, %v8224_v6, 0.0 }
 0x507   : > { %v11405_v7 = vpop.f32.mrf.mxu1  ;;  %v8944_v48 = vadd.f32 %v8943_v50, %v8942_v20  ;;  %v8555_v41 = vadd.f32 %v8554_v21, %v8553_v61  ;;  %v8951_v52 = vsel %vm8276_vm4, %v8746_v14, 0.0  ;;  %v19262_v61 = vld [vmem:[#allocation88_spill] sm:$0xff] }
 0x508   : > { %v11536_v37 = vpop.f32.mrf.mxu0  ;;  %v7531_v63 = vadd.f32 %v11405_v7, %v19258_v15  ;;  %8356 = vst.msk [vmem:[%s16371_s24 + $0x278] sm:$0xff] %vm8276_vm4, %v8227_v40  ;;  %v8225_v29 = vadd.f32 %v7944_v28, %v7526_v38  ;;  %v8947_v3 = vsel %vm8276_vm4, %v8744_v45, 0.0  ;;  %v8560_v28 = vsel %vm8276_vm4, %v8226_v9, 0.0 }
 0x509   : > { %v7258_v55 = vpop.f32.mrf.mxu1  ;;  %v8557_v26 = vadd.f32 %v8556_v35, %v8555_v41  ;;  %v8946_v34 = vadd.f32 %v8945_v2, %v8944_v48  ;;  %v8747_v0 = vmul.f32 %v8227_v40, %v8227_v40  ;;  %v8562_v9 = vsel %vm8276_vm4, %v8227_v40, 0.0  ;;  %v19263_v2 = vld [vmem:[#allocation96_spill] sm:$0xff] }
 0x50a   : > { %v7960_v62 = vpop.f32.mrf.mxu0  ;;  %v8230_v24 = vadd.f32 %v11535_v46, %v7531_v63  ;;  %v7529_v49 = vadd.f32 %v7258_v55, %v19259_v51  ;;  %8354 = vst.msk [vmem:[%s16371_s24 + $0x268] sm:$0xff] %vm8276_vm4, %v8225_v29  ;;  %v8558_v54 = vsel %vm8276_vm4, %v8225_v29, 0.0  ;;  %v8745_v58 = vmul.f32 %v8225_v29, %v8225_v29  ;;  %v19264_v51 = vld [vmem:[#allocation273_spill] sm:$0xff] }
 0x50b   : > { %v11406_v23 = vpop.f32.mrf.mxu1  ;;  %v8948_v1 = vadd.f32 %v8947_v3, %v8946_v34  ;;  %v8559_v33 = vadd.f32 %v8558_v54, %v8557_v26  ;;  %v8953_v21 = vsel %vm8276_vm4, %v8747_v0, 0.0 }
 0x50c   : > { %v11539_v10 = vpop.f32.mrf.mxu0  ;;  %8359 = vst.msk [vmem:[%s16371_s24 + $0x290] sm:$0xff] %vm8276_vm4, %v8230_v24  ;;  %v8949_v17 = vsel %vm8276_vm4, %v8745_v58, 0.0  ;;  %v8228_v32 = vadd.f32 %v7957_v27, %v7529_v49  ;;  %v7532_v60 = vadd.f32 %v11406_v23, %v19260_v30  ;;  %v8750_v41 = vmul.f32 %v8230_v24, %v8230_v24 }
 0x50d   : > { %v7261_v59 = vpop.f32.mrf.mxu1  ;;  %v8561_v46 = vadd.f32 %v8560_v28, %v8559_v33  ;;  %v8950_v18 = vadd.f32 %v8949_v17, %v8948_v1  ;;  %v8568_v14 = vsel %vm8276_vm4, %v8230_v24, 0.0  ;;  %v19265_v33 = vld [vmem:[#allocation157_spill] sm:$0xff] }
 0x50e   : > { %v7973_v36 = vpop.f32.mrf.mxu0  ;;  %v7530_v6 = vadd.f32 %v7261_v59, %v19261_v16  ;;  %8357 = vst.msk [vmem:[%s16371_s24 + $0x280] sm:$0xff] %vm8276_vm4, %v8228_v32  ;;  %v8748_v31 = vmul.f32 %v8228_v32, %v8228_v32  ;;  %v8231_v12 = vadd.f32 %v11536_v37, %v7532_v60  ;;  %v8564_v45 = vsel %vm8276_vm4, %v8228_v32, 0.0 }
 0x50f   : > { %v11409_v8 = vpop.f32.mrf.mxu1  ;;  %v8952_v11 = vadd.f32 %v8951_v52, %v8950_v18  ;;  %v8563_v27 = vadd.f32 %v8562_v9, %v8561_v46  ;;  %v8959_v17 = vsel %vm8276_vm4, %v8750_v41, 0.0 }
 0x510   : > { %v11540_v56 = vpop.f32.mrf.mxu0  ;;  %v8229_v50 = vadd.f32 %v7960_v62, %v7530_v6  ;;  %v7535_v20 = vadd.f32 %v11409_v8, %v19262_v61  ;;  %8360 = vst.msk [vmem:[%s16371_s24 + $0x298] sm:$0xff] %vm8276_vm4, %v8231_v12  ;;  %v8955_v15 = vsel %vm8276_vm4, %v8748_v31, 0.0  ;;  %v8751_v3 = vmul.f32 %v8231_v12, %v8231_v12  ;;  %v19266_v6 = vld [vmem:[#allocation160_spill] sm:$0xff] }
 0x511   : > { %v7274_v4 = vpop.f32.mrf.mxu1  ;;  %v8565_v38 = vadd.f32 %v8564_v45, %v8563_v27  ;;  %v8954_v7 = vadd.f32 %v8953_v21, %v8952_v11  ;;  %v8570_v32 = vsel %vm8276_vm4, %v8231_v12, 0.0  ;;  %v19267_v11 = vld [vmem:[#allocation192_spill] sm:$0xff] }
 0x512   : > { %v7976_v40 = vpop.f32.mrf.mxu0  ;;  %8358 = vst.msk [vmem:[%s16371_s24 + $0x288] sm:$0xff] %vm8276_vm4, %v8229_v50  ;;  %v8566_v37 = vsel %vm8276_vm4, %v8229_v50, 0.0  ;;  %v8749_v48 = vmul.f32 %v8229_v50, %v8229_v50  ;;  %v8234_v63 = vadd.f32 %v11539_v10, %v7535_v20  ;;  %v7533_v35 = vadd.f32 %v7274_v4, %v19263_v2 }
 0x513   : > { %v11410_v29 = vpop.f32.mrf.mxu1  ;;  %v8956_v62 = vadd.f32 %v8955_v15, %v8954_v7  ;;  %v8567_v26 = vadd.f32 %v8566_v37, %v8565_v38  ;;  %v19268_v37 = vld [vmem:[#allocation105_spill] sm:$0xff] }
 0x514   : > { %v11543_v55 = vpop.f32.mrf.mxu0  ;;  %v8957_v34 = vsel %vm8276_vm4, %v8749_v48, 0.0  ;;  %v7536_v49 = vadd.f32 %v11410_v29, %v19264_v51  ;;  %8363 = vst.msk [vmem:[%s16371_s24 + $0x2b0] sm:$0xff] %vm8276_vm4, %v8234_v63  ;;  %v8232_v54 = vadd.f32 %v7973_v36, %v7533_v35  ;;  %v8961_v36 = vsel %vm8276_vm4, %v8751_v3, 0.0 }
 0x515   : > { %v7277_v58 = vpop.f32.mrf.mxu1  ;;  %v8569_v10 = vadd.f32 %v8568_v14, %v8567_v26  ;;  %v8958_v28 = vadd.f32 %v8957_v34, %v8956_v62  ;;  %v8754_v12 = vmul.f32 %v8234_v63, %v8234_v63  ;;  %v8576_v41 = vsel %vm8276_vm4, %v8234_v63, 0.0  ;;  %v19269_v14 = vld [vmem:[#allocation171_spill] sm:$0xff] }
 0x516   : > { %v7989_v23 = vpop.f32.mrf.mxu0  ;;  %v8235_v1 = vadd.f32 %v11540_v56, %v7536_v49  ;;  %v7534_v0 = vadd.f32 %v7277_v58, %v19265_v33  ;;  %8361 = vst.msk [vmem:[%s16371_s24 + $0x2a0] sm:$0xff] %vm8276_vm4, %v8232_v54  ;;  %v8752_v30 = vmul.f32 %v8232_v54, %v8232_v54  ;;  %v8572_v18 = vsel %vm8276_vm4, %v8232_v54, 0.0 }
 0x517   : > { %v11413_v24 = vpop.f32.mrf.mxu1  ;;  %v8960_v59 = vadd.f32 %v8959_v17, %v8958_v28  ;;  %v8571_v46 = vadd.f32 %v8570_v32, %v8569_v10  ;;  %v19270_v10 = vld [vmem:[#allocation274_spill] sm:$0xff] }
 0x518   : > { %v11544_v60 = vpop.f32.mrf.mxu0  ;;  %8364 = vst.msk [vmem:[%s16371_s24 + $0x2b8] sm:$0xff] %vm8276_vm4, %v8235_v1  ;;  %v8233_v16 = vadd.f32 %v7976_v40, %v7534_v0  ;;  %v7539_v52 = vadd.f32 %v11413_v24, %v19266_v6  ;;  %v8963_v50 = vsel %vm8276_vm4, %v8752_v30, 0.0  ;;  %v8755_v15 = vmul.f32 %v8235_v1, %v8235_v1 }
 0x519   : > { %v7290_v9 = vpop.f32.mrf.mxu1  ;;  %v8573_v8 = vadd.f32 %v8572_v18, %v8571_v46  ;;  %v8962_v56 = vadd.f32 %v8961_v36, %v8960_v59  ;;  %v8578_v34 = vsel %vm8276_vm4, %v8235_v1, 0.0  ;;  %v19271_v59 = vld [vmem:[#allocation177_spill] sm:$0xff] }
 0x51a   : > { %v7992_v31 = vpop.f32.mrf.mxu0  ;;  %v7537_v27 = vadd.f32 %v7290_v9, %v19267_v11  ;;  %8362 = vst.msk [vmem:[%s16371_s24 + $0x2a8] sm:$0xff] %vm8276_vm4, %v8233_v16  ;;  %v8574_v61 = vsel %vm8276_vm4, %v8233_v16, 0.0  ;;  %v8753_v20 = vmul.f32 %v8233_v16, %v8233_v16  ;;  %v8238_v21 = vadd.f32 %v11543_v55, %v7539_v52 }
 0x51b   : > { %v11414_v45 = vpop.f32.mrf.mxu1  ;;  %v8964_v40 = vadd.f32 %v8963_v50, %v8962_v56  ;;  %v8575_v38 = vadd.f32 %v8574_v61, %v8573_v8  ;;  %v8967_v55 = vsel %vm8276_vm4, %v8754_v12, 0.0  ;;  %v8969_v33 = vsel %vm8276_vm4, %v8755_v15, 0.0  ;;  %v19272_v50 = vld [vmem:[#allocation195_spill] sm:$0xff] }
 0x51c   : > { %v11547_v4 = vpop.f32.mrf.mxu0  ;;  %v8236_v7 = vadd.f32 %v7989_v23, %v7537_v27  ;;  %v7540_v48 = vadd.f32 %v11414_v45, %v19268_v37  ;;  %v8965_v2 = vsel %vm8276_vm4, %v8753_v20, 0.0  ;;  %8367 = vst.msk [vmem:[%s16371_s24 + $0x2d0] sm:$0xff] %vm8276_vm4, %v8238_v21  ;;  %v8758_v36 = vmul.f32 %v8238_v21, %v8238_v21 }
 0x51d   : > { %v7293_v35 = vpop.f32.mrf.mxu1  ;;  %v8577_v62 = vadd.f32 %v8576_v41, %v8575_v38  ;;  %v8966_v26 = vadd.f32 %v8965_v2, %v8964_v40  ;;  %v19273_v38 = vld [vmem:[#allocation180_spill] sm:$0xff] }
 0x51e   : > { %v8005_v29 = vpop.f32.mrf.mxu0  ;;  %8365 = vst.msk [vmem:[%s16371_s24 + $0x2c0] sm:$0xff] %vm8276_vm4, %v8236_v7  ;;  %v8756_v51 = vmul.f32 %v8236_v7, %v8236_v7  ;;  %v8239_v49 = vadd.f32 %v11544_v60, %v7540_v48  ;;  %v7538_v63 = vadd.f32 %v7293_v35, %v19269_v14  ;;  %v8580_v0 = vsel %vm8276_vm4, %v8236_v7, 0.0 }
 0x51f   : > { %v11417_v3 = vpop.f32.mrf.mxu1  ;;  %v8968_v58 = vadd.f32 %v8967_v55, %v8966_v26  ;;  %v8579_v23 = vadd.f32 %v8578_v34, %v8577_v62  ;;  %v8975_v37 = vsel %vm8276_vm4, %v8758_v36, 0.0  ;;  %v19274_v62 = vld [vmem:[#allocation163_spill] sm:$0xff] }
 0x520   : > { %v11548_v54 = vpop.f32.mrf.mxu0  ;;  %v7543_v28 = vadd.f32 %v11417_v3, %v19270_v10  ;;  %8368 = vst.msk [vmem:[%s16371_s24 + $0x2d8] sm:$0xff] %vm8276_vm4, %v8239_v49  ;;  %v8237_v17 = vadd.f32 %v7992_v31, %v7538_v63  ;;  %v8971_v18 = vsel %vm8276_vm4, %v8756_v51, 0.0  ;;  %v8584_v31 = vsel %vm8276_vm4, %v8238_v21, 0.0 }
 0x521   : > { %v7306_v32 = vpop.f32.mrf.mxu1  ;;  %v8581_v30 = vadd.f32 %v8580_v0, %v8579_v23  ;;  %v8970_v24 = vadd.f32 %v8969_v33, %v8968_v58  ;;  %v8759_v56 = vmul.f32 %v8239_v49, %v8239_v49  ;;  %v8586_v21 = vsel %vm8276_vm4, %v8239_v49, 0.0  ;;  %v19275_v33 = vld [vmem:[#allocation201_spill] sm:$0xff] }
 0x522   : > { %v8008_v1 = vpop.f32.mrf.mxu0  ;;  %v8242_v60 = vadd.f32 %v11547_v4, %v7543_v28  ;;  %v7541_v46 = vadd.f32 %v7306_v32, %v19271_v59  ;;  %8366 = vst.msk [vmem:[%s16371_s24 + $0x2c8] sm:$0xff] %vm8276_vm4, %v8237_v17  ;;  %v8582_v16 = vsel %vm8276_vm4, %v8237_v17, 0.0  ;;  %v8757_v6 = vmul.f32 %v8237_v17, %v8237_v17  ;;  %v19276_v59 = vld [vmem:[#allocation11_spill] sm:$0xff] }
 0x523   : > { %v11418_v52 = vpop.f32.mrf.mxu1  ;;  %v8972_v12 = vadd.f32 %v8971_v18, %v8970_v24  ;;  %v8583_v8 = vadd.f32 %v8582_v16, %v8581_v30  ;;  %v8977_v34 = vsel %vm8276_vm4, %v8759_v56, 0.0 }
 0x524   : > { %v11551_v9 = vpop.f32.mrf.mxu0  ;;  %8371 = vst.msk [vmem:[%s16371_s24 + $0x2f0] sm:$0xff] %vm8276_vm4, %v8242_v60  ;;  %v8973_v11 = vsel %vm8276_vm4, %v8757_v6, 0.0  ;;  %v8240_v27 = vadd.f32 %v8005_v29, %v7541_v46  ;;  %v7544_v61 = vadd.f32 %v11418_v52, %v19272_v50  ;;  %v8762_v23 = vmul.f32 %v8242_v60, %v8242_v60 }
 0x525   : > { %v7309_v20 = vpop.f32.mrf.mxu1  ;;  %v8585_v4 = vadd.f32 %v8584_v31, %v8583_v8  ;;  %v8974_v40 = vadd.f32 %v8973_v11, %v8972_v12  ;;  %v8592_v36 = vsel %vm8276_vm4, %v8242_v60, 0.0  ;;  %v19277_v8 = vld [vmem:[#allocation14_spill] sm:$0xff] }
 0x526   : > { %v8021_v45 = vpop.f32.mrf.mxu0  ;;  %v7542_v7 = vadd.f32 %v7309_v20, %v19273_v38  ;;  %8369 = vst.msk [vmem:[%s16371_s24 + $0x2e0] sm:$0xff] %vm8276_vm4, %v8240_v27  ;;  %v8760_v48 = vmul.f32 %v8240_v27, %v8240_v27  ;;  %v8243_v41 = vadd.f32 %v11548_v54, %v7544_v61  ;;  %v8588_v51 = vsel %vm8276_vm4, %v8240_v27, 0.0 }
 0x527   : > { %v11421_v15 = vpop.f32.mrf.mxu1  ;;  %v8976_v35 = vadd.f32 %v8975_v37, %v8974_v40  ;;  %v8587_v29 = vadd.f32 %v8586_v21, %v8585_v4  ;;  %v8983_v11 = vsel %vm8276_vm4, %v8762_v23, 0.0 }
 0x528   : > { %v11552_v2 = vpop.f32.mrf.mxu0  ;;  %v8241_v55 = vadd.f32 %v8008_v1, %v7542_v7  ;;  %v7547_v26 = vadd.f32 %v11421_v15, %v19274_v62  ;;  %8372 = vst.msk [vmem:[%s16371_s24 + $0x2f8] sm:$0xff] %vm8276_vm4, %v8243_v41  ;;  %v8979_v10 = vsel %vm8276_vm4, %v8760_v48, 0.0  ;;  %v8763_v18 = vmul.f32 %v8243_v41, %v8243_v41  ;;  %v19278_v7 = vld [vmem:[#allocation16_spill] sm:$0xff] }
 0x529   : > { %v7322_v14 = vpop.f32.mrf.mxu1  ;;  %v8589_v63 = vadd.f32 %v8588_v51, %v8587_v29  ;;  %v8978_v3 = vadd.f32 %v8977_v34, %v8976_v35  ;;  %v8594_v27 = vsel %vm8276_vm4, %v8243_v41, 0.0  ;;  %v19279_v35 = vld [vmem:[#allocation186_spill] sm:$0xff] }
 0x52a   : > { %v8024_v49 = vpop.f32.mrf.mxu0  ;;  %8370 = vst.msk [vmem:[%s16371_s24 + $0x2e8] sm:$0xff] %vm8276_vm4, %v8241_v55  ;;  %v8590_v54 = vsel %vm8276_vm4, %v8241_v55, 0.0  ;;  %v8761_v58 = vmul.f32 %v8241_v55, %v8241_v55  ;;  %v8246_v28 = vadd.f32 %v11551_v9, %v7547_v26  ;;  %v7545_v0 = vadd.f32 %v7322_v14, %v19275_v33 }
 0x52b   : > { %v11422_v17 = vpop.f32.mrf.mxu1  ;;  %v8980_v1 = vadd.f32 %v8979_v10, %v8978_v3  ;;  %v8591_v30 = vadd.f32 %v8590_v54, %v8589_v63  ;;  %v19280_v54 = vld [vmem:[#allocation132_spill] sm:$0xff] }
 0x52c   : > { %v11555_v32 = vpop.f32.mrf.mxu0  ;;  %v8981_v24 = vsel %vm8276_vm4, %v8761_v58, 0.0  ;;  %v7548_v46 = vadd.f32 %v11422_v17, %v19276_v59  ;;  %8375 = vst.msk [vmem:[%s16371_s24 + $0x310] sm:$0xff] %vm8276_vm4, %v8246_v28  ;;  %v8244_v16 = vadd.f32 %v8021_v45, %v7545_v0  ;;  %v8985_v45 = vsel %vm8276_vm4, %v8763_v18, 0.0 }
 0x52d   : > { %v7325_v6 = vpop.f32.mrf.mxu1  ;;  %v8593_v9 = vadd.f32 %v8592_v36, %v8591_v30  ;;  %v8982_v31 = vadd.f32 %v8981_v24, %v8980_v1  ;;  %v8766_v41 = vmul.f32 %v8246_v28, %v8246_v28  ;;  %v8600_v23 = vsel %vm8276_vm4, %v8246_v28, 0.0  ;;  %v19281_v36 = vld [vmem:[#allocation100_spill] sm:$0xff] }
 0x52e   : > { %v8037_v52 = vpop.f32.mrf.mxu0  ;;  %v8247_v12 = vadd.f32 %v11552_v2, %v7548_v46  ;;  %v7546_v56 = vadd.f32 %v7325_v6, %v19277_v8  ;;  %8373 = vst.msk [vmem:[%s16371_s24 + $0x300] sm:$0xff] %vm8276_vm4, %v8244_v16  ;;  %v8764_v50 = vmul.f32 %v8244_v16, %v8244_v16  ;;  %v8596_v40 = vsel %vm8276_vm4, %v8244_v16, 0.0 }
 0x52f   : > { %v11425_v60 = vpop.f32.mrf.mxu1  ;;  %v8984_v20 = vadd.f32 %v8983_v11, %v8982_v31  ;;  %v8595_v4 = vadd.f32 %v8594_v27, %v8593_v9  ;;  %v19282_v9 = vld [vmem:[#allocation20_spill] sm:$0xff] }
 0x530   : > { %v11556_v61 = vpop.f32.mrf.mxu0  ;;  %8376 = vst.msk [vmem:[%s16371_s24 + $0x318] sm:$0xff] %vm8276_vm4, %v8247_v12  ;;  %v8245_v38 = vadd.f32 %v8024_v49, %v7546_v56  ;;  %v7551_v37 = vadd.f32 %v11425_v60, %v19278_v7  ;;  %v8987_v55 = vsel %vm8276_vm4, %v8764_v50, 0.0  ;;  %v8767_v10 = vmul.f32 %v8247_v12, %v8247_v12 }
 0x531   : > { %v7338_v21 = vpop.f32.mrf.mxu1  ;;  %v8597_v15 = vadd.f32 %v8596_v40, %v8595_v4  ;;  %v8986_v2 = vadd.f32 %v8985_v45, %v8984_v20  ;;  %v8602_v24 = vsel %vm8276_vm4, %v8247_v12, 0.0 }
 0x532   : > { %v8040_v48 = vpop.f32.mrf.mxu0  ;;  %v7549_v29 = vadd.f32 %v7338_v21, %v19279_v35  ;;  %8374 = vst.msk [vmem:[%s16371_s24 + $0x308] sm:$0xff] %vm8276_vm4, %v8245_v38  ;;  %v8598_v62 = vsel %vm8276_vm4, %v8245_v38, 0.0  ;;  %v8765_v26 = vmul.f32 %v8245_v38, %v8245_v38  ;;  %v8250_v34 = vadd.f32 %v11555_v32, %v7551_v37  ;;  %v19283_v35 = vld [vmem:[#allocation189_spill] sm:$0xff] }
 0x533   : > { %v11426_v51 = vpop.f32.mrf.mxu1  ;;  %v8988_v49 = vadd.f32 %v8987_v55, %v8986_v2  ;;  %v8599_v63 = vadd.f32 %v8598_v62, %v8597_v15  ;;  %v8991_v32 = vsel %vm8276_vm4, %v8766_v41, 0.0  ;;  %v8993_v8 = vsel %vm8276_vm4, %v8767_v10, 0.0 }
 0x534   : > { %v11559_v14 = vpop.f32.mrf.mxu0  ;;  %v8248_v3 = vadd.f32 %v8037_v52, %v7549_v29  ;;  %v7552_v58 = vadd.f32 %v11426_v51, %v19280_v54  ;;  %v8989_v33 = vsel %vm8276_vm4, %v8765_v26, 0.0  ;;  %8379 = vst.msk [vmem:[%s16371_s24 + $0x330] sm:$0xff] %vm8276_vm4, %v8250_v34  ;;  %v8770_v4 = vmul.f32 %v8250_v34, %v8250_v34 }
 0x535   : > { %v7341_v0 = vpop.f32.mrf.mxu1  ;;  %v8601_v1 = vadd.f32 %v8600_v23, %v8599_v63  ;;  %v8990_v30 = vadd.f32 %v8989_v33, %v8988_v49  ;;  %v8608_v21 = vsel %vm8276_vm4, %v8250_v34, 0.0 }
 0x536   : > { %v8053_v17 = vpop.f32.mrf.mxu0  ;;  %8377 = vst.msk [vmem:[%s16371_s24 + $0x320] sm:$0xff] %vm8276_vm4, %v8248_v3  ;;  %v8768_v59 = vmul.f32 %v8248_v3, %v8248_v3  ;;  %v8251_v46 = vadd.f32 %v11556_v61, %v7552_v58  ;;  %v7550_v28 = vadd.f32 %v7341_v0, %v19281_v36  ;;  %v8604_v56 = vsel %vm8276_vm4, %v8248_v3, 0.0  ;;  %v19284_v0 = vld [vmem:[#allocation23_spill] sm:$0xff] }
 0x537   : > { %v11429_v18 = vpop.f32.mrf.mxu1  ;;  %v8992_v6 = vadd.f32 %v8991_v32, %v8990_v30  ;;  %v8603_v52 = vadd.f32 %v8602_v24, %v8601_v1  ;;  %v8999_v49 = vsel %vm8276_vm4, %v8770_v4, 0.0 }
 0x538   : > { %v11560_v16 = vpop.f32.mrf.mxu0  ;;  %v7555_v31 = vadd.f32 %v11429_v18, %v19282_v9  ;;  %8380 = vst.msk [vmem:[%s16371_s24 + $0x338] sm:$0xff] %vm8276_vm4, %v8251_v46  ;;  %v8249_v11 = vadd.f32 %v8040_v48, %v7550_v28  ;;  %v8995_v45 = vsel %vm8276_vm4, %v8768_v59, 0.0  ;;  %v8771_v15 = vmul.f32 %v8251_v46, %v8251_v46 }
 0x539   : > { %v7354_v27 = vpop.f32.mrf.mxu1  ;;  %v8605_v50 = vadd.f32 %v8604_v56, %v8603_v52  ;;  %v8994_v60 = vadd.f32 %v8993_v8, %v8992_v6  ;;  %v8610_v34 = vsel %vm8276_vm4, %v8251_v46, 0.0 }
 0x53a   : > { %v8056_v12 = vpop.f32.mrf.mxu0  ;;  %v8254_v61 = vadd.f32 %v11559_v14, %v7555_v31  ;;  %v7553_v20 = vadd.f32 %v7354_v27, %v16252_v42  ;;  %8378 = vst.msk [vmem:[%s16371_s24 + $0x328] sm:$0xff] %vm8276_vm4, %v8249_v11  ;;  %v8606_v40 = vsel %vm8276_vm4, %v8249_v11, 0.0  ;;  %v8769_v38 = vmul.f32 %v8249_v11, %v8249_v11  ;;  %v19285_v11 = vld [vmem:[#allocation121_spill] sm:$0xff] }
 0x53b   : > { %v11430_v7 = vpop.f32.mrf.mxu1  ;;  %v8996_v48 = vadd.f32 %v8995_v45, %v8994_v60  ;;  %v8607_v41 = vadd.f32 %v8606_v40, %v8605_v50  ;;  %v9001_v32 = vsel %vm8276_vm4, %v8771_v15, 0.0 }
 0x53c   : > { %v11563_v37 = vpop.f32.mrf.mxu0  ;;  %8383 = vst.msk [vmem:[%s16371_s24 + $0x350] sm:$0xff] %vm8276_vm4, %v8254_v61  ;;  %v8997_v42 = vsel %vm8276_vm4, %v8769_v38, 0.0  ;;  %v8252_v2 = vadd.f32 %v8053_v17, %v7553_v20  ;;  %v7556_v29 = vadd.f32 %v11430_v7, %v19283_v35  ;;  %v8774_v28 = vmul.f32 %v8254_v61, %v8254_v61 }
 0x53d   : > { %v7357_v55 = vpop.f32.mrf.mxu1  ;;  %v8609_v26 = vadd.f32 %v8608_v21, %v8607_v41  ;;  %v8998_v51 = vadd.f32 %v8997_v42, %v8996_v48 }
 0x53e   : > { %v8069_v62 = vpop.f32.mrf.mxu0  ;;  %v7554_v14 = vadd.f32 %v7357_v55, %v16262_v53  ;;  %8381 = vst.msk [vmem:[%s16371_s24 + $0x340] sm:$0xff] %vm8276_vm4, %v8252_v2  ;;  %v8772_v63 = vmul.f32 %v8252_v2, %v8252_v2  ;;  %v8255_v3 = vadd.f32 %v11560_v16, %v7556_v29  ;;  %v8612_v53 = vsel %vm8276_vm4, %v8252_v2, 0.0 }
 0x53f   : > { %v11433_v54 = vpop.f32.mrf.mxu1  ;;  %v9000_v23 = vadd.f32 %v8999_v49, %v8998_v51  ;;  %v8611_v10 = vadd.f32 %v8610_v34, %v8609_v26  ;;  %v9007_v7 = vsel %vm8276_vm4, %v8774_v28, 0.0 }
 0x540   : > { %v11564_v58 = vpop.f32.mrf.mxu0  ;;  %v8253_v33 = vadd.f32 %v8056_v12, %v7554_v14  ;;  %v7559_v17 = vadd.f32 %v11433_v54, %v19284_v0  ;;  %8384 = vst.msk [vmem:[%s16371_s24 + $0x358] sm:$0xff] %vm8276_vm4, %v8255_v3  ;;  %v9003_v18 = vsel %vm8276_vm4, %v8772_v63, 0.0  ;;  %v8616_v12 = vsel %vm8276_vm4, %v8254_v61, 0.0 }
 0x541   : > { %v7370_v1 = vpop.f32.mrf.mxu1  ;;  %v8613_v24 = vadd.f32 %v8612_v53, %v8611_v10  ;;  %v9002_v59 = vadd.f32 %v9001_v32, %v9000_v23  ;;  %v8775_v50 = vmul.f32 %v8255_v3, %v8255_v3 }
 0x542   : > { %v8072_v30 = vpop.f32.mrf.mxu0  ;;  %8382 = vst.msk [vmem:[%s16371_s24 + $0x348] sm:$0xff] %vm8276_vm4, %v8253_v33  ;;  %v8614_v46 = vsel %vm8276_vm4, %v8253_v33, 0.0  ;;  %v8773_v36 = vmul.f32 %v8253_v33, %v8253_v33  ;;  %v8258_v16 = vadd.f32 %v11563_v37, %v7559_v17  ;;  %v7557_v6 = vadd.f32 %v7370_v1, %v16272_v19  ;;  %v19287_v17 = vld [vmem:[#allocation191_spill] sm:$0xff] }
 0x543   : > { %v11434_v52 = vpop.f32.mrf.mxu1  ;;  %v9004_v31 = vadd.f32 %v9003_v18, %v9002_v59  ;;  %v8615_v8 = vadd.f32 %v8614_v46, %v8613_v24  ;;  %v8618_v37 = vsel %vm8276_vm4, %v8255_v3, 0.0  ;;  %v9009_v42 = vsel %vm8276_vm4, %v8775_v50, 0.0 }
 0x544   : > { %v11567_v9 = vpop.f32.mrf.mxu0  ;;  %v9005_v56 = vsel %vm8276_vm4, %v8773_v36, 0.0  ;;  %v7560_v27 = vadd.f32 %v11434_v52, %v19285_v11  ;;  %8387 = vst.msk [vmem:[%s16371_s24 + $0x370] sm:$0xff] %vm8276_vm4, %v8258_v16  ;;  %v8256_v60 = vadd.f32 %v8069_v62, %v7557_v6  ;;  %v8778_v26 = vmul.f32 %v8258_v16, %v8258_v16 }
 0x545   : > { %v7373_v20 = vpop.f32.mrf.mxu1  ;;  %v8617_v45 = vadd.f32 %v8616_v12, %v8615_v8  ;;  %v9006_v19 = vadd.f32 %v9005_v56, %v9004_v31  ;;  %v8624_v53 = vsel %vm8276_vm4, %v8258_v16, 0.0 }
 0x546   : > { %v8085_v4 = vpop.f32.mrf.mxu0  ;;  %v8259_v40 = vadd.f32 %v11564_v58, %v7560_v27  ;;  %v7558_v38 = vadd.f32 %v7373_v20, %v16282_v25  ;;  %8385 = vst.msk [vmem:[%s16371_s24 + $0x360] sm:$0xff] %vm8276_vm4, %v8256_v60  ;;  %v8776_v21 = vmul.f32 %v8256_v60, %v8256_v60  ;;  %v8620_v2 = vsel %vm8276_vm4, %v8256_v60, 0.0  ;;  %v19286_v25 = vld [vmem:[#allocation135_spill] sm:$0xff] }
 0x547   : > { %v11437_v61 = vpop.f32.mrf.mxu1  ;;  %v9008_v41 = vadd.f32 %v9007_v7, %v9006_v19  ;;  %v8619_v15 = vadd.f32 %v8618_v37, %v8617_v45  ;;  %v9015_v59 = vsel %vm8276_vm4, %v8778_v26, 0.0  ;;  %v19288_v45 = vld [vmem:[#allocation136_spill] sm:$0xff] }
 0x548   : > { %v11568_v48 = vpop.f32.mrf.mxu0  ;;  %8388 = vst.msk [vmem:[%s16371_s24 + $0x378] sm:$0xff] %vm8276_vm4, %v8259_v40  ;;  %v8257_v35 = vadd.f32 %v8072_v30, %v7558_v38  ;;  %v7563_v29 = vadd.f32 %v11437_v61, %v19286_v25  ;;  %v9011_v34 = vsel %vm8276_vm4, %v8776_v21, 0.0  ;;  %v8779_v1 = vmul.f32 %v8259_v40, %v8259_v40 }
 0x549   : > { %v7386_v55 = vpop.f32.mrf.mxu1  ;;  %v8621_v51 = vadd.f32 %v8620_v2, %v8619_v15  ;;  %v9010_v14 = vadd.f32 %v9009_v42, %v9008_v41  ;;  %v8626_v28 = vsel %vm8276_vm4, %v8259_v40, 0.0 }
 0x54a   : > { %v8088_v62 = vpop.f32.mrf.mxu0  ;;  %v7561_v49 = vadd.f32 %v7386_v55, %v16292_v44  ;;  %8386 = vst.msk [vmem:[%s16371_s24 + $0x368] sm:$0xff] %vm8276_vm4, %v8257_v35  ;;  %v8622_v63 = vsel %vm8276_vm4, %v8257_v35, 0.0  ;;  %v8777_v3 = vmul.f32 %v8257_v35, %v8257_v35  ;;  %v8262_v54 = vadd.f32 %v11567_v9, %v7563_v29 }
 0x54b   : > { %v11438_v58 = vpop.f32.mrf.mxu1  ;;  %v9012_v10 = vadd.f32 %v9011_v34, %v9010_v14  ;;  %v8623_v33 = vadd.f32 %v8622_v63, %v8621_v51  ;;  %v9017_v11 = vsel %vm8276_vm4, %v8779_v1, 0.0 }
 0x54c   : > { %v11571_v23 = vpop.f32.mrf.mxu0  ;;  %v8260_v0 = vadd.f32 %v8085_v4, %v7561_v49  ;;  %v7564_v32 = vadd.f32 %v11438_v58, %v19287_v17  ;;  %v9013_v44 = vsel %vm8276_vm4, %v8777_v3, 0.0  ;;  %8391 = vst.msk [vmem:[%s16371_s24 + $0x390] sm:$0xff] %vm8276_vm4, %v8262_v54  ;;  %v8782_v40 = vmul.f32 %v8262_v54, %v8262_v54 }
 0x54d   : > { %v7389_v30 = vpop.f32.mrf.mxu1  ;;  %v8625_v46 = vadd.f32 %v8624_v53, %v8623_v33  ;;  %v9014_v36 = vadd.f32 %v9013_v44, %v9012_v10  ;;  %v8632_v61 = vsel %vm8276_vm4, %v8262_v54, 0.0 }
 0x54e   : > { %v8101_v24 = vpop.f32.mrf.mxu0  ;;  %8389 = vst.msk [vmem:[%s16371_s24 + $0x380] sm:$0xff] %vm8276_vm4, %v8260_v0  ;;  %v8780_v18 = vmul.f32 %v8260_v0, %v8260_v0  ;;  %v8263_v6 = vadd.f32 %v11568_v48, %v7564_v32  ;;  %v7562_v16 = vadd.f32 %v7389_v30, %v16302_v39  ;;  %v8628_v27 = vsel %vm8276_vm4, %v8260_v0, 0.0 }
 0x54f   : > { %v11441_v52 = vpop.f32.mrf.mxu1  ;;  %v9016_v31 = vadd.f32 %v9015_v59, %v9014_v36  ;;  %v8627_v8 = vadd.f32 %v8626_v28, %v8625_v46  ;;  %v9023_v51 = vsel %vm8276_vm4, %v8782_v40, 0.0 }
 0x550   : > { %v11572_v9 = vpop.f32.mrf.mxu0  ;;  %v7567_v56 = vadd.f32 %v11441_v52, %v16307_v57  ;;  %8392 = vst.msk [vmem:[%s16371_s24 + $0x398] sm:$0xff] %vm8276_vm4, %v8263_v6  ;;  %v8261_v12 = vadd.f32 %v8088_v62, %v7562_v16  ;;  %v9019_v38 = vsel %vm8276_vm4, %v8780_v18, 0.0  ;;  %v8783_v15 = vmul.f32 %v8263_v6, %v8263_v6 }
 0x551   : > { %v7402_v50 = vpop.f32.mrf.mxu1  ;;  %v8629_v20 = vadd.f32 %v8628_v27, %v8627_v8  ;;  %v9018_v4 = vadd.f32 %v9017_v11, %v9016_v31  ;;  %v8634_v14 = vsel %vm8276_vm4, %v8263_v6, 0.0  ;;  %v19289_v11 = vld [vmem:[#allocation123_spill] sm:$0xff] }
 0x552   : > { %v8104_v60 = vpop.f32.mrf.mxu0  ;;  %v8266_v39 = vadd.f32 %v11571_v23, %v7567_v56  ;;  %v7565_v19 = vadd.f32 %v7402_v50, %v19288_v45  ;;  %8390 = vst.msk [vmem:[%s16371_s24 + $0x388] sm:$0xff] %vm8276_vm4, %v8261_v12  ;;  %v8630_v57 = vsel %vm8276_vm4, %v8261_v12, 0.0  ;;  %v8781_v7 = vmul.f32 %v8261_v12, %v8261_v12 }
 0x553   : > { %v11442_v37 = vpop.f32.mrf.mxu1  ;;  %v9020_v48 = vadd.f32 %v9019_v38, %v9018_v4  ;;  %v8631_v41 = vadd.f32 %v8630_v57, %v8629_v20  ;;  %v9025_v10 = vsel %vm8276_vm4, %v8783_v15, 0.0  ;;  %v19290_v38 = vld [vmem:[#allocation27_spill] sm:$0xff] }
 0x554   : > { %v11575_v21 = vpop.f32.mrf.mxu0  ;;  %8395 = vst.msk [vmem:[%s16371_s24 + $0x3b0] sm:$0xff] %vm8276_vm4, %v8266_v39  ;;  %v9021_v42 = vsel %vm8276_vm4, %v8781_v7, 0.0  ;;  %v8264_v2 = vadd.f32 %v8101_v24, %v7565_v19  ;;  %v7568_v35 = vadd.f32 %v11442_v37, %v16317_v13  ;;  %v8786_v44 = vmul.f32 %v8266_v39, %v8266_v39 }
 0x555   : > { %v7405_v25 = vpop.f32.mrf.mxu1  ;;  %v8633_v55 = vadd.f32 %v8632_v61, %v8631_v41  ;;  %v9022_v62 = vadd.f32 %v9021_v42, %v9020_v48  ;;  %v8640_v16 = vsel %vm8276_vm4, %v8266_v39, 0.0  ;;  %v19291_v48 = vld [vmem:[#allocation194_spill] sm:$0xff] }
 0x556   : > { %v8117_v29 = vpop.f32.mrf.mxu0  ;;  %v7566_v26 = vadd.f32 %v7405_v25, %v16322_v22  ;;  %8393 = vst.msk [vmem:[%s16371_s24 + $0x3a0] sm:$0xff] %vm8276_vm4, %v8264_v2  ;;  %v8784_v49 = vmul.f32 %v8264_v2, %v8264_v2  ;;  %v8267_v34 = vadd.f32 %v11572_v9, %v7568_v35  ;;  %v8636_v22 = vsel %vm8276_vm4, %v8264_v2, 0.0 }
 0x557   : > { %v11445_v63 = vpop.f32.mrf.mxu1  ;;  %v9024_v54 = vadd.f32 %v9023_v51, %v9022_v62  ;;  %v8635_v13 = vadd.f32 %v8634_v14, %v8633_v55  ;;  %v9031_v12 = vsel %vm8276_vm4, %v8786_v44, 0.0 }
 0x558   : > { %v11576_v3 = vpop.f32.mrf.mxu0  ;;  %v8265_v58 = vadd.f32 %v8104_v60, %v7566_v26  ;;  %v7571_v23 = vadd.f32 %v11445_v63, %v16327_v47  ;;  %8396 = vst.msk [vmem:[%s16371_s24 + $0x3b8] sm:$0xff] %vm8276_vm4, %v8267_v34  ;;  %v9027_v30 = vsel %vm8276_vm4, %v8784_v49, 0.0  ;;  %v8787_v52 = vmul.f32 %v8267_v34, %v8267_v34  ;;  %v19292_v26 = vld [vmem:[#allocation30_spill] sm:$0xff] }
 0x559   : > { %v7418_v33 = vpop.f32.mrf.mxu1  ;;  %v8637_v17 = vadd.f32 %v8636_v22, %v8635_v13  ;;  %v9026_v32 = vadd.f32 %v9025_v10, %v9024_v54  ;;  %v8642_v50 = vsel %vm8276_vm4, %v8267_v34, 0.0 }
 0x55a   : > { %v8120_v0 = vpop.f32.mrf.mxu0  ;;  %8394 = vst.msk [vmem:[%s16371_s24 + $0x3a8] sm:$0xff] %vm8276_vm4, %v8265_v58  ;;  %v8638_v53 = vsel %vm8276_vm4, %v8265_v58, 0.0  ;;  %v8785_v1 = vmul.f32 %v8265_v58, %v8265_v58  ;;  %v8270_v47 = vadd.f32 %v11575_v21, %v7571_v23  ;;  %v7569_v24 = vadd.f32 %v7418_v33, %v16333_v5  ;;  %v19293_v33 = vld [vmem:[#allocation124_spill] sm:$0xff] }
 0x55b   : > { %v11446_v59 = vpop.f32.mrf.mxu1  ;;  %v9028_v46 = vadd.f32 %v9027_v30, %v9026_v32  ;;  %v8639_v36 = vadd.f32 %v8638_v53, %v8637_v17  ;;  %v9033_v45 = vsel %vm8276_vm4, %v8787_v52, 0.0 }
 0x55c   : > { %v9029_v28 = vsel %vm8276_vm4, %v8785_v1, 0.0  ;;  %v7572_v18 = vadd.f32 %v11446_v59, %v16338_v43  ;;  %v11579_v6 = vpop.f32.mrf.mxu0  ;;  %8399 = vst.msk [vmem:[%s16371_s24 + $0x3d0] sm:$0xff] %vm8276_vm4, %v8270_v47  ;;  %v8268_v9 = vadd.f32 %v8117_v29, %v7569_v24  ;;  %v8790_v37 = vmul.f32 %v8270_v47, %v8270_v47 }
 0x55d   : > { %v7421_v31 = vpop.f32.mrf.mxu1  ;;  %v8641_v8 = vadd.f32 %v8640_v16, %v8639_v36  ;;  %v9030_v56 = vadd.f32 %v9029_v28, %v9028_v46  ;;  %v8648_v49 = vsel %vm8276_vm4, %v8270_v47, 0.0 }
 0x55e   : > { %v8271_v5 = vadd.f32 %v11576_v3, %v7572_v18  ;;  %v7570_v27 = vadd.f32 %v7421_v31, %v19289_v11  ;;  %8397 = vst.msk [vmem:[%s16371_s24 + $0x3c0] sm:$0xff] %vm8276_vm4, %v8268_v9  ;;  %v8788_v43 = vmul.f32 %v8268_v9, %v8268_v9  ;;  %v8133_v39 = vpop.f32.mrf.mxu0  ;;  %v8644_v19 = vsel %vm8276_vm4, %v8268_v9, 0.0 }
 0x55f   : > { %v11449_v60 = vpop.f32.mrf.mxu1  ;;  %v9032_v20 = vadd.f32 %v9031_v12, %v9030_v56  ;;  %v8643_v4 = vadd.f32 %v8642_v50, %v8641_v8  ;;  %v9039_v54 = vsel %vm8276_vm4, %v8790_v37, 0.0 }
 0x560   : > { %8400 = vst.msk [vmem:[%s16371_s24 + $0x3d8] sm:$0xff] %vm8276_vm4, %v8271_v5  ;;  %v8269_v40 = vadd.f32 %v8120_v0, %v7570_v27  ;;  %v7575_v57 = vadd.f32 %v11449_v60, %v19290_v38  ;;  %v9035_v15 = vsel %vm8276_vm4, %v8788_v43, 0.0  ;;  %v11580_v14 = vpop.f32.mrf.mxu0  ;;  %v8791_v34 = vmul.f32 %v8271_v5, %v8271_v5 }
 0x561   : > { %v7434_v7 = vpop.f32.mrf.mxu1  ;;  %v8645_v21 = vadd.f32 %v8644_v19, %v8643_v4  ;;  %v9034_v61 = vadd.f32 %v9033_v45, %v9032_v20  ;;  %v8650_v23 = vsel %vm8276_vm4, %v8271_v5, 0.0 }
 0x562   : > { %v7573_v41 = vadd.f32 %v7434_v7, %v19291_v48  ;;  %8398 = vst.msk [vmem:[%s16371_s24 + $0x3c8] sm:$0xff] %vm8276_vm4, %v8269_v40  ;;  %v8646_v42 = vsel %vm8276_vm4, %v8269_v40, 0.0  ;;  %v8789_v2 = vmul.f32 %v8269_v40, %v8269_v40  ;;  %v8274_v35 = vadd.f32 %v11579_v6, %v7575_v57  ;;  %v8136_v53 = vpop.f32.mrf.mxu0 }
 0x563   : > { %v11450_v25 = vpop.f32.mrf.mxu1  ;;  %v9036_v29 = vadd.f32 %v9035_v15, %v9034_v61  ;;  %v8647_v55 = vadd.f32 %v8646_v42, %v8645_v21  ;;  %v9041_v1 = vsel %vm8276_vm4, %v8791_v34, 0.0 }
 0x564   : > { %v8272_v62 = vadd.f32 %v8133_v39, %v7573_v41  ;;  %v7576_v51 = vadd.f32 %v11450_v25, %v19292_v26  ;;  %v9037_v63 = vsel %vm8276_vm4, %v8789_v2, 0.0  ;;  %8403 = vst.msk [vmem:[%s16371_s24 + $0x3f0] sm:$0xff] %vm8276_vm4, %v8274_v35  ;;  %v8794_v59 = vmul.f32 %v8274_v35, %v8274_v35 }
 0x565   : > { %v7437_v3 = vpop.f32.mrf.mxu1  ;;  %v8649_v13 = vadd.f32 %v8648_v49, %v8647_v55  ;;  %v9038_v58 = vadd.f32 %v9037_v63, %v9036_v29  ;;  %v8656_v16 = vsel %vm8276_vm4, %v8274_v35, 0.0 }
 0x566   : > { %8401 = vst.msk [vmem:[%s16371_s24 + $0x3e0] sm:$0xff] %vm8276_vm4, %v8272_v62  ;;  %v8792_v10 = vmul.f32 %v8272_v62, %v8272_v62  ;;  %v8275_v22 = vadd.f32 %v11580_v14, %v7576_v51  ;;  %v7574_v0 = vadd.f32 %v7437_v3, %v19293_v33  ;;  %v8652_v44 = vsel %vm8276_vm4, %v8272_v62, 0.0 }
 0x567   : > { %v9040_v17 = vadd.f32 %v9039_v54, %v9038_v58  ;;  %v8651_v32 = vadd.f32 %v8650_v23, %v8649_v13  ;;  %v9047_v56 = vsel %vm8276_vm4, %v8794_v59, 0.0 }
 0x568   : > { %8404 = vst.msk [vmem:[%s16371_s24 + $0x3f8] sm:$0xff] %vm8276_vm4, %v8275_v22  ;;  %v8273_v30 = vadd.f32 %v8136_v53, %v7574_v0  ;;  %v9043_v46 = vsel %vm8276_vm4, %v8792_v10, 0.0  ;;  %v8795_v52 = vmul.f32 %v8275_v22, %v8275_v22  ;;  %v8658_v5 = vsel %vm8276_vm4, %v8275_v22, 0.0 }
 0x569   : > { %v8653_v47 = vadd.f32 %v8652_v44, %v8651_v32  ;;  %v9042_v24 = vadd.f32 %v9041_v1, %v9040_v17 }
 0x56a   : > { %8402 = vst.msk [vmem:[%s16371_s24 + $0x3e8] sm:$0xff] %vm8276_vm4, %v8273_v30  ;;  %v8654_v36 = vsel %vm8276_vm4, %v8273_v30, 0.0  ;;  %v8793_v28 = vmul.f32 %v8273_v30, %v8273_v30  ;;  %v9049_v12 = vsel %vm8276_vm4, %v8795_v52, 0.0 }
 0x56b   : > { %v9044_v18 = vadd.f32 %v9043_v46, %v9042_v24  ;;  %v8655_v6 = vadd.f32 %v8654_v36, %v8653_v47 }
 0x56c   : > { %v9045_v9 = vsel %vm8276_vm4, %v8793_v28, 0.0 }
 0x56d   : > { %v8657_v31 = vadd.f32 %v8656_v16, %v8655_v6  ;;  %v9046_v8 = vadd.f32 %v9045_v9, %v9044_v18 }
 0x56f   : > { %v8659_v11 = vadd.f32 %v8658_v5, %v8657_v31  ;;  %v9048_v27 = vadd.f32 %v9047_v56, %v9046_v8 }
 0x571   : > { %v8660_v50 = vrot.slane %v8659_v11, 4  ;;  %v9050_v43 = vadd.f32 %v9049_v12, %v9048_v27 }
 0x573   : > { %v8661_v60 = vadd.f32 %v8660_v50, %v8659_v11  ;;  %v9051_v20 = vrot.slane %v9050_v43, 4 }
 0x575   : > { %v8662_v4 = vrot.slane %v8661_v60, 2  ;;  %v9052_v39 = vadd.f32 %v9051_v20, %v9050_v43 }
 0x577   : > { %v8663_v45 = vadd.f32 %v8662_v4, %v8661_v60  ;;  %v9053_v19 = vrot.slane %v9052_v39, 2 }
 0x579   : > { %v8664_v40 = vrot.slane %v8663_v45, 1  ;;  %v9054_v38 = vadd.f32 %v9053_v19, %v9052_v39 }
 0x57b   : > { %v8665_v57 = vadd.f32 %v8664_v40, %v8663_v45  ;;  %v9055_v7 = vrot.slane %v9054_v38, 1 }
 0x57d   : > { %8667 = vst.msk [vmem:[%s212_s27] sm:$0x1] %vm8666_vm5, %v8665_v57  ;;  %v9056_v37 = vadd.f32 %v9055_v7, %v9054_v38 }
 0x57f   : > { %9057 = vst.msk [vmem:[%s215_s30] sm:$0x1] %vm8666_vm5, %v9056_v37 }
 0x580 PF: > { %s15_s15 = sadd.s32 1, %s11807_s15  }
 0x581   : > { %p12_p5 = scmp.ge.s32.totalorder %s15_s15, 4  }
 0x583   :  { %14 = sbr.rel (!%p12_p5) target bundleno = 1 (0x1), region = 90 }

</bundles_post_ra>
